<compile_context>
chip_gen: v7x
topology: tpu7x:2x2x1
jax: 0.10.0
libtpu: 0.0.40
codegen_flags: <defaults>
</compile_context>

<pallas_src>
import functools
import math

import jax
import jax.numpy as jnp
from jax import lax
from jax.experimental import pallas as pl
from jax.experimental.pallas import tpu as pltpu

N_BLOCKS = 6
CH = 128                 # channels used by every block (reference uses 128)
LRELU_SLOPE = 0.2


def _round_up(x, m):
    return (x + m - 1) // m * m


def _vmem_limit_bytes():
    """Per-generation scoped-VMEM budget.

    v5e/v6e have 128 MiB physical VMEM -> request 96 MiB so large strips fit;
    v7x only has 64 MiB -> request 48 MiB (headroom for compiler scratch).
    Fall back to the conservative 48 MiB if the query is unavailable.
    """
    try:
        cap = int(pltpu.get_tpu_info().vmem_capacity_bytes)
    except Exception:   # query unavailable -> be conservative (works everywhere)
        cap = 64 * 1024 * 1024
    if cap >= 100 * 1024 * 1024:
        return 96 * 1024 * 1024
    return 48 * 1024 * 1024


VMEM_LIMIT = _vmem_limit_bytes()
# Fraction of the scoped limit the strip-size heuristic plans against.
_STRIP_BUDGET = int(VMEM_LIMIT * 0.7)


# --------------------------------------------------------------------------- #
# Strip-size selection: largest even divisor of H whose per-strip working set
# (im2col patches, f32 activations, halo scratch, double-buffered I/O) fits the
# per-generation VMEM budget.  Large strips keep M = strip*W big so per-matmul
# weight-load / drain overhead is amortized.
# --------------------------------------------------------------------------- #
def _even_divisors(h):
    divs = [d for d in range(2, h + 1, 2) if h % d == 0]
    return divs if divs else [h]


def _choose_strip_rows(h, width, c, budget_bytes, cap=None):
    wp = _round_up(width + 2, 16)
    cands = sorted(_even_divisors(h), reverse=True)
    if cap is not None:
        capped = [d for d in cands if d <= cap]
        cands = capped if capped else [cands[-1]]
    for s in cands:
        m = s * width
        est = ((s + 2) * width * 9 * c * 2   # conv1 im2col patch (bf16)
               + m * 9 * c * 2               # conv2 im2col patch (bf16)
               + (s + 2) * width * c * 4     # a1 (f32)
               + m * c * 4                   # a2 (f32)
               + (s + 4) * wp * c * 2        # halo'd pad scratch (bf16)
               + 2 * m * c * 2               # double-buffered input strip
               + 2 * (m // 4) * c * 2        # double-buffered output strip
               + 4 * 9 * c * c * 2           # double-buffered weight slabs
               + (2 << 20))                  # slack
        if est <= budget_bytes:
            return s
    return cands[-1]


# --------------------------------------------------------------------------- #
# One discriminator block, fused in one kernel per (batch, row-strip):
#   [optional from_rgb 1x1] -> conv3x3(pad=1) -> LReLU -> conv3x3(pad=1)
#   -> LReLU -> AvgPool2d(2)
# The scratch `pad_ref` holds a zero-padded (S+4, Wp, C) window whose rows map
# to image rows [strip_start-2, strip_start+S+2): a 2-row input halo is needed
# because the two stacked 3x3 convs are fused.
# --------------------------------------------------------------------------- #
def _make_block_kernel(s_rows, width, c, fuse_rgb):
    so, wo = s_rows // 2, width // 2

    def conv3x3_lrelu(pad_ref, w_ref, b_ref, rows):
        # im2col with both dy and dx taps folded into K: a single MXU matmul
        # (rows*W, 9C) x (9C, C) with f32 accumulation per conv.
        patch = jnp.concatenate(
            [pad_ref[dy:dy + rows, dx:dx + width, :]
             for dy in range(3) for dx in range(3)],
            axis=-1).reshape(rows * width, 9 * c)
        acc = jnp.dot(patch, w_ref[...], preferred_element_type=jnp.float32)
        acc = acc + b_ref[...]
        return jnp.where(acc > 0, acc, LRELU_SLOPE * acc)      # (rows*W, C) f32

    def kernel(*refs):
        if fuse_rgb:
            (x_ref, top_ref, bot_ref, wr_ref, br_ref,
             w1_ref, b1_ref, w2_ref, b2_ref, o_ref, pad_ref) = refs
        else:
            (x_ref, top_ref, bot_ref,
             w1_ref, b1_ref, w2_ref, b2_ref, o_ref, pad_ref) = refs

        si = pl.program_id(1)
        n_s = pl.num_programs(1)

        def to_feat(v):
            # Raw 128-channel bf16 activations, or the from_rgb 1x1 conv applied
            # in-kernel (3 VPU rank-1 updates, hidden under the MXU work).
            if not fuse_rgb:
                return v.astype(pad_ref.dtype)
            vf = v.astype(jnp.float32)
            y = (br_ref[...]
                 + vf[..., 0:1] * wr_ref[0:1, :]
                 + vf[..., 1:2] * wr_ref[1:2, :]
                 + vf[..., 2:3] * wr_ref[2:3, :])
            return y.astype(pad_ref.dtype)

        # Left/right zero-padding columns (also covers the four halo corners).
        zcol = jnp.zeros((s_rows + 4, 1, c), pad_ref.dtype)
        pad_ref[:, 0:1, :] = zcol
        pad_ref[:, width + 1:width + 2, :] = zcol

        # 2-row input halos: real neighbor rows, or zeros at the image edge.
        top = to_feat(top_ref[0])
        top = jnp.where(si == 0, jnp.zeros_like(top), top)
        pad_ref[0:2, 1:width + 1, :] = top
        bot = to_feat(bot_ref[0])
        bot = jnp.where(si == n_s - 1, jnp.zeros_like(bot), bot)
        pad_ref[s_rows + 2:s_rows + 4, 1:width + 1, :] = bot

        # Strip interior.
        pad_ref[2:s_rows + 2, 1:width + 1, :] = to_feat(x_ref[0])

        # conv1 (+LReLU) over S+2 rows: the strip plus one extra row per side
        # that conv2 needs as its own halo.
        a1 = conv3x3_lrelu(pad_ref, w1_ref, b1_ref, s_rows + 2)

        # Stage a1 for conv2: pad rows [0, S+2) <-> image rows strip-1 .. strip+S.
        pad_ref[0:s_rows + 2, 1:width + 1, :] = (
            a1.reshape(s_rows + 2, width, c).astype(pad_ref.dtype))

        # a1 outside the image is conv2's zero padding, NOT conv1-of-zeros.
        @pl.when(si == 0)
        def _():
            pad_ref[0:1, 1:width + 1, :] = jnp.zeros((1, width, c),
                                                     pad_ref.dtype)

        @pl.when(si == n_s - 1)
        def _():
            pad_ref[s_rows + 1:s_rows + 2, 1:width + 1, :] = (
                jnp.zeros((1, width, c), pad_ref.dtype))

        # conv2 (+LReLU) over the S strip rows.
        a2 = conv3x3_lrelu(pad_ref, w2_ref, b2_ref, s_rows)

        # 2x2 average pool straight from the f32 value: pair adjacent columns
        # along the lane axis, then pair adjacent rows.  No bf16 re-rounding,
        # no strided scratch reads.
        a2 = a2.reshape(s_rows, wo, 2 * c)
        hsum = a2[:, :, 0:c] + a2[:, :, c:2 * c]
        hsum = hsum.reshape(so, 2, wo, c)
        pooled = (hsum[:, 0, :, :] + hsum[:, 1, :, :]) * 0.25
        o_ref[0] = pooled.astype(o_ref.dtype)

    return kernel


def disc_block(x, block_params, rgb_params=None, max_strip_rows=None):
    """conv3x3->LReLU->conv3x3->LReLU->AvgPool2d(2), one fused kernel.

    Grid = (batch, row_strip).  If `rgb_params` is given, the from_rgb 1x1 conv
    is fused in as well (no (B,H,W,128) HBM round trip for the first block).
    `max_strip_rows` is a tuning / test hook capping the strip height.
    """
    b, h, width, cin = x.shape
    c = CH
    assert h % 2 == 0 and width % 2 == 0, (h, width)
    fuse_rgb = rgb_params is not None
    assert cin == (3 if fuse_rgb else CH), (cin, fuse_rgb)

    s_rows = _choose_strip_rows(h, width, c, _STRIP_BUDGET, cap=max_strip_rows)
    n_strips = h // s_rows
    half = s_rows // 2
    wp = _round_up(width + 2, 16)          # bf16 sublane-tile-aligned row pitch
    ho, wo = h // 2, width // 2

    kernel = _make_block_kernel(s_rows, width, c, fuse_rgb)

    def x_map(bi, si):
        return (bi, si, 0, 0)

    def top_map(bi, si):       # 2-row block just above the strip (clamped)
        return (bi, jnp.maximum(si * half - 1, 0), 0, 0)

    def bot_map(bi, si):       # 2-row block just below the strip (clamped)
        return (bi, jnp.minimum((si + 1) * half, h // 2 - 1), 0, 0)

    const2 = lambda bi, si: (0, 0)

    in_specs = [
        pl.BlockSpec((1, s_rows, width, cin), x_map),
        pl.BlockSpec((1, 2, width, cin), top_map),
        pl.BlockSpec((1, 2, width, cin), bot_map),
    ]
    operands = [x, x, x]
    if fuse_rgb:
        in_specs += [pl.BlockSpec((3, c), const2),
                     pl.BlockSpec((1, c), const2)]
        operands += [rgb_params["w"], rgb_params["b"]]
    in_specs += [
        pl.BlockSpec((9 * c, c), const2), pl.BlockSpec((1, c), const2),
        pl.BlockSpec((9 * c, c), const2), pl.BlockSpec((1, c), const2),
    ]
    operands += [block_params["w1"], block_params["b1"],
                 block_params["w2"], block_params["b2"]]

    return pl.pallas_call(
        kernel,
        out_shape=jax.ShapeDtypeStruct((b, ho, wo, c), jnp.bfloat16),
        grid_spec=pltpu.PrefetchScalarGridSpec(
            num_scalar_prefetch=0,
            grid=(b, n_strips),
            in_specs=in_specs,
            out_specs=pl.BlockSpec((1, half, wo, c),
                                   lambda bi, si: (bi, si, 0, 0)),
            scratch_shapes=[pltpu.VMEM((s_rows + 4, wp, c), jnp.bfloat16)],
        ),
        compiler_params=pltpu.CompilerParams(
            dimension_semantics=("parallel", "parallel"),
            vmem_limit_bytes=VMEM_LIMIT),
    )(*operands)


# --------------------------------------------------------------------------- #
# Standalone from_rgb 1x1 conv (only used when no block runs at all; the normal
# path fuses it into the first block).  Cin = 3, so it is three rank-1
# broadcast multiply-adds on the VPU; gridded over M so it still pipelines.
# --------------------------------------------------------------------------- #
def _from_rgb_kernel(x_ref, w_ref, b_ref, o_ref):
    x = x_ref[...].astype(jnp.float32)
    acc = (b_ref[...]
           + x[:, 0:1] * w_ref[0:1, :]
           + x[:, 1:2] * w_ref[1:2, :]
           + x[:, 2:3] * w_ref[2:3, :])
    o_ref[...] = acc.astype(o_ref.dtype)


def from_rgb(x_nhwc, w, b):
    bsz, h, width, _ = x_nhwc.shape
    m = bsz * h * width
    c = w.shape[1]
    tm = m
    for cand in range(min(m, 2048), 0, -1):   # largest divisor of m <= 2048
        if m % cand == 0:
            tm = cand
            break
    y = pl.pallas_call(
        _from_rgb_kernel,
        out_shape=jax.ShapeDtypeStruct((m, c), jnp.bfloat16),
        grid_spec=pltpu.PrefetchScalarGridSpec(
            num_scalar_prefetch=0,
            grid=(m // tm,),
            in_specs=[
                pl.BlockSpec((tm, 3), lambda i: (i, 0)),
                pl.BlockSpec((3, c), lambda i: (0, 0)),
                pl.BlockSpec((1, c), lambda i: (0, 0)),
            ],
            out_specs=pl.BlockSpec((tm, c), lambda i: (i, 0)),
        ),
        compiler_params=pltpu.CompilerParams(
            dimension_semantics=("parallel",),
            vmem_limit_bytes=VMEM_LIMIT),
    )(x_nhwc.reshape(m, 3), w, b)
    return y.reshape(bsz, h, width, c)


# --------------------------------------------------------------------------- #
# Final head: MinibatchStdev (unbiased std over batch, mean over C,H,W) then a
# 1x1 conv (128 + 1) -> 1, fused in one small kernel.
# NOTE: unbiased std divides by (B - 1); batch size 1 yields NaN, exactly like
# torch.std(unbiased=True).
# --------------------------------------------------------------------------- #
def _final_kernel(x_ref, wm_ref, we_ref, b_ref, o_ref):
    bsz, hf, wf, c = x_ref.shape
    x = x_ref[...].astype(jnp.float32)

    s = x[0]
    for i in range(1, bsz):
        s = s + x[i]
    mean_b = s / bsz
    sq = (x[0] - mean_b) ** 2
    for i in range(1, bsz):
        sq = sq + (x[i] - mean_b) ** 2
    std = jnp.sqrt(sq / (bsz - 1))                            # (Hf, Wf, C)
    ms = jnp.sum(std.reshape(hf * wf, c)) / (hf * wf * c)     # scalar mean stdev

    xm = x.reshape(bsz * hf * wf, c)
    y = jnp.sum(xm * wm_ref[...], axis=1, keepdims=True)      # 1x1 conv, 128 ch
    o_ref[...] = y + ms * we_ref[0, 0] + b_ref[0, 0]


def final_conv(x, wm, we, b):
    # TODO(synk): grid this over spatial tiles if the head is ever used on
    # activations larger than PGGAN's 4x4 (needs a two-pass std reduction).
    bsz, hf, wf, _ = x.shape
    return pl.pallas_call(
        _final_kernel,
        out_shape=jax.ShapeDtypeStruct((bsz * hf * wf, 1), jnp.float32),
        compiler_params=pltpu.CompilerParams(vmem_limit_bytes=VMEM_LIMIT),
    )(x, wm, we, b)


# --------------------------------------------------------------------------- #
# Parameters.  Conv2dWS: weight ~ N(0,1) with scale sqrt(2/(in_ch*kernel_size))
# baked in, bias = 0.  The reference passes kernel_size as an int, so the 3x3
# convs use scale sqrt(2/(128*3)).  Raw params keep HWIO f32 weights (used by
# the pure-JAX reference); prepare_params() pre-bakes the bf16 cast and the
# (3,3,C,C) -> (9C,C) im2col layout once, so no per-call reshape/cast remains.
# --------------------------------------------------------------------------- #
def init_params(key):
    keys = jax.random.split(key, 2 * N_BLOCKS + 1)
    rgb_scale = math.sqrt(2.0 / (3 * 1))            # Conv2dWS(3, 128, 1)
    from_rgb_p = []
    for i in range(N_BLOCKS):
        w = jax.random.normal(keys[i], (3, CH), jnp.float32) * rgb_scale
        from_rgb_p.append(dict(w=w, b=jnp.zeros((1, CH), jnp.float32)))

    blk_scale = math.sqrt(2.0 / (CH * 3))           # Conv2dWS(128, 128, 3)
    blocks = []
    for i in range(N_BLOCKS):
        k1, k2 = jax.random.split(keys[N_BLOCKS + i])
        w1 = jax.random.normal(k1, (3, 3, CH, CH), jnp.float32) * blk_scale
        w2 = jax.random.normal(k2, (3, 3, CH, CH), jnp.float32) * blk_scale
        blocks.append(dict(w1=w1, b1=jnp.zeros((1, CH), jnp.float32),
                           w2=w2, b2=jnp.zeros((1, CH), jnp.float32)))

    fin_scale = math.sqrt(2.0 / ((CH + 1) * 1))     # Conv2dWS(129, 1, 1)
    wf = jax.random.normal(keys[-1], (CH + 1,), jnp.float32) * fin_scale
    final = dict(wm=wf[:CH].reshape(1, CH), we=wf[CH:].reshape(1, 1),
                 b=jnp.zeros((1, 1), jnp.float32))
    return dict(from_rgb=from_rgb_p, blocks=blocks, final=final)


def prepare_params(raw):
    from_rgb_p = [dict(w=p["w"], b=p["b"]) for p in raw["from_rgb"]]
    blocks = []
    for p in raw["blocks"]:
        blocks.append(dict(
            w1=p["w1"].astype(jnp.bfloat16).reshape(9 * CH, CH),
            b1=p["b1"],
            w2=p["w2"].astype(jnp.bfloat16).reshape(9 * CH, CH),
            b2=p["b2"]))
    return dict(from_rgb=from_rgb_p, blocks=blocks, final=dict(raw["final"]))


@functools.partial(jax.jit, static_argnames=("step", "max_strip_rows"))
def progressive_discriminator(params, x_nchw, step, alpha=1.0,
                              max_strip_rows=None):
    # `alpha` is accepted but unused, exactly as in the reference forward().
    del alpha
    x = jnp.transpose(x_nchw, (0, 2, 3, 1)).astype(jnp.bfloat16)  # NCHW->NHWC
    _, h, w, _ = x.shape
    rgb = params["from_rgb"][N_BLOCKS - step - 1]
    block_ids = list(range(step, N_BLOCKS))

    if block_ids and h > 1 and w > 1:
        # from_rgb fused into the first block (no HBM round trip of the full
        # 128-channel activation at the largest resolution).
        x = disc_block(x, params["blocks"][block_ids[0]], rgb_params=rgb,
                       max_strip_rows=max_strip_rows)
        block_ids = block_ids[1:]
    else:
        x = from_rgb(x, rgb["w"], rgb["b"])

    for i in block_ids:
        if x.shape[1] <= 1 or x.shape[2] <= 1:
            break
        x = disc_block(x, params["blocks"][i], max_strip_rows=max_strip_rows)

    fin = params["final"]
    out = final_conv(x, fin["wm"], fin["we"], fin["b"])
    return out.reshape(-1)


# --------------------------------------------------------------------------- #
# Pure-JAX reference (same bf16 rounding points as the kernels) for validation.
# --------------------------------------------------------------------------- #
def reference_forward(raw, x_nchw, step):
    dn = ("NHWC", "HWIO", "NHWC")
    x = jnp.transpose(x_nchw, (0, 2, 3, 1)).astype(jnp.bfloat16)
    p = raw["from_rgb"][N_BLOCKS - step - 1]
    xf = x.astype(jnp.float32)
    y = (p["b"].reshape(1, 1, 1, -1)
         + xf[..., 0:1] * p["w"][0, :]
         + xf[..., 1:2] * p["w"][1, :]
         + xf[..., 2:3] * p["w"][2, :])
    x = y.astype(jnp.bfloat16)
    for i in range(step, N_BLOCKS):
        if x.shape[1] <= 1 or x.shape[2] <= 1:
            break
        bp = raw["blocks"][i]
        a = lax.conv_general_dilated(
            x, bp["w1"].astype(jnp.bfloat16), (1, 1), "SAME",
            dimension_numbers=dn, preferred_element_type=jnp.float32)
        a = a + bp["b1"].reshape(1, 1, 1, -1)
        a = jnp.where(a > 0, a, LRELU_SLOPE * a).astype(jnp.bfloat16)
        a2 = lax.conv_general_dilated(
            a, bp["w2"].astype(jnp.bfloat16), (1, 1), "SAME",
            dimension_numbers=dn, preferred_element_type=jnp.float32)
        a2 = a2 + bp["b2"].reshape(1, 1, 1, -1)
        a2 = jnp.where(a2 > 0, a2, LRELU_SLOPE * a2)
        b_, h_, w_, c_ = a2.shape
        a2 = a2.reshape(b_, h_ // 2, 2, w_ // 2, 2, c_).mean(axis=(2, 4))
        x = a2.astype(jnp.bfloat16)
    xf = x.astype(jnp.float32)
    std = jnp.std(xf, axis=0, ddof=1)
    ms = jnp.mean(std)
    fin = raw["final"]
    y = jnp.sum(xf * fin["wm"].reshape(1, 1, 1, -1), axis=-1)
    y = y + ms * fin["we"][0, 0] + fin["b"][0, 0]
    return y.reshape(-1)


if __name__ == "__main__":
    key = jax.random.PRNGKey(0)
    pkey, xkey = jax.random.split(key)
    raw_params = init_params(pkey)
    params = prepare_params(raw_params)

    B, H = 2, 16
    x = jax.random.normal(xkey, (B, 3, H, H), jnp.float32)   # NCHW, like torch
    step = 4   # from_rgb[-5], blocks[4] (16->8), blocks[5] (8->4), final head

    ref = reference_forward(raw_params, x, step)

    # Normal path (single strip per image at this small resolution).
    out = progressive_discriminator(params, x, step=step, alpha=0.5)
    out = jax.block_until_ready(out)
    assert out.shape == (B * (H // 4) * (H // 4),), out.shape
    assert bool(jnp.all(jnp.isfinite(out)))
    assert bool(jnp.allclose(out, ref, rtol=2e-2, atol=2e-2)), (
        float(jnp.max(jnp.abs(out - ref))))

    # Force multiple row strips per image to exercise the halo / strip path.
    out_strips = progressive_discriminator(params, x, step=step, alpha=0.5,
                                           max_strip_rows=4)
    out_strips = jax.block_until_ready(out_strips)
    assert bool(jnp.allclose(out_strips, ref, rtol=2e-2, atol=2e-2)), (
        float(jnp.max(jnp.abs(out_strips - ref))))

    print("KERNEL_OK")
</pallas_src>

<mosaic_0001>
module attributes {stable_mosaic.version = 11 : i64} {
  func.func @kernel(%arg0: i32, %arg1: i32, %arg2: memref<1x8x8x128xbf16, #tpu.memory_space<vmem>>, %arg3: memref<1x2x8x128xbf16, #tpu.memory_space<vmem>>, %arg4: memref<1x2x8x128xbf16, #tpu.memory_space<vmem>>, %arg5: memref<1152x128xbf16, #tpu.memory_space<vmem>>, %arg6: memref<1x128xf32, #tpu.memory_space<vmem>>, %arg7: memref<1152x128xbf16, #tpu.memory_space<vmem>>, %arg8: memref<1x128xf32, #tpu.memory_space<vmem>>, %arg9: memref<1x4x4x128xbf16, #tpu.memory_space<vmem>>, %arg10: memref<12x16x128xbf16, #tpu.memory_space<vmem>>) attributes {dimension_semantics = [#tpu.dimension_semantics<parallel>, #tpu.dimension_semantics<parallel>], iteration_bounds = array<i64: 2, 1>, scalar_prefetch = 0 : i64, scratch_operands = 1 : i64, tpu.core_type = #tpu.core_type<tc>, window_params = [{transform_indices = @transform_0, window_bounds = array<i64: 1, 8, 8, 128>}, {transform_indices = @transform_1, window_bounds = array<i64: 1, 2, 8, 128>}, {transform_indices = @transform_2, window_bounds = array<i64: 1, 2, 8, 128>}, {pipeline_mode = #tpu.pipeline_mode<synchronous>, transform_indices = @transform_3, window_bounds = array<i64: 1152, 128>}, {pipeline_mode = #tpu.pipeline_mode<synchronous>, transform_indices = @transform_4, window_bounds = array<i64: 1, 128>}, {pipeline_mode = #tpu.pipeline_mode<synchronous>, transform_indices = @transform_5, window_bounds = array<i64: 1152, 128>}, {pipeline_mode = #tpu.pipeline_mode<synchronous>, transform_indices = @transform_6, window_bounds = array<i64: 1, 128>}, {transform_indices = @transform_7, window_bounds = array<i64: 1, 4, 4, 128>}]} {
    %cst = arith.constant 0.000000e+00 : bf16
    %0 = vector.broadcast %cst : bf16 to vector<12x1x128xbf16>
    %c0 = arith.constant 0 : index
    %c0_0 = arith.constant 0 : index
    %c0_1 = arith.constant 0 : index
    %1 = vector.load %arg10[%c0, %c0_0, %c0_1] : memref<12x16x128xbf16, #tpu.memory_space<vmem>>, vector<12x1x128xbf16>
    tpu.vector_store %arg10[%c0, %c0_0, %c0_1], %0 {strides = array<i32>} : memref<12x16x128xbf16, #tpu.memory_space<vmem>>, vector<12x1x128xbf16>,
    %c0_2 = arith.constant 0 : index
    %c9 = arith.constant 9 : index
    %c0_3 = arith.constant 0 : index
    %2 = vector.load %arg10[%c0_2, %c9, %c0_3] : memref<12x16x128xbf16, #tpu.memory_space<vmem>>, vector<12x1x128xbf16>
    tpu.vector_store %arg10[%c0_2, %c9, %c0_3], %0 {strides = array<i32>} : memref<12x16x128xbf16, #tpu.memory_space<vmem>>, vector<12x1x128xbf16>,
    %c0_4 = arith.constant 0 : index
    %c0_5 = arith.constant 0 : index
    %c0_6 = arith.constant 0 : index
    %c0_7 = arith.constant 0 : index
    %3 = vector.load %arg3[%c0_4, %c0_5, %c0_6, %c0_7] : memref<1x2x8x128xbf16, #tpu.memory_space<vmem>>, vector<1x2x8x128xbf16>
    %4 = vector.shape_cast %3 : vector<1x2x8x128xbf16> to vector<2x8x128xbf16>
    %c0_i32 = arith.constant 0 : i32
    %5 = arith.cmpi eq, %arg1, %c0_i32 : i32
    %cst_8 = arith.constant 0.000000e+00 : bf16
    %6 = vector.broadcast %cst_8 : bf16 to vector<2x8x128xbf16>
    %7 = arith.select %5, %6, %4 : vector<2x8x128xbf16>
    %c0_9 = arith.constant 0 : index
    %c1 = arith.constant 1 : index
    %c0_10 = arith.constant 0 : index
    %8 = vector.load %arg10[%c0_9, %c1, %c0_10] : memref<12x16x128xbf16, #tpu.memory_space<vmem>>, vector<2x8x128xbf16>
    tpu.vector_store %arg10[%c0_9, %c1, %c0_10], %7 {strides = array<i32>} : memref<12x16x128xbf16, #tpu.memory_space<vmem>>, vector<2x8x128xbf16>,
    %c0_11 = arith.constant 0 : index
    %c0_12 = arith.constant 0 : index
    %c0_13 = arith.constant 0 : index
    %c0_14 = arith.constant 0 : index
    %9 = vector.load %arg4[%c0_11, %c0_12, %c0_13, %c0_14] : memref<1x2x8x128xbf16, #tpu.memory_space<vmem>>, vector<1x2x8x128xbf16>
    %10 = vector.shape_cast %9 : vector<1x2x8x128xbf16> to vector<2x8x128xbf16>
    %c0_i32_15 = arith.constant 0 : i32
    %11 = arith.cmpi eq, %arg1, %c0_i32_15 : i32
    %cst_16 = arith.constant 0.000000e+00 : bf16
    %12 = vector.broadcast %cst_16 : bf16 to vector<2x8x128xbf16>
    %13 = arith.select %11, %12, %10 : vector<2x8x128xbf16>
    %c10 = arith.constant 10 : index
    %c1_17 = arith.constant 1 : index
    %c0_18 = arith.constant 0 : index
    %14 = vector.load %arg10[%c10, %c1_17, %c0_18] : memref<12x16x128xbf16, #tpu.memory_space<vmem>>, vector<2x8x128xbf16>
    tpu.vector_store %arg10[%c10, %c1_17, %c0_18], %13 {strides = array<i32>} : memref<12x16x128xbf16, #tpu.memory_space<vmem>>, vector<2x8x128xbf16>,
    %c0_19 = arith.constant 0 : index
    %c0_20 = arith.constant 0 : index
    %c0_21 = arith.constant 0 : index
    %c0_22 = arith.constant 0 : index
    %15 = vector.load %arg2[%c0_19, %c0_20, %c0_21, %c0_22] : memref<1x8x8x128xbf16, #tpu.memory_space<vmem>>, vector<1x8x8x128xbf16>
    %16 = vector.shape_cast %15 : vector<1x8x8x128xbf16> to vector<8x8x128xbf16>
    %c2 = arith.constant 2 : index
    %c1_23 = arith.constant 1 : index
    %c0_24 = arith.constant 0 : index
    %17 = vector.load %arg10[%c2, %c1_23, %c0_24] : memref<12x16x128xbf16, #tpu.memory_space<vmem>>, vector<8x8x128xbf16>
    tpu.vector_store %arg10[%c2, %c1_23, %c0_24], %16 {strides = array<i32>} : memref<12x16x128xbf16, #tpu.memory_space<vmem>>, vector<8x8x128xbf16>,
    %c0_25 = arith.constant 0 : index
    %c0_26 = arith.constant 0 : index
    %c0_27 = arith.constant 0 : index
    %18 = vector.load %arg10[%c0_25, %c0_26, %c0_27] : memref<12x16x128xbf16, #tpu.memory_space<vmem>>, vector<10x8x128xbf16>
    %c0_28 = arith.constant 0 : index
    %c1_29 = arith.constant 1 : index
    %c0_30 = arith.constant 0 : index
    %19 = vector.load %arg10[%c0_28, %c1_29, %c0_30] : memref<12x16x128xbf16, #tpu.memory_space<vmem>>, vector<10x8x128xbf16>
    %c0_31 = arith.constant 0 : index
    %c2_32 = arith.constant 2 : index
    %c0_33 = arith.constant 0 : index
    %20 = vector.load %arg10[%c0_31, %c2_32, %c0_33] : memref<12x16x128xbf16, #tpu.memory_space<vmem>>, vector<10x8x128xbf16>
    %c1_34 = arith.constant 1 : index
    %c0_35 = arith.constant 0 : index
    %c0_36 = arith.constant 0 : index
    %21 = vector.load %arg10[%c1_34, %c0_35, %c0_36] : memref<12x16x128xbf16, #tpu.memory_space<vmem>>, vector<10x8x128xbf16>
    %c1_37 = arith.constant 1 : index
    %c1_38 = arith.constant 1 : index
    %c0_39 = arith.constant 0 : index
    %22 = vector.load %arg10[%c1_37, %c1_38, %c0_39] : memref<12x16x128xbf16, #tpu.memory_space<vmem>>, vector<10x8x128xbf16>
    %c1_40 = arith.constant 1 : index
    %c2_41 = arith.constant 2 : index
    %c0_42 = arith.constant 0 : index
    %23 = vector.load %arg10[%c1_40, %c2_41, %c0_42] : memref<12x16x128xbf16, #tpu.memory_space<vmem>>, vector<10x8x128xbf16>
    %c2_43 = arith.constant 2 : index
    %c0_44 = arith.constant 0 : index
    %c0_45 = arith.constant 0 : index
    %24 = vector.load %arg10[%c2_43, %c0_44, %c0_45] : memref<12x16x128xbf16, #tpu.memory_space<vmem>>, vector<10x8x128xbf16>
    %c2_46 = arith.constant 2 : index
    %c1_47 = arith.constant 1 : index
    %c0_48 = arith.constant 0 : index
    %25 = vector.load %arg10[%c2_46, %c1_47, %c0_48] : memref<12x16x128xbf16, #tpu.memory_space<vmem>>, vector<10x8x128xbf16>
    %c2_49 = arith.constant 2 : index
    %c2_50 = arith.constant 2 : index
    %c0_51 = arith.constant 0 : index
    %26 = vector.load %arg10[%c2_49, %c2_50, %c0_51] : memref<12x16x128xbf16, #tpu.memory_space<vmem>>, vector<10x8x128xbf16>
    %27 = tpu.concatenate %18, %19, %20, %21, %22, %23, %24, %25, %26 in 2 : vector<10x8x128xbf16>, vector<10x8x128xbf16>, vector<10x8x128xbf16>, vector<10x8x128xbf16>, vector<10x8x128xbf16>, vector<10x8x128xbf16>, vector<10x8x128xbf16>, vector<10x8x128xbf16>, vector<10x8x128xbf16> -> vector<10x8x1152xbf16>
    %28 = vector.shape_cast %27 : vector<10x8x1152xbf16> to vector<80x1152xbf16>
    %c0_52 = arith.constant 0 : index
    %c0_53 = arith.constant 0 : index
    %29 = vector.load %arg5[%c0_52, %c0_53] : memref<1152x128xbf16, #tpu.memory_space<vmem>>, vector<1152x128xbf16>
    %cst_54 = arith.constant dense<0.000000e+00> : vector<80x128xf32>
    %30 = tpu.matmul %28, %29, %cst_54 {dimension_numbers = #tpu.dot_dimension_numbers<[1], [0], [0], [1], [0, 0, 1, 1], [], []>} : vector<80x1152xbf16>, vector<1152x128xbf16>, vector<80x128xf32> -> vector<80x128xf32>
    %c0_55 = arith.constant 0 : index
    %c0_56 = arith.constant 0 : index
    %31 = vector.load %arg6[%c0_55, %c0_56] : memref<1x128xf32, #tpu.memory_space<vmem>>, vector<1x128xf32>
    %32 = vector.broadcast %31 : vector<1x128xf32> to vector<80x128xf32>
    %33 = arith.addf %30, %32 : vector<80x128xf32>
    %cst_57 = arith.constant 0.000000e+00 : f32
    %34 = vector.broadcast %cst_57 : f32 to vector<80x128xf32>
    %35 = arith.cmpf ogt, %33, %34 : vector<80x128xf32>
    %cst_58 = arith.constant 2.000000e-01 : f32
    %36 = vector.broadcast %cst_58 : f32 to vector<80x128xf32>
    %37 = arith.mulf %36, %33 : vector<80x128xf32>
    %38 = arith.select %35, %33, %37 : vector<80x128xi1>, vector<80x128xf32>
    %39 = vector.shape_cast %38 : vector<80x128xf32> to vector<10x8x128xf32>
    %40 = arith.truncf %39 : vector<10x8x128xf32> to vector<10x8x128xbf16>
    %c0_59 = arith.constant 0 : index
    %c1_60 = arith.constant 1 : index
    %c0_61 = arith.constant 0 : index
    %41 = vector.load %arg10[%c0_59, %c1_60, %c0_61] : memref<12x16x128xbf16, #tpu.memory_space<vmem>>, vector<10x8x128xbf16>
    tpu.vector_store %arg10[%c0_59, %c1_60, %c0_61], %40 {strides = array<i32>} : memref<12x16x128xbf16, #tpu.memory_space<vmem>>, vector<10x8x128xbf16>,
    %c0_i32_62 = arith.constant 0 : i32
    %42 = arith.cmpi eq, %arg1, %c0_i32_62 : i32
    %43 = arith.extui %42 : i1 to i32
    %c0_i32_63 = arith.constant 0 : i32
    %44 = arith.cmpi ne, %43, %c0_i32_63 : i32
    scf.if %44 {
      %cst_105 = arith.constant 0.000000e+00 : bf16
      %85 = vector.broadcast %cst_105 : bf16 to vector<1x8x128xbf16>
      %c0_106 = arith.constant 0 : index
      %c1_107 = arith.constant 1 : index
      %c0_108 = arith.constant 0 : index
      %86 = vector.load %arg10[%c0_106, %c1_107, %c0_108] : memref<12x16x128xbf16, #tpu.memory_space<vmem>>, vector<1x8x128xbf16>
      tpu.vector_store %arg10[%c0_106, %c1_107, %c0_108], %85 {strides = array<i32>} : memref<12x16x128xbf16, #tpu.memory_space<vmem>>, vector<1x8x128xbf16>,
    } else {
    }
    %c0_i32_64 = arith.constant 0 : i32
    %45 = arith.cmpi eq, %arg1, %c0_i32_64 : i32
    %46 = arith.extui %45 : i1 to i32
    %c0_i32_65 = arith.constant 0 : i32
    %47 = arith.cmpi ne, %46, %c0_i32_65 : i32
    scf.if %47 {
      %cst_105 = arith.constant 0.000000e+00 : bf16
      %85 = vector.broadcast %cst_105 : bf16 to vector<1x8x128xbf16>
      %c9_106 = arith.constant 9 : index
      %c1_107 = arith.constant 1 : index
      %c0_108 = arith.constant 0 : index
      %86 = vector.load %arg10[%c9_106, %c1_107, %c0_108] : memref<12x16x128xbf16, #tpu.memory_space<vmem>>, vector<1x8x128xbf16>
      tpu.vector_store %arg10[%c9_106, %c1_107, %c0_108], %85 {strides = array<i32>} : memref<12x16x128xbf16, #tpu.memory_space<vmem>>, vector<1x8x128xbf16>,
    } else {
    }
    %c0_66 = arith.constant 0 : index
    %c0_67 = arith.constant 0 : index
    %c0_68 = arith.constant 0 : index
    %48 = vector.load %arg10[%c0_66, %c0_67, %c0_68] : memref<12x16x128xbf16, #tpu.memory_space<vmem>>, vector<8x8x128xbf16>
    %c0_69 = arith.constant 0 : index
    %c1_70 = arith.constant 1 : index
    %c0_71 = arith.constant 0 : index
    %49 = vector.load %arg10[%c0_69, %c1_70, %c0_71] : memref<12x16x128xbf16, #tpu.memory_space<vmem>>, vector<8x8x128xbf16>
    %c0_72 = arith.constant 0 : index
    %c2_73 = arith.constant 2 : index
    %c0_74 = arith.constant 0 : index
    %50 = vector.load %arg10[%c0_72, %c2_73, %c0_74] : memref<12x16x128xbf16, #tpu.memory_space<vmem>>, vector<8x8x128xbf16>
    %c1_75 = arith.constant 1 : index
    %c0_76 = arith.constant 0 : index
    %c0_77 = arith.constant 0 : index
    %51 = vector.load %arg10[%c1_75, %c0_76, %c0_77] : memref<12x16x128xbf16, #tpu.memory_space<vmem>>, vector<8x8x128xbf16>
    %c1_78 = arith.constant 1 : index
    %c1_79 = arith.constant 1 : index
    %c0_80 = arith.constant 0 : index
    %52 = vector.load %arg10[%c1_78, %c1_79, %c0_80] : memref<12x16x128xbf16, #tpu.memory_space<vmem>>, vector<8x8x128xbf16>
    %c1_81 = arith.constant 1 : index
    %c2_82 = arith.constant 2 : index
    %c0_83 = arith.constant 0 : index
    %53 = vector.load %arg10[%c1_81, %c2_82, %c0_83] : memref<12x16x128xbf16, #tpu.memory_space<vmem>>, vector<8x8x128xbf16>
    %c2_84 = arith.constant 2 : index
    %c0_85 = arith.constant 0 : index
    %c0_86 = arith.constant 0 : index
    %54 = vector.load %arg10[%c2_84, %c0_85, %c0_86] : memref<12x16x128xbf16, #tpu.memory_space<vmem>>, vector<8x8x128xbf16>
    %c2_87 = arith.constant 2 : index
    %c1_88 = arith.constant 1 : index
    %c0_89 = arith.constant 0 : index
    %55 = vector.load %arg10[%c2_87, %c1_88, %c0_89] : memref<12x16x128xbf16, #tpu.memory_space<vmem>>, vector<8x8x128xbf16>
    %c2_90 = arith.constant 2 : index
    %c2_91 = arith.constant 2 : index
    %c0_92 = arith.constant 0 : index
    %56 = vector.load %arg10[%c2_90, %c2_91, %c0_92] : memref<12x16x128xbf16, #tpu.memory_space<vmem>>, vector<8x8x128xbf16>
    %57 = tpu.concatenate %48, %49, %50, %51, %52, %53, %54, %55, %56 in 2 : vector<8x8x128xbf16>, vector<8x8x128xbf16>, vector<8x8x128xbf16>, vector<8x8x128xbf16>, vector<8x8x128xbf16>, vector<8x8x128xbf16>, vector<8x8x128xbf16>, vector<8x8x128xbf16>, vector<8x8x128xbf16> -> vector<8x8x1152xbf16>
    %58 = vector.shape_cast %57 : vector<8x8x1152xbf16> to vector<64x1152xbf16>
    %c0_93 = arith.constant 0 : index
    %c0_94 = arith.constant 0 : index
    %59 = vector.load %arg7[%c0_93, %c0_94] : memref<1152x128xbf16, #tpu.memory_space<vmem>>, vector<1152x128xbf16>
    %cst_95 = arith.constant dense<0.000000e+00> : vector<64x128xf32>
    %60 = tpu.matmul %58, %59, %cst_95 {dimension_numbers = #tpu.dot_dimension_numbers<[1], [0], [0], [1], [0, 0, 1, 1], [], []>} : vector<64x1152xbf16>, vector<1152x128xbf16>, vector<64x128xf32> -> vector<64x128xf32>
    %c0_96 = arith.constant 0 : index
    %c0_97 = arith.constant 0 : index
    %61 = vector.load %arg8[%c0_96, %c0_97] : memref<1x128xf32, #tpu.memory_space<vmem>>, vector<1x128xf32>
    %62 = vector.broadcast %61 : vector<1x128xf32> to vector<64x128xf32>
    %63 = arith.addf %60, %62 : vector<64x128xf32>
    %cst_98 = arith.constant 0.000000e+00 : f32
    %64 = vector.broadcast %cst_98 : f32 to vector<64x128xf32>
    %65 = arith.cmpf ogt, %63, %64 : vector<64x128xf32>
    %cst_99 = arith.constant 2.000000e-01 : f32
    %66 = vector.broadcast %cst_99 : f32 to vector<64x128xf32>
    %67 = arith.mulf %66, %63 : vector<64x128xf32>
    %68 = arith.select %65, %63, %67 : vector<64x128xi1>, vector<64x128xf32>
    %69 = vector.shape_cast %68 : vector<64x128xf32> to vector<8x4x256xf32>
    %70 = vector.extract_strided_slice %69 {offsets = [0, 0, 0], sizes = [8, 4, 128], strides = [1, 1, 1]} : vector<8x4x256xf32> to vector<8x4x128xf32>
    %71 = vector.extract_strided_slice %69 {offsets = [0, 0, 128], sizes = [8, 4, 128], strides = [1, 1, 1]} : vector<8x4x256xf32> to vector<8x4x128xf32>
    %72 = arith.addf %70, %71 : vector<8x4x128xf32>
    %73 = vector.shape_cast %72 : vector<8x4x128xf32> to vector<4x2x4x128xf32>
    %74 = vector.extract_strided_slice %73 {offsets = [0, 0, 0, 0], sizes = [4, 1, 4, 128], strides = [1, 1, 1, 1]} : vector<4x2x4x128xf32> to vector<4x1x4x128xf32>
    %75 = vector.shape_cast %74 : vector<4x1x4x128xf32> to vector<4x4x128xf32>
    %76 = vector.extract_strided_slice %73 {offsets = [0, 1, 0, 0], sizes = [4, 1, 4, 128], strides = [1, 1, 1, 1]} : vector<4x2x4x128xf32> to vector<4x1x4x128xf32>
    %77 = vector.shape_cast %76 : vector<4x1x4x128xf32> to vector<4x4x128xf32>
    %78 = arith.addf %75, %77 : vector<4x4x128xf32>
    %cst_100 = arith.constant 2.500000e-01 : f32
    %79 = vector.broadcast %cst_100 : f32 to vector<4x4x128xf32>
    %80 = arith.mulf %78, %79 : vector<4x4x128xf32>
    %81 = arith.truncf %80 : vector<4x4x128xf32> to vector<4x4x128xbf16>
    %c0_101 = arith.constant 0 : index
    %c0_102 = arith.constant 0 : index
    %c0_103 = arith.constant 0 : index
    %c0_104 = arith.constant 0 : index
    %82 = vector.load %arg9[%c0_101, %c0_102, %c0_103, %c0_104] : memref<1x4x4x128xbf16, #tpu.memory_space<vmem>>, vector<1x4x4x128xbf16>
    %83 = vector.shape_cast %82 : vector<1x4x4x128xbf16> to vector<4x4x128xbf16>
    %84 = vector.shape_cast %81 : vector<4x4x128xbf16> to vector<1x4x4x128xbf16>
    tpu.vector_store %arg9[%c0_101, %c0_102, %c0_103, %c0_104], %84 {strides = array<i32>} : memref<1x4x4x128xbf16, #tpu.memory_space<vmem>>, vector<1x4x4x128xbf16>,
    return
  }
  func.func @transform_0(%arg0: i32, %arg1: i32) -> (i32, i32, i32, i32) {
    %c0_i32 = arith.constant 0 : i32
    %c0_i32_0 = arith.constant 0 : i32
    %c0_i32_1 = arith.constant 0 : i32
    return %arg0, %arg1, %c0_i32, %c0_i32_0 : i32, i32, i32, i32
  }
  func.func @transform_1(%arg0: i32, %arg1: i32) -> (i32, i32, i32, i32) {
    %c4_i32 = arith.constant 4 : i32
    %0 = arith.muli %arg1, %c4_i32 : i32
    %c1_i32 = arith.constant 1 : i32
    %1 = arith.subi %0, %c1_i32 : i32
    %c0_i32 = arith.constant 0 : i32
    %2 = arith.maxsi %1, %c0_i32 : i32
    %c0_i32_0 = arith.constant 0 : i32
    %c0_i32_1 = arith.constant 0 : i32
    %c0_i32_2 = arith.constant 0 : i32
    return %arg0, %2, %c0_i32_0, %c0_i32_1 : i32, i32, i32, i32
  }
  func.func @transform_2(%arg0: i32, %arg1: i32) -> (i32, i32, i32, i32) {
    %c1_i32 = arith.constant 1 : i32
    %0 = arith.addi %arg1, %c1_i32 : i32
    %c4_i32 = arith.constant 4 : i32
    %1 = arith.muli %0, %c4_i32 : i32
    %c3_i32 = arith.constant 3 : i32
    %2 = arith.minsi %1, %c3_i32 : i32
    %c0_i32 = arith.constant 0 : i32
    %c0_i32_0 = arith.constant 0 : i32
    %c0_i32_1 = arith.constant 0 : i32
    return %arg0, %2, %c0_i32, %c0_i32_0 : i32, i32, i32, i32
  }
  func.func @transform_3(%arg0: i32, %arg1: i32) -> (i32, i32) {
    %c0_i32 = arith.constant 0 : i32
    %c0_i32_0 = arith.constant 0 : i32
    %c0_i32_1 = arith.constant 0 : i32
    return %c0_i32, %c0_i32_0 : i32, i32
  }
  func.func @transform_4(%arg0: i32, %arg1: i32) -> (i32, i32) {
    %c0_i32 = arith.constant 0 : i32
    %c0_i32_0 = arith.constant 0 : i32
    %c0_i32_1 = arith.constant 0 : i32
    return %c0_i32, %c0_i32_0 : i32, i32
  }
  func.func @transform_5(%arg0: i32, %arg1: i32) -> (i32, i32) {
    %c0_i32 = arith.constant 0 : i32
    %c0_i32_0 = arith.constant 0 : i32
    %c0_i32_1 = arith.constant 0 : i32
    return %c0_i32, %c0_i32_0 : i32, i32
  }
  func.func @transform_6(%arg0: i32, %arg1: i32) -> (i32, i32) {
    %c0_i32 = arith.constant 0 : i32
    %c0_i32_0 = arith.constant 0 : i32
    %c0_i32_1 = arith.constant 0 : i32
    return %c0_i32, %c0_i32_0 : i32, i32
  }
  func.func @transform_7(%arg0: i32, %arg1: i32) -> (i32, i32, i32, i32) {
    %c0_i32 = arith.constant 0 : i32
    %c0_i32_0 = arith.constant 0 : i32
    %c0_i32_1 = arith.constant 0 : i32
    return %arg0, %arg1, %c0_i32, %c0_i32_0 : i32, i32, i32, i32
  }
}

module attributes {stable_mosaic.version = 11 : i64} {
  func.func @kernel(%arg0: i32, %arg1: i32, %arg2: memref<1x16x16x3xbf16, #tpu.memory_space<vmem>>, %arg3: memref<1x2x16x3xbf16, #tpu.memory_space<vmem>>, %arg4: memref<1x2x16x3xbf16, #tpu.memory_space<vmem>>, %arg5: memref<3x128xf32, #tpu.memory_space<vmem>>, %arg6: memref<1x128xf32, #tpu.memory_space<vmem>>, %arg7: memref<1152x128xbf16, #tpu.memory_space<vmem>>, %arg8: memref<1x128xf32, #tpu.memory_space<vmem>>, %arg9: memref<1152x128xbf16, #tpu.memory_space<vmem>>, %arg10: memref<1x128xf32, #tpu.memory_space<vmem>>, %arg11: memref<1x8x8x128xbf16, #tpu.memory_space<vmem>>, %arg12: memref<20x32x128xbf16, #tpu.memory_space<vmem>>) attributes {dimension_semantics = [#tpu.dimension_semantics<parallel>, #tpu.dimension_semantics<parallel>], iteration_bounds = array<i64: 2, 1>, scalar_prefetch = 0 : i64, scratch_operands = 1 : i64, tpu.core_type = #tpu.core_type<tc>, window_params = [{transform_indices = @transform_0, window_bounds = array<i64: 1, 16, 16, 3>}, {transform_indices = @transform_1, window_bounds = array<i64: 1, 2, 16, 3>}, {transform_indices = @transform_2, window_bounds = array<i64: 1, 2, 16, 3>}, {pipeline_mode = #tpu.pipeline_mode<synchronous>, transform_indices = @transform_3, window_bounds = array<i64: 3, 128>}, {pipeline_mode = #tpu.pipeline_mode<synchronous>, transform_indices = @transform_4, window_bounds = array<i64: 1, 128>}, {pipeline_mode = #tpu.pipeline_mode<synchronous>, transform_indices = @transform_5, window_bounds = array<i64: 1152, 128>}, {pipeline_mode = #tpu.pipeline_mode<synchronous>, transform_indices = @transform_6, window_bounds = array<i64: 1, 128>}, {pipeline_mode = #tpu.pipeline_mode<synchronous>, transform_indices = @transform_7, window_bounds = array<i64: 1152, 128>}, {pipeline_mode = #tpu.pipeline_mode<synchronous>, transform_indices = @transform_8, window_bounds = array<i64: 1, 128>}, {transform_indices = @transform_9, window_bounds = array<i64: 1, 8, 8, 128>}]} {
    %cst = arith.constant 0.000000e+00 : bf16
    %0 = vector.broadcast %cst : bf16 to vector<20x1x128xbf16>
    %c0 = arith.constant 0 : index
    %c0_0 = arith.constant 0 : index
    %c0_1 = arith.constant 0 : index
    %1 = vector.load %arg12[%c0, %c0_0, %c0_1] : memref<20x32x128xbf16, #tpu.memory_space<vmem>>, vector<20x1x128xbf16>
    tpu.vector_store %arg12[%c0, %c0_0, %c0_1], %0 {strides = array<i32>} : memref<20x32x128xbf16, #tpu.memory_space<vmem>>, vector<20x1x128xbf16>,
    %c0_2 = arith.constant 0 : index
    %c17 = arith.constant 17 : index
    %c0_3 = arith.constant 0 : index
    %2 = vector.load %arg12[%c0_2, %c17, %c0_3] : memref<20x32x128xbf16, #tpu.memory_space<vmem>>, vector<20x1x128xbf16>
    tpu.vector_store %arg12[%c0_2, %c17, %c0_3], %0 {strides = array<i32>} : memref<20x32x128xbf16, #tpu.memory_space<vmem>>, vector<20x1x128xbf16>,
    %c0_4 = arith.constant 0 : index
    %c0_5 = arith.constant 0 : index
    %c0_6 = arith.constant 0 : index
    %c0_7 = arith.constant 0 : index
    %3 = vector.load %arg3[%c0_4, %c0_5, %c0_6, %c0_7] : memref<1x2x16x3xbf16, #tpu.memory_space<vmem>>, vector<1x2x16x3xbf16>
    %4 = vector.shape_cast %3 : vector<1x2x16x3xbf16> to vector<2x16x3xbf16>
    %5 = arith.extf %4 : vector<2x16x3xbf16> to vector<2x16x3xf32>
    %c0_8 = arith.constant 0 : index
    %c0_9 = arith.constant 0 : index
    %6 = vector.load %arg6[%c0_8, %c0_9] : memref<1x128xf32, #tpu.memory_space<vmem>>, vector<1x128xf32>
    %7 = vector.extract_strided_slice %5 {offsets = [0, 0, 0], sizes = [2, 16, 1], strides = [1, 1, 1]} : vector<2x16x3xf32> to vector<2x16x1xf32>
    %c0_10 = arith.constant 0 : index
    %c0_11 = arith.constant 0 : index
    %8 = vector.load %arg5[%c0_10, %c0_11] : memref<3x128xf32, #tpu.memory_space<vmem>>, vector<1x128xf32>
    %9 = vector.shape_cast %8 : vector<1x128xf32> to vector<1x1x128xf32>
    %10 = vector.broadcast %7 : vector<2x16x1xf32> to vector<2x16x128xf32>
    %11 = vector.broadcast %9 : vector<1x1x128xf32> to vector<2x16x128xf32>
    %12 = arith.mulf %10, %11 : vector<2x16x128xf32>
    %13 = vector.shape_cast %6 : vector<1x128xf32> to vector<1x1x128xf32>
    %14 = vector.broadcast %13 : vector<1x1x128xf32> to vector<2x16x128xf32>
    %15 = arith.addf %14, %12 : vector<2x16x128xf32>
    %16 = vector.extract_strided_slice %5 {offsets = [0, 0, 1], sizes = [2, 16, 1], strides = [1, 1, 1]} : vector<2x16x3xf32> to vector<2x16x1xf32>
    %c1 = arith.constant 1 : index
    %c0_12 = arith.constant 0 : index
    %17 = vector.load %arg5[%c1, %c0_12] : memref<3x128xf32, #tpu.memory_space<vmem>>, vector<1x128xf32>
    %18 = vector.shape_cast %17 : vector<1x128xf32> to vector<1x1x128xf32>
    %19 = vector.broadcast %16 : vector<2x16x1xf32> to vector<2x16x128xf32>
    %20 = vector.broadcast %18 : vector<1x1x128xf32> to vector<2x16x128xf32>
    %21 = arith.mulf %19, %20 : vector<2x16x128xf32>
    %22 = arith.addf %15, %21 : vector<2x16x128xf32>
    %23 = vector.extract_strided_slice %5 {offsets = [0, 0, 2], sizes = [2, 16, 1], strides = [1, 1, 1]} : vector<2x16x3xf32> to vector<2x16x1xf32>
    %c2 = arith.constant 2 : index
    %c0_13 = arith.constant 0 : index
    %24 = vector.load %arg5[%c2, %c0_13] : memref<3x128xf32, #tpu.memory_space<vmem>>, vector<1x128xf32>
    %25 = vector.shape_cast %24 : vector<1x128xf32> to vector<1x1x128xf32>
    %26 = vector.broadcast %23 : vector<2x16x1xf32> to vector<2x16x128xf32>
    %27 = vector.broadcast %25 : vector<1x1x128xf32> to vector<2x16x128xf32>
    %28 = arith.mulf %26, %27 : vector<2x16x128xf32>
    %29 = arith.addf %22, %28 : vector<2x16x128xf32>
    %30 = arith.truncf %29 : vector<2x16x128xf32> to vector<2x16x128xbf16>
    %c0_i32 = arith.constant 0 : i32
    %31 = arith.cmpi eq, %arg1, %c0_i32 : i32
    %cst_14 = arith.constant 0.000000e+00 : bf16
    %32 = vector.broadcast %cst_14 : bf16 to vector<2x16x128xbf16>
    %33 = arith.select %31, %32, %30 : vector<2x16x128xbf16>
    %c0_15 = arith.constant 0 : index
    %c1_16 = arith.constant 1 : index
    %c0_17 = arith.constant 0 : index
    %34 = vector.load %arg12[%c0_15, %c1_16, %c0_17] : memref<20x32x128xbf16, #tpu.memory_space<vmem>>, vector<2x16x128xbf16>
    tpu.vector_store %arg12[%c0_15, %c1_16, %c0_17], %33 {strides = array<i32>} : memref<20x32x128xbf16, #tpu.memory_space<vmem>>, vector<2x16x128xbf16>,
    %c0_18 = arith.constant 0 : index
    %c0_19 = arith.constant 0 : index
    %c0_20 = arith.constant 0 : index
    %c0_21 = arith.constant 0 : index
    %35 = vector.load %arg4[%c0_18, %c0_19, %c0_20, %c0_21] : memref<1x2x16x3xbf16, #tpu.memory_space<vmem>>, vector<1x2x16x3xbf16>
    %36 = vector.shape_cast %35 : vector<1x2x16x3xbf16> to vector<2x16x3xbf16>
    %37 = arith.extf %36 : vector<2x16x3xbf16> to vector<2x16x3xf32>
    %c0_22 = arith.constant 0 : index
    %c0_23 = arith.constant 0 : index
    %38 = vector.load %arg6[%c0_22, %c0_23] : memref<1x128xf32, #tpu.memory_space<vmem>>, vector<1x128xf32>
    %39 = vector.extract_strided_slice %37 {offsets = [0, 0, 0], sizes = [2, 16, 1], strides = [1, 1, 1]} : vector<2x16x3xf32> to vector<2x16x1xf32>
    %c0_24 = arith.constant 0 : index
    %c0_25 = arith.constant 0 : index
    %40 = vector.load %arg5[%c0_24, %c0_25] : memref<3x128xf32, #tpu.memory_space<vmem>>, vector<1x128xf32>
    %41 = vector.shape_cast %40 : vector<1x128xf32> to vector<1x1x128xf32>
    %42 = vector.broadcast %39 : vector<2x16x1xf32> to vector<2x16x128xf32>
    %43 = vector.broadcast %41 : vector<1x1x128xf32> to vector<2x16x128xf32>
    %44 = arith.mulf %42, %43 : vector<2x16x128xf32>
    %45 = vector.shape_cast %38 : vector<1x128xf32> to vector<1x1x128xf32>
    %46 = vector.broadcast %45 : vector<1x1x128xf32> to vector<2x16x128xf32>
    %47 = arith.addf %46, %44 : vector<2x16x128xf32>
    %48 = vector.extract_strided_slice %37 {offsets = [0, 0, 1], sizes = [2, 16, 1], strides = [1, 1, 1]} : vector<2x16x3xf32> to vector<2x16x1xf32>
    %c1_26 = arith.constant 1 : index
    %c0_27 = arith.constant 0 : index
    %49 = vector.load %arg5[%c1_26, %c0_27] : memref<3x128xf32, #tpu.memory_space<vmem>>, vector<1x128xf32>
    %50 = vector.shape_cast %49 : vector<1x128xf32> to vector<1x1x128xf32>
    %51 = vector.broadcast %48 : vector<2x16x1xf32> to vector<2x16x128xf32>
    %52 = vector.broadcast %50 : vector<1x1x128xf32> to vector<2x16x128xf32>
    %53 = arith.mulf %51, %52 : vector<2x16x128xf32>
    %54 = arith.addf %47, %53 : vector<2x16x128xf32>
    %55 = vector.extract_strided_slice %37 {offsets = [0, 0, 2], sizes = [2, 16, 1], strides = [1, 1, 1]} : vector<2x16x3xf32> to vector<2x16x1xf32>
    %c2_28 = arith.constant 2 : index
    %c0_29 = arith.constant 0 : index
    %56 = vector.load %arg5[%c2_28, %c0_29] : memref<3x128xf32, #tpu.memory_space<vmem>>, vector<1x128xf32>
    %57 = vector.shape_cast %56 : vector<1x128xf32> to vector<1x1x128xf32>
    %58 = vector.broadcast %55 : vector<2x16x1xf32> to vector<2x16x128xf32>
    %59 = vector.broadcast %57 : vector<1x1x128xf32> to vector<2x16x128xf32>
    %60 = arith.mulf %58, %59 : vector<2x16x128xf32>
    %61 = arith.addf %54, %60 : vector<2x16x128xf32>
    %62 = arith.truncf %61 : vector<2x16x128xf32> to vector<2x16x128xbf16>
    %c0_i32_30 = arith.constant 0 : i32
    %63 = arith.cmpi eq, %arg1, %c0_i32_30 : i32
    %cst_31 = arith.constant 0.000000e+00 : bf16
    %64 = vector.broadcast %cst_31 : bf16 to vector<2x16x128xbf16>
    %65 = arith.select %63, %64, %62 : vector<2x16x128xbf16>
    %c18 = arith.constant 18 : index
    %c1_32 = arith.constant 1 : index
    %c0_33 = arith.constant 0 : index
    %66 = vector.load %arg12[%c18, %c1_32, %c0_33] : memref<20x32x128xbf16, #tpu.memory_space<vmem>>, vector<2x16x128xbf16>
    tpu.vector_store %arg12[%c18, %c1_32, %c0_33], %65 {strides = array<i32>} : memref<20x32x128xbf16, #tpu.memory_space<vmem>>, vector<2x16x128xbf16>,
    %c0_34 = arith.constant 0 : index
    %c0_35 = arith.constant 0 : index
    %c0_36 = arith.constant 0 : index
    %c0_37 = arith.constant 0 : index
    %67 = vector.load %arg2[%c0_34, %c0_35, %c0_36, %c0_37] : memref<1x16x16x3xbf16, #tpu.memory_space<vmem>>, vector<1x16x16x3xbf16>
    %68 = vector.shape_cast %67 : vector<1x16x16x3xbf16> to vector<16x16x3xbf16>
    %69 = arith.extf %68 : vector<16x16x3xbf16> to vector<16x16x3xf32>
    %c0_38 = arith.constant 0 : index
    %c0_39 = arith.constant 0 : index
    %70 = vector.load %arg6[%c0_38, %c0_39] : memref<1x128xf32, #tpu.memory_space<vmem>>, vector<1x128xf32>
    %71 = vector.extract_strided_slice %69 {offsets = [0, 0, 0], sizes = [16, 16, 1], strides = [1, 1, 1]} : vector<16x16x3xf32> to vector<16x16x1xf32>
    %c0_40 = arith.constant 0 : index
    %c0_41 = arith.constant 0 : index
    %72 = vector.load %arg5[%c0_40, %c0_41] : memref<3x128xf32, #tpu.memory_space<vmem>>, vector<1x128xf32>
    %73 = vector.shape_cast %72 : vector<1x128xf32> to vector<1x1x128xf32>
    %74 = vector.broadcast %71 : vector<16x16x1xf32> to vector<16x16x128xf32>
    %75 = vector.broadcast %73 : vector<1x1x128xf32> to vector<16x16x128xf32>
    %76 = arith.mulf %74, %75 : vector<16x16x128xf32>
    %77 = vector.shape_cast %70 : vector<1x128xf32> to vector<1x1x128xf32>
    %78 = vector.broadcast %77 : vector<1x1x128xf32> to vector<16x16x128xf32>
    %79 = arith.addf %78, %76 : vector<16x16x128xf32>
    %80 = vector.extract_strided_slice %69 {offsets = [0, 0, 1], sizes = [16, 16, 1], strides = [1, 1, 1]} : vector<16x16x3xf32> to vector<16x16x1xf32>
    %c1_42 = arith.constant 1 : index
    %c0_43 = arith.constant 0 : index
    %81 = vector.load %arg5[%c1_42, %c0_43] : memref<3x128xf32, #tpu.memory_space<vmem>>, vector<1x128xf32>
    %82 = vector.shape_cast %81 : vector<1x128xf32> to vector<1x1x128xf32>
    %83 = vector.broadcast %80 : vector<16x16x1xf32> to vector<16x16x128xf32>
    %84 = vector.broadcast %82 : vector<1x1x128xf32> to vector<16x16x128xf32>
    %85 = arith.mulf %83, %84 : vector<16x16x128xf32>
    %86 = arith.addf %79, %85 : vector<16x16x128xf32>
    %87 = vector.extract_strided_slice %69 {offsets = [0, 0, 2], sizes = [16, 16, 1], strides = [1, 1, 1]} : vector<16x16x3xf32> to vector<16x16x1xf32>
    %c2_44 = arith.constant 2 : index
    %c0_45 = arith.constant 0 : index
    %88 = vector.load %arg5[%c2_44, %c0_45] : memref<3x128xf32, #tpu.memory_space<vmem>>, vector<1x128xf32>
    %89 = vector.shape_cast %88 : vector<1x128xf32> to vector<1x1x128xf32>
    %90 = vector.broadcast %87 : vector<16x16x1xf32> to vector<16x16x128xf32>
    %91 = vector.broadcast %89 : vector<1x1x128xf32> to vector<16x16x128xf32>
    %92 = arith.mulf %90, %91 : vector<16x16x128xf32>
    %93 = arith.addf %86, %92 : vector<16x16x128xf32>
    %94 = arith.truncf %93 : vector<16x16x128xf32> to vector<16x16x128xbf16>
    %c2_46 = arith.constant 2 : index
    %c1_47 = arith.constant 1 : index
    %c0_48 = arith.constant 0 : index
    %95 = vector.load %arg12[%c2_46, %c1_47, %c0_48] : memref<20x32x128xbf16, #tpu.memory_space<vmem>>, vector<16x16x128xbf16>
    tpu.vector_store %arg12[%c2_46, %c1_47, %c0_48], %94 {strides = array<i32>} : memref<20x32x128xbf16, #tpu.memory_space<vmem>>, vector<16x16x128xbf16>,
    %c0_49 = arith.constant 0 : index
    %c0_50 = arith.constant 0 : index
    %c0_51 = arith.constant 0 : index
    %96 = vector.load %arg12[%c0_49, %c0_50, %c0_51] : memref<20x32x128xbf16, #tpu.memory_space<vmem>>, vector<18x16x128xbf16>
    %c0_52 = arith.constant 0 : index
    %c1_53 = arith.constant 1 : index
    %c0_54 = arith.constant 0 : index
    %97 = vector.load %arg12[%c0_52, %c1_53, %c0_54] : memref<20x32x128xbf16, #tpu.memory_space<vmem>>, vector<18x16x128xbf16>
    %c0_55 = arith.constant 0 : index
    %c2_56 = arith.constant 2 : index
    %c0_57 = arith.constant 0 : index
    %98 = vector.load %arg12[%c0_55, %c2_56, %c0_57] : memref<20x32x128xbf16, #tpu.memory_space<vmem>>, vector<18x16x128xbf16>
    %c1_58 = arith.constant 1 : index
    %c0_59 = arith.constant 0 : index
    %c0_60 = arith.constant 0 : index
    %99 = vector.load %arg12[%c1_58, %c0_59, %c0_60] : memref<20x32x128xbf16, #tpu.memory_space<vmem>>, vector<18x16x128xbf16>
    %c1_61 = arith.constant 1 : index
    %c1_62 = arith.constant 1 : index
    %c0_63 = arith.constant 0 : index
    %100 = vector.load %arg12[%c1_61, %c1_62, %c0_63] : memref<20x32x128xbf16, #tpu.memory_space<vmem>>, vector<18x16x128xbf16>
    %c1_64 = arith.constant 1 : index
    %c2_65 = arith.constant 2 : index
    %c0_66 = arith.constant 0 : index
    %101 = vector.load %arg12[%c1_64, %c2_65, %c0_66] : memref<20x32x128xbf16, #tpu.memory_space<vmem>>, vector<18x16x128xbf16>
    %c2_67 = arith.constant 2 : index
    %c0_68 = arith.constant 0 : index
    %c0_69 = arith.constant 0 : index
    %102 = vector.load %arg12[%c2_67, %c0_68, %c0_69] : memref<20x32x128xbf16, #tpu.memory_space<vmem>>, vector<18x16x128xbf16>
    %c2_70 = arith.constant 2 : index
    %c1_71 = arith.constant 1 : index
    %c0_72 = arith.constant 0 : index
    %103 = vector.load %arg12[%c2_70, %c1_71, %c0_72] : memref<20x32x128xbf16, #tpu.memory_space<vmem>>, vector<18x16x128xbf16>
    %c2_73 = arith.constant 2 : index
    %c2_74 = arith.constant 2 : index
    %c0_75 = arith.constant 0 : index
    %104 = vector.load %arg12[%c2_73, %c2_74, %c0_75] : memref<20x32x128xbf16, #tpu.memory_space<vmem>>, vector<18x16x128xbf16>
    %105 = tpu.concatenate %96, %97, %98, %99, %100, %101, %102, %103, %104 in 2 : vector<18x16x128xbf16>, vector<18x16x128xbf16>, vector<18x16x128xbf16>, vector<18x16x128xbf16>, vector<18x16x128xbf16>, vector<18x16x128xbf16>, vector<18x16x128xbf16>, vector<18x16x128xbf16>, vector<18x16x128xbf16> -> vector<18x16x1152xbf16>
    %106 = vector.shape_cast %105 : vector<18x16x1152xbf16> to vector<288x1152xbf16>
    %c0_76 = arith.constant 0 : index
    %c0_77 = arith.constant 0 : index
    %107 = vector.load %arg7[%c0_76, %c0_77] : memref<1152x128xbf16, #tpu.memory_space<vmem>>, vector<1152x128xbf16>
    %cst_78 = arith.constant dense<0.000000e+00> : vector<288x128xf32>
    %108 = tpu.matmul %106, %107, %cst_78 {dimension_numbers = #tpu.dot_dimension_numbers<[1], [0], [0], [1], [0, 0, 1, 1], [], []>} : vector<288x1152xbf16>, vector<1152x128xbf16>, vector<288x128xf32> -> vector<288x128xf32>
    %c0_79 = arith.constant 0 : index
    %c0_80 = arith.constant 0 : index
    %109 = vector.load %arg8[%c0_79, %c0_80] : memref<1x128xf32, #tpu.memory_space<vmem>>, vector<1x128xf32>
    %110 = vector.broadcast %109 : vector<1x128xf32> to vector<288x128xf32>
    %111 = arith.addf %108, %110 : vector<288x128xf32>
    %cst_81 = arith.constant 0.000000e+00 : f32
    %112 = vector.broadcast %cst_81 : f32 to vector<288x128xf32>
    %113 = arith.cmpf ogt, %111, %112 : vector<288x128xf32>
    %cst_82 = arith.constant 2.000000e-01 : f32
    %114 = vector.broadcast %cst_82 : f32 to vector<288x128xf32>
    %115 = arith.mulf %114, %111 : vector<288x128xf32>
    %116 = arith.select %113, %111, %115 : vector<288x128xi1>, vector<288x128xf32>
    %117 = vector.shape_cast %116 : vector<288x128xf32> to vector<18x16x128xf32>
    %118 = arith.truncf %117 : vector<18x16x128xf32> to vector<18x16x128xbf16>
    %c0_83 = arith.constant 0 : index
    %c1_84 = arith.constant 1 : index
    %c0_85 = arith.constant 0 : index
    %119 = vector.load %arg12[%c0_83, %c1_84, %c0_85] : memref<20x32x128xbf16, #tpu.memory_space<vmem>>, vector<18x16x128xbf16>
    tpu.vector_store %arg12[%c0_83, %c1_84, %c0_85], %118 {strides = array<i32>} : memref<20x32x128xbf16, #tpu.memory_space<vmem>>, vector<18x16x128xbf16>,
    %c0_i32_86 = arith.constant 0 : i32
    %120 = arith.cmpi eq, %arg1, %c0_i32_86 : i32
    %121 = arith.extui %120 : i1 to i32
    %c0_i32_87 = arith.constant 0 : i32
    %122 = arith.cmpi ne, %121, %c0_i32_87 : i32
    scf.if %122 {
      %cst_129 = arith.constant 0.000000e+00 : bf16
      %163 = vector.broadcast %cst_129 : bf16 to vector<1x16x128xbf16>
      %c0_130 = arith.constant 0 : index
      %c1_131 = arith.constant 1 : index
      %c0_132 = arith.constant 0 : index
      %164 = vector.load %arg12[%c0_130, %c1_131, %c0_132] : memref<20x32x128xbf16, #tpu.memory_space<vmem>>, vector<1x16x128xbf16>
      tpu.vector_store %arg12[%c0_130, %c1_131, %c0_132], %163 {strides = array<i32>} : memref<20x32x128xbf16, #tpu.memory_space<vmem>>, vector<1x16x128xbf16>,
    } else {
    }
    %c0_i32_88 = arith.constant 0 : i32
    %123 = arith.cmpi eq, %arg1, %c0_i32_88 : i32
    %124 = arith.extui %123 : i1 to i32
    %c0_i32_89 = arith.constant 0 : i32
    %125 = arith.cmpi ne, %124, %c0_i32_89 : i32
    scf.if %125 {
      %cst_129 = arith.constant 0.000000e+00 : bf16
      %163 = vector.broadcast %cst_129 : bf16 to vector<1x16x128xbf16>
      %c17_130 = arith.constant 17 : index
      %c1_131 = arith.constant 1 : index
      %c0_132 = arith.constant 0 : index
      %164 = vector.load %arg12[%c17_130, %c1_131, %c0_132] : memref<20x32x128xbf16, #tpu.memory_space<vmem>>, vector<1x16x128xbf16>
      tpu.vector_store %arg12[%c17_130, %c1_131, %c0_132], %163 {strides = array<i32>} : memref<20x32x128xbf16, #tpu.memory_space<vmem>>, vector<1x16x128xbf16>,
    } else {
    }
    %c0_90 = arith.constant 0 : index
    %c0_91 = arith.constant 0 : index
    %c0_92 = arith.constant 0 : index
    %126 = vector.load %arg12[%c0_90, %c0_91, %c0_92] : memref<20x32x128xbf16, #tpu.memory_space<vmem>>, vector<16x16x128xbf16>
    %c0_93 = arith.constant 0 : index
    %c1_94 = arith.constant 1 : index
    %c0_95 = arith.constant 0 : index
    %127 = vector.load %arg12[%c0_93, %c1_94, %c0_95] : memref<20x32x128xbf16, #tpu.memory_space<vmem>>, vector<16x16x128xbf16>
    %c0_96 = arith.constant 0 : index
    %c2_97 = arith.constant 2 : index
    %c0_98 = arith.constant 0 : index
    %128 = vector.load %arg12[%c0_96, %c2_97, %c0_98] : memref<20x32x128xbf16, #tpu.memory_space<vmem>>, vector<16x16x128xbf16>
    %c1_99 = arith.constant 1 : index
    %c0_100 = arith.constant 0 : index
    %c0_101 = arith.constant 0 : index
    %129 = vector.load %arg12[%c1_99, %c0_100, %c0_101] : memref<20x32x128xbf16, #tpu.memory_space<vmem>>, vector<16x16x128xbf16>
    %c1_102 = arith.constant 1 : index
    %c1_103 = arith.constant 1 : index
    %c0_104 = arith.constant 0 : index
    %130 = vector.load %arg12[%c1_102, %c1_103, %c0_104] : memref<20x32x128xbf16, #tpu.memory_space<vmem>>, vector<16x16x128xbf16>
    %c1_105 = arith.constant 1 : index
    %c2_106 = arith.constant 2 : index
    %c0_107 = arith.constant 0 : index
    %131 = vector.load %arg12[%c1_105, %c2_106, %c0_107] : memref<20x32x128xbf16, #tpu.memory_space<vmem>>, vector<16x16x128xbf16>
    %c2_108 = arith.constant 2 : index
    %c0_109 = arith.constant 0 : index
    %c0_110 = arith.constant 0 : index
    %132 = vector.load %arg12[%c2_108, %c0_109, %c0_110] : memref<20x32x128xbf16, #tpu.memory_space<vmem>>, vector<16x16x128xbf16>
    %c2_111 = arith.constant 2 : index
    %c1_112 = arith.constant 1 : index
    %c0_113 = arith.constant 0 : index
    %133 = vector.load %arg12[%c2_111, %c1_112, %c0_113] : memref<20x32x128xbf16, #tpu.memory_space<vmem>>, vector<16x16x128xbf16>
    %c2_114 = arith.constant 2 : index
    %c2_115 = arith.constant 2 : index
    %c0_116 = arith.constant 0 : index
    %134 = vector.load %arg12[%c2_114, %c2_115, %c0_116] : memref<20x32x128xbf16, #tpu.memory_space<vmem>>, vector<16x16x128xbf16>
    %135 = tpu.concatenate %126, %127, %128, %129, %130, %131, %132, %133, %134 in 2 : vector<16x16x128xbf16>, vector<16x16x128xbf16>, vector<16x16x128xbf16>, vector<16x16x128xbf16>, vector<16x16x128xbf16>, vector<16x16x128xbf16>, vector<16x16x128xbf16>, vector<16x16x128xbf16>, vector<16x16x128xbf16> -> vector<16x16x1152xbf16>
    %136 = vector.shape_cast %135 : vector<16x16x1152xbf16> to vector<256x1152xbf16>
    %c0_117 = arith.constant 0 : index
    %c0_118 = arith.constant 0 : index
    %137 = vector.load %arg9[%c0_117, %c0_118] : memref<1152x128xbf16, #tpu.memory_space<vmem>>, vector<1152x128xbf16>
    %cst_119 = arith.constant dense<0.000000e+00> : vector<256x128xf32>
    %138 = tpu.matmul %136, %137, %cst_119 {dimension_numbers = #tpu.dot_dimension_numbers<[1], [0], [0], [1], [0, 0, 1, 1], [], []>} : vector<256x1152xbf16>, vector<1152x128xbf16>, vector<256x128xf32> -> vector<256x128xf32>
    %c0_120 = arith.constant 0 : index
    %c0_121 = arith.constant 0 : index
    %139 = vector.load %arg10[%c0_120, %c0_121] : memref<1x128xf32, #tpu.memory_space<vmem>>, vector<1x128xf32>
    %140 = vector.broadcast %139 : vector<1x128xf32> to vector<256x128xf32>
    %141 = arith.addf %138, %140 : vector<256x128xf32>
    %cst_122 = arith.constant 0.000000e+00 : f32
    %142 = vector.broadcast %cst_122 : f32 to vector<256x128xf32>
    %143 = arith.cmpf ogt, %141, %142 : vector<256x128xf32>
    %cst_123 = arith.constant 2.000000e-01 : f32
    %144 = vector.broadcast %cst_123 : f32 to vector<256x128xf32>
    %145 = arith.mulf %144, %141 : vector<256x128xf32>
    %146 = arith.select %143, %141, %145 : vector<256x128xi1>, vector<256x128xf32>
    %147 = vector.shape_cast %146 : vector<256x128xf32> to vector<16x8x256xf32>
    %148 = vector.extract_strided_slice %147 {offsets = [0, 0, 0], sizes = [16, 8, 128], strides = [1, 1, 1]} : vector<16x8x256xf32> to vector<16x8x128xf32>
    %149 = vector.extract_strided_slice %147 {offsets = [0, 0, 128], sizes = [16, 8, 128], strides = [1, 1, 1]} : vector<16x8x256xf32> to vector<16x8x128xf32>
    %150 = arith.addf %148, %149 : vector<16x8x128xf32>
    %151 = vector.shape_cast %150 : vector<16x8x128xf32> to vector<8x2x8x128xf32>
    %152 = vector.extract_strided_slice %151 {offsets = [0, 0, 0, 0], sizes = [8, 1, 8, 128], strides = [1, 1, 1, 1]} : vector<8x2x8x128xf32> to vector<8x1x8x128xf32>
    %153 = vector.shape_cast %152 : vector<8x1x8x128xf32> to vector<8x8x128xf32>
    %154 = vector.extract_strided_slice %151 {offsets = [0, 1, 0, 0], sizes = [8, 1, 8, 128], strides = [1, 1, 1, 1]} : vector<8x2x8x128xf32> to vector<8x1x8x128xf32>
    %155 = vector.shape_cast %154 : vector<8x1x8x128xf32> to vector<8x8x128xf32>
    %156 = arith.addf %153, %155 : vector<8x8x128xf32>
    %cst_124 = arith.constant 2.500000e-01 : f32
    %157 = vector.broadcast %cst_124 : f32 to vector<8x8x128xf32>
    %158 = arith.mulf %156, %157 : vector<8x8x128xf32>
    %159 = arith.truncf %158 : vector<8x8x128xf32> to vector<8x8x128xbf16>
    %c0_125 = arith.constant 0 : index
    %c0_126 = arith.constant 0 : index
    %c0_127 = arith.constant 0 : index
    %c0_128 = arith.constant 0 : index
    %160 = vector.load %arg11[%c0_125, %c0_126, %c0_127, %c0_128] : memref<1x8x8x128xbf16, #tpu.memory_space<vmem>>, vector<1x8x8x128xbf16>
    %161 = vector.shape_cast %160 : vector<1x8x8x128xbf16> to vector<8x8x128xbf16>
    %162 = vector.shape_cast %159 : vector<8x8x128xbf16> to vector<1x8x8x128xbf16>
    tpu.vector_store %arg11[%c0_125, %c0_126, %c0_127, %c0_128], %162 {strides = array<i32>} : memref<1x8x8x128xbf16, #tpu.memory_space<vmem>>, vector<1x8x8x128xbf16>,
    return
  }
  func.func @transform_0(%arg0: i32, %arg1: i32) -> (i32, i32, i32, i32) {
    %c0_i32 = arith.constant 0 : i32
    %c0_i32_0 = arith.constant 0 : i32
    %c0_i32_1 = arith.constant 0 : i32
    return %arg0, %arg1, %c0_i32, %c0_i32_0 : i32, i32, i32, i32
  }
  func.func @transform_1(%arg0: i32, %arg1: i32) -> (i32, i32, i32, i32) {
    %c8_i32 = arith.constant 8 : i32
    %0 = arith.muli %arg1, %c8_i32 : i32
    %c1_i32 = arith.constant 1 : i32
    %1 = arith.subi %0, %c1_i32 : i32
    %c0_i32 = arith.constant 0 : i32
    %2 = arith.maxsi %1, %c0_i32 : i32
    %c0_i32_0 = arith.constant 0 : i32
    %c0_i32_1 = arith.constant 0 : i32
    %c0_i32_2 = arith.constant 0 : i32
    return %arg0, %2, %c0_i32_0, %c0_i32_1 : i32, i32, i32, i32
  }
  func.func @transform_2(%arg0: i32, %arg1: i32) -> (i32, i32, i32, i32) {
    %c1_i32 = arith.constant 1 : i32
    %0 = arith.addi %arg1, %c1_i32 : i32
    %c8_i32 = arith.constant 8 : i32
    %1 = arith.muli %0, %c8_i32 : i32
    %c7_i32 = arith.constant 7 : i32
    %2 = arith.minsi %1, %c7_i32 : i32
    %c0_i32 = arith.constant 0 : i32
    %c0_i32_0 = arith.constant 0 : i32
    %c0_i32_1 = arith.constant 0 : i32
    return %arg0, %2, %c0_i32, %c0_i32_0 : i32, i32, i32, i32
  }
  func.func @transform_3(%arg0: i32, %arg1: i32) -> (i32, i32) {
    %c0_i32 = arith.constant 0 : i32
    %c0_i32_0 = arith.constant 0 : i32
    %c0_i32_1 = arith.constant 0 : i32
    return %c0_i32, %c0_i32_0 : i32, i32
  }
  func.func @transform_4(%arg0: i32, %arg1: i32) -> (i32, i32) {
    %c0_i32 = arith.constant 0 : i32
    %c0_i32_0 = arith.constant 0 : i32
    %c0_i32_1 = arith.constant 0 : i32
    return %c0_i32, %c0_i32_0 : i32, i32
  }
  func.func @transform_5(%arg0: i32, %arg1: i32) -> (i32, i32) {
    %c0_i32 = arith.constant 0 : i32
    %c0_i32_0 = arith.constant 0 : i32
    %c0_i32_1 = arith.constant 0 : i32
    return %c0_i32, %c0_i32_0 : i32, i32
  }
  func.func @transform_6(%arg0: i32, %arg1: i32) -> (i32, i32) {
    %c0_i32 = arith.constant 0 : i32
    %c0_i32_0 = arith.constant 0 : i32
    %c0_i32_1 = arith.constant 0 : i32
    return %c0_i32, %c0_i32_0 : i32, i32
  }
  func.func @transform_7(%arg0: i32, %arg1: i32) -> (i32, i32) {
    %c0_i32 = arith.constant 0 : i32
    %c0_i32_0 = arith.constant 0 : i32
    %c0_i32_1 = arith.constant 0 : i32
    return %c0_i32, %c0_i32_0 : i32, i32
  }
  func.func @transform_8(%arg0: i32, %arg1: i32) -> (i32, i32) {
    %c0_i32 = arith.constant 0 : i32
    %c0_i32_0 = arith.constant 0 : i32
    %c0_i32_1 = arith.constant 0 : i32
    return %c0_i32, %c0_i32_0 : i32, i32
  }
  func.func @transform_9(%arg0: i32, %arg1: i32) -> (i32, i32, i32, i32) {
    %c0_i32 = arith.constant 0 : i32
    %c0_i32_0 = arith.constant 0 : i32
    %c0_i32_1 = arith.constant 0 : i32
    return %arg0, %arg1, %c0_i32, %c0_i32_0 : i32, i32, i32, i32
  }
}

module attributes {stable_mosaic.version = 11 : i64} {
  func.func @_final_kernel(%arg0: memref<2x4x4x128xbf16, #tpu.memory_space<vmem>>, %arg1: memref<1x128xf32, #tpu.memory_space<vmem>>, %arg2: memref<1x1xf32, #tpu.memory_space<vmem>>, %arg3: memref<1x1xf32, #tpu.memory_space<vmem>>, %arg4: memref<32x1xf32, #tpu.memory_space<vmem>>) attributes {dimension_semantics = [], scalar_prefetch = 0 : i64, scratch_operands = 0 : i64, tpu.core_type = #tpu.core_type<tc>} {
    %c0 = arith.constant 0 : index
    %c0_0 = arith.constant 0 : index
    %c0_1 = arith.constant 0 : index
    %c0_2 = arith.constant 0 : index
    %0 = vector.load %arg0[%c0, %c0_0, %c0_1, %c0_2] : memref<2x4x4x128xbf16, #tpu.memory_space<vmem>>, vector<2x4x4x128xbf16>
    %1 = arith.extf %0 : vector<2x4x4x128xbf16> to vector<2x4x4x128xf32>
    %2 = vector.extract_strided_slice %1 {offsets = [0, 0, 0, 0], sizes = [1, 4, 4, 128], strides = [1, 1, 1, 1]} : vector<2x4x4x128xf32> to vector<1x4x4x128xf32>
    %3 = vector.shape_cast %2 : vector<1x4x4x128xf32> to vector<4x4x128xf32>
    %4 = vector.extract_strided_slice %1 {offsets = [1, 0, 0, 0], sizes = [1, 4, 4, 128], strides = [1, 1, 1, 1]} : vector<2x4x4x128xf32> to vector<1x4x4x128xf32>
    %5 = vector.shape_cast %4 : vector<1x4x4x128xf32> to vector<4x4x128xf32>
    %6 = arith.addf %3, %5 : vector<4x4x128xf32>
    %cst = arith.constant 2.000000e+00 : f32
    %7 = vector.broadcast %cst : f32 to vector<4x4x128xf32>
    %8 = arith.divf %6, %7 : vector<4x4x128xf32>
    %9 = vector.extract_strided_slice %1 {offsets = [0, 0, 0, 0], sizes = [1, 4, 4, 128], strides = [1, 1, 1, 1]} : vector<2x4x4x128xf32> to vector<1x4x4x128xf32>
    %10 = vector.shape_cast %9 : vector<1x4x4x128xf32> to vector<4x4x128xf32>
    %11 = arith.subf %10, %8 : vector<4x4x128xf32>
    %12 = arith.mulf %11, %11 : vector<4x4x128xf32>
    %13 = vector.extract_strided_slice %1 {offsets = [1, 0, 0, 0], sizes = [1, 4, 4, 128], strides = [1, 1, 1, 1]} : vector<2x4x4x128xf32> to vector<1x4x4x128xf32>
    %14 = vector.shape_cast %13 : vector<1x4x4x128xf32> to vector<4x4x128xf32>
    %15 = arith.subf %14, %8 : vector<4x4x128xf32>
    %16 = arith.mulf %15, %15 : vector<4x4x128xf32>
    %17 = arith.addf %12, %16 : vector<4x4x128xf32>
    %cst_3 = arith.constant 1.000000e+00 : f32
    %18 = vector.broadcast %cst_3 : f32 to vector<4x4x128xf32>
    %19 = arith.divf %17, %18 : vector<4x4x128xf32>
    %20 = math.sqrt %19 : vector<4x4x128xf32>
    %21 = vector.shape_cast %20 : vector<4x4x128xf32> to vector<16x128xf32>
    %22 = vector.shape_cast %21 : vector<16x128xf32> to vector<1x16x128xf32>
    %cst_4 = arith.constant dense<0.000000e+00> : vector<1xf32>
    %23 = vector.multi_reduction <add>, %22, %cst_4 [1, 2] : vector<1x16x128xf32> to vector<1xf32>
    %24 = vector.shape_cast %23 : vector<1xf32> to vector<1x1x1xf32>
    %25 = vector.extract %24[0, 0, 0] : f32 from vector<1x1x1xf32>
    %cst_5 = arith.constant 2.048000e+03 : f32
    %26 = arith.divf %25, %cst_5 : f32
    %27 = vector.shape_cast %1 : vector<2x4x4x128xf32> to vector<32x128xf32>
    %c0_6 = arith.constant 0 : index
    %c0_7 = arith.constant 0 : index
    %28 = vector.load %arg1[%c0_6, %c0_7] : memref<1x128xf32, #tpu.memory_space<vmem>>, vector<1x128xf32>
    %29 = vector.broadcast %28 : vector<1x128xf32> to vector<32x128xf32>
    %30 = arith.mulf %27, %29 : vector<32x128xf32>
    %cst_8 = arith.constant dense<0.000000e+00> : vector<32xf32>
    %31 = vector.multi_reduction <add>, %30, %cst_8 [1] : vector<32x128xf32> to vector<32xf32>
    %32 = vector.shape_cast %31 : vector<32xf32> to vector<32x1xf32>
    %c0_9 = arith.constant 0 : index
    %c0_10 = arith.constant 0 : index
    %33 = vector.load %arg2[%c0_9, %c0_10] : memref<1x1xf32, #tpu.memory_space<vmem>>, vector<1x1xf32>
    %34 = vector.extract %33[0, 0] : f32 from vector<1x1xf32>
    %35 = arith.mulf %26, %34 : f32
    %36 = vector.broadcast %35 : f32 to vector<32x1xf32>
    %37 = arith.addf %32, %36 : vector<32x1xf32>
    %c0_11 = arith.constant 0 : index
    %c0_12 = arith.constant 0 : index
    %38 = vector.load %arg3[%c0_11, %c0_12] : memref<1x1xf32, #tpu.memory_space<vmem>>, vector<1x1xf32>
    %39 = vector.extract %38[0, 0] : f32 from vector<1x1xf32>
    %40 = vector.broadcast %39 : f32 to vector<32x1xf32>
    %41 = arith.addf %37, %40 : vector<32x1xf32>
    %c0_13 = arith.constant 0 : index
    %c0_14 = arith.constant 0 : index
    %42 = vector.load %arg4[%c0_13, %c0_14] : memref<32x1xf32, #tpu.memory_space<vmem>>, vector<32x1xf32>
    tpu.vector_store %arg4[%c0_13, %c0_14], %41 {strides = array<i32>} : memref<32x1xf32, #tpu.memory_space<vmem>>, vector<32x1xf32>,
    return
  }
}

</mosaic_0001>

<bundles_post_ra>
// kernel: progressive_discriminator.5
= control target key start
LH: loop header
LB: loop body
LE: loop exit
PB: predicated region body
PF: predicated region fallthrough
CT: control target
= control target key end

     0   :  { %vm171_vm8 = vcmask 7168   ;;  %s301_s0 = inlined_call_operand.vmem [shape: bf16[2,4,4,128], index: 0, kind: input, shape index: {}]   ;;  %s302_s1 = inlined_call_operand.vmem [shape: f32[1,128], index: 1, kind: input, shape index: {}]   ;;  %s303_s2 = inlined_call_operand.<no memory space> [shape: f32[1,1], index: 2, kind: input, shape index: {}]   ;;  %s304_s3 = inlined_call_operand.<no memory space> [shape: f32[1,1], index: 3, kind: input, shape index: {}]   ;;  %s305_s4 = inlined_call_operand.vmem [shape: f32[32,1], index: 4, kind: output, shape index: {}]  }
   0x1   :  { %v21_v0 = vld [vmem:[%s301_s0] sm:$0x3]  ;;  %v22_v1 = vld [vmem:[%s301_s0 + $0x2] sm:$0x3]  ;;  %v23_v2 = vld [vmem:[%s301_s0 + $0x4] sm:$0x3] }
   0x2   :  { %v24_v3 = vld [vmem:[%s301_s0 + $0x6] sm:$0x3]  ;;  %v25_v4 = vld [vmem:[%s301_s0 + $0x8] sm:$0x3]  ;;  %v26_v5 = vld [vmem:[%s301_s0 + $0xa] sm:$0x3]  ;;  %v238_v6 = vunpack.c.l.bf16 %v21_v0  ;;  %v240_v7 = vunpack.c.l.bf16 %v22_v1  ;;  %v31_v8 = vunpack.c.l.bf16 %v23_v2 }
   0x3   :  { %v27_v9 = vld [vmem:[%s301_s0 + $0xc] sm:$0x3]  ;;  %v28_v10 = vld [vmem:[%s301_s0 + $0xe] sm:$0x3]  ;;  %v32_v11 = vunpack.c.l.bf16 %v24_v3  ;;  %v33_v12 = vunpack.c.l.bf16 %v25_v4  ;;  %v34_v13 = vunpack.c.l.bf16 %v26_v5  ;;  %v251_v14 = vld [vmem:[%s302_s1] ss:$0 sm:$0xff] }
   0x4   :  { %v253_v15 = vunpack.c.l.bf16 %v27_v9  ;;  %v255_v16 = vunpack.c.l.bf16 %v28_v10  ;;  %v259_v17 = vcombine.high %v251_v14, %v251_v14  ;;  %v126_v18 = vmul.f32 %v251_v14, %v31_v8 }
   0x5   :  { %v37_v19 = vadd.f32 %v33_v12, %v238_v6  ;;  %v38_v20 = vadd.f32 %v34_v13, %v240_v7  ;;  %v128_v26 = vmul.f32 %v251_v14, %v33_v12 }
   0x6   :  { %v39_v21 = vadd.f32 %v253_v15, %v31_v8  ;;  %v40_v22 = vadd.f32 %v255_v16, %v32_v11  ;;  %v127_v23 = vmul.f32 %v259_v17, %v32_v11  ;;  %v129_v30 = vmul.f32 %v259_v17, %v34_v13 }
   0x7   :  { %v42_v24 = vmul.f32 0.5, %v37_v19  ;;  %v43_v25 = vmul.f32 0.5, %v38_v20  ;;  %v130_v20 = vmul.f32 %v251_v14, %v253_v15 }
   0x8   :  { %v44_v27 = vmul.f32 0.5, %v39_v21  ;;  %v45_v28 = vmul.f32 0.5, %v40_v22  ;;  %v141_v29 = vcombine.low %v126_v18, %v127_v23  ;;  %v142_v49 = vcombine.low %v128_v26, %v129_v30 }
   0x9   :  { %v46_v31 = vsub.f32 %v238_v6, %v42_v24  ;;  %v47_v32 = vsub.f32 %v240_v7, %v43_v25  ;;  %v54_v33 = vsub.f32 %v33_v12, %v42_v24  ;;  %v55_v34 = vsub.f32 %v34_v13, %v43_v25 }
   0xa   :  { %v48_v35 = vsub.f32 %v31_v8, %v44_v27  ;;  %v49_v36 = vsub.f32 %v32_v11, %v45_v28  ;;  %v56_v37 = vsub.f32 %v253_v15, %v44_v27  ;;  %v57_v38 = vsub.f32 %v255_v16, %v45_v28  ;;  %150 = vadd.xlane.f32.xlu1 %v141_v29 }
   0xb   :  { %v50_v39 = vmul.f32 %v46_v31, %v46_v31  ;;  %v51_v40 = vmul.f32 %v47_v32, %v47_v32  ;;  %v58_v41 = vmul.f32 %v54_v33, %v54_v33  ;;  %v59_v42 = vmul.f32 %v55_v34, %v55_v34 }
   0xc   :  { %v52_v43 = vmul.f32 %v48_v35, %v48_v35  ;;  %v53_v44 = vmul.f32 %v49_v36, %v49_v36  ;;  %v60_v45 = vmul.f32 %v56_v37, %v56_v37  ;;  %v61_v46 = vmul.f32 %v57_v38, %v57_v38 }
   0xd   :  { %v62_v47 = vadd.f32 %v58_v41, %v50_v39  ;;  %v63_v48 = vadd.f32 %v59_v42, %v51_v40  ;;  %v124_v12 = vmul.f32 %v251_v14, %v238_v6  ;;  %v125_v13 = vmul.f32 %v259_v17, %v240_v7 }
   0xe   :  { %v64_v50 = vadd.f32 %v60_v45, %v52_v43  ;;  %v65_v51 = vadd.f32 %v61_v46, %v53_v44  ;;  %152 = vadd.xlane.f32.xlu1 %v142_v49  ;;  %v131_v21 = vmul.f32 %v259_v17, %v255_v16  ;;  %v9_v23 = vstv %s303_s2 }
   0xf   :  { %187 = vrsqrt.f32 %v62_v47  ;;  %vm68_vm0 = vcmp.eq.f32.partialorder %v62_v47, inf  ;;  %vm70_vm1 = vcmp.eq.f32.partialorder %v62_v47, 0.0  ;;  %v71_v53 = vand.u32 2147483648, %v62_v47  ;;  %10 = vst [vmem:[#allocation2] sm:$0x1] %v9_v23 }
  0x10   :  { %189 = vrsqrt.f32 %v63_v48  ;;  %vm75_vm2 = vcmp.eq.f32.partialorder %v63_v48, inf  ;;  %vm77_vm3 = vcmp.eq.f32.partialorder %v63_v48, 0.0  ;;  %v78_v56 = vand.u32 2147483648, %v63_v48 }
  0x11   :  { %191 = vrsqrt.f32 %v64_v50  ;;  %vm82_vm4 = vcmp.eq.f32.partialorder %v64_v50, inf  ;;  %vm84_vm5 = vcmp.eq.f32.partialorder %v64_v50, 0.0  ;;  %v85_v59 = vand.u32 2147483648, %v64_v50 }
  0x12   :  { %193 = vrsqrt.f32 %v65_v51  ;;  %vm89_vm6 = vcmp.eq.f32.partialorder %v65_v51, inf  ;;  %v92_v63 = vand.u32 2147483648, %v65_v51  ;;  %vm91_vm7 = vcmp.eq.f32.partialorder %v65_v51, 0.0 }
  0x13   :  { %v140_v19 = vcombine.low %v124_v12, %v125_v13  ;;  %v143_v22 = vcombine.low %v130_v20, %v131_v21  ;;  %v11_v6 = vstv %s304_s3 }
  0x14   :  { %12 = vst [vmem:[#allocation3] sm:$0x1] %v11_v6 }
  0x16   :  { %v156_v17 = vld [vmem:[#allocation2] sm:$0x1] }
  0x19   :  { %v188_v52 = vpop.eup %187 }
  0x1a   :  { %v190_v54 = vpop.eup %189  ;;  %v67_v55 = vmul.f32 %v188_v52, %v62_v47 }
  0x1b   :  { %v192_v57 = vpop.eup %191  ;;  %v74_v58 = vmul.f32 %v190_v54, %v63_v48  ;;  %v164_v27 = vld [vmem:[#allocation3] sm:$0x1] }
  0x1c   :  { %v194_v60 = vpop.eup %193  ;;  %v69_v61 = vsel %vm68_vm0, %v62_v47, %v67_v55  ;;  %v81_v62 = vmul.f32 %v192_v57, %v64_v50 }
  0x1d   :  { %v72_v0 = vsel %vm70_vm1, %v71_v53, %v69_v61  ;;  %v76_v1 = vsel %vm75_vm2, %v63_v48, %v74_v58  ;;  %v88_v2 = vmul.f32 %v194_v60, %v65_v51 }
  0x1e   :  { %v79_v3 = vsel %vm77_vm3, %v78_v56, %v76_v1  ;;  %v83_v4 = vsel %vm82_vm4, %v64_v50, %v81_v62 }
  0x1f   :  { %v86_v5 = vsel %vm84_vm5, %v85_v59, %v83_v4  ;;  %v90_v8 = vsel %vm89_vm6, %v65_v51, %v88_v2  ;;  %v98_v9 = vcombine.low %v72_v0, %v79_v3 }
  0x20   :  { %v93_v10 = vsel %vm91_vm7, %v92_v63, %v90_v8 }
  0x21   :  { %v99_v11 = vcombine.low %v86_v5, %v93_v10 }
  0x23   :  { %v102_v18 = vadd.f32 %v99_v11, %v98_v9 }
  0x25   :  { %103 = vadd.xlane.f32.xlu0 %v102_v18 }
  0x29   :  { %148 = vadd.xlane.f32.xlu0 %v140_v19 }
  0x2d   :  { %154 = vadd.xlane.f32.xlu0 %v143_v22 }
  0x97   :  { %v151_v28 = vpop.xlane.xlu1 %150 }
  0x9b   :  { %v153_v30 = vpop.xlane.xlu1 %152 }
  0xb2   :  { %v104_v7 = vpop.xlane.xlu0 %103 }
  0xb3   :  { %v105_v24 = vrot.slane %v104_v7, 4 }
  0xb5   :  { %v106_v25 = vadd.f32 %v105_v24, %v104_v7 }
  0xb6   :  { %v149_v29 = vpop.xlane.xlu0 %148 }
  0xb7   :  { %v107_v14 = vrot.slane %v106_v25, 2 }
  0xb9   :  { %v108_v15 = vadd.f32 %v107_v14, %v106_v25 }
  0xba   :  { %v155_v31 = vpop.xlane.xlu0 %154 }
  0xbb   :  { %v109_v26 = vrot.slane %v108_v15, 1 }
  0xbd   :  { %v110_v16 = vadd.f32 %v109_v26, %v108_v15 }
  0xbf   :  { %181 = vpush %v110_v16 }
  0xc0   :  { %183 = vpush %v156_v17 }
  0xc1   :  { %185 = vpush %v164_v27 }
  0xf0   :  { %s182_s2 = spop %181 }
  0xf1   :  { %s114_s9 = smul.f32 0.00048828125, %s182_s2  ;;  %s184_s10 = spop %183 }
  0xf2   :  { %s186_s11 = spop %185 }
  0xf3   :  { %s158_s3 = smul.f32 %s184_s10, %s114_s9  ;;  %v166_v33 = vstv %s186_s11 }
  0xf5   :  { %v159_v32 = vstv %s158_s3 }
  0xf6   :  { %v160_v34 = vadd.f32 %v159_v32, %v149_v29  ;;  %v161_v35 = vadd.f32 %v159_v32, %v151_v28  ;;  %v162_v36 = vadd.f32 %v159_v32, %v153_v30  ;;  %v163_v37 = vadd.f32 %v159_v32, %v155_v31 }
  0xf8   :  { %v167_v38 = vadd.f32 %v166_v33, %v160_v34  ;;  %v168_v39 = vadd.f32 %v166_v33, %v161_v35  ;;  %v169_v40 = vadd.f32 %v166_v33, %v162_v36  ;;  %v170_v41 = vadd.f32 %v166_v33, %v163_v37 }
  0xfa   :  { %172 = vst.msk [vmem:[%s305_s4] sm:$0xff] %vm171_vm8, %v167_v38  ;;  %173 = vst.msk [vmem:[%s305_s4 + $0x8] sm:$0xff] %vm171_vm8, %v168_v39 }
  0xfb   :  { %174 = vst.msk [vmem:[%s305_s4 + $0x10] sm:$0xff] %vm171_vm8, %v169_v40  ;;  %175 = vst.msk [vmem:[%s305_s4 + $0x18] sm:$0xff] %vm171_vm8, %v170_v41 }

// kernel: progressive_discriminator.4
= control target key start
LH: loop header
LB: loop body
LE: loop exit
PB: predicated region body
PF: predicated region fallthrough
CT: control target
= control target key end

     0   :  { %s4975_s24 = smov 0   ;;  %s4977_s1 = smov 0   ;;  %s5745_s0 = inlined_call_operand.vmem [shape: bf16[2,8,8,128], index: 0, kind: input, shape index: {}, may-alias: {0,1,2}]   ;;  %s5746_s1 = inlined_call_operand.vmem [shape: bf16[2,8,8,128], index: 1, kind: input, shape index: {}, may-alias: {0,1,2}]   ;;  %s5747_s2 = inlined_call_operand.vmem [shape: bf16[2,8,8,128], index: 2, kind: input, shape index: {}, may-alias: {0,1,2}]   ;;  %s5748_s3 = inlined_call_operand.vmem [shape: bf16[1152,128], index: 3, kind: input, shape index: {}]   ;;  %s5749_s4 = inlined_call_operand.vmem [shape: f32[1,128], index: 4, kind: input, shape index: {}]   ;;  %s5750_s5 = inlined_call_operand.vmem [shape: bf16[1152,128], index: 5, kind: input, shape index: {}]   ;;  %s5751_s6 = inlined_call_operand.vmem [shape: f32[1,128], index: 6, kind: input, shape index: {}]   ;;  %s5752_s7 = inlined_call_operand.vmem [shape: bf16[2,4,4,128], index: 7, kind: output, shape index: {}]  }
   0x1   :  { %s4979_s2 = smov 0  }
   0x2 LB: > { %s29_s25 = sadd.s32 1, %s4925_s1  ;;  %p4015_p0 = scmp.ge.s32.totalorder %s4929_s2, 1  ;;  %s4929_s2 = sphi %s4979_s2, %s17_s2   ;;  %s4925_s1 = sphi %s4977_s1, %s5760_s1   ;;  %s4921_s24 = sphi %s4975_s24, %s5759_s24  }
   0x3   : > { %p31_p1 = scmp.ge.s32.totalorder %s29_s25, 2  ;;  %p324_p2 = scmp.lt.s32.totalorder %s4929_s2, 3 }
   0x5   : > { %s5762_s25 = smov (%p31_p1, %s29_s25), 0  ;;  %p325_p3 = pnand %p4015_p0, %p324_p2 }
   0x6   : > { %v4727_v0 = vld [vmem:[%s5748_s3 + $0x40] sm:$0xff] (!%p325_p3)   ;;  %v4731_v4 = vld [vmem:[%s5748_s3 + $0x48] sm:$0xff] (!%p325_p3)   ;;  %v4735_v8 = vld [vmem:[%s5748_s3 + $0x50] sm:$0xff] (!%p325_p3)   ;;  %p391_p4 = scmp.lt.s32.totalorder (!%p325_p3), %s4921_s24, 1  ;;  %vm447_vm0 = vcmask (!%p325_p3), 1040384   ;;  %v4931_v26 = vmov (!%p325_p3), 0  }
   0x7   : > { %328 = sbr.rel (%p325_p3) target bundleno = 717 (0x2cd), region = 48  ;;  %v4728_v1 = vld [vmem:[%s5748_s3] sm:$0xff] (!%p325_p3)   ;;  %4270 = vmatprep.subr.bf16.mxu0 (!%p325_p3), %v4727_v0  ;;  %v4732_v5 = vld [vmem:[%s5748_s3 + $0x8] sm:$0xff] (!%p325_p3)   ;;  %v4736_v9 = vld [vmem:[%s5748_s3 + $0x10] sm:$0xff] (!%p325_p3)   ;;  %v4024_v27 = vcombine.low (!%p325_p3), %v4931_v26, %v4931_v26  ;;  %vm486_vm1 = vcmask (!%p325_p3), 1044484   ;;  %vm555_vm2 = vcmask (!%p325_p3), 1044480  }
   0x8   : > { %v4729_v2 = vld [vmem:[%s5748_s3 + $0xc0] sm:$0xff] (!%p325_p3)   ;;  %4271 = vmatpush3.bf16.msra.mxu0 (!%p325_p3), %v4728_v1  ;;  %v4733_v6 = vld [vmem:[%s5748_s3 + $0xc8] sm:$0xff] (!%p325_p3)   ;;  %v4737_v10 = vld [vmem:[%s5748_s3 + $0xd0] sm:$0xff] (!%p325_p3)   ;;  %vm448_vm3 = vsmask.f32 (!%p325_p3), 256  ;;  %vm4933_vm9 = vmmov (!%p325_p3), 0  }
   0x9   : > { %v4730_v3 = vld [vmem:[%s5748_s3 + $0x80] sm:$0xff] (!%p325_p3)   ;;  %4316 = vmatprep.subr.bf16.mxu1 (!%p325_p3), %v4729_v2  ;;  %4272 = vmatprep.subr.bf16.mxu0 (!%p325_p3), %v4731_v4  ;;  %v4734_v7 = vld [vmem:[%s5748_s3 + $0x88] sm:$0xff] (!%p325_p3)   ;;  %v4738_v11 = vld [vmem:[%s5748_s3 + $0x90] sm:$0xff] (!%p325_p3)   ;;  %v540_v32 = vshrl.u32 (!%p325_p3), %v4024_v27, 16  ;;  %vm487_vm5 = vsmask.f32 (!%p325_p3), 7954 }
   0xa   : > { %4317 = vmatpush3.bf16.msra.mxu1 (!%p325_p3), %v4730_v3  ;;  %v4739_v12 = vld [vmem:[%s5748_s3 + $0x58] sm:$0xff] (!%p325_p3)   ;;  %v4743_v16 = vld [vmem:[%s5748_s3 + $0x60] sm:$0xff] (!%p325_p3)   ;;  %v4747_v20 = vld [vmem:[%s5748_s3 + $0x68] sm:$0xff] (!%p325_p3)   ;;  %vm556_vm7 = vsmask.f32 (!%p325_p3), 4354  ;;  %v543_v44 = vshll.u32 (!%p325_p3), %v4024_v27, 16 }
   0xb   : > { %4318 = vmatprep.subr.bf16.mxu1 (!%p325_p3), %v4733_v6  ;;  %v4740_v13 = vld [vmem:[%s5748_s3 + $0x18] sm:$0xff] (!%p325_p3)   ;;  %v4744_v17 = vld [vmem:[%s5748_s3 + $0x20] sm:$0xff] (!%p325_p3)   ;;  %v4748_v21 = vld [vmem:[%s5748_s3 + $0x28] sm:$0xff] (!%p325_p3)   ;;  %v542_v46 = vrot.slane (!%p325_p3), %v540_v32, 7 }
   0xc   : > { %4273 = vmatpush3.bf16.msra.mxu0 (!%p325_p3), %v4732_v5  ;;  %v4741_v14 = vld [vmem:[%s5748_s3 + $0xd8] sm:$0xff] (!%p325_p3)   ;;  %v4745_v18 = vld [vmem:[%s5748_s3 + $0xe0] sm:$0xff] (!%p325_p3)   ;;  %v4749_v22 = vld [vmem:[%s5748_s3 + $0xe8] sm:$0xff] (!%p325_p3)  }
   0xd   : > { %4274 = vmatprep.subr.bf16.mxu0 (!%p325_p3), %v4735_v8  ;;  %v4742_v15 = vld [vmem:[%s5748_s3 + $0x98] sm:$0xff] (!%p325_p3)   ;;  %v4746_v19 = vld [vmem:[%s5748_s3 + $0xa0] sm:$0xff] (!%p325_p3)   ;;  %v4750_v23 = vld [vmem:[%s5748_s3 + $0xa8] sm:$0xff] (!%p325_p3)   ;;  %v5127_v53 = vor.u32 (!%p325_p3), %v543_v44, %v542_v46 }
   0xe   : > { %4319 = vmatpush3.bf16.msra.mxu1 %v4734_v7  ;;  %v4751_v24 = vld [vmem:[%s5748_s3 + $0x70] sm:$0xff]   ;;  %s5764_s24 = smov (!%p391_p4, %s4921_s24), 1  ;;  %v4755_v30 = vld [vmem:[%s5748_s3 + $0x78] sm:$0xff]   ;;  %v450_v34 = vld [vmem:[#allocation2] sm:$0x1] }
   0xf   : > { %4320 = vmatprep.subr.bf16.mxu1 %v4737_v10  ;;  %v4752_v25 = vld [vmem:[%s5748_s3 + $0x30] sm:$0xff]   ;;  %v4756_v31 = vld [vmem:[%s5748_s3 + $0x38] sm:$0xff]   ;;  %s4265_s23 = sshll.u32 %s5764_s24, 5  ;;  %v453_v35 = vld [vmem:[#allocation2 + $0x8] sm:$0x1]  ;;  %s4269_s29 = sshll.u32 %s5764_s24, 3 }
  0x10   : > { %4275 = vmatpush3.bf16.msra.mxu0 %v4736_v9  ;;  %v4753_v28 = vld [vmem:[%s5748_s3 + $0xf0] sm:$0xff]   ;;  %v4757_v33 = vld [vmem:[%s5748_s3 + $0xf8] sm:$0xff]   ;;  %vm5094_vm4 = vmand %vm447_vm0, %vm448_vm3  ;;  %s5117_s30 = scalar_lea.vmem %s5745_s0, %s4265_s23  ;;  %s5719_s10 = scalar_lea.vmem %s5752_s7, %s4269_s29 }
  0x11   : > { %4276 = vmatprep.subr.bf16.mxu0 %v4739_v12  ;;  %v4754_v29 = vld [vmem:[%s5748_s3 + $0xb0] sm:$0xff]   ;;  %v489_v37 = vld [vmem:[#allocation2] sm:$0x10]  ;;  %v492_v38 = vld [vmem:[#allocation2 + $0x8] sm:$0x10]  ;;  %v451_v39 = vsel %vm5094_vm4, 0, %v450_v34 }
  0x12   : > { %4321 = vmatpush3.bf16.msra.mxu1 %v4738_v11  ;;  %v454_v40 = vsel %vm5094_vm4, 0, %v453_v35  ;;  %vm5103_vm6 = vmand %vm486_vm1, %vm487_vm5  ;;  %452 = vst [vmem:[#allocation2] sm:$0x1] %v451_v39  ;;  %v4758_v45 = vld [vmem:[%s5748_s3 + $0xb8] sm:$0xff]   ;;  %v4760_v47 = vld [vmem:[%s5748_s3 + $0x140] sm:$0xff]  }
  0x13   : > { %4322 = vmatprep.subr.bf16.mxu1 %v4741_v14  ;;  %455 = vst [vmem:[#allocation2 + $0x8] sm:$0x1] %v454_v40  ;;  %v490_v42 = vsel %vm5103_vm6, 0, %v489_v37  ;;  %v493_v43 = vsel %vm5103_vm6, 0, %v492_v38  ;;  %v456_v48 = vld [vmem:[#allocation2 + $0x10] sm:$0x1]  ;;  %vm5131_vm8 = vmand %vm555_vm2, %vm556_vm7 }
  0x14   : > { %4277 = vmatpush3.bf16.msra.mxu0 %v4740_v13  ;;  %491 = vst [vmem:[#allocation2] sm:$0x10] %v490_v42  ;;  %494 = vst [vmem:[#allocation2 + $0x8] sm:$0x10] %v493_v43  ;;  %v495_v49 = vld [vmem:[#allocation2 + $0x10] sm:$0x10] }
  0x15   : > { %4278 = vmatprep.subr.bf16.mxu0 %v4743_v16  ;;  %v457_v50 = vsel %vm5094_vm4, 0, %v456_v48  ;;  %v496_v51 = vsel %vm5103_vm6, 0, %v495_v49  ;;  %v4761_v52 = vld [vmem:[%s5117_s30] ss:$0 sps:$4 sm:$0xff]   ;;  %v459_v57 = vld [vmem:[#allocation2 + $0x18] sm:$0x1] }
  0x16   : > { %4323 = vmatpush3.bf16.msra.mxu1 %v4742_v15  ;;  %458 = vst [vmem:[#allocation2 + $0x10] sm:$0x1] %v457_v50  ;;  %497 = vst [vmem:[#allocation2 + $0x10] sm:$0x10] %v496_v51  ;;  %v630_v55 = vshrl.u32 %v4761_v52, 16  ;;  %v633_v56 = vshll.u32 %v4761_v52, 16 }
  0x17   : > { %4324 = vmatprep.subr.bf16.mxu1 %v4745_v18  ;;  %v460_v59 = vsel %vm5094_vm4, 0, %v459_v57  ;;  %v498_v60 = vld [vmem:[#allocation2 + $0x18] sm:$0x10]  ;;  %v4766_v3 = vld [vmem:[%s5117_s30 + $0x4] ss:$0 sps:$4 sm:$0xff]   ;;  %v4764_v44 = vld [vmem:[%s5748_s3 + $0x148] sm:$0xff]  }
  0x18   : > { %4279 = vmatpush3.bf16.msra.mxu0 %v4744_v17  ;;  %v632_v58 = vrot.slane %v630_v55, 7  ;;  %461 = vst [vmem:[#allocation2 + $0x18] sm:$0x1] %v460_v59  ;;  %v499_v63 = vsel %vm5103_vm6, 0, %v498_v60  ;;  %v462_v4 = vld [vmem:[#allocation2 + $0x20] sm:$0x1] }
  0x19   : > { %4280 = vmatprep.subr.bf16.mxu0 %v4747_v20  ;;  %500 = vst [vmem:[#allocation2 + $0x18] sm:$0x10] %v499_v63  ;;  %v501_v5 = vld [vmem:[#allocation2 + $0x20] sm:$0x10]  ;;  %v463_v6 = vsel %vm5094_vm4, 0, %v462_v4  ;;  %v637_v10 = vshrl.u32 %v4766_v3, 16 }
  0x1a   : > { %4325 = vmatpush3.bf16.msra.mxu1 %v4746_v19  ;;  %v635_v2 = vor.u32 %v633_v56, %v632_v58  ;;  %v502_v7 = vsel %vm5103_vm6, 0, %v501_v5  ;;  %v4768_v8 = vld [vmem:[%s5117_s30 + $0x8] ss:$0 sps:$4 sm:$0xff]   ;;  %v640_v11 = vshll.u32 %v4766_v3, 16  ;;  %464 = vst [vmem:[#allocation2 + $0x20] sm:$0x1] %v463_v6 }
  0x1b   : > { %4326 = vmatprep.subr.bf16.mxu1 %v4749_v22  ;;  %v558_v61 = vld [vmem:[#allocation2] sm:$0x1f]  ;;  %v561_v62 = vld [vmem:[#allocation2 + $0x8] sm:$0x1f]  ;;  %503 = vst [vmem:[#allocation2 + $0x20] sm:$0x10] %v502_v7 }
  0x1c   : > { %4281 = vmatpush3.bf16.msra.mxu0 %v4748_v21  ;;  %v559_v0 = vsel %vm5131_vm8, %v5127_v53, %v558_v61  ;;  %v562_v1 = vsel %vm5131_vm8, %v5127_v53, %v561_v62  ;;  %v644_v13 = vshrl.u32 %v4768_v8, 16  ;;  %v639_v14 = vrot.slane %v637_v10, 7  ;;  %v4771_v15 = vld [vmem:[%s5748_s3 + $0x1c0] sm:$0xff]   ;;  %v4774_v48 = vld [vmem:[%s5748_s3 + $0x1c8] sm:$0xff]   ;;  %v4880_v54 = vld [vmem:[%s5750_s5 + $0x238] sm:$0xff]  }
  0x1d   : > { %4282 = vmatprep.subr.bf16.mxu0 %v4751_v24  ;;  %560 = vst [vmem:[#allocation2] sm:$0x1f] %v559_v0  ;;  %563 = vst [vmem:[#allocation2 + $0x8] sm:$0x1f] %v562_v1  ;;  %v694_v9 = vld [vmem:[#allocation2 + $0x10] sm:$0x1f] }
  0x1e   : > { %4327 = vmatpush3.bf16.msra.mxu1 %v4750_v23  ;;  %v695_v12 = vsel %vm5131_vm8, %v635_v2, %v694_v9  ;;  %v642_v16 = vor.u32 %v640_v11, %v639_v14  ;;  %v646_v17 = vrot.slane %v644_v13, 7  ;;  %v647_v18 = vshll.u32 %v4768_v8, 16  ;;  %v4763_v39 = vld [vmem:[%s5748_s3 + $0x100] sm:$0xff]   ;;  %v465_v49 = vld [vmem:[#allocation2 + $0x28] sm:$0x1]  ;;  %v4770_v2 = vld [vmem:[%s5748_s3 + $0x150] sm:$0xff]  }
  0x1f   : > { %4328 = vmatprep.subr.bf16.mxu1 %v4753_v28  ;;  %696 = vst [vmem:[#allocation2 + $0x10] sm:$0x1f] %v695_v12  ;;  %v4773_v43 = vld [vmem:[%s5748_s3 + $0x180] sm:$0xff]   ;;  %v466_v55 = vsel %vm5094_vm4, 0, %v465_v49  ;;  %v504_v56 = vld [vmem:[#allocation2 + $0x28] sm:$0x10] }
  0x20   : > { %4283 = vmatpush3.bf16.msra.mxu0 %v4752_v25  ;;  %v697_v19 = vld [vmem:[#allocation2 + $0x18] sm:$0x1f]  ;;  %v649_v28 = vor.u32 %v647_v18, %v646_v17  ;;  %467 = vst [vmem:[#allocation2 + $0x28] sm:$0x1] %v466_v55  ;;  %v505_v59 = vsel %vm5103_vm6, 0, %v504_v56  ;;  %v4765_v60 = vld [vmem:[%s5748_s3 + $0x108] sm:$0xff]  }
  0x21   : > { %4284 = vmatprep.subr.bf16.mxu0 %v4755_v30  ;;  %v698_v22 = vsel %vm5131_vm8, %v642_v16, %v697_v19  ;;  %506 = vst [vmem:[#allocation2 + $0x28] sm:$0x10] %v505_v59  ;;  %v4777_v0 = vld [vmem:[%s5748_s3 + $0x188] sm:$0xff]   ;;  %v4772_v12 = vld [vmem:[%s5748_s3 + $0x110] sm:$0xff]   ;;  %v4788_v59 = vld [vmem:[%s5748_s3 + $0x198] sm:$0xff]  }
  0x22   : > { %4329 = vmatpush3.bf16.msra.mxu1 %v4754_v29  ;;  %699 = vst [vmem:[#allocation2 + $0x18] sm:$0x1f] %v698_v22  ;;  %v700_v42 = vld [vmem:[#allocation2 + $0x20] sm:$0x1f]  ;;  %v4775_v3 = vld [vmem:[%s5117_s30 + $0xc] ss:$0 sps:$4 sm:$0xff]  }
  0x23   : > { %4330 = vmatprep.subr.bf16.mxu1 %v4757_v33  ;;  %v701_v46 = vsel %vm5131_vm8, %v649_v28, %v700_v42  ;;  %v651_v7 = vshrl.u32 %v4775_v3, 16  ;;  %v654_v8 = vshll.u32 %v4775_v3, 16  ;;  %v468_v13 = vld [vmem:[#allocation2 + $0x30] sm:$0x1]  ;;  %v507_v19 = vld [vmem:[#allocation2 + $0x30] sm:$0x10] }
  0x24   : > { %4285 = vmatpush3.bf16.msra.mxu0 %v4756_v31  ;;  %v728_v20 = vld [vmem:[#allocation2] sm:$0x1f]  ;;  %v729_v21 = vld [vmem:[#allocation2 + $0x8] sm:$0x1f]  ;;  %702 = vst [vmem:[#allocation2 + $0x20] sm:$0x1f] %v701_v46 }
  0x25   : > { %4362 = vmatprep.subr.bf16.mxu0 %v4760_v47  ;;  %v810_v23 = vshrl.u32 %v728_v20, 16  ;;  %v812_v24 = vshll.u32 %v728_v20, 16  ;;  %v817_v25 = vshrl.u32 %v729_v21, 16  ;;  %v819_v26 = vshll.u32 %v729_v21, 16  ;;  %v738_v27 = vld [vmem:[#allocation2] sm:$0x1e] }
  0x26   : > { %4331 = vmatpush3.bf16.msra.mxu1 %v4758_v45  ;;  %v4762_v31 = vld [vmem:[#allocation2 + $0x8] ss:$8 sps:$4 sm:$0xff]   ;;  %v889_v34 = vrot.slane %v738_v27, 1  ;;  %v469_v16 = vsel %vm5094_vm4, 0, %v468_v13  ;;  %v4776_v22 = vld [vmem:[%s5748_s3 + $0x158] sm:$0xff]  }
  0x27   : > { %4408 = vmatprep.subr.bf16.mxu1 %v4771_v15  ;;  %v814_v29 = vrot.slane %v812_v24, 1  ;;  %v821_v30 = vrot.slane %v819_v26, 1  ;;  %v4759_v32 = vld [vmem:[#allocation2] ss:$8 sps:$4 sm:$0xff]   ;;  %v730_v35 = vld [vmem:[#allocation2 + $0x10] sm:$0x1f]  ;;  %1977 = vmatprep.mubr.bf16.mxu1 %v4762_v31 }
  0x28   : > { %v739_v33 = vld [vmem:[#allocation2 + $0x8] sm:$0x1e]  ;;  %v826_v45 = vshll.u32 %v730_v35, 16  ;;  %v740_v47 = vld [vmem:[#allocation2 + $0x10] sm:$0x1e]  ;;  %v824_v52 = vshrl.u32 %v730_v35, 16 }
  0x29   : > { %v815_v37 = vor.u32 %v814_v29, %v810_v23  ;;  %v822_v38 = vor.u32 %v821_v30, %v817_v25  ;;  %v890_v40 = vrot.slane %v739_v33, 1  ;;  %v731_v57 = vld [vmem:[#allocation2 + $0x18] sm:$0x1f]  ;;  %v891_v63 = vrot.slane %v740_v47, 1  ;;  %470 = vst [vmem:[#allocation2 + $0x30] sm:$0x1] %v469_v16 }
  0x2a   : > { %v828_v58 = vrot.slane %v826_v45, 1  ;;  %v831_v61 = vshrl.u32 %v731_v57, 16  ;;  %v833_v62 = vshll.u32 %v731_v57, 16  ;;  %v741_v1 = vld [vmem:[#allocation2 + $0x18] sm:$0x1e]  ;;  %v653_v15 = vrot.slane %v651_v7, 7 }
  0x2b   : > { %v4038_v50 = vcombine.low %v815_v37, %v822_v38  ;;  %v4039_v51 = vcombine.low %v889_v34, %v890_v40  ;;  %v892_v6 = vrot.slane %v741_v1, 1  ;;  %v4767_v10 = vld [vmem:[#allocation2 + $0x10] ss:$8 sps:$4 sm:$0xff]   ;;  %v732_v18 = vld [vmem:[#allocation2 + $0x20] sm:$0x1f]  ;;  %v508_v23 = vsel %vm5103_vm6, 0, %v507_v19 }
  0x2c   : > { %v829_v4 = vor.u32 %v828_v58, %v824_v52  ;;  %v835_v5 = vrot.slane %v833_v62, 1  ;;  %v4769_v14 = vld [vmem:[#allocation2 + $0x18] ss:$8 sps:$4 sm:$0xff]   ;;  %v656_v20 = vor.u32 %v654_v8, %v653_v15  ;;  %v703_v21 = vld [vmem:[#allocation2 + $0x28] sm:$0x1f]  ;;  %v4782_v24 = vld [vmem:[%s5748_s3 + $0x1d0] sm:$0xff]  }
  0x2d   : > { %1904 = vmatprep.mubr.bf16.mxu0 %v4038_v50  ;;  %1978 = vmatmul.mubr.bf16.vlgmr.msra.gmra.mrb[0].mxu1 %v4039_v51  ;;  %v4048_v11 = vcombine.low %v891_v63, %v892_v6  ;;  %509 = vst [vmem:[#allocation2 + $0x30] sm:$0x10] %v508_v23  ;;  %v4780_v25 = vld [vmem:[%s5117_s30 + $0x10] ss:$0 sps:$4 sm:$0xff]   ;;  %v840_v27 = vshll.u32 %v732_v18, 16  ;;  %v4779_v28 = vld [vmem:[%s5748_s3 + $0x118] sm:$0xff]  }
  0x2e   : > { %1905 = vmatmul.mubr.bf16.vlgmr.msra.gmra.mrb[0].mxu0 %v4759_v32  ;;  %4409 = vmatpush3.bf16.msra.mxu1 %v4773_v43  ;;  %v836_v9 = vor.u32 %v835_v5, %v831_v61  ;;  %v704_v26 = vsel %vm5131_vm8, %v656_v20, %v703_v21  ;;  %v658_v29 = vshrl.u32 %v4780_v25, 16  ;;  %v661_v30 = vshll.u32 %v4780_v25, 16  ;;  %v4783_v31 = vld [vmem:[%s5748_s3 + $0x190] sm:$0xff]   ;;  %v742_v33 = vld [vmem:[#allocation2 + $0x20] sm:$0x1e]  ;;  %v4786_v40 = vld [vmem:[%s5748_s3 + $0x1d8] sm:$0xff]  }
  0x2f   : > { %4363 = vmatpush3.bf16.msra.mxu0 %v4763_v39  ;;  %4410 = vmatprep.subr.bf16.mxu1 %v4774_v48  ;;  %705 = vst [vmem:[#allocation2 + $0x28] sm:$0x1f] %v704_v26  ;;  %v4784_v34 = vld [vmem:[%s5748_s3 + $0x160] sm:$0xff]   ;;  %v838_v35 = vshrl.u32 %v732_v18, 16  ;;  %v842_v38 = vrot.slane %v840_v27, 1  ;;  %v893_v50 = vrot.slane %v742_v33, 1 }
  0x30   : > { %4364 = vmatprep.subr.bf16.mxu0 %v4764_v44  ;;  %v4047_v17 = vcombine.low %v829_v4, %v836_v9  ;;  %1985 = vmatprep.mubr.bf16.mxu1 %v4769_v14  ;;  %v660_v32 = vrot.slane %v658_v29, 7  ;;  %v4785_v37 = vld [vmem:[%s5748_s3 + $0x120] sm:$0xff]   ;;  %v471_v42 = vld [vmem:[#allocation2 + $0x38] sm:$0x1]  ;;  %v510_v43 = vld [vmem:[#allocation2 + $0x38] sm:$0x10] }
  0x31   : > { %v472_v45 = vsel %vm5094_vm4, 0, %v471_v42  ;;  %v511_v46 = vsel %vm5103_vm6, 0, %v510_v43  ;;  %v4787_v48 = vld [vmem:[%s5117_s30 + $0x14] ss:$0 sps:$4 sm:$0xff]   ;;  %v843_v61 = vor.u32 %v842_v38, %v838_v35  ;;  %v4790_v4 = vld [vmem:[%s5117_s30 + $0x18] ss:$0 sps:$4 sm:$0xff]  }
  0x32   : > { %4411 = vmatpush3.bf16.msra.mxu1 %v4777_v0  ;;  %1912 = vmatprep.mubr.bf16.mxu0 %v4047_v17  ;;  %v663_v39 = vor.u32 %v661_v30, %v660_v32  ;;  %473 = vst [vmem:[#allocation2 + $0x38] sm:$0x1] %v472_v45  ;;  %512 = vst [vmem:[#allocation2 + $0x38] sm:$0x10] %v511_v46  ;;  %v665_v57 = vshrl.u32 %v4787_v48, 16  ;;  %v668_v58 = vshll.u32 %v4787_v48, 16 }
  0x33   : > { %4365 = vmatpush3.bf16.msra.mxu0 %v4765_v60  ;;  %4412 = vmatprep.subr.bf16.mxu1 %v4782_v24  ;;  %v474_v60 = vld [vmem:[#allocation2 + $0x40] sm:$0x1]  ;;  %v513_v0 = vld [vmem:[#allocation2 + $0x40] sm:$0x10]  ;;  %v4792_v6 = vld [vmem:[%s5748_s3 + $0x168] sm:$0xff]  }
  0x34   : > { %4366 = vmatprep.subr.bf16.mxu0 %v4770_v2  ;;  %v706_v44 = vld [vmem:[#allocation2 + $0x30] sm:$0x1f]  ;;  %v475_v63 = vsel %vm5094_vm4, 0, %v474_v60  ;;  %v667_v2 = vrot.slane %v665_v57, 7  ;;  %v514_v3 = vsel %vm5103_vm6, 0, %v513_v0  ;;  %v4793_v17 = vld [vmem:[%s5748_s3 + $0x128] sm:$0xff]  }
  0x35   : > { %1986 = vmatmul.mubr.bf16.gmra.mrb[4].mxu1 %v4048_v11  ;;  %v707_v47 = vsel %vm5131_vm8, %v663_v39, %v706_v44  ;;  %476 = vst [vmem:[#allocation2 + $0x40] sm:$0x1] %v475_v63  ;;  %515 = vst [vmem:[#allocation2 + $0x40] sm:$0x10] %v514_v3  ;;  %v675_v11 = vshll.u32 %v4790_v4, 16  ;;  %v4794_v20 = vld [vmem:[%s5748_s3 + $0x1e0] sm:$0xff]  }
  0x36   : > { %1913 = vmatmul.mubr.bf16.gmra.mrb[4].mxu0 %v4767_v10  ;;  %4413 = vmatpush3.bf16.msra.mxu1 %v4783_v31  ;;  %v733_v49 = vld [vmem:[#allocation2 + $0x28] sm:$0x1f]  ;;  %708 = vst [vmem:[#allocation2 + $0x30] sm:$0x1f] %v707_v47  ;;  %v670_v8 = vor.u32 %v668_v58, %v667_v2  ;;  %v672_v10 = vshrl.u32 %v4790_v4, 16  ;;  %v4795_v21 = vld [vmem:[%s5748_s3 + $0x1a0] sm:$0xff]  }
  0x37   : > { %4367 = vmatpush3.bf16.msra.mxu0 %v4772_v12  ;;  %4414 = vmatprep.subr.bf16.mxu1 %v4786_v40  ;;  %v845_v51 = vshrl.u32 %v733_v49, 16  ;;  %v847_v52 = vshll.u32 %v733_v49, 16  ;;  %v743_v55 = vld [vmem:[#allocation2 + $0x28] sm:$0x1e]  ;;  %v4796_v25 = vld [vmem:[%s5748_s3 + $0x170] sm:$0xff]   ;;  %v4804_v49 = vld [vmem:[%s5748_s3 + $0x178] sm:$0xff]  }
  0x38   : > { %4368 = vmatprep.subr.bf16.mxu0 %v4776_v22  ;;  %v894_v56 = vrot.slane %v743_v55, 1  ;;  %v4778_v1 = vld [vmem:[#allocation2 + $0x20] ss:$8 sps:$4 sm:$0xff]   ;;  %v674_v16 = vrot.slane %v672_v10, 7  ;;  %v516_v31 = vld [vmem:[#allocation2 + $0x48] sm:$0x10] }
  0x39   : > { %v849_v62 = vrot.slane %v847_v52, 1  ;;  %v709_v9 = vld [vmem:[#allocation2 + $0x38] sm:$0x1f]  ;;  %v477_v29 = vld [vmem:[#allocation2 + $0x48] sm:$0x1]  ;;  %v4799_v32 = vld [vmem:[%s5748_s3 + $0x130] sm:$0xff]  }
  0x3a   : > { %4415 = vmatpush3.bf16.msra.mxu1 %v4788_v59  ;;  %v4057_v7 = vcombine.low %v893_v50, %v894_v56  ;;  %v710_v15 = vsel %vm5131_vm8, %v670_v8, %v709_v9  ;;  %v677_v19 = vor.u32 %v675_v11, %v674_v16  ;;  %v478_v30 = vsel %vm5094_vm4, 0, %v477_v29  ;;  %v4800_v35 = vld [vmem:[%s5748_s3 + $0x1a8] sm:$0xff]   ;;  %v4803_v46 = vld [vmem:[%s5748_s3 + $0x1f0] sm:$0xff]   ;;  %v4806_v63 = vld [vmem:[%s5748_s3 + $0x138] sm:$0xff]  }
  0x3b   : > { %4369 = vmatpush3.bf16.msra.mxu0 %v4779_v28  ;;  %v850_v5 = vor.u32 %v849_v62, %v845_v51  ;;  %711 = vst [vmem:[#allocation2 + $0x38] sm:$0x1f] %v710_v15  ;;  %4416 = vmatprep.subr.bf16.mxu1 %v4794_v20  ;;  %v4797_v28 = vld [vmem:[%s5748_s3 + $0x1e8] sm:$0xff]   ;;  %479 = vst [vmem:[#allocation2 + $0x48] sm:$0x1] %v478_v30  ;;  %v517_v33 = vsel %vm5103_vm6, 0, %v516_v31 }
  0x3c   : > { %4370 = vmatprep.subr.bf16.mxu0 %v4784_v34  ;;  %v712_v24 = vld [vmem:[#allocation2 + $0x40] sm:$0x1f]  ;;  %v4798_v34 = vld [vmem:[%s5117_s30 + $0x1c] ss:$0 sps:$4 sm:$0xff]   ;;  %518 = vst [vmem:[#allocation2 + $0x48] sm:$0x10] %v517_v33 }
  0x3d   : > { %v4056_v12 = vcombine.low %v843_v61, %v850_v5  ;;  %v4781_v13 = vld [vmem:[#allocation2 + $0x28] ss:$8 sps:$4 sm:$0xff]   ;;  %v713_v27 = vsel %vm5131_vm8, %v677_v19, %v712_v24  ;;  %v679_v44 = vshrl.u32 %v4798_v34, 16  ;;  %v682_v45 = vshll.u32 %v4798_v34, 16  ;;  %v519_v55 = vld [vmem:[#allocation2 + $0x50] sm:$0x10] }
  0x3e   : > { %v734_v14 = vld [vmem:[#allocation2 + $0x30] sm:$0x1f]  ;;  %1993 = vmatprep.mubr.bf16.mxu1 %v4781_v13  ;;  %4417 = vmatpush3.bf16.msra.mxu1 %v4795_v21  ;;  %714 = vst [vmem:[#allocation2 + $0x40] sm:$0x1f] %v713_v27  ;;  %v520_v2 = vsel %vm5103_vm6, 0, %v519_v55  ;;  %v4807_v3 = vld [vmem:[%s5748_s3 + $0x1f8] sm:$0xff]  }
  0x3f   : > { %4371 = vmatpush3.bf16.msra.mxu0 %v4785_v37  ;;  %1920 = vmatprep.mubr.bf16.mxu0 %v4056_v12  ;;  %v854_v18 = vshll.u32 %v734_v14, 16  ;;  %v744_v22 = vld [vmem:[#allocation2 + $0x30] sm:$0x1e]  ;;  %v852_v23 = vshrl.u32 %v734_v14, 16  ;;  %v681_v51 = vrot.slane %v679_v44, 7  ;;  %v4808_v10 = vld [vmem:[%s5748_s3 + $0x1b8] sm:$0xff]  }
  0x40   : > { %4372 = vmatprep.subr.bf16.mxu0 %v4792_v6  ;;  %1921 = vmatmul.mubr.bf16.gmra.mrb[8].mxu0 %v4778_v1  ;;  %v895_v38 = vrot.slane %v744_v22, 1  ;;  %v480_v52 = vld [vmem:[#allocation2 + $0x50] sm:$0x1]  ;;  %521 = vst [vmem:[#allocation2 + $0x50] sm:$0x10] %v520_v2 }
  0x41   : > { %1994 = vmatmul.mubr.bf16.gmra.mrb[8].mxu1 %v4057_v7  ;;  %v856_v26 = vrot.slane %v854_v18, 1  ;;  %4418 = vmatprep.subr.bf16.mxu1 %v4797_v28  ;;  %v4805_v56 = vld [vmem:[%s5748_s3 + $0x1b0] sm:$0xff]   ;;  %v684_v61 = vor.u32 %v682_v45, %v681_v51  ;;  %v481_v62 = vsel %vm5094_vm4, 0, %v480_v52  ;;  %v4932_v7 = vmov 0.0   ;;  %v769_v8 = vld [vmem:[#allocation2 + $0x8] sm:$0x1e] }
  0x42   : > { %v735_v37 = vld [vmem:[#allocation2 + $0x38] sm:$0x1f]  ;;  %4419 = vmatpush3.bf16.msra.mxu1 %v4800_v35  ;;  %482 = vst [vmem:[#allocation2 + $0x50] sm:$0x1] %v481_v62  ;;  %v770_v9 = vld [vmem:[#allocation2 + $0x10] sm:$0x1e] }
  0x43   : > { %4373 = vmatpush3.bf16.msra.mxu0 %v4793_v17  ;;  %v859_v39 = vshrl.u32 %v735_v37, 16  ;;  %v861_v40 = vshll.u32 %v735_v37, 16  ;;  %v745_v42 = vld [vmem:[#allocation2 + $0x38] sm:$0x1e]  ;;  %v857_v47 = vor.u32 %v856_v26, %v852_v23  ;;  %4420 = vmatprep.subr.bf16.mxu1 %v4803_v46  ;;  %v715_v1 = vld [vmem:[#allocation2 + $0x48] sm:$0x1f] }
  0x44   : > { %4374 = vmatprep.subr.bf16.mxu0 %v4796_v25  ;;  %v896_v43 = vrot.slane %v745_v42, 1  ;;  %v4789_v60 = vld [vmem:[#allocation2 + $0x30] ss:$8 sps:$4 sm:$0xff]   ;;  %v716_v4 = vsel %vm5131_vm8, %v684_v61, %v715_v1  ;;  %v759_v13 = vld [vmem:[#allocation2 + $0x8] sm:$0x1f]  ;;  %v979_v15 = vrot.slane %v769_v8, 1 }
  0x45   : > { %v863_v48 = vrot.slane %v861_v40, 1  ;;  %v4791_v58 = vld [vmem:[#allocation2 + $0x38] ss:$8 sps:$4 sm:$0xff]   ;;  %717 = vst [vmem:[#allocation2 + $0x48] sm:$0x1f] %v716_v4  ;;  %v980_v16 = vrot.slane %v770_v9, 1 }
  0x46   : > { %v4066_v50 = vcombine.low %v895_v38, %v896_v43  ;;  %v736_v59 = vld [vmem:[#allocation2 + $0x40] sm:$0x1f]  ;;  %4421 = vmatpush3.bf16.msra.mxu1 %v4805_v56  ;;  %2001 = vmatprep.mubr.bf16.mxu1 %v4791_v58  ;;  %v760_v17 = vld [vmem:[#allocation2 + $0x10] sm:$0x1f]  ;;  %v902_v19 = vshll.u32 %v759_v13, 16  ;;  %v900_v30 = vshrl.u32 %v759_v13, 16 }
  0x47   : > { %4375 = vmatpush3.bf16.msra.mxu0 %v4799_v32  ;;  %v864_v57 = vor.u32 %v863_v48, %v859_v39  ;;  %v868_v5 = vshll.u32 %v736_v59, 16  ;;  %v746_v6 = vld [vmem:[#allocation2 + $0x40] sm:$0x1e]  ;;  %4422 = vmatprep.subr.bf16.mxu1 %v4807_v3  ;;  %v866_v11 = vshrl.u32 %v736_v59, 16  ;;  %v909_v20 = vshll.u32 %v760_v17, 16 }
  0x48   : > { %4376 = vmatprep.subr.bf16.mxu0 %v4804_v49  ;;  %v897_v14 = vrot.slane %v746_v6, 1  ;;  %v789_v21 = vld [vmem:[#allocation2 + $0x10] sm:$0x1f]  ;;  %v790_v24 = vld [vmem:[#allocation2 + $0x18] sm:$0x1f]  ;;  %v907_v31 = vshrl.u32 %v760_v17, 16  ;;  %v4042_v45 = vcombine.low %v979_v15, %v980_v16 }
  0x49   : > { %v4065_v0 = vcombine.low %v857_v47, %v864_v57  ;;  %2002 = vmatmul.mubr.bf16.gmra.mrb[12].mxu1 %v4066_v50  ;;  %v870_v12 = vrot.slane %v868_v5, 1  ;;  %v591_v18 = vld [vmem:[#allocation2 + $0x50] sm:$0x1f]  ;;  %v990_v32 = vshrl.u32 %v789_v21, 16  ;;  %v992_v34 = vshll.u32 %v789_v21, 16 }
  0x4a   : > { %4423 = vmatpush3.bf16.msra.mxu1 %v4808_v10  ;;  %v592_v23 = vsel %vm5131_vm8, %v5127_v53, %v591_v18  ;;  %v997_v35 = vshrl.u32 %v790_v24, 16  ;;  %v999_v37 = vshll.u32 %v790_v24, 16  ;;  %v904_v38 = vrot.slane %v902_v19, 1  ;;  %v761_v50 = vld [vmem:[#allocation2 + $0x18] sm:$0x1f] }
  0x4b   : > { %4377 = vmatpush3.bf16.msra.mxu0 %v4806_v63  ;;  %1928 = vmatprep.mubr.bf16.mxu0 %v4065_v0  ;;  %v871_v25 = vor.u32 %v870_v12, %v866_v11  ;;  %593 = vst [vmem:[#allocation2 + $0x50] sm:$0x1f] %v592_v23  ;;  %v911_v39 = vrot.slane %v909_v20, 1  ;;  %v994_v42 = vrot.slane %v992_v34, 1  ;;  %v762_v51 = vld [vmem:[#allocation2 + $0x20] sm:$0x1f] }
  0x4c   : > { %1929 = vmatmul.mubr.bf16.gmra.mrb[12].mxu0 %v4789_v60  ;;  %4639 = vmatprep.subr.bf16.mxu0 %v4932_v7  ;;  %v737_v22 = vld [vmem:[#allocation2 + $0x48] sm:$0x1f]  ;;  %v1001_v43 = vrot.slane %v999_v37, 1  ;;  %v905_v55 = vor.u32 %v904_v38, %v900_v30  ;;  %v771_v56 = vld [vmem:[#allocation2 + $0x18] sm:$0x1e]  ;;  %v916_v60 = vshll.u32 %v761_v50, 16 }
  0x4d   : > { %v873_v26 = vshrl.u32 %v737_v22, 16  ;;  %v875_v27 = vshll.u32 %v737_v22, 16  ;;  %v747_v28 = vld [vmem:[#allocation2 + $0x48] sm:$0x1e]  ;;  %v995_v48 = vor.u32 %v994_v42, %v990_v32  ;;  %v912_v57 = vor.u32 %v911_v39, %v907_v31  ;;  %v772_v59 = vld [vmem:[#allocation2 + $0x20] sm:$0x1e] }
  0x4e   : > { %v898_v29 = vrot.slane %v747_v28, 1  ;;  %v4801_v44 = vld [vmem:[#allocation2 + $0x40] ss:$8 sps:$4 sm:$0xff]   ;;  %v1002_v49 = vor.u32 %v1001_v43, %v997_v35  ;;  %v923_v61 = vshll.u32 %v762_v51, 16  ;;  %v981_v4 = vrot.slane %v771_v56, 1  ;;  %v4813_v43 = vld [vmem:[%s5748_s3 + $0x210] sm:$0xff]  }
  0x4f   : > { %v877_v33 = vrot.slane %v875_v27, 1  ;;  %v791_v62 = vld [vmem:[#allocation2 + $0x20] sm:$0x1f]  ;;  %v792_v63 = vld [vmem:[#allocation2 + $0x28] sm:$0x1f]  ;;  %v982_v5 = vrot.slane %v772_v59, 1  ;;  %v4041_v8 = vcombine.low %v905_v55, %v912_v57 }
  0x50   : > { %v4075_v47 = vcombine.low %v897_v14, %v898_v29  ;;  %v4044_v58 = vcombine.low %v995_v48, %v1002_v49  ;;  %v1004_v0 = vshrl.u32 %v791_v62, 16  ;;  %v1006_v1 = vshll.u32 %v791_v62, 16  ;;  %v4810_v9 = vld [vmem:[#allocation2 + $0x10] ss:$8 sps:$4 sm:$0xff]   ;;  %v4809_v12 = vld [vmem:[%s5748_s3 + $0x200] sm:$0xff]   ;;  %v4811_v32 = vld [vmem:[%s5748_s3 + $0x208] sm:$0xff]  }
  0x51   : > { %v878_v40 = vor.u32 %v877_v33, %v873_v26  ;;  %v1011_v2 = vshrl.u32 %v792_v63, 16  ;;  %v1013_v3 = vshll.u32 %v792_v63, 16  ;;  %v914_v10 = vshrl.u32 %v761_v50, 16  ;;  %v763_v17 = vld [vmem:[#allocation2 + $0x28] sm:$0x1f] }
  0x52   : > { %v4802_v52 = vld [vmem:[#allocation2 + $0x48] ss:$8 sps:$4 sm:$0xff]   ;;  %v1008_v6 = vrot.slane %v1006_v1, 1  ;;  %v918_v13 = vrot.slane %v916_v60, 1  ;;  %v921_v14 = vshrl.u32 %v762_v51, 16  ;;  %v925_v15 = vrot.slane %v923_v61, 1 }
  0x53   : > { %v4074_v46 = vcombine.low %v871_v25, %v878_v40  ;;  %2009 = vmatprep.mubr.bf16.mxu1 %v4802_v52  ;;  %v1015_v11 = vrot.slane %v1013_v3, 1  ;;  %v773_v19 = vld [vmem:[#allocation2 + $0x28] sm:$0x1e]  ;;  %v764_v20 = vld [vmem:[#allocation2 + $0x30] sm:$0x1f]  ;;  %v4051_v21 = vcombine.low %v981_v4, %v982_v5  ;;  %v930_v23 = vshll.u32 %v763_v17, 16 }
  0x54   : > { %2010 = vmatmul.mubr.bf16.gmra.mrb[16].mxu1 %v4075_v47  ;;  %v1009_v16 = vor.u32 %v1008_v6, %v1004_v0  ;;  %v774_v22 = vld [vmem:[#allocation2 + $0x30] sm:$0x1e]  ;;  %v937_v24 = vshll.u32 %v764_v20, 16  ;;  %v794_v27 = vld [vmem:[#allocation2 + $0x38] sm:$0x1f]  ;;  %v919_v28 = vor.u32 %v918_v13, %v914_v10  ;;  %v926_v29 = vor.u32 %v925_v15, %v921_v14 }
  0x55   : > { %1936 = vmatprep.mubr.bf16.mxu0 %v4074_v46  ;;  %2123 = vmatprep.mubr.bf16.mxu1 %v4044_v58  ;;  %v1016_v18 = vor.u32 %v1015_v11, %v1011_v2  ;;  %v793_v26 = vld [vmem:[#allocation2 + $0x30] sm:$0x1f]  ;;  %v983_v33 = vrot.slane %v773_v19, 1  ;;  %v1025_v34 = vshrl.u32 %v794_v27, 16  ;;  %v1027_v35 = vshll.u32 %v794_v27, 16  ;;  %v4814_v1 = vld [vmem:[%s5748_s3 + $0x218] sm:$0xff]  }
  0x56   : > { %1937 = vmatmul.mubr.bf16.gmra.mrb[16].mxu0 %v4801_v44  ;;  %v1018_v30 = vshrl.u32 %v793_v26, 16  ;;  %v1020_v31 = vshll.u32 %v793_v26, 16  ;;  %v984_v37 = vrot.slane %v774_v22, 1  ;;  %v928_v38 = vshrl.u32 %v763_v17, 16  ;;  %v4812_v42 = vld [vmem:[#allocation2 + $0x20] ss:$8 sps:$4 sm:$0xff]  }
  0x57   : > { %2050 = vmatprep.mubr.bf16.mxu0 %v4042_v45  ;;  %v4053_v25 = vcombine.low %v1009_v16, %v1016_v18  ;;  %v932_v39 = vrot.slane %v930_v23, 1  ;;  %v935_v44 = vshrl.u32 %v764_v20, 16  ;;  %v939_v45 = vrot.slane %v937_v24, 1  ;;  %v765_v47 = vld [vmem:[#allocation2 + $0x38] sm:$0x1f]  ;;  %v4816_v16 = vld [vmem:[%s5748_s3 + $0x220] sm:$0xff]  }
  0x58   : > { %v1022_v40 = vrot.slane %v1020_v31, 1  ;;  %v1029_v46 = vrot.slane %v1027_v35, 1  ;;  %v4050_v48 = vcombine.low %v919_v28, %v926_v29  ;;  %v775_v50 = vld [vmem:[#allocation2 + $0x38] sm:$0x1e]  ;;  %v766_v51 = vld [vmem:[#allocation2 + $0x40] sm:$0x1f]  ;;  %v4060_v60 = vcombine.low %v983_v33, %v984_v37 }
  0x59   : > { %v795_v52 = vld [vmem:[#allocation2 + $0x40] sm:$0x1f]  ;;  %v944_v57 = vshll.u32 %v765_v47, 16  ;;  %v951_v58 = vshll.u32 %v766_v51, 16  ;;  %v796_v59 = vld [vmem:[#allocation2 + $0x48] sm:$0x1f]  ;;  %v933_v61 = vor.u32 %v932_v39, %v928_v38  ;;  %v940_v0 = vor.u32 %v939_v45, %v935_v44 }
  0x5a   : > { %v1023_v49 = vor.u32 %v1022_v40, %v1018_v30  ;;  %v1030_v55 = vor.u32 %v1029_v46, %v1025_v34  ;;  %v776_v56 = vld [vmem:[#allocation2 + $0x40] sm:$0x1e]  ;;  %v1032_v62 = vshrl.u32 %v795_v52, 16  ;;  %v1034_v63 = vshll.u32 %v795_v52, 16  ;;  %v4815_v15 = vld [vmem:[#allocation2 + $0x30] ss:$8 sps:$4 sm:$0xff]  }
  0x5b   : > { %v1039_v3 = vshrl.u32 %v796_v59, 16  ;;  %v1041_v4 = vshll.u32 %v796_v59, 16  ;;  %v985_v5 = vrot.slane %v775_v50, 1  ;;  %v986_v6 = vrot.slane %v776_v56, 1  ;;  %v777_v18 = vld [vmem:[#allocation2 + $0x48] sm:$0x1e] }
  0x5c   : > { %2124 = vmatmul.mubr.bf16.vlgmr.msra.gmra.mrb[20].mxu1 %v4810_v9  ;;  %v4062_v2 = vcombine.low %v1023_v49, %v1030_v55  ;;  %v1036_v9 = vrot.slane %v1034_v63, 1  ;;  %v946_v10 = vrot.slane %v944_v57, 1  ;;  %v949_v11 = vshrl.u32 %v766_v51, 16  ;;  %v778_v20 = vld [vmem:[#allocation2 + $0x50] sm:$0x1e]  ;;  %v4818_v38 = vld [vmem:[%s5748_s3 + $0x228] sm:$0xff]  }
  0x5d   : > { %2131 = vmatprep.mubr.bf16.mxu1 %v4053_v25  ;;  %v1043_v13 = vrot.slane %v1041_v4, 1  ;;  %v4059_v19 = vcombine.low %v933_v61, %v940_v0  ;;  %v483_v22 = vld [vmem:[#allocation2 + $0x58] sm:$0x1]  ;;  %v4069_v23 = vcombine.low %v985_v5, %v986_v6  ;;  %v768_v26 = vld [vmem:[#allocation2 + $0x50] sm:$0x1f]  ;;  %v987_v30 = vrot.slane %v777_v18, 1 }
  0x5e   : > { %2051 = vmatmul.mubr.bf16.vlgmr.msra.gmra.mrb[20].mxu0 %v4041_v8  ;;  %v942_v8 = vshrl.u32 %v765_v47, 16  ;;  %v1037_v14 = vor.u32 %v1036_v9, %v1032_v62  ;;  %v522_v27 = vld [vmem:[#allocation2 + $0x58] sm:$0x10]  ;;  %v5311_v28 = vld [vmem:[#allocation2 + $0x50] sm:$0x1f]  ;;  %v484_v31 = vsel %vm5094_vm4, 0, %v483_v22 }
  0x5f   : > { %4640 = vmatpush3.bf16.msra.mxu0 %v4809_v12  ;;  %2058 = vmatprep.mubr.bf16.mxu0 %v4051_v21  ;;  %v953_v12 = vrot.slane %v951_v58, 1  ;;  %v1044_v17 = vor.u32 %v1043_v13, %v1039_v3  ;;  %v767_v21 = vld [vmem:[#allocation2 + $0x48] sm:$0x1f]  ;;  %v988_v33 = vrot.slane %v778_v20, 1  ;;  %485 = vst [vmem:[#allocation2 + $0x58] sm:$0x1] %v484_v31 }
  0x60   : > { %4641 = vmatprep.subr.bf16.mxu0 %v4932_v7  ;;  %v947_v24 = vor.u32 %v946_v10, %v942_v8  ;;  %v958_v34 = vshll.u32 %v767_v21, 16  ;;  %v965_v35 = vshll.u32 %v768_v26, 16  ;;  %v1048_v37 = vshll.u32 %v5311_v28, 16  ;;  %v799_v39 = vld [vmem:[#allocation2 + $0x10] sm:$0x1e]  ;;  %v4821_v0 = vld [vmem:[%s5748_s3 + $0x238] sm:$0xff]  }
  0x61   : > { %v954_v25 = vor.u32 %v953_v12, %v949_v11  ;;  %v4071_v29 = vcombine.low %v1037_v14, %v1044_v17  ;;  %v800_v36 = vld [vmem:[#allocation2 + $0x18] sm:$0x1e]  ;;  %v801_v41 = vld [vmem:[#allocation2 + $0x20] sm:$0x1e]  ;;  %v4078_v44 = vcombine.low %v987_v30, %v988_v33  ;;  %v956_v45 = vshrl.u32 %v767_v21, 16  ;;  %v4819_v49 = vld [vmem:[%s5748_s3 + $0x230] sm:$0xff]  }
  0x62   : > { %v960_v46 = vrot.slane %v958_v34, 1  ;;  %v963_v47 = vshrl.u32 %v768_v26, 16  ;;  %v967_v50 = vrot.slane %v965_v35, 1  ;;  %v1046_v51 = vshrl.u32 %v5311_v28, 16  ;;  %v806_v4 = vld [vmem:[#allocation2 + $0x48] sm:$0x1e] }
  0x63   : > { %4642 = vmatpush3.bf16.msra.mxu0 %v4811_v32  ;;  %v523_v32 = vsel %vm5103_vm6, 0, %v522_v27  ;;  %v4068_v40 = vcombine.low %v947_v24, %v954_v25  ;;  %v1050_v52 = vrot.slane %v1048_v37, 1  ;;  %v1069_v55 = vrot.slane %v799_v39, 1  ;;  %v807_v5 = vld [vmem:[#allocation2 + $0x50] sm:$0x1e]  ;;  %v4826_v25 = vld [vmem:[%s5750_s5 + $0x140] sm:$0xff]  }
  0x64   : > { %4643 = vmatprep.subr.bf16.mxu0 %v4932_v7  ;;  %2132 = vmatmul.mubr.bf16.gmra.mrb[24].mxu1 %v4812_v42  ;;  %524 = vst [vmem:[#allocation2 + $0x58] sm:$0x10] %v523_v32  ;;  %v802_v42 = vld [vmem:[#allocation2 + $0x28] sm:$0x1e]  ;;  %v1070_v56 = vrot.slane %v800_v36, 1  ;;  %v1071_v57 = vrot.slane %v801_v41, 1  ;;  %v961_v62 = vor.u32 %v960_v46, %v956_v45  ;;  %v968_v63 = vor.u32 %v967_v50, %v963_v47 }
  0x65   : > { %2139 = vmatprep.mubr.bf16.mxu1 %v4062_v2  ;;  %v1072_v58 = vrot.slane %v802_v42, 1  ;;  %v805_v2 = vld [vmem:[#allocation2 + $0x40] sm:$0x1e]  ;;  %v1076_v12 = vrot.slane %v806_v4, 1  ;;  %v1077_v13 = vrot.slane %v807_v5, 1  ;;  %v1051_v14 = vor.u32 %v1050_v52, %v1046_v51  ;;  %v4825_v30 = vld [vmem:[%s5750_s5 + $0x8] sm:$0xff]  }
  0x66   : > { %2059 = vmatmul.mubr.bf16.gmra.mrb[24].mxu0 %v4050_v48  ;;  %v4817_v48 = vld [vmem:[#allocation2 + $0x40] ss:$8 sps:$4 sm:$0xff]   ;;  %v4077_v3 = vcombine.low %v961_v62, %v968_v63  ;;  %v1075_v8 = vrot.slane %v805_v2, 1  ;;  %v4832_v32 = vld [vmem:[%s5750_s5 + $0x150] sm:$0xff]   ;;  %v4836_v46 = vld [vmem:[%s5750_s5 + $0x158] sm:$0xff]  }
  0x67   : > { %4644 = vmatpush3.bf16.msra.mxu0 %v4813_v43  ;;  %2066 = vmatprep.mubr.bf16.mxu0 %v4060_v60  ;;  %v803_v43 = vld [vmem:[#allocation2 + $0x30] sm:$0x1e]  ;;  %v4054_v21 = vcombine.low %v1071_v57, %v1072_v58  ;;  %v4827_v26 = vld [vmem:[%s5750_s5 + $0x100] sm:$0xff]   ;;  %v4831_v31 = vld [vmem:[%s5750_s5 + $0x108] sm:$0xff]  }
  0x68   : > { %4645 = vmatprep.subr.bf16.mxu0 %v4932_v7  ;;  %v1073_v59 = vrot.slane %v803_v43, 1  ;;  %v4822_v27 = vld [vmem:[%s5750_s5 + $0x40] sm:$0xff]   ;;  %v4834_v34 = vld [vmem:[%s5750_s5 + $0x110] sm:$0xff]   ;;  %v4833_v52 = vld [vmem:[%s5750_s5 + $0x58] sm:$0xff]  }
  0x69   : > { %v4823_v28 = vld [vmem:[%s5750_s5] sm:$0xff]   ;;  %4467 = vmatprep.subr.bf16.mxu1 %v4822_v27  ;;  %v4830_v42 = vld [vmem:[%s5750_s5 + $0x10] sm:$0xff]  }
  0x6a   : > { %4468 = vmatpush3.bf16.msra.mxu1 %v4823_v28  ;;  %v5381_v39 = vld [vmem:[%s5749_s4] ss:$0 sm:$0xff] }
  0x6b   : > { %4646 = vmatpush3.bf16.msra.mxu0 %v4814_v1  ;;  %v594_v60 = vld [vmem:[#allocation2 + $0x58] sm:$0x1f]  ;;  %v4840_v58 = vld [vmem:[%s5750_s5 + $0x160] sm:$0xff]  }
  0x6c   : > { %4647 = vmatprep.subr.bf16.mxu0 %v4932_v7  ;;  %2140 = vmatmul.mubr.bf16.gmra.mrb[28].mxu1 %v4815_v15  ;;  %v595_v61 = vsel %vm5131_vm8, %v5127_v53, %v594_v60  ;;  %v804_v1 = vld [vmem:[#allocation2 + $0x38] sm:$0x1e]  ;;  %v4841_v60 = vld [vmem:[%s5750_s5 + $0x120] sm:$0xff]  }
  0x6d   : > { %2147 = vmatprep.mubr.bf16.mxu1 %v4071_v29  ;;  %596 = vst [vmem:[#allocation2 + $0x58] sm:$0x1f] %v595_v61  ;;  %v1074_v6 = vrot.slane %v804_v1, 1  ;;  %v4824_v29 = vld [vmem:[%s5750_s5 + $0x48] sm:$0xff]   ;;  %v4839_v4 = vld [vmem:[%s5750_s5 + $0x20] sm:$0xff]  }
  0x6e   : > { %2067 = vmatmul.mubr.bf16.gmra.mrb[28].mxu0 %v4059_v19  ;;  %v4045_v19 = vcombine.low %v1069_v55, %v1070_v56  ;;  %4469 = vmatprep.subr.bf16.mxu1 %v4824_v29  ;;  %v4835_v55 = vld [vmem:[%s5750_s5 + $0x18] sm:$0xff]   ;;  %v5461_v27 = vld [vmem:[%s5750_s5 + $0x200] sm:$0xff]  }
  0x6f   : > { %4648 = vmatpush3.bf16.msra.mxu0 %v4816_v16  ;;  %2074 = vmatprep.mubr.bf16.mxu0 %v4069_v23  ;;  %v4063_v22 = vcombine.low %v1073_v59, %v1074_v6  ;;  %v4072_v23 = vcombine.low %v1075_v8, %v1076_v12  ;;  %v4844_v8 = vld [vmem:[%s5750_s5 + $0x168] sm:$0xff]   ;;  %v4856_v28 = vld [vmem:[%s5750_s5 + $0xc0] sm:$0xff]  }
  0x70   : > { %4649 = vmatprep.subr.bf16.mxu0 %v4932_v7  ;;  %4470 = vmatpush3.bf16.msra.mxu1 %v4825_v30 }
  0x73   : > { %4650 = vmatpush3.bf16.msra.mxu0 %v4818_v38  ;;  %v4828_v38 = vld [vmem:[%s5750_s5 + $0x50] sm:$0xff]  }
  0x74   : > { %4651 = vmatprep.subr.bf16.mxu0 %v4932_v7  ;;  %2148 = vmatmul.mubr.bf16.gmra.mrb[32].mxu1 %v4817_v48  ;;  %v798_v53 = vld [vmem:[#allocation2 + $0x58] sm:$0x1f] }
  0x75   : > { %v1053_v9 = vshrl.u32 %v798_v53, 16  ;;  %v1055_v10 = vshll.u32 %v798_v53, 16  ;;  %v808_v11 = vld [vmem:[#allocation2 + $0x58] sm:$0x1e]  ;;  %4471 = vmatprep.subr.bf16.mxu1 %v4828_v38 }
  0x76   : > { %2075 = vmatmul.mubr.bf16.gmra.mrb[32].mxu0 %v4068_v40  ;;  %v1078_v16 = vrot.slane %v808_v11, 1  ;;  %v4820_v17 = vld [vmem:[#allocation2 + $0x50] ss:$8 sps:$4 sm:$0xff]   ;;  %4472 = vmatpush3.bf16.msra.mxu1 %v4830_v42  ;;  %v4845_v11 = vld [vmem:[%s5750_s5 + $0x128] sm:$0xff]  }
  0x77   : > { %2082 = vmatprep.mubr.bf16.mxu0 %v4078_v44  ;;  %4652 = vmatpush3.bf16.msra.mxu0 %v4819_v49  ;;  %v1057_v15 = vrot.slane %v1055_v10, 1  ;;  %v4837_v49 = vld [vmem:[%s5750_s5 + $0x118] sm:$0xff]  }
  0x78   : > { %4653 = vmatprep.subr.bf16.mxu0 %v4932_v7  ;;  %v4081_v24 = vcombine.low %v1077_v13, %v1078_v16  ;;  %4473 = vmatprep.subr.bf16.mxu1 %v4833_v52 }
  0x79   : > { %v1058_v18 = vor.u32 %v1057_v15, %v1053_v9  ;;  %v4843_v15 = vld [vmem:[%s5750_s5 + $0x28] sm:$0xff]  }
  0x7a   : > { %4474 = vmatpush3.bf16.msra.mxu1 %v4835_v55 }
  0x7b   : > { %4654 = vmatpush3.bf16.msra.mxu0 %v4821_v0  ;;  %v4080_v20 = vcombine.low %v1051_v14, %v1058_v18  ;;  %v4838_v0 = vld [vmem:[%s5750_s5 + $0x60] sm:$0xff]   ;;  %v4842_v14 = vld [vmem:[%s5750_s5 + $0x68] sm:$0xff]   ;;  %v4847_v18 = vld [vmem:[%s5750_s5 + $0x170] sm:$0xff]  }
  0x7c   : > { %4547 = vmatprep.subr.bf16.mxu0 %v4826_v25  ;;  %4475 = vmatprep.subr.bf16.mxu1 %v4838_v0  ;;  %v4851_v25 = vld [vmem:[%s5750_s5 + $0x78] sm:$0xff]  }
  0x7d   : > { %2155 = vmatprep.mubr.bf16.mxu1 %v4080_v20  ;;  %v4846_v20 = vld [vmem:[%s5750_s5 + $0x70] sm:$0xff]  }
  0x7e   : > { %2083 = vmatmul.mubr.bf16.gmra.mrb[36].mxu0 %v4077_v3  ;;  %2156 = vmatmul.mubr.bf16.gmra.mrb[36].mxu1 %v4820_v17 }
  0x7f   : > { %4655 = vmatprep.mubr.msk.bf16.mxu0 %vm4933_vm9, %v4932_v7  ;;  %4476 = vmatpush3.bf16.msra.mxu1 %v4839_v4 }
  0x80   : > { %4477 = vmatprep.subr.bf16.mxu1 %v4842_v14 }
  0x83   : > { %4478 = vmatpush3.bf16.msra.mxu1 %v4843_v15 }
  0x84   : > { %4479 = vmatprep.subr.bf16.mxu1 %v4846_v20 }
  0x86   : > { %4656 = vmatmul.mubr.bf16.vlgmr.msra.gmra.mrb[40].mxu0 %v4045_v19 }
  0x87   : > { %4659 = vmatprep.mubr.msk.bf16.mxu0 %vm4933_vm9, %v4932_v7  ;;  %4548 = vmatpush3.bf16.msra.mxu0 %v4827_v26  ;;  %v4853_v26 = vld [vmem:[%s5750_s5 + $0x38] sm:$0xff]  }
  0x8e   : > { %4660 = vmatmul.mubr.bf16.gmra.mrb[44].mxu0 %v4054_v21  ;;  %v4849_v21 = vld [vmem:[%s5750_s5 + $0x130] sm:$0xff]  }
  0x8f   : > { %4663 = vmatprep.mubr.msk.bf16.mxu0 %vm4933_vm9, %v4932_v7 }
  0x96   : > { %4664 = vmatmul.mubr.bf16.gmra.mrb[48].mxu0 %v4063_v22  ;;  %v4848_v22 = vld [vmem:[%s5750_s5 + $0x30] sm:$0xff]  }
  0x97   : > { %4667 = vmatprep.mubr.msk.bf16.mxu0 %vm4933_vm9, %v4932_v7  ;;  %4480 = vmatpush3.bf16.msra.mxu1 %v4848_v22 }
  0x98   : > { %4481 = vmatprep.subr.bf16.mxu1 %v4851_v25 }
  0x9b   : > { %4482 = vmatpush3.bf16.msra.mxu1 %v4853_v26 }
  0x9c   : > { %4507 = vmatprep.subr.bf16.mxu1 %v4856_v28 }
  0x9e   : > { %4668 = vmatmul.mubr.bf16.gmra.mrb[52].mxu0 %v4072_v23  ;;  %v4850_v23 = vld [vmem:[%s5750_s5 + $0x178] sm:$0xff]  }
  0x9f   : > { %4671 = vmatprep.mubr.msk.bf16.mxu0 %vm4933_vm9, %v4932_v7  ;;  %v4829_v7 = vld [vmem:[%s5750_s5 + $0x148] sm:$0xff]  }
  0xa0   : > { %4549 = vmatprep.subr.bf16.mxu0 %v4829_v7 }
  0xa1   : > { %4550 = vmatpush3.bf16.msra.mxu0 %v4831_v31 }
  0xa2   : > { %4551 = vmatprep.subr.bf16.mxu0 %v4832_v32 }
  0xa5   : > { %4552 = vmatpush3.bf16.msra.mxu0 %v4834_v34 }
  0xa6   : > { %4672 = vmatmul.mubr.bf16.gmra.mrb[56].mxu0 %v4081_v24  ;;  %4553 = vmatprep.subr.bf16.mxu0 %v4836_v46  ;;  %v4852_v24 = vld [vmem:[%s5750_s5 + $0x138] sm:$0xff]  }
  0xa9   : > { %4554 = vmatpush3.bf16.msra.mxu0 %v4837_v49 }
  0xaa   : > { %4555 = vmatprep.subr.bf16.mxu0 %v4840_v58 }
  0xad   : > { %4556 = vmatpush3.bf16.msra.mxu0 %v4841_v60 }
  0xae   : > { %4557 = vmatprep.subr.bf16.mxu0 %v4844_v8 }
  0xb1   : > { %4558 = vmatpush3.bf16.msra.mxu0 %v4845_v11 }
  0xb2   : > { %4559 = vmatprep.subr.bf16.mxu0 %v4847_v18 }
  0xb5   : > { %4560 = vmatpush3.bf16.msra.mxu0 %v4849_v21 }
  0xb6   : > { %4561 = vmatprep.subr.bf16.mxu0 %v4850_v23 }
  0xb9   : > { %4562 = vmatpush3.bf16.msra.mxu0 %v4852_v24 }
  0xba   : > { %4675 = vmatprep.subr.bf16.mxu0 %v5461_v27 }
 0x100   : > { %v4332_v33 = vpop.f32.mrb[0].mxu1 }
 0x101   : > { %v4286_v35 = vpop.f32.mrb[0].mxu0  ;;  %v4333_v37 = vpop.f32.mrb[1].mxu1 }
 0x102   : > { %v4287_v36 = vpop.f32.mrb[1].mxu0  ;;  %v4334_v40 = vadd.f32 %v4333_v37, %v4332_v33  ;;  %v4335_v41 = vpop.f32.mrb[2].mxu1 }
 0x103   : > { %v4288_v43 = vadd.f32 %v4287_v36, %v4286_v35  ;;  %v4289_v44 = vpop.f32.mrb[2].mxu0  ;;  %v4336_v45 = vpop.f32.mrb[3].mxu1 }
 0x104   : > { %v4290_v47 = vpop.f32.mrb[3].mxu0  ;;  %v4337_v48 = vadd.f32 %v4336_v45, %v4335_v41 }
 0x105   : > { %v1907_v50 = vadd.f32 %v4288_v43, %v5381_v39  ;;  %v4291_v51 = vadd.f32 %v4290_v47, %v4289_v44 }
 0x107   : > { %v1910_v56 = vadd.f32 %v4291_v51, %v5381_v39  ;;  %v5400_v57 = vadd.f32 %v4334_v40, %v1907_v50 }
 0x108   : > { %v4338_v59 = vpop.f32.mrb[4].mxu1 }
 0x109   : > { %v5408_v61 = vadd.f32 %v4337_v48, %v1910_v56  ;;  %v4292_v62 = vpop.f32.mrb[4].mxu0  ;;  %v4339_v63 = vpop.f32.mrb[5].mxu1 }
 0x10a   : > { %v4293_v1 = vpop.f32.mrb[5].mxu0  ;;  %v4340_v2 = vadd.f32 %v4339_v63, %v4338_v59  ;;  %v4341_v3 = vpop.f32.mrb[6].mxu1 }
 0x10b   : > { %v4294_v5 = vadd.f32 %v4293_v1, %v4292_v62  ;;  %v4295_v53 = vpop.f32.mrb[6].mxu0  ;;  %v4342_v6 = vpop.f32.mrb[7].mxu1 }
 0x10c   : > { %v4296_v9 = vpop.f32.mrb[7].mxu0  ;;  %v4343_v10 = vadd.f32 %v4342_v6, %v4341_v3 }
 0x10d   : > { %v1915_v12 = vadd.f32 %v4294_v5, %v5381_v39  ;;  %v4297_v13 = vadd.f32 %v4296_v9, %v4295_v53 }
 0x10f   : > { %v1918_v16 = vadd.f32 %v4297_v13, %v5381_v39  ;;  %v5430_v17 = vadd.f32 %v4340_v2, %v1915_v12 }
 0x111   : > { %v5435_v19 = vadd.f32 %v4343_v10, %v1918_v16 }
 0x113   : > { %v4298_v7 = vpop.f32.mrb[8].mxu0 }
 0x114   : > { %v4344_v29 = vpop.f32.mrb[8].mxu1  ;;  %v4299_v30 = vpop.f32.mrb[9].mxu0 }
 0x115   : > { %v4345_v31 = vpop.f32.mrb[9].mxu1  ;;  %v4300_v32 = vadd.f32 %v4299_v30, %v4298_v7  ;;  %v4301_v33 = vpop.f32.mrb[10].mxu0 }
 0x116   : > { %v4346_v34 = vadd.f32 %v4345_v31, %v4344_v29  ;;  %v4347_v35 = vpop.f32.mrb[10].mxu1  ;;  %v4302_v37 = vpop.f32.mrb[11].mxu0 }
 0x117   : > { %v4348_v38 = vpop.f32.mrb[11].mxu1  ;;  %v1923_v36 = vadd.f32 %v4300_v32, %v5381_v39  ;;  %v4303_v40 = vadd.f32 %v4302_v37, %v4301_v33 }
 0x118   : > { %v4349_v41 = vadd.f32 %v4348_v38, %v4347_v35 }
 0x119   : > { %v1926_v42 = vadd.f32 %v4303_v40, %v5381_v39  ;;  %v5469_v43 = vadd.f32 %v4346_v34, %v1923_v36 }
 0x11b   : > { %v5471_v44 = vadd.f32 %v4349_v41, %v1926_v42 }
 0x11c   : > { %v4350_v45 = vpop.f32.mrb[12].mxu1 }
 0x11d   : > { %v4351_v46 = vpop.f32.mrb[13].mxu1 }
 0x11e   : > { %v4352_v48 = vadd.f32 %v4351_v46, %v4350_v45  ;;  %v4353_v49 = vpop.f32.mrb[14].mxu1 }
 0x11f   : > { %v4304_v47 = vpop.f32.mrb[12].mxu0  ;;  %v4354_v51 = vpop.f32.mrb[15].mxu1 }
 0x120   : > { %v4305_v50 = vpop.f32.mrb[13].mxu0  ;;  %v4355_v56 = vadd.f32 %v4354_v51, %v4353_v49 }
 0x121   : > { %v4306_v52 = vadd.f32 %v4305_v50, %v4304_v47  ;;  %v4307_v55 = vpop.f32.mrb[14].mxu0 }
 0x122   : > { %v4308_v58 = vpop.f32.mrb[15].mxu0 }
 0x123   : > { %v1931_v59 = vadd.f32 %v4306_v52, %v5381_v39  ;;  %v4309_v60 = vadd.f32 %v4308_v58, %v4307_v55 }
 0x125   : > { %v1934_v62 = vadd.f32 %v4309_v60, %v5381_v39  ;;  %v5475_v63 = vadd.f32 %v4352_v48, %v1931_v59 }
 0x127   : > { %v5477_v0 = vadd.f32 %v4355_v56, %v1934_v62  ;;  %v4356_v3 = vpop.f32.mrb[16].mxu1 }
 0x128   : > { %v4357_v53 = vpop.f32.mrb[17].mxu1 }
 0x129   : > { %v4310_v1 = vpop.f32.mrb[16].mxu0  ;;  %v4358_v8 = vadd.f32 %v4357_v53, %v4356_v3  ;;  %v4359_v9 = vpop.f32.mrb[18].mxu1 }
 0x12a   : > { %v4311_v2 = vpop.f32.mrb[17].mxu0  ;;  %v4360_v12 = vpop.f32.mrb[19].mxu1 }
 0x12b   : > { %v4312_v4 = vadd.f32 %v4311_v2, %v4310_v1  ;;  %v4313_v5 = vpop.f32.mrb[18].mxu0  ;;  %v4361_v13 = vadd.f32 %v4360_v12, %v4359_v9 }
 0x12c   : > { %v4314_v6 = vpop.f32.mrb[19].mxu0 }
 0x12d   : > { %v1939_v10 = vadd.f32 %v4312_v4, %v5381_v39  ;;  %v4315_v11 = vadd.f32 %v4314_v6, %v4313_v5 }
 0x12f   : > { %v1942_v14 = vadd.f32 %v4315_v11, %v5381_v39  ;;  %v5481_v15 = vadd.f32 %v4358_v8, %v1939_v10  ;;  %v4424_v21 = vpop.f32.mrb[20].mxu1 }
 0x130   : > { %v4425_v24 = vpop.f32.mrb[21].mxu1 }
 0x131   : > { %v5483_v16 = vadd.f32 %v4361_v13, %v1942_v14  ;;  %v4378_v18 = vpop.f32.mrb[20].mxu0  ;;  %v4426_v26 = vadd.f32 %v4425_v24, %v4424_v21  ;;  %v4427_v28 = vpop.f32.mrb[22].mxu1 }
 0x132   : > { %v4379_v20 = vpop.f32.mrb[21].mxu0  ;;  %v4428_v30 = vpop.f32.mrb[23].mxu1 }
 0x133   : > { %v4380_v22 = vadd.f32 %v4379_v20, %v4378_v18  ;;  %v4381_v23 = vpop.f32.mrb[22].mxu0  ;;  %v4429_v31 = vadd.f32 %v4428_v30, %v4427_v28 }
 0x134   : > { %v4382_v25 = vpop.f32.mrb[23].mxu0 }
 0x135   : > { %v2053_v7 = vadd.f32 %v4380_v22, %v5400_v57  ;;  %v4383_v29 = vadd.f32 %v4382_v25, %v4381_v23 }
 0x137   : > { %v2056_v39 = vadd.f32 %v4383_v29, %v5408_v61  ;;  %v2126_v32 = vadd.f32 %v4426_v26, %v2053_v7  ;;  %v4430_v37 = vpop.f32.mrb[24].mxu1 }
 0x138   : > { %v4431_v40 = vpop.f32.mrb[25].mxu1 }
 0x139   : > { %v4384_v33 = vpop.f32.mrb[24].mxu0  ;;  %v5487_v34 = vadd.f32 %v4429_v31, %v2056_v39  ;;  %v4432_v42 = vadd.f32 %v4431_v40, %v4430_v37  ;;  %v4433_v45 = vpop.f32.mrb[26].mxu1 }
 0x13a   : > { %v4385_v35 = vpop.f32.mrb[25].mxu0  ;;  %v4434_v47 = vpop.f32.mrb[27].mxu1 }
 0x13b   : > { %v4386_v38 = vadd.f32 %v4385_v35, %v4384_v33  ;;  %v4387_v36 = vpop.f32.mrb[26].mxu0  ;;  %v4435_v48 = vadd.f32 %v4434_v47, %v4433_v45 }
 0x13c   : > { %v4388_v41 = vpop.f32.mrb[27].mxu0 }
 0x13d   : > { %v2061_v46 = vadd.f32 %v4386_v38, %v5430_v17  ;;  %v4389_v57 = vadd.f32 %v4388_v41, %v4387_v36 }
 0x13f   : > { %v2064_v49 = vadd.f32 %v4389_v57, %v5435_v19  ;;  %v5491_v61 = vadd.f32 %v4432_v42, %v2061_v46  ;;  %v4436_v55 = vpop.f32.mrb[28].mxu1 }
 0x140   : > { %v4437_v59 = vpop.f32.mrb[29].mxu1 }
 0x141   : > { %v4390_v50 = vpop.f32.mrb[28].mxu0  ;;  %v5493_v51 = vadd.f32 %v4435_v48, %v2064_v49  ;;  %v4438_v62 = vadd.f32 %v4437_v59, %v4436_v55  ;;  %v4439_v1 = vpop.f32.mrb[30].mxu1 }
 0x142   : > { %v4391_v52 = vpop.f32.mrb[29].mxu0  ;;  %v4440_v3 = vpop.f32.mrb[31].mxu1 }
 0x143   : > { %v4392_v56 = vadd.f32 %v4391_v52, %v4390_v50  ;;  %v4393_v58 = vpop.f32.mrb[30].mxu0  ;;  %v4441_v4 = vadd.f32 %v4440_v3, %v4439_v1 }
 0x144   : > { %v4394_v60 = vpop.f32.mrb[31].mxu0 }
 0x145   : > { %v2069_v17 = vadd.f32 %v4392_v56, %v5469_v43  ;;  %v4395_v2 = vadd.f32 %v4394_v60, %v4393_v58 }
 0x147   : > { %v2072_v19 = vadd.f32 %v4395_v2, %v5471_v44  ;;  %v5497_v5 = vadd.f32 %v4438_v62, %v2069_v17  ;;  %v4442_v9 = vpop.f32.mrb[32].mxu1 }
 0x148   : > { %v4443_v12 = vpop.f32.mrb[33].mxu1 }
 0x149   : > { %v4396_v53 = vpop.f32.mrb[32].mxu0  ;;  %v5499_v6 = vadd.f32 %v4441_v4, %v2072_v19  ;;  %v4444_v14 = vadd.f32 %v4443_v12, %v4442_v9  ;;  %v4445_v18 = vpop.f32.mrb[34].mxu1 }
 0x14a   : > { %v4397_v8 = vpop.f32.mrb[33].mxu0  ;;  %v4446_v21 = vpop.f32.mrb[35].mxu1 }
 0x14b   : > { %v4398_v10 = vadd.f32 %v4397_v8, %v4396_v53  ;;  %v4399_v11 = vpop.f32.mrb[34].mxu0  ;;  %v4447_v22 = vadd.f32 %v4446_v21, %v4445_v18  ;;  %v2359_v53 = vld [vmem:[#allocation2 + $0x8] sm:$0x1f] }
 0x14c   : > { %v4400_v13 = vpop.f32.mrb[35].mxu0 }
 0x14d   : > { %v2077_v43 = vadd.f32 %v4398_v10, %v5475_v63  ;;  %v4401_v20 = vadd.f32 %v4400_v13, %v4399_v11  ;;  %v4906_v10 = vld [vmem:[#allocation2] sm:$0x1f] }
 0x14f   : > { %v2080_v44 = vadd.f32 %v4401_v20, %v5477_v0  ;;  %v5503_v23 = vadd.f32 %v4444_v14, %v2077_v43 }
 0x151   : > { %v4402_v24 = vpop.f32.mrb[36].mxu0  ;;  %v5505_v25 = vadd.f32 %v4447_v22, %v2080_v44  ;;  %v4448_v33 = vpop.f32.mrb[36].mxu1 }
 0x152   : > { %v4403_v26 = vpop.f32.mrb[37].mxu0  ;;  %v4449_v38 = vpop.f32.mrb[37].mxu1 }
 0x153   : > { %v4404_v28 = vadd.f32 %v4403_v26, %v4402_v24  ;;  %v4405_v7 = vpop.f32.mrb[38].mxu0  ;;  %v4450_v36 = vadd.f32 %v4449_v38, %v4448_v33  ;;  %v4451_v40 = vpop.f32.mrb[38].mxu1  ;;  %v2365_v33 = vld [vmem:[#allocation2 + $0x18] sm:$0x1f] }
 0x154   : > { %v4406_v29 = vpop.f32.mrb[39].mxu0  ;;  %v4452_v46 = vpop.f32.mrb[39].mxu1 }
 0x155   : > { %v2085_v30 = vadd.f32 %v4404_v28, %v5481_v15  ;;  %v4407_v31 = vadd.f32 %v4406_v29, %v4405_v7  ;;  %v4453_v57 = vadd.f32 %v4452_v46, %v4451_v40  ;;  %v2362_v28 = vld [vmem:[#allocation2 + $0x10] sm:$0x1f] }
 0x157   : > { %v2088_v39 = vadd.f32 %v4407_v31, %v5483_v16  ;;  %v5510_v16 = vadd.f32 %v4450_v36, %v2085_v30 }
 0x159   : > { %v2198_v63 = vpop.f32.mrb[40].mxu0 }
 0x15a   : > { %v2199_v35 = vadd.f32 %v2198_v63, %v2126_v32  ;;  %v4657_v37 = vpop.f32.mrb[41].mxu0  ;;  %v5512_v32 = vadd.f32 %v4453_v57, %v2088_v39 }
 0x15b   : > { %v2201_v0 = vpop.f32.mrb[42].mxu0 }
 0x15c   : > { %vm2237_vm10 = vcmp.gt.f32.partialorder %v2199_v35, 0.0  ;;  %v2247_v41 = vmul.f32 0.2, %v2199_v35  ;;  %v2202_v42 = vadd.f32 %v2201_v0, %v5487_v34  ;;  %v4658_v45 = vpop.f32.mrb[43].mxu0 }
 0x15e   : > { %v2257_v47 = vsel %vm2237_vm10, %v2199_v35, %v2247_v41  ;;  %vm2238_vm11 = vcmp.gt.f32.partialorder %v2202_v42, 0.0  ;;  %v2248_v15 = vmul.f32 0.2, %v2202_v42 }
 0x15f   : > { %v2267_v48 = vpack.c.bf16 %v2257_v47, %v2257_v47 }
 0x160   : > { %v2258_v49 = vsel %vm2238_vm11, %v2202_v42, %v2248_v15  ;;  %v2368_v15 = vld [vmem:[#allocation2 + $0x20] sm:$0x1f] }
 0x161   : > { %v2278_v50 = vshrl.u32 %v2267_v48, 16  ;;  %v2268_v52 = vpack.c.bf16 %v2258_v49, %v2258_v49  ;;  %v2206_v55 = vpop.f32.mrb[44].mxu0  ;;  %v2281_v34 = vshll.u32 %v2267_v48, 16 }
 0x162   : > { %v2207_v56 = vadd.f32 %v2206_v55, %v5491_v61  ;;  %v4661_v58 = vpop.f32.mrb[45].mxu0 }
 0x163   : > { %v2280_v59 = vrot.slane %v2278_v50, 7  ;;  %v2285_v60 = vshrl.u32 %v2268_v52, 16  ;;  %v2209_v62 = vpop.f32.mrb[46].mxu0  ;;  %v2288_v19 = vshll.u32 %v2268_v52, 16 }
 0x164   : > { %vm2239_vm12 = vcmp.gt.f32.partialorder %v2207_v56, 0.0  ;;  %v2249_v1 = vmul.f32 0.2, %v2207_v56  ;;  %v2210_v17 = vadd.f32 %v2209_v62, %v5493_v51  ;;  %v4662_v2 = vpop.f32.mrb[47].mxu0 }
 0x165   : > { %v2283_v3 = vor.u32 %v2281_v34, %v2280_v59  ;;  %v2287_v4 = vrot.slane %v2285_v60, 7  ;;  %v2371_v60 = vld [vmem:[#allocation2 + $0x28] sm:$0x1f] }
 0x166   : > { %v2259_v8 = vsel %vm2239_vm12, %v2207_v56, %v2249_v1  ;;  %vm2240_vm13 = vcmp.gt.f32.partialorder %v2210_v17, 0.0  ;;  %v2250_v9 = vmul.f32 0.2, %v2210_v17 }
 0x167   : > { %v2357_v61 = vsel %vm5131_vm8, %v2283_v3, %v4906_v10  ;;  %v2290_v11 = vor.u32 %v2288_v19, %v2287_v4  ;;  %v2269_v12 = vpack.c.bf16 %v2259_v8, %v2259_v8 }
 0x168   : > { %2358 = vst [vmem:[#allocation2] sm:$0x1f] %v2357_v61  ;;  %v2260_v13 = vsel %vm2240_vm13, %v2210_v17, %v2250_v9 }
 0x169   : > { %v2360_v14 = vsel %vm5131_vm8, %v2290_v11, %v2359_v53  ;;  %v2292_v51 = vshrl.u32 %v2269_v12, 16  ;;  %v2270_v18 = vpack.c.bf16 %v2260_v13, %v2260_v13  ;;  %v2214_v43 = vpop.f32.mrb[48].mxu0  ;;  %v2295_v44 = vshll.u32 %v2269_v12, 16 }
 0x16a   : > { %2361 = vst [vmem:[#allocation2 + $0x8] sm:$0x1f] %v2360_v14  ;;  %v2215_v20 = vadd.f32 %v2214_v43, %v5497_v5  ;;  %v4665_v21 = vpop.f32.mrb[49].mxu0 }
 0x16b   : > { %v2294_v22 = vrot.slane %v2292_v51, 7  ;;  %v2299_v24 = vshrl.u32 %v2270_v18, 16  ;;  %v2217_v26 = vpop.f32.mrb[50].mxu0  ;;  %v2302_v63 = vshll.u32 %v2270_v18, 16 }
 0x16c   : > { %vm2241_vm14 = vcmp.gt.f32.partialorder %v2215_v20, 0.0  ;;  %v2251_v7 = vmul.f32 0.2, %v2215_v20  ;;  %v2218_v29 = vadd.f32 %v2217_v26, %v5499_v6  ;;  %v4666_v30 = vpop.f32.mrb[51].mxu0 }
 0x16d   : > { %v2297_v31 = vor.u32 %v2295_v44, %v2294_v22  ;;  %v2301_v39 = vrot.slane %v2299_v24, 7 }
 0x16e   : > { %v2261_v35 = vsel %vm2241_vm14, %v2215_v20, %v2251_v7  ;;  %vm2242_vm15 = vcmp.gt.f32.partialorder %v2218_v29, 0.0  ;;  %v2252_v37 = vmul.f32 0.2, %v2218_v29  ;;  %v2374_v7 = vld [vmem:[#allocation2 + $0x30] sm:$0x1f] }
 0x16f   : > { %v2363_v5 = vsel %vm5131_vm8, %v2297_v31, %v2362_v28  ;;  %v2304_v38 = vor.u32 %v2302_v63, %v2301_v39  ;;  %v2271_v0 = vpack.c.bf16 %v2261_v35, %v2261_v35  ;;  %v2389_v36 = vld [vmem:[#allocation2] sm:$0x1f] }
 0x170   : > { %2364 = vst [vmem:[#allocation2 + $0x10] sm:$0x1f] %v2363_v5  ;;  %v2262_v40 = vsel %vm2242_vm15, %v2218_v29, %v2252_v37  ;;  %v2390_v41 = vsel %vm5131_vm8, 0, %v2389_v36 }
 0x171   : > { %v2366_v6 = vsel %vm5131_vm8, %v2304_v38, %v2365_v33  ;;  %v2306_v42 = vshrl.u32 %v2271_v0, 16  ;;  %v2272_v45 = vpack.c.bf16 %v2262_v40, %v2262_v40  ;;  %v2222_v46 = vpop.f32.mrb[52].mxu0  ;;  %v2436_v57 = vld [vmem:[#allocation2 + $0x8] sm:$0x1e]  ;;  %2391 = vst [vmem:[#allocation2] sm:$0x1f] %v2390_v41 }
 0x172   : > { %2367 = vst [vmem:[#allocation2 + $0x18] sm:$0x1f] %v2366_v6  ;;  %v2309_v47 = vshll.u32 %v2271_v0, 16  ;;  %v2223_v48 = vadd.f32 %v2222_v46, %v5503_v23  ;;  %v4669_v49 = vpop.f32.mrb[53].mxu0  ;;  %v2428_v50 = vld [vmem:[#allocation2 + $0x8] sm:$0x1f] }
 0x173   : > { %v5529_v52 = vld [vmem:[#allocation2 + $0x8] sm:$0x1f]  ;;  %v2308_v55 = vrot.slane %v2306_v42, 7  ;;  %v2313_v56 = vshrl.u32 %v2272_v45, 16  ;;  %v2316_v58 = vshll.u32 %v2272_v45, 16  ;;  %v2225_v59 = vpop.f32.mrb[54].mxu0 }
 0x174   : > { %v2604_v34 = vrot.slane %v2436_v57, 1  ;;  %vm2243_vm0 = vcmp.gt.f32.partialorder %v2223_v48, 0.0  ;;  %v2253_v62 = vmul.f32 0.2, %v2223_v48  ;;  %v2226_v1 = vadd.f32 %v2225_v59, %v5505_v25  ;;  %v4670_v17 = vpop.f32.mrb[55].mxu0 }
 0x175   : > { %v2543_v2 = vshll.u32 %v2428_v50, 16  ;;  %v2311_v3 = vor.u32 %v2309_v47, %v2308_v55  ;;  %v2315_v4 = vrot.slane %v2313_v56, 7  ;;  %v2541_v19 = vshrl.u32 %v2428_v50, 16  ;;  %v2377_v38 = vld [vmem:[#allocation2 + $0x38] sm:$0x1f] }
 0x176   : > { %v2478_v23 = vshll.u32 %v5529_v52, 16  ;;  %v2263_v53 = vsel %vm2243_vm0, %v2223_v48, %v2253_v62  ;;  %vm2244_vm1 = vcmp.gt.f32.partialorder %v2226_v1, 0.0  ;;  %v2254_v8 = vmul.f32 0.2, %v2226_v1  ;;  %v4858_v62 = vld [vmem:[%s5750_s5 + $0x208] sm:$0xff]  }
 0x177   : > { %v2545_v9 = vrot.slane %v2543_v2, 1  ;;  %v2369_v10 = vsel %vm5131_vm8, %v2311_v3, %v2368_v15  ;;  %v2318_v61 = vor.u32 %v2316_v58, %v2315_v4  ;;  %v2273_v11 = vpack.c.bf16 %v2263_v53, %v2263_v53  ;;  %v2437_v12 = vld [vmem:[#allocation2 + $0x10] sm:$0x1e] }
 0x178   : > { %v2429_v13 = vld [vmem:[#allocation2 + $0x10] sm:$0x1f]  ;;  %v2476_v25 = vshrl.u32 %v5529_v52, 16  ;;  %2370 = vst [vmem:[#allocation2 + $0x20] sm:$0x1f] %v2369_v10  ;;  %v2264_v14 = vsel %vm2244_vm1, %v2226_v1, %v2254_v8  ;;  %v2605_v51 = vrot.slane %v2437_v12, 1 }
 0x179   : > { %v2546_v18 = vor.u32 %v2545_v9, %v2541_v19  ;;  %v2404_v43 = vld [vmem:[#allocation2] sm:$0x1f]  ;;  %v2480_v20 = vrot.slane %v2478_v23, 1  ;;  %v2372_v21 = vsel %vm5131_vm8, %v2318_v61, %v2371_v60  ;;  %v2320_v22 = vshrl.u32 %v2273_v11, 16  ;;  %v2230_v24 = vpop.f32.mrb[56].mxu0  ;;  %v4859_v12 = vld [vmem:[%s5750_s5 + $0xc8] sm:$0xff]  }
 0x17a   : > { %v2274_v44 = vpack.c.bf16 %v2264_v14, %v2264_v14  ;;  %v2548_v26 = vshrl.u32 %v2429_v13, 16  ;;  %2373 = vst [vmem:[#allocation2 + $0x28] sm:$0x1f] %v2372_v21  ;;  %v2323_v28 = vshll.u32 %v2273_v11, 16  ;;  %v2231_v29 = vadd.f32 %v2230_v24, %v5510_v16  ;;  %v4673_v30 = vpop.f32.mrb[57].mxu0  ;;  %v4861_v24 = vld [vmem:[%s5750_s5 + $0x210] sm:$0xff]  }
 0x17b   : > { %v4160_v31 = vcombine.low %v2604_v34, %v2605_v51  ;;  %v2550_v39 = vshll.u32 %v2429_v13, 16  ;;  %v2322_v63 = vrot.slane %v2320_v22, 7  ;;  %v2233_v35 = vpop.f32.mrb[58].mxu0  ;;  %v2469_v37 = vshrl.u32 %v2404_v43, 16  ;;  %v2406_v16 = vld [vmem:[#allocation2 + $0x10] sm:$0x1f] }
 0x17c   : > { %v2327_v33 = vshrl.u32 %v2274_v44, 16  ;;  %v2471_v5 = vshll.u32 %v2404_v43, 16  ;;  %vm2245_vm2 = vcmp.gt.f32.partialorder %v2231_v29, 0.0  ;;  %v2255_v0 = vmul.f32 0.2, %v2231_v29  ;;  %v4674_v15 = vpop.f32.mrb[59].mxu0 }
 0x17d   : > { %v2234_v36 = vadd.f32 %v2233_v35, %v5512_v32  ;;  %3597 = vmatprep.mubr.bf16.mxu0 %v4160_v31  ;;  %v2552_v40 = vrot.slane %v2550_v39, 1  ;;  %v2325_v41 = vor.u32 %v2323_v28, %v2322_v63  ;;  %v2330_v42 = vshll.u32 %v2274_v44, 16  ;;  %v2407_v55 = vld [vmem:[#allocation2 + $0x18] sm:$0x1f]  ;;  %v4857_v34 = vld [vmem:[%s5750_s5 + $0x80] sm:$0xff]   ;;  %v4860_v39 = vld [vmem:[%s5750_s5 + $0x88] sm:$0xff]  }
 0x17e   : > { %v2329_v6 = vrot.slane %v2327_v33, 7  ;;  %v2473_v45 = vrot.slane %v2471_v5, 1  ;;  %v2265_v46 = vsel %vm2245_vm2, %v2231_v29, %v2255_v0  ;;  %v2481_v58 = vor.u32 %v2480_v20, %v2476_v25  ;;  %v2438_v60 = vld [vmem:[#allocation2 + $0x18] sm:$0x1e]  ;;  %v4855_v4 = vld [vmem:[#allocation2] ss:$8 sps:$4 sm:$0xff]  }
 0x17f   : > { %vm2246_vm3 = vcmp.gt.f32.partialorder %v2234_v36, 0.0  ;;  %v2256_v57 = vmul.f32 0.2, %v2234_v36  ;;  %v2553_v47 = vor.u32 %v2552_v40, %v2548_v26  ;;  %v2375_v48 = vsel %vm5131_vm8, %v2325_v41, %v2374_v7  ;;  %v5548_v1 = vld [vmem:[#allocation2 + $0x18] sm:$0x1f]  ;;  %v4863_v35 = vld [vmem:[%s5750_s5 + $0xd0] sm:$0xff]  }
 0x180   : > { %v2332_v49 = vor.u32 %v2330_v42, %v2329_v6  ;;  %v2275_v50 = vpack.c.bf16 %v2265_v46, %v2265_v46  ;;  %v2474_v52 = vor.u32 %v2473_v45, %v2469_v37  ;;  %2376 = vst [vmem:[#allocation2 + $0x30] sm:$0x1f] %v2375_v48  ;;  %v2485_v59 = vshll.u32 %v2406_v16, 16  ;;  %v2439_v23 = vld [vmem:[#allocation2 + $0x20] sm:$0x1e]  ;;  %v4865_v46 = vld [vmem:[%s5750_s5 + $0x218] sm:$0xff]  }
 0x181   : > { %v2266_v32 = vsel %vm2246_vm3, %v2234_v36, %v2256_v57  ;;  %v4159_v56 = vcombine.low %v2546_v18, %v2553_v47  ;;  %v2483_v19 = vshrl.u32 %v2406_v16, 16  ;;  %v5552_v53 = vld [vmem:[#allocation2 + $0x20] sm:$0x1f]  ;;  %v2492_v11 = vshll.u32 %v2407_v55, 16  ;;  %v2383_v43 = vld [vmem:[#allocation2 + $0x48] sm:$0x1f] }
 0x182   : > { %v2378_v17 = vsel %vm5131_vm8, %v2332_v49, %v2377_v38  ;;  %v2334_v2 = vshrl.u32 %v2275_v50, 16  ;;  %v2276_v3 = vpack.c.bf16 %v2266_v32, %v2266_v32  ;;  %v2337_v8 = vshll.u32 %v2275_v50, 16  ;;  %v2380_v9 = vld [vmem:[#allocation2 + $0x40] sm:$0x1f]  ;;  %v2440_v37 = vld [vmem:[#allocation2 + $0x28] sm:$0x1e] }
 0x183   : > { %2379 = vst [vmem:[#allocation2 + $0x38] sm:$0x1f] %v2378_v17  ;;  %3598 = vmatmul.mubr.bf16.vlgmr.msra.gmra.mrb[60].mxu0 %v4159_v56  ;;  %v4156_v10 = vcombine.low %v2474_v52, %v2481_v58  ;;  %v2487_v61 = vrot.slane %v2485_v59, 1  ;;  %v5557_v13 = vld [vmem:[#allocation2 + $0x20] sm:$0x1f]  ;;  %v2490_v18 = vshrl.u32 %v2407_v55, 16 }
 0x184   : > { %v2336_v25 = vrot.slane %v2334_v2, 7  ;;  %v2341_v14 = vshrl.u32 %v2276_v3, 16  ;;  %v2344_v51 = vshll.u32 %v2276_v3, 16  ;;  %4676 = vmatpush3.bf16.msra.mxu0 %v5461_v27  ;;  %v2494_v21 = vrot.slane %v2492_v11, 1  ;;  %v2409_v27 = vld [vmem:[#allocation2 + $0x28] sm:$0x1f] }
 0x185   : > { %3467 = vmatprep.mubr.bf16.mxu1 %v4156_v10  ;;  %v2488_v20 = vor.u32 %v2487_v61, %v2483_v19  ;;  %v2606_v22 = vrot.slane %v2438_v60, 1  ;;  %v2607_v44 = vrot.slane %v2439_v23, 1  ;;  %4677 = vmatprep.subr.bf16.mxu0 %v4858_v62  ;;  %v2555_v7 = vshrl.u32 %v5548_v1, 16  ;;  %v2432_v41 = vld [vmem:[#allocation2 + $0x28] sm:$0x1f]  ;;  %v4864_v56 = vld [vmem:[%s5750_s5 + $0x90] sm:$0xff]  }
 0x186   : > { %v2339_v26 = vor.u32 %v2337_v8, %v2336_v25  ;;  %v2343_v28 = vrot.slane %v2341_v14, 7  ;;  %3468 = vmatmul.mubr.bf16.vlgmr.msra.gmra.mrb[40].mxu1 %v4855_v4  ;;  %v2557_v29 = vshll.u32 %v5548_v1, 16  ;;  %v2495_v30 = vor.u32 %v2494_v21, %v2490_v18  ;;  %v4862_v48 = vld [vmem:[#allocation2 + $0x10] ss:$8 sps:$4 sm:$0xff]   ;;  %v4868_v23 = vld [vmem:[%s5750_s5 + $0x220] sm:$0xff]  }
 0x187   : > { %4508 = vmatpush3.bf16.msra.mxu1 %v4857_v34  ;;  %v4169_v31 = vcombine.low %v2606_v22, %v2607_v44  ;;  %v2562_v63 = vshrl.u32 %v5552_v53, 16  ;;  %v2564_v33 = vshll.u32 %v5552_v53, 16  ;;  %v2499_v36 = vshll.u32 %v5557_v13, 16  ;;  %v2441_v40 = vld [vmem:[#allocation2 + $0x30] sm:$0x1e]  ;;  %v4866_v60 = vld [vmem:[%s5750_s5 + $0xd8] sm:$0xff]  }
 0x188   : > { %v2381_v5 = vsel %vm5131_vm8, %v2339_v26, %v2380_v9  ;;  %v2346_v38 = vor.u32 %v2344_v51, %v2343_v28  ;;  %4678 = vmatpush3.bf16.msra.mxu0 %v4858_v62  ;;  %4509 = vmatprep.subr.bf16.mxu1 %v4859_v12  ;;  %v2559_v0 = vrot.slane %v2557_v29, 1  ;;  %v4165_v6 = vcombine.low %v2488_v20, %v2495_v30  ;;  %v2433_v57 = vld [vmem:[#allocation2 + $0x30] sm:$0x1f]  ;;  %v4867_v12 = vld [vmem:[%s5750_s5 + $0x98] sm:$0xff]   ;;  %v4872_v28 = vld [vmem:[%s5750_s5 + $0x228] sm:$0xff]  }
 0x189   : > { %2382 = vst [vmem:[#allocation2 + $0x40] sm:$0x1f] %v2381_v5  ;;  %3605 = vmatprep.mubr.bf16.mxu0 %v4169_v31  ;;  %v2566_v42 = vrot.slane %v2564_v33, 1  ;;  %4679 = vmatprep.subr.bf16.mxu0 %v4861_v24  ;;  %v2497_v45 = vshrl.u32 %v5557_v13, 16  ;;  %v2506_v16 = vshll.u32 %v2409_v27, 16  ;;  %v2501_v49 = vrot.slane %v2499_v36, 1 }
 0x18a   : > { %v2384_v47 = vsel %vm5131_vm8, %v2346_v38, %v2383_v43  ;;  %v2560_v15 = vor.u32 %v2559_v0, %v2555_v7  ;;  %v2504_v50 = vshrl.u32 %v2409_v27, 16  ;;  %v2410_v52 = vld [vmem:[#allocation2 + $0x30] sm:$0x1f]  ;;  %3475 = vmatprep.mubr.bf16.mxu1 %v4165_v6  ;;  %v2608_v58 = vrot.slane %v2440_v37, 1  ;;  %v2411_v34 = vld [vmem:[#allocation2 + $0x38] sm:$0x1f] }
 0x18b   : > { %2385 = vst [vmem:[#allocation2 + $0x48] sm:$0x1f] %v2384_v47  ;;  %4510 = vmatpush3.bf16.msra.mxu1 %v4860_v39  ;;  %v2567_v55 = vor.u32 %v2566_v42, %v2562_v63  ;;  %v2508_v32 = vrot.slane %v2506_v16, 1  ;;  %v2609_v59 = vrot.slane %v2441_v40, 1  ;;  %v2569_v62 = vshrl.u32 %v2432_v41, 16  ;;  %v4870_v13 = vld [vmem:[%s5750_s5 + $0xe0] sm:$0xff]  }
 0x18c   : > { %4680 = vmatpush3.bf16.msra.mxu0 %v4861_v24  ;;  %4511 = vmatprep.subr.bf16.mxu1 %v4863_v35  ;;  %v2571_v1 = vshll.u32 %v2432_v41, 16  ;;  %v2578_v17 = vshll.u32 %v2433_v57, 16  ;;  %v2502_v3 = vor.u32 %v2501_v49, %v2497_v45  ;;  %v2434_v53 = vld [vmem:[#allocation2 + $0x38] sm:$0x1f]  ;;  %v2576_v9 = vshrl.u32 %v2433_v57, 16  ;;  %v4871_v37 = vld [vmem:[%s5750_s5 + $0xa0] sm:$0xff]  }
 0x18d   : > { %v4168_v2 = vcombine.low %v2560_v15, %v2567_v55  ;;  %v2509_v4 = vor.u32 %v2508_v32, %v2504_v50  ;;  %v4178_v19 = vcombine.low %v2608_v58, %v2609_v59  ;;  %4681 = vmatprep.subr.bf16.mxu0 %v4865_v46  ;;  %v2513_v61 = vshll.u32 %v2410_v52, 16  ;;  %v2442_v51 = vld [vmem:[#allocation2 + $0x38] sm:$0x1e]  ;;  %v4869_v35 = vld [vmem:[#allocation2 + $0x20] ss:$8 sps:$4 sm:$0xff]   ;;  %v4875_v41 = vld [vmem:[%s5750_s5 + $0x230] sm:$0xff]  }
 0x18e   : > { %3476 = vmatmul.mubr.bf16.gmra.mrb[44].mxu1 %v4862_v48  ;;  %v2573_v8 = vrot.slane %v2571_v1, 1  ;;  %v2580_v10 = vrot.slane %v2578_v17, 1  ;;  %v2511_v25 = vshrl.u32 %v2410_v52, 16  ;;  %v2520_v14 = vshll.u32 %v2411_v34, 16  ;;  %v4873_v0 = vld [vmem:[%s5750_s5 + $0xe8] sm:$0xff]   ;;  %v4877_v15 = vld [vmem:[%s5750_s5 + $0xf0] sm:$0xff]  }
 0x18f   : > { %3606 = vmatmul.mubr.bf16.gmra.mrb[64].mxu0 %v4168_v2  ;;  %v4174_v11 = vcombine.low %v2502_v3, %v2509_v4  ;;  %4512 = vmatpush3.bf16.msra.mxu1 %v4864_v56  ;;  %v2515_v20 = vrot.slane %v2513_v61, 1  ;;  %v2518_v21 = vshrl.u32 %v2411_v34, 16  ;;  %v2585_v7 = vshll.u32 %v2434_v53, 16  ;;  %v2461_v45 = vld [vmem:[#allocation2 + $0x18] sm:$0x1e]  ;;  %v4878_v55 = vld [vmem:[%s5750_s5 + $0xb0] sm:$0xff]  }
 0x190   : > { %3613 = vmatprep.mubr.bf16.mxu0 %v4178_v19  ;;  %4682 = vmatpush3.bf16.msra.mxu0 %v4865_v46  ;;  %v2574_v18 = vor.u32 %v2573_v8, %v2569_v62  ;;  %v2581_v43 = vor.u32 %v2580_v10, %v2576_v9  ;;  %v2443_v22 = vld [vmem:[#allocation2 + $0x40] sm:$0x1e]  ;;  %v2522_v24 = vrot.slane %v2520_v14, 1  ;;  %v2610_v27 = vrot.slane %v2442_v51, 1  ;;  %v4874_v46 = vld [vmem:[%s5750_s5 + $0xa8] sm:$0xff]   ;;  %v4881_v56 = vld [vmem:[%s5750_s5 + $0xf8] sm:$0xff]  }
 0x191   : > { %v2435_v44 = vld [vmem:[#allocation2 + $0x40] sm:$0x1f]  ;;  %3483 = vmatprep.mubr.bf16.mxu1 %v4174_v11  ;;  %4513 = vmatprep.subr.bf16.mxu1 %v4866_v60  ;;  %v2611_v26 = vrot.slane %v2443_v22, 1  ;;  %v2516_v31 = vor.u32 %v2515_v20, %v2511_v25  ;;  %v2587_v36 = vrot.slane %v2585_v7, 1  ;;  %v2583_v6 = vshrl.u32 %v2434_v53, 16  ;;  %v4882_v60 = vld [vmem:[%s5750_s5 + $0xb8] sm:$0xff]  }
 0x192   : > { %v2592_v29 = vshll.u32 %v2435_v44, 16  ;;  %4683 = vmatprep.subr.bf16.mxu0 %v4868_v23  ;;  %v4177_v30 = vcombine.low %v2574_v18, %v2581_v43  ;;  %v2523_v39 = vor.u32 %v2522_v24, %v2518_v21  ;;  %v2393_v33 = vld [vmem:[#allocation2 + $0x48] sm:$0x1f]  ;;  %v2590_v40 = vshrl.u32 %v2435_v44, 16  ;;  %v2460_v47 = vld [vmem:[#allocation2 + $0x10] sm:$0x1e] }
 0x193   : > { %4514 = vmatpush3.bf16.msra.mxu1 %v4867_v12  ;;  %v4187_v5 = vcombine.low %v2610_v27, %v2611_v26  ;;  %v2394_v16 = vsel %vm5131_vm8, 0, %v2393_v33  ;;  %v2588_v57 = vor.u32 %v2587_v36, %v2583_v6  ;;  %v2677_v48 = vrot.slane %v2461_v45, 1  ;;  %v4876_v52 = vld [vmem:[#allocation2 + $0x30] ss:$8 sps:$4 sm:$0xff]   ;;  %v2463_v59 = vld [vmem:[#allocation2 + $0x28] sm:$0x1e] }
 0x194   : > { %v2594_v63 = vrot.slane %v2592_v29, 1  ;;  %4684 = vmatpush3.bf16.msra.mxu0 %v4868_v23  ;;  %4515 = vmatprep.subr.bf16.mxu1 %v4870_v13  ;;  %v4183_v38 = vcombine.low %v2516_v31, %v2523_v39  ;;  %2395 = vst [vmem:[#allocation2 + $0x48] sm:$0x1f] %v2394_v16  ;;  %v2676_v50 = vrot.slane %v2460_v47, 1  ;;  %v4879_v32 = vld [vmem:[#allocation2 + $0x8] ss:$8 sps:$4 sm:$0xff]  }
 0x195   : > { %4685 = vmatprep.subr.bf16.mxu0 %v4872_v28  ;;  %v2412_v34 = vld [vmem:[#allocation2] sm:$0x1e]  ;;  %v2465_v62 = vld [vmem:[#allocation2 + $0x38] sm:$0x1e]  ;;  %v2413_v17 = vld [vmem:[#allocation2 + $0x8] sm:$0x1e] }
 0x196   : > { %3484 = vmatmul.mubr.bf16.gmra.mrb[48].mxu1 %v4869_v35  ;;  %v2595_v42 = vor.u32 %v2594_v63, %v2590_v40  ;;  %v4163_v58 = vcombine.low %v2676_v50, %v2677_v48  ;;  %v2462_v1 = vld [vmem:[#allocation2 + $0x20] sm:$0x1e]  ;;  %v2679_v3 = vrot.slane %v2463_v59, 1  ;;  %v2464_v4 = vld [vmem:[#allocation2 + $0x30] sm:$0x1e]  ;;  %v2532_v19 = vrot.slane %v2412_v34, 1 }
 0x197   : > { %3614 = vmatmul.mubr.bf16.gmra.mrb[68].mxu0 %v4177_v30  ;;  %3491 = vmatprep.mubr.bf16.mxu1 %v4183_v38  ;;  %v4883_v2 = vld [vmem:[%s5750_s5 + $0x1c0] sm:$0xff]   ;;  %v2681_v23 = vrot.slane %v2465_v62, 1  ;;  %v2678_v53 = vrot.slane %v2462_v1, 1  ;;  %v2533_v8 = vrot.slane %v2413_v17, 1  ;;  %v2680_v9 = vrot.slane %v2464_v4, 1  ;;  %v4886_v12 = vld [vmem:[%s5750_s5 + $0x1c8] sm:$0xff]  }
 0x198   : > { %4516 = vmatpush3.bf16.msra.mxu1 %v4871_v37  ;;  %3621 = vmatprep.mubr.bf16.mxu0 %v4187_v5  ;;  %v4186_v49 = vcombine.low %v2588_v57, %v2595_v42  ;;  %v4885_v11 = vld [vmem:[%s5750_s5 + $0x180] sm:$0xff]   ;;  %v2415_v51 = vld [vmem:[#allocation2 + $0x18] sm:$0x1e]  ;;  %v2414_v43 = vld [vmem:[#allocation2 + $0x10] sm:$0x1e] }
 0x199   : > { %4686 = vmatpush3.bf16.msra.mxu0 %v4872_v28  ;;  %4517 = vmatprep.subr.bf16.mxu1 %v4873_v0  ;;  %v4172_v10 = vcombine.low %v2678_v53, %v2679_v3  ;;  %v4157_v61 = vcombine.low %v2532_v19, %v2533_v8  ;;  %v4181_v13 = vcombine.low %v2680_v9, %v2681_v23  ;;  %v4884_v25 = vld [vmem:[#allocation2 + $0x18] ss:$8 sps:$4 sm:$0xff]   ;;  %v4887_v20 = vld [vmem:[%s5750_s5 + $0x188] sm:$0xff]   ;;  %v2535_v22 = vrot.slane %v2415_v51, 1  ;;  %v4888_v44 = vld [vmem:[%s5750_s5 + $0x1d0] sm:$0xff]  }
 0x19a   : > { %4687 = vmatprep.subr.bf16.mxu0 %v4875_v41  ;;  %v2466_v18 = vld [vmem:[#allocation2 + $0x40] sm:$0x1e]  ;;  %v2534_v26 = vrot.slane %v2414_v43, 1  ;;  %v4890_v29 = vld [vmem:[%s5750_s5 + $0x190] sm:$0xff]   ;;  %v4891_v30 = vld [vmem:[%s5750_s5 + $0x1d8] sm:$0xff]  }
 0x19b   : > { %v2467_v14 = vld [vmem:[#allocation2 + $0x48] sm:$0x1e]  ;;  %v2682_v24 = vrot.slane %v2466_v18, 1  ;;  %v2453_v39 = vld [vmem:[#allocation2 + $0x18] sm:$0x1f]  ;;  %v4893_v5 = vld [vmem:[%s5750_s5 + $0x1e0] sm:$0xff]  }
 0x19c   : > { %4518 = vmatpush3.bf16.msra.mxu1 %v4874_v46  ;;  %v2683_v21 = vrot.slane %v2467_v14, 1  ;;  %v4166_v7 = vcombine.low %v2534_v26, %v2535_v22  ;;  %v4889_v27 = vld [vmem:[#allocation2 + $0x28] ss:$8 sps:$4 sm:$0xff]   ;;  %v2416_v63 = vld [vmem:[#allocation2 + $0x20] sm:$0x1e]  ;;  %v4892_v33 = vld [vmem:[%s5750_s5 + $0x198] sm:$0xff]  }
 0x19d   : > { %4688 = vmatpush3.bf16.msra.mxu0 %v4875_v41  ;;  %4519 = vmatprep.subr.bf16.mxu1 %v4877_v15  ;;  %v2417_v31 = vld [vmem:[#allocation2 + $0x28] sm:$0x1e]  ;;  %v2452_v37 = vld [vmem:[#allocation2 + $0x10] sm:$0x1f]  ;;  %v2622_v38 = vshll.u32 %v2453_v39, 16  ;;  %v2536_v0 = vrot.slane %v2416_v63, 1 }
 0x19e   : > { %3492 = vmatmul.mubr.bf16.gmra.mrb[52].mxu1 %v4876_v52  ;;  %4689 = vmatprep.subr.bf16.mxu0 %v4880_v54  ;;  %v4190_v28 = vcombine.low %v2682_v24, %v2683_v21  ;;  %v2537_v35 = vrot.slane %v2417_v31, 1  ;;  %v2615_v36 = vshll.u32 %v2452_v37, 16  ;;  %v4895_v41 = vld [vmem:[%s5750_s5 + $0x1a0] sm:$0xff]   ;;  %v4896_v42 = vld [vmem:[%s5750_s5 + $0x1e8] sm:$0xff]   ;;  %v2419_v45 = vld [vmem:[#allocation2 + $0x38] sm:$0x1e] }
 0x19f   : > { %3622 = vmatmul.mubr.bf16.gmra.mrb[72].mxu0 %v4186_v49  ;;  %3532 = vmatprep.mubr.bf16.mxu1 %v4879_v32  ;;  %v4894_v6 = vld [vmem:[#allocation2 + $0x38] ss:$8 sps:$4 sm:$0xff]   ;;  %v2624_v16 = vrot.slane %v2622_v38, 1  ;;  %v2418_v46 = vld [vmem:[#allocation2 + $0x30] sm:$0x1e]  ;;  %v2620_v47 = vshrl.u32 %v2453_v39, 16 }
 0x1a0   : > { %4691 = vmatprep.mubr.bf16.mxu0 %v4163_v58  ;;  %4520 = vmatpush3.bf16.msra.mxu1 %v4878_v55  ;;  %v4175_v40 = vcombine.low %v2536_v0, %v2537_v35  ;;  %v2617_v57 = vrot.slane %v2615_v36, 1  ;;  %v2455_v15 = vld [vmem:[#allocation2 + $0x28] sm:$0x1f]  ;;  %v4898_v49 = vld [vmem:[%s5750_s5 + $0x1f0] sm:$0xff]   ;;  %v2613_v50 = vshrl.u32 %v2452_v37, 16  ;;  %v2538_v32 = vrot.slane %v2418_v46, 1 }
 0x1a1   : > { %4690 = vmatpush3.bf16.msra.mxu0 %v4880_v54  ;;  %4521 = vmatprep.subr.bf16.mxu1 %v4881_v56  ;;  %v4897_v48 = vld [vmem:[%s5750_s5 + $0x1a8] sm:$0xff]   ;;  %v2539_v54 = vrot.slane %v2419_v45, 1  ;;  %v2625_v52 = vor.u32 %v2624_v16, %v2620_v47  ;;  %v2454_v55 = vld [vmem:[#allocation2 + $0x20] sm:$0x1f]  ;;  %v2636_v56 = vshll.u32 %v2455_v15, 16  ;;  %v4899_v34 = vld [vmem:[%s5750_s5 + $0x1b0] sm:$0xff]  }
 0x1a2   : > { %v2618_v58 = vor.u32 %v2617_v57, %v2613_v50  ;;  %v4900_v1 = vld [vmem:[%s5750_s5 + $0x1f8] sm:$0xff]   ;;  %v2634_v19 = vshrl.u32 %v2455_v15, 16  ;;  %v2456_v23 = vld [vmem:[#allocation2 + $0x30] sm:$0x1f]  ;;  %v2627_v53 = vshrl.u32 %v2454_v55, 16 }
 0x1a3   : > { %v4184_v59 = vcombine.low %v2538_v32, %v2539_v54  ;;  %v2638_v17 = vrot.slane %v2636_v56, 1  ;;  %v4901_v3 = vld [vmem:[%s5750_s5 + $0x1b8] sm:$0xff]   ;;  %v2458_v18 = vld [vmem:[#allocation2 + $0x40] sm:$0x1f]  ;;  %v2641_v43 = vshrl.u32 %v2456_v23, 16 }
 0x1a4   : > { %4522 = vmatpush3.bf16.msra.mxu1 %v4882_v60  ;;  %v2629_v60 = vshll.u32 %v2454_v55, 16  ;;  %v4162_v62 = vcombine.low %v2618_v58, %v2625_v52  ;;  %v4903_v24 = vld [vmem:[#allocation2 + $0x20] ss:$8 sps:$4 sm:$0xff]   ;;  %v4904_v39 = vld [vmem:[#allocation2 + $0x30] ss:$8 sps:$4 sm:$0xff]  }
 0x1a5   : > { %4587 = vmatprep.subr.bf16.mxu1 %v4883_v2  ;;  %v2457_v2 = vld [vmem:[#allocation2 + $0x38] sm:$0x1f]  ;;  %v2639_v8 = vor.u32 %v2638_v17, %v2634_v19 }
 0x1a6   : > { %v2631_v4 = vrot.slane %v2629_v60, 1  ;;  %v2650_v9 = vshll.u32 %v2457_v2, 16  ;;  %v2648_v51 = vshrl.u32 %v2457_v2, 16 }
 0x1a7   : > { %4692 = vmatmul.mubr.bf16.vlgmr.msra.gmra.mrb[76].mxu0 %v4172_v10  ;;  %3533 = vmatmul.mubr.bf16.vlgmr.msra.gmra.mrb[56].mxu1 %v4157_v61  ;;  %v2643_v61 = vshll.u32 %v2456_v23, 16 }
 0x1a8   : > { %4695 = vmatprep.mubr.bf16.mxu0 %v4181_v13  ;;  %3540 = vmatprep.mubr.bf16.mxu1 %v4884_v25  ;;  %v2632_v10 = vor.u32 %v2631_v4, %v2627_v53  ;;  %v2652_v13 = vrot.slane %v2650_v9, 1  ;;  %v2459_v25 = vld [vmem:[#allocation2 + $0x48] sm:$0x1f] }
 0x1a9   : > { %4588 = vmatpush3.bf16.msra.mxu1 %v4885_v11  ;;  %v4902_v11 = vld [vmem:[#allocation2 + $0x10] ss:$8 sps:$4 sm:$0xff]   ;;  %v2645_v14 = vrot.slane %v2643_v61, 1  ;;  %v2664_v21 = vshll.u32 %v2459_v25, 16 }
 0x1aa   : > { %4589 = vmatprep.subr.bf16.mxu1 %v4886_v12  ;;  %v4171_v12 = vcombine.low %v2632_v10, %v2639_v8 }
 0x1ab   : > { %v2646_v22 = vor.u32 %v2645_v14, %v2641_v43  ;;  %v4154_v43 = vld [vmem:[%s5751_s6] ss:$0 sm:$0xff] }
 0x1ad   : > { %4590 = vmatpush3.bf16.msra.mxu1 %v4887_v20  ;;  %v2653_v20 = vor.u32 %v2652_v13, %v2648_v51 }
 0x1ae   : > { %4591 = vmatprep.subr.bf16.mxu1 %v4888_v44  ;;  %v2657_v44 = vshll.u32 %v2458_v18, 16 }
 0x1af   : > { %4696 = vmatmul.mubr.bf16.gmra.mrb[80].mxu0 %v4190_v28  ;;  %3541 = vmatmul.mubr.bf16.gmra.mrb[60].mxu1 %v4166_v7  ;;  %v4180_v26 = vcombine.low %v2646_v22, %v2653_v20  ;;  %v2666_v28 = vrot.slane %v2664_v21, 1 }
 0x1b0   : > { %3548 = vmatprep.mubr.bf16.mxu1 %v4889_v27  ;;  %v2659_v7 = vrot.slane %v2657_v44, 1  ;;  %v2655_v27 = vshrl.u32 %v2458_v18, 16 }
 0x1b1   : > { %4592 = vmatpush3.bf16.msra.mxu1 %v4890_v29  ;;  %v2662_v29 = vshrl.u32 %v2459_v25, 16 }
 0x1b2   : > { %4593 = vmatprep.subr.bf16.mxu1 %v4891_v30  ;;  %v2660_v31 = vor.u32 %v2659_v7, %v2655_v27 }
 0x1b3   : > { %v2667_v30 = vor.u32 %v2666_v28, %v2662_v29 }
 0x1b5   : > { %4594 = vmatpush3.bf16.msra.mxu1 %v4892_v33  ;;  %v4189_v63 = vcombine.low %v2660_v31, %v2667_v30  ;;  %v4905_v33 = vld [vmem:[#allocation2 + $0x40] ss:$8 sps:$4 sm:$0xff]  }
 0x1b6   : > { %4595 = vmatprep.subr.bf16.mxu1 %v4893_v5 }
 0x1b7   : > { %3549 = vmatmul.mubr.bf16.gmra.mrb[64].mxu1 %v4175_v40 }
 0x1b8   : > { %3556 = vmatprep.mubr.bf16.mxu1 %v4894_v6 }
 0x1b9   : > { %4596 = vmatpush3.bf16.msra.mxu1 %v4895_v41 }
 0x1ba   : > { %4597 = vmatprep.subr.bf16.mxu1 %v4896_v42 }
 0x1bd   : > { %4598 = vmatpush3.bf16.msra.mxu1 %v4897_v48 }
 0x1be   : > { %4599 = vmatprep.subr.bf16.mxu1 %v4898_v49 }
 0x1bf   : > { %3557 = vmatmul.mubr.bf16.gmra.mrb[68].mxu1 %v4184_v59 }
 0x1c0   : > { %3662 = vmatprep.mubr.bf16.mxu1 %v4162_v62 }
 0x1c1   : > { %4600 = vmatpush3.bf16.msra.mxu1 %v4899_v34 }
 0x1c2   : > { %4601 = vmatprep.subr.bf16.mxu1 %v4900_v1 }
 0x1c5   : > { %4602 = vmatpush3.bf16.msra.mxu1 %v4901_v3 }
 0x1c8   : > { %3663 = vmatmul.mubr.bf16.vlgmr.msra.gmra.mrb[72].mxu1 %v4902_v11 }
 0x1c9   : > { %3670 = vmatprep.mubr.bf16.mxu1 %v4171_v12 }
 0x1d0   : > { %3671 = vmatmul.mubr.bf16.gmra.mrb[76].mxu1 %v4903_v24 }
 0x1d1   : > { %3678 = vmatprep.mubr.bf16.mxu1 %v4180_v26 }
 0x1d8   : > { %3679 = vmatmul.mubr.bf16.gmra.mrb[80].mxu1 %v4904_v39 }
 0x1d9   : > { %3686 = vmatprep.mubr.bf16.mxu1 %v4189_v63 }
 0x1e0   : > { %3687 = vmatmul.mubr.bf16.gmra.mrb[84].mxu1 %v4905_v33 }
 0x256   : > { %v4563_v35 = vpop.f32.mrb[60].mxu0 }
 0x257   : > { %v4564_v37 = vpop.f32.mrb[61].mxu0 }
 0x258   : > { %v4565_v5 = vadd.f32 %v4564_v37, %v4563_v35  ;;  %v4566_v38 = vpop.f32.mrb[62].mxu0 }
 0x259   : > { %v4483_v0 = vpop.f32.mrb[40].mxu1  ;;  %v4567_v36 = vpop.f32.mrb[63].mxu0 }
 0x25a   : > { %v4484_v40 = vpop.f32.mrb[41].mxu1  ;;  %v4568_v41 = vadd.f32 %v4567_v36, %v4566_v38 }
 0x25b   : > { %v4485_v6 = vadd.f32 %v4484_v40, %v4483_v0  ;;  %v4486_v42 = vpop.f32.mrb[42].mxu1 }
 0x25c   : > { %v4487_v45 = vpop.f32.mrb[43].mxu1 }
 0x25d   : > { %v4488_v16 = vadd.f32 %v4487_v45, %v4486_v42  ;;  %v3470_v24 = vadd.f32 %v4485_v6, %v4154_v43 }
 0x25f   : > { %v3473_v30 = vadd.f32 %v4488_v16, %v4154_v43 }
 0x261   : > { %v4489_v46 = vpop.f32.mrb[44].mxu1 }
 0x262   : > { %v4569_v57 = vpop.f32.mrb[64].mxu0  ;;  %v4490_v47 = vpop.f32.mrb[45].mxu1 }
 0x263   : > { %v4570_v15 = vpop.f32.mrb[65].mxu0  ;;  %v4491_v48 = vadd.f32 %v4490_v47, %v4489_v46  ;;  %v4492_v54 = vpop.f32.mrb[46].mxu1 }
 0x264   : > { %v4571_v49 = vadd.f32 %v4570_v15, %v4569_v57  ;;  %v4572_v50 = vpop.f32.mrb[66].mxu0  ;;  %v4493_v52 = vpop.f32.mrb[47].mxu1 }
 0x265   : > { %v4573_v55 = vpop.f32.mrb[67].mxu0  ;;  %v4494_v32 = vadd.f32 %v4493_v52, %v4492_v54  ;;  %v3478_v40 = vadd.f32 %v4491_v48, %v4154_v43 }
 0x266   : > { %v4574_v56 = vadd.f32 %v4573_v55, %v4572_v50 }
 0x267   : > { %v3481_v16 = vadd.f32 %v4494_v32, %v4154_v43 }
 0x269   : > { %v4495_v58 = vpop.f32.mrb[48].mxu1 }
 0x26a   : > { %v4575_v59 = vpop.f32.mrb[68].mxu0  ;;  %v4496_v34 = vpop.f32.mrb[49].mxu1 }
 0x26b   : > { %v4576_v60 = vpop.f32.mrb[69].mxu0  ;;  %v4497_v62 = vadd.f32 %v4496_v34, %v4495_v58  ;;  %v4498_v1 = vpop.f32.mrb[50].mxu1 }
 0x26c   : > { %v4577_v17 = vadd.f32 %v4576_v60, %v4575_v59  ;;  %v4578_v2 = vpop.f32.mrb[70].mxu0  ;;  %v4499_v3 = vpop.f32.mrb[51].mxu1 }
 0x26d   : > { %v4579_v4 = vpop.f32.mrb[71].mxu0  ;;  %v4500_v19 = vadd.f32 %v4499_v3, %v4498_v1 }
 0x26e   : > { %v4580_v23 = vadd.f32 %v4579_v4, %v4578_v2 }
 0x26f   : > { %v3489_v48 = vadd.f32 %v4500_v19, %v4154_v43  ;;  %v4934_v19 = vmov 1966171168  }
 0x271   : > { %v4501_v53 = vpop.f32.mrb[52].mxu1 }
 0x272   : > { %v4581_v8 = vpop.f32.mrb[72].mxu0  ;;  %v4502_v9 = vpop.f32.mrb[53].mxu1 }
 0x273   : > { %v4582_v10 = vpop.f32.mrb[73].mxu0  ;;  %v4503_v61 = vadd.f32 %v4502_v9, %v4501_v53  ;;  %v4504_v11 = vpop.f32.mrb[54].mxu1 }
 0x274   : > { %v4583_v12 = vadd.f32 %v4582_v10, %v4581_v8  ;;  %v4584_v13 = vpop.f32.mrb[74].mxu0  ;;  %v4505_v25 = vpop.f32.mrb[55].mxu1 }
 0x275   : > { %v4585_v14 = vpop.f32.mrb[75].mxu0  ;;  %v4506_v51 = vadd.f32 %v4505_v25, %v4504_v11  ;;  %v3494_v8 = vadd.f32 %v4503_v61, %v4154_v43 }
 0x276   : > { %v4586_v18 = vadd.f32 %v4585_v14, %v4584_v13  ;;  %v3785_v14 = vunpack.c.l.s4 %v4934_v19 }
 0x27a   : > { %v5680_v20 = vpop.f32.mrb[76].mxu0  ;;  %v4523_v21 = vpop.f32.mrb[56].mxu1 }
 0x27b   : > { %v5682_v22 = vpop.f32.mrb[77].mxu0  ;;  %v4524_v44 = vpop.f32.mrb[57].mxu1 }
 0x27c   : > { %v5684_v26 = vpop.f32.mrb[78].mxu0  ;;  %v4525_v28 = vadd.f32 %v4524_v44, %v4523_v21  ;;  %v4526_v7 = vpop.f32.mrb[58].mxu1  ;;  %v3787_v21 = vlaneseq }
 0x27d   : > { %v5686_v29 = vpop.f32.mrb[79].mxu0  ;;  %v4527_v27 = vpop.f32.mrb[59].mxu1 }
 0x27e   : > { %v3535_v31 = vadd.f32 %v4525_v28, %v3470_v24  ;;  %v4528_v39 = vadd.f32 %v4527_v27, %v4526_v7  ;;  %v3786_v7 = vunpack.c.0.s8 %v3785_v14  ;;  %v3788_v61 = vshrl.u32 %v3787_v21, 7 }
 0x280   : > { %v3538_v63 = vadd.f32 %v4528_v39, %v3473_v30  ;;  %v3600_v33 = vadd.f32 %v4565_v5, %v3535_v31  ;;  %v5705_v39 = vsub.s32 %v3786_v7, %v3788_v61 }
 0x282   : > { %v5688_v35 = vpop.f32.mrb[80].mxu0  ;;  %v4529_v37 = vpop.f32.mrb[60].mxu1  ;;  %v3603_v38 = vadd.f32 %v4568_v41, %v3538_v63  ;;  %v3486_v41 = vadd.f32 %v4497_v62, %v4154_v43 }
 0x283   : > { %v5690_v0 = vpop.f32.mrb[81].mxu0  ;;  %v4530_v36 = vpop.f32.mrb[61].mxu1 }
 0x284   : > { %v5692_v6 = vpop.f32.mrb[82].mxu0  ;;  %v4531_v42 = vadd.f32 %v4530_v36, %v4529_v37  ;;  %v4532_v45 = vpop.f32.mrb[62].mxu1 }
 0x285   : > { %v5694_v46 = vpop.f32.mrb[83].mxu0  ;;  %v4533_v57 = vpop.f32.mrb[63].mxu1 }
 0x286   : > { %v3543_v47 = vadd.f32 %v4531_v42, %v3478_v40  ;;  %v4534_v15 = vadd.f32 %v4533_v57, %v4532_v45 }
 0x288   : > { %v3546_v54 = vadd.f32 %v4534_v15, %v3481_v16  ;;  %v3608_v5 = vadd.f32 %v4571_v49, %v3543_v47 }
 0x28a   : > { %v4535_v50 = vpop.f32.mrb[64].mxu1  ;;  %v3611_v52 = vadd.f32 %v4574_v56, %v3546_v54  ;;  %v3497_v56 = vadd.f32 %v4506_v51, %v4154_v43 }
 0x28b   : > { %v4536_v55 = vpop.f32.mrb[65].mxu1 }
 0x28c   : > { %v4537_v58 = vadd.f32 %v4536_v55, %v4535_v50  ;;  %v4538_v59 = vpop.f32.mrb[66].mxu1 }
 0x28d   : > { %v4539_v34 = vpop.f32.mrb[67].mxu1 }
 0x28e   : > { %v3551_v60 = vadd.f32 %v4537_v58, %v3486_v41  ;;  %v4540_v1 = vadd.f32 %v4539_v34, %v4538_v59 }
 0x290   : > { %v3554_v2 = vadd.f32 %v4540_v1, %v3489_v48  ;;  %v5696_v3 = vadd.f32 %v4577_v17, %v3551_v60 }
 0x292   : > { %v4541_v4 = vpop.f32.mrb[68].mxu1  ;;  %v5698_v53 = vadd.f32 %v4580_v23, %v3554_v2 }
 0x293   : > { %v4542_v32 = vpop.f32.mrb[69].mxu1 }
 0x294   : > { %v4543_v9 = vadd.f32 %v4542_v32, %v4541_v4  ;;  %v4544_v49 = vpop.f32.mrb[70].mxu1 }
 0x295   : > { %v4545_v10 = vpop.f32.mrb[71].mxu1 }
 0x296   : > { %v3559_v11 = vadd.f32 %v4543_v9, %v3494_v8  ;;  %v4546_v62 = vadd.f32 %v4545_v10, %v4544_v49 }
 0x298   : > { %v3562_v13 = vadd.f32 %v4546_v62, %v3497_v56  ;;  %v5700_v25 = vadd.f32 %v4583_v12, %v3559_v11 }
 0x29a   : > { %v5702_v44 = vadd.f32 %v4586_v18, %v3562_v13 }
 0x29b   : > { %v4603_v17 = vpop.f32.mrb[72].mxu1 }
 0x29c   : > { %v4604_v24 = vpop.f32.mrb[73].mxu1 }
 0x29d   : > { %v4605_v23 = vadd.f32 %v4604_v24, %v4603_v17  ;;  %v4606_v28 = vpop.f32.mrb[74].mxu1 }
 0x29e   : > { %v4607_v27 = vpop.f32.mrb[75].mxu1 }
 0x29f   : > { %v3665_v30 = vadd.f32 %v4605_v23, %v3600_v33  ;;  %v4608_v31 = vadd.f32 %v4607_v27, %v4606_v28 }
 0x2a1   : > { %v3730_v51 = vadd.f32 %v5682_v22, %v3665_v30  ;;  %v3668_v43 = vadd.f32 %v4608_v31, %v3603_v38 }
 0x2a3   : > { %vm3760_vm4 = vcmp.gt.f32.partialorder %v3730_v51, 0.0  ;;  %v3768_v12 = vmul.f32 0.2, %v3730_v51  ;;  %v3733_v63 = vadd.f32 %v5686_v29, %v3668_v43  ;;  %v4609_v18 = vpop.f32.mrb[76].mxu1 }
 0x2a4   : > { %v4610_v37 = vpop.f32.mrb[77].mxu1 }
 0x2a5   : > { %v3776_v36 = vsel %vm3760_vm4, %v3730_v51, %v3768_v12  ;;  %vm3761_vm5 = vcmp.gt.f32.partialorder %v3733_v63, 0.0  ;;  %v3769_v40 = vmul.f32 0.2, %v3733_v63  ;;  %v4611_v42 = vadd.f32 %v4610_v37, %v4609_v18  ;;  %v4612_v45 = vpop.f32.mrb[78].mxu1 }
 0x2a6   : > { %v3790_v57 = vrot.slane %v3776_v36, %v5705_v39  ;;  %v4613_v33 = vpop.f32.mrb[79].mxu1 }
 0x2a7   : > { %v3777_v16 = vsel %vm3761_vm5, %v3733_v63, %v3769_v40  ;;  %v3673_v47 = vadd.f32 %v4611_v42, %v3608_v5  ;;  %v4614_v22 = vadd.f32 %v4613_v33, %v4612_v45 }
 0x2a8   : > { %v3848_v38 = vrot.slane %v3790_v57, 4  ;;  %v3797_v15 = vrot.slane %v3777_v16, %v5705_v39 }
 0x2a9   : > { %v3738_v54 = vadd.f32 %v5680_v20, %v3673_v47  ;;  %v3676_v29 = vadd.f32 %v4614_v22, %v3611_v52 }
 0x2aa   : > { %v3849_v50 = vrot.slane %v3797_v15, 4  ;;  %v3864_v59 = vadd.f32 %v3848_v38, %v3790_v57 }
 0x2ab   : > { %vm3762_vm6 = vcmp.gt.f32.partialorder %v3738_v54, 0.0  ;;  %v3770_v55 = vmul.f32 0.2, %v3738_v54  ;;  %v3741_v41 = vadd.f32 %v5684_v26, %v3676_v29  ;;  %v4615_v58 = vpop.f32.mrb[80].mxu1 }
 0x2ac   : > { %v3865_v34 = vadd.f32 %v3849_v50, %v3797_v15  ;;  %v4616_v48 = vpop.f32.mrb[81].mxu1 }
 0x2ad   : > { %v3778_v60 = vsel %vm3762_vm6, %v3738_v54, %v3770_v55  ;;  %vm3763_vm7 = vcmp.gt.f32.partialorder %v3741_v41, 0.0  ;;  %v3771_v5 = vmul.f32 0.2, %v3741_v41  ;;  %v4617_v1 = vadd.f32 %v4616_v48, %v4615_v58  ;;  %v4618_v2 = vpop.f32.mrb[82].mxu1 }
 0x2ae   : > { %v3872_v4 = vadd.f32 %v3865_v34, %v3864_v59  ;;  %v3804_v32 = vrot.slane %v3778_v60, %v5705_v39  ;;  %v4619_v20 = vpop.f32.mrb[83].mxu1 }
 0x2af   : > { %v3779_v52 = vsel %vm3763_vm7, %v3741_v41, %v3771_v5  ;;  %v3681_v8 = vadd.f32 %v4617_v1, %v5696_v3  ;;  %v4620_v9 = vadd.f32 %v4619_v20, %v4618_v2 }
 0x2b0   : > { %v3876_v49 = vmul.f32 0.25, %v3872_v4  ;;  %v3850_v26 = vrot.slane %v3804_v32, 4  ;;  %v3811_v10 = vrot.slane %v3779_v52, %v5705_v39 }
 0x2b1   : > { %v3746_v56 = vadd.f32 %v5690_v0, %v3681_v8  ;;  %v3684_v11 = vadd.f32 %v4620_v9, %v5698_v53 }
 0x2b2   : > { %v3880_v62 = vpack.c.bf16 %v3876_v49, %v3876_v49  ;;  %v3851_v13 = vrot.slane %v3811_v10, 4  ;;  %v3866_v21 = vadd.f32 %v3850_v26, %v3804_v32 }
 0x2b3   : > { %vm3764_vm8 = vcmp.gt.f32.partialorder %v3746_v56, 0.0  ;;  %v3772_v19 = vmul.f32 0.2, %v3746_v56  ;;  %v3749_v3 = vadd.f32 %v5694_v46, %v3684_v11  ;;  %v4621_v14 = vpop.f32.mrb[84].mxu1 }
 0x2b4   : > { %3884 = vst [vmem:[%s5719_s10] sm:$0x3] %v3880_v62  ;;  %v3867_v17 = vadd.f32 %v3851_v13, %v3811_v10  ;;  %v4622_v24 = vpop.f32.mrb[85].mxu1 }
 0x2b5   : > { %v3780_v23 = vsel %vm3764_vm8, %v3746_v56, %v3772_v19  ;;  %vm3765_vm9 = vcmp.gt.f32.partialorder %v3749_v3, 0.0  ;;  %v3773_v28 = vmul.f32 0.2, %v3749_v3  ;;  %v4623_v7 = vadd.f32 %v4622_v24, %v4621_v14  ;;  %v4624_v61 = vpop.f32.mrb[86].mxu1 }
 0x2b6   : > { %v3873_v27 = vadd.f32 %v3867_v17, %v3866_v21  ;;  %v3818_v0 = vrot.slane %v3780_v23, %v5705_v39  ;;  %v4625_v53 = vpop.f32.mrb[87].mxu1 }
 0x2b7   : > { %v3781_v30 = vsel %vm3765_vm9, %v3749_v3, %v3773_v28  ;;  %v3689_v31 = vadd.f32 %v4623_v7, %v5700_v25  ;;  %v4626_v51 = vadd.f32 %v4625_v53, %v4624_v61 }
 0x2b8   : > { %v3877_v46 = vmul.f32 0.25, %v3873_v27  ;;  %v3852_v43 = vrot.slane %v3818_v0, 4  ;;  %v3825_v12 = vrot.slane %v3781_v30, %v5705_v39 }
 0x2b9   : > { %v3754_v63 = vadd.f32 %v5688_v35, %v3689_v31  ;;  %v3692_v18 = vadd.f32 %v4626_v51, %v5702_v44 }
 0x2ba   : > { %v3881_v37 = vpack.c.bf16 %v3877_v46, %v3877_v46  ;;  %v3853_v36 = vrot.slane %v3825_v12, 4  ;;  %v3868_v45 = vadd.f32 %v3852_v43, %v3818_v0 }
 0x2bb   : > { %vm3766_vm10 = vcmp.gt.f32.partialorder %v3754_v63, 0.0  ;;  %v3774_v40 = vmul.f32 0.2, %v3754_v63  ;;  %v3757_v42 = vadd.f32 %v5692_v6, %v3692_v18 }
 0x2bc   : > { %3885 = vst [vmem:[%s5719_s10 + $0x2] sm:$0x3] %v3881_v37  ;;  %v3869_v57 = vadd.f32 %v3853_v36, %v3825_v12 }
 0x2bd   : > { %v3782_v25 = vsel %vm3766_vm10, %v3754_v63, %v3774_v40  ;;  %vm3767_vm11 = vcmp.gt.f32.partialorder %v3757_v42, 0.0  ;;  %v3775_v33 = vmul.f32 0.2, %v3757_v42 }
 0x2be   : > { %v3874_v16 = vadd.f32 %v3869_v57, %v3868_v45  ;;  %v3832_v47 = vrot.slane %v3782_v25, %v5705_v39 }
 0x2bf   : > { %v3783_v35 = vsel %vm3767_vm11, %v3757_v42, %v3775_v33 }
 0x2c0   : > { %v3878_v22 = vmul.f32 0.25, %v3874_v16  ;;  %v3854_v44 = vrot.slane %v3832_v47, 4  ;;  %v3839_v38 = vrot.slane %v3783_v35, %v5705_v39 }
 0x2c2   : > { %v3882_v15 = vpack.c.bf16 %v3878_v22, %v3878_v22  ;;  %v3855_v54 = vrot.slane %v3839_v38, 4  ;;  %v3870_v29 = vadd.f32 %v3854_v44, %v3832_v47 }
 0x2c4   : > { %3886 = vst [vmem:[%s5719_s10 + $0x4] sm:$0x3] %v3882_v15  ;;  %v3871_v6 = vadd.f32 %v3855_v54, %v3839_v38 }
 0x2c6   : > { %v3875_v50 = vadd.f32 %v3871_v6, %v3870_v29 }
 0x2c8   : > { %v3879_v55 = vmul.f32 0.25, %v3875_v50 }
 0x2ca   : > { %v3883_v41 = vpack.c.bf16 %v3879_v55, %v3879_v55 }
 0x2cc   : > { %3887 = vst [vmem:[%s5719_s10 + $0x6] sm:$0x3] %v3883_v41 }
 0x2cd PF: > { %s17_s2 = sadd.s32 1, %s4929_s2   ;;  %s5759_s24 = smov %s4925_s1 }
 0x2ce   : > { %p14_p5 = scmp.ge.s32.totalorder %s17_s2, 4   ;;  %s5760_s1 = smov %s5762_s25 }
 0x2d0   :  { %16 = sbr.rel (!%p14_p5) target bundleno = 2 (0x2), region = 92 }

// kernel: progressive_discriminator.3
= control target key start
LH: loop header
LB: loop body
LE: loop exit
PB: predicated region body
PF: predicated region fallthrough
CT: control target
= control target key end

     0   :  { %14 = vsyncpa [#allocation4], 0  ;;  %s12216_s0 = inlined_call_operand.vmem [shape: bf16[2,16,16,3], index: 0, kind: input, shape index: {}, may-alias: {0,1,2}]   ;;  %s12217_s1 = inlined_call_operand.vmem [shape: bf16[2,16,16,3], index: 1, kind: input, shape index: {}, may-alias: {0,1,2}]   ;;  %s12218_s2 = inlined_call_operand.vmem [shape: bf16[2,16,16,3], index: 2, kind: input, shape index: {}, may-alias: {0,1,2}]   ;;  %s12219_s3 = inlined_call_operand.vmem [shape: f32[3,128], index: 3, kind: input, shape index: {}]   ;;  %s12220_s4 = inlined_call_operand.vmem [shape: f32[1,128], index: 4, kind: input, shape index: {}]   ;;  %s12221_s5 = inlined_call_operand.hbm [shape: bf16[1152,128], index: 5, kind: input, shape index: {}]   ;;  %s12222_s6 = inlined_call_operand.vmem [shape: f32[1,128], index: 6, kind: input, shape index: {}]   ;;  %s12223_s7 = inlined_call_operand.hbm [shape: bf16[1152,128], index: 7, kind: input, shape index: {}]   ;;  %s12224_s8 = inlined_call_operand.vmem [shape: f32[1,128], index: 8, kind: input, shape index: {}]   ;;  %s12225_s9 = inlined_call_operand.vmem [shape: bf16[2,8,8,128], index: 9, kind: output, shape index: {}]  }
   0x1   :  { %15 = vsyncpa [#allocation6], 0  ;;  %s9926_s28 = smov 0   ;;  %s9928_s29 = smov 0  }
   0x2   :  { %s9930_s30 = smov 0  }
   0x3 LB: > { %s8099_s10 = sadd.s32 4294967295, %s9866_s30   ;;  %s33_s11 = sadd.s32 1, %s9862_s29  ;;  %s9866_s30 = sphi %s9930_s30, %s21_s30   ;;  %s9862_s29 = sphi %s9928_s29, %s12269_s29   ;;  %s9858_s28 = sphi %s9926_s28, %s12268_s28  }
   0x4   : > { %p35_p0 = scmp.ge.s32.totalorder %s33_s11, 2  ;;  %p8101_p1 = scmp.ge.s32.totalorder %s9866_s30, 1 }
   0x5   : > { %p292_p2 = scmp.lt.s32.totalorder %s9866_s30, 3  ;;  %p9951_p4 = scmp.eq.s32.totalorder %s8099_s10, 0 }
   0x6   : > { %s12271_s11 = smov (%p35_p0, %s33_s11), 0  ;;  %s9868_s14 = smov [#allocation3]  }
   0x7   : > { %p9947_p3 = pnand %p8101_p1, %p292_p2  ;;  %s310_s15 = sshll.u32 %s9868_s14, 4  ;;  %s311_s15 = int_to_ptr.vmem [resolvable:$true] %s310_s15 }
   0x8   : > { %s12232_s13 = scalar_select %p9951_p4, 1, 0 }
   0x9   : > { %s12231_s12 = scalar_select %p9947_p3, 1, 0 }
   0xa   : > { %p9276_p5 = pneg %p9947_p3  ;;  %s9869_s17 = smov [#allocation5]  }
   0xb   : > { %s326_s18 = sshll.u32 %s9869_s17, 4  ;;  %s9780_s21 = scalar_lea.hbm %s12221_s5, 9216  ;;  %s9963_s18 = int_to_ptr.vmem [resolvable:$true] %s326_s18 }
   0xc   : > { %p9959_p6 = pnand %p9951_p4, %p9276_p5  ;;  %p9781_p7 = scmp.ne.s32.totalorder %s12221_s5, %s9780_s21 }
   0xd   : > { %p9787_p11 = scmp.lt.u32.totalorder %s9780_s21, %s12221_s5 }
   0xe   : > { %p9782_p8 = pneg %p9959_p6 }
  0x10   : > { %p9783_p9 = pnand %p9782_p8, %p9781_p7 }
  0x12   : > { %p9784_p10 = pneg %p9783_p9 }
  0x14   : > { %p9789_p12 = pnand %p9787_p11, %p9784_p10 }
  0x16   : > { %9792 = shalt.err (!%p9789_p12)
}
  0x17   : > { %s9793_s26 = scalar_lea.vmem %s311_s15, 9216  ;;  %p9801_p2 = scmp.lt.s32.totalorder %s311_s15, %s311_s15 }
  0x18   : > { %p9794_p13 = scmp.ne.s32.totalorder %s311_s15, %s9793_s26  ;;  %p9802_p5 = scmp.lt.s32.totalorder %s9793_s26, %s9793_s26 }
  0x1a   : > { %p9796_p0 = pnand %p9794_p13, %p9782_p8  ;;  %p9803_p4 = por %p9802_p5, %p9801_p2 }
  0x1c   : > { %p9797_p1 = pneg %p9796_p0 }
  0x1e   : > { %p9804_p3 = pnand %p9803_p4, %p9797_p1 }
  0x20   : > { %9807 = shalt.err (!%p9804_p3)
}
  0x21   : > { %s9870_s1 = smov 64   ;;  %s9871_s27 = smov 4  }
  0x22   : > { %9279 = dma.hbm_to_vmem [thread:$0]  (!%p9959_p6), %s12221_s5, 9216, %s311_s15, [#allocation4], %s9870_s1, %s9870_s1, %s9871_s27  }
  0x23   : > { %s9808_s19 = scalar_lea.hbm %s12223_s7, 9216 }
  0x24   : > { %p9809_p7 = scmp.ne.s32.totalorder %s12223_s7, %s9808_s19  ;;  %p9815_p9 = scmp.lt.u32.totalorder %s9808_s19, %s12223_s7 }
  0x26   : > { %p9811_p3 = pnand %p9809_p7, %p9782_p8 }
  0x28   : > { %p9812_p4 = pneg %p9811_p3 }
  0x2a   : > { %p9817_p10 = pnand %p9815_p9, %p9812_p4 }
  0x2c   : > { %9820 = shalt.err (!%p9817_p10)
}
  0x2d   : > { %s9821_s15 = scalar_lea.vmem %s9963_s18, 9216  ;;  %p9829_p0 = scmp.lt.s32.totalorder %s9963_s18, %s9963_s18 }
  0x2e   : > { %p9822_p11 = scmp.ne.s32.totalorder %s9963_s18, %s9821_s15  ;;  %p9830_p1 = scmp.lt.s32.totalorder %s9821_s15, %s9821_s15 }
  0x30   : > { %p9824_p12 = pnand %p9822_p11, %p9782_p8  ;;  %p9831_p2 = por %p9830_p1, %p9829_p0 }
  0x32   : > { %p9825_p13 = pneg %p9824_p12 }
  0x34   : > { %p9832_p5 = pnand %p9831_p2, %p9825_p13 }
  0x36   : > { %9835 = shalt.err (!%p9832_p5)
}
  0x37   : > { %9282 = dma.hbm_to_vmem [thread:$0]  (!%p9959_p6), %s12223_s7, 9216, %s9963_s18, [#allocation6], %s9870_s1, %s9870_s1, %s9871_s27  }
  0x38   : > { %p12234_p7 = scmp.ne.s32.totalorder %s12231_s12, 0 }
  0x3a   : > { %403 = sbr.rel (%p12234_p7) target bundleno = 1875 (0x753), region = 56 }
  0x41   : > { %p12235_p3 = scmp.ne.s32.totalorder %s12232_s13, 0 }
  0x43   : > { %9849 = dma.done.wait (%p12235_p3), [#allocation4], 9216  }
  0x44   : > { %9851 = vsyncadd (%p12235_p3), [#allocation4], 4294958080 }
  0x45   : > { %9853 = dma.done.wait (%p12235_p3), [#allocation6], 9216  }
  0x46   : > { %9855 = vsyncadd (%p12235_p3), [#allocation6], 4294958080  ;;  %p481_p8 = scmp.lt.s32.totalorder %s9858_s28, 1  ;;  %v9872_v0 = vmov 2   ;;  %v9873_v1 = vmov 0   ;;  %v9600_v9 = vld [vmem:[#allocation3] sm:$0xff]  }
  0x47   : > { %9331 = vset.pattern.permute.xlu1 %v9872_v0  ;;  %9319 = vset.pattern.permute.xlu0 %v9873_v1  ;;  %v9601_v11 = vld [vmem:[#allocation3 + $0x8] sm:$0xff]   ;;  %v9874_v12 = vmov 1   ;;  %v9602_v16 = vld [vmem:[#allocation3 + $0x10] sm:$0xff]   ;;  %v9603_v19 = vld [vmem:[#allocation3 + $0x18] sm:$0xff]   ;;  %vm540_vm0 = vcmask 1040384   ;;  %vm797_vm5 = vcmask 1047552  }
  0x48   : > { %s12273_s28 = smov (!%p481_p8, %s9858_s28), 1  ;;  %3677 = vmatprep.subr.bf16.mxu0 %v9873_v1  ;;  %vm603_vm1 = vsmask.f32 7938  ;;  %vm541_vm2 = vsmask.f32 256  ;;  %v9604_v29 = vld [vmem:[#allocation3 + $0x20] sm:$0xff]  }
  0x49   : > { %s8276_s12 = sshll.u32 %s12273_s28, 7  ;;  %3678 = vmatpush1.bf16.msra.mxu0 %v9600_v9  ;;  %vm10049_vm3 = vmand %vm540_vm0, %vm541_vm2  ;;  %v549_v24 = vld [vmem:[#allocation2 + $0x20] sm:$0x1]  ;;  %v611_v25 = vld [vmem:[#allocation2 + $0x28] sm:$0x1]  ;;  %v10095_v59 = vrot.slane %v9873_v1, 7 }
  0x4a   : > { %s10033_s13 = scalar_lea.vmem %s12216_s0, %s8276_s12  ;;  %3679 = vmatprep.subr.bf16.mxu0 %v9873_v1  ;;  %vm10057_vm4 = vmand %vm540_vm0, %vm603_vm1  ;;  %v550_v28 = vsel %vm10049_vm3, 0, %v549_v24  ;;  %v552_v34 = vld [vmem:[#allocation2 + $0x30] sm:$0x1]  ;;  %v614_v35 = vld [vmem:[#allocation2 + $0x38] sm:$0x1]  ;;  %vm2337_vm8 = vcmask 1046528  }
  0x4b   : > { %v8298_v2 = vld [vmem:[%s10033_s13] sm:$0xff]   ;;  %v8384_v3 = vld [vmem:[%s10033_s13 + $0x8] sm:$0xff]   ;;  %v8385_v13 = vld [vmem:[%s10033_s13 + $0x10] sm:$0xff]   ;;  %551 = vst [vmem:[#allocation2 + $0x20] sm:$0x1] %v550_v28  ;;  %v612_v30 = vsel %vm10057_vm4, 0, %v611_v25 }
  0x4c   : > { %v8299_v4 = vunpack.c.l.bf16 %v8298_v2  ;;  %v8300_v5 = vunpack.c.h.bf16 %v8298_v2  ;;  %v8303_v6 = vunpack.c.l.bf16 %v8384_v3  ;;  %v8304_v7 = vunpack.c.h.bf16 %v8384_v3  ;;  %v8386_v18 = vld [vmem:[%s10033_s13 + $0x18] sm:$0xff]   ;;  %v8387_v22 = vld [vmem:[%s10033_s13 + $0x20] sm:$0xff]   ;;  %v8388_v33 = vld [vmem:[%s10033_s13 + $0x28] sm:$0xff]   ;;  %613 = vst [vmem:[#allocation2 + $0x28] sm:$0x1] %v612_v30  ;;  %s8280_s1 = sshll.u32 %s12273_s28, 5 }
  0x4d   : > { %3680 = vmatpush1.bf16.msra.mxu0 %v9601_v11  ;;  %v8307_v14 = vunpack.c.l.bf16 %v8385_v13  ;;  %v8308_v15 = vunpack.c.h.bf16 %v8385_v13  ;;  %v8311_v20 = vunpack.c.l.bf16 %v8386_v18  ;;  %v8312_v21 = vunpack.c.h.bf16 %v8386_v18  ;;  %v9605_v41 = vld [vmem:[#allocation3 + $0x28] sm:$0xff]   ;;  %v543_v42 = vld [vmem:[#allocation2] sm:$0x1]  ;;  %v8389_v44 = vld [vmem:[%s10033_s13 + $0x30] sm:$0xff]   ;;  %s12155_s2 = scalar_lea.vmem %s12225_s9, %s8280_s1 }
  0x4e   : > { %v9332_v8 = vpack.i.bf16 %v8300_v5, %v8299_v4  ;;  %v9338_v10 = vpack.i.bf16 %v8304_v7, %v8303_v6  ;;  %3681 = vmatprep.subr.bf16.mxu0 %v9873_v1  ;;  %v8315_v31 = vunpack.c.l.bf16 %v8387_v22  ;;  %v8316_v32 = vunpack.c.h.bf16 %v8387_v22  ;;  %v605_v43 = vld [vmem:[#allocation2 + $0x8] sm:$0x1]  ;;  %v546_v47 = vld [vmem:[#allocation2 + $0x10] sm:$0x1]  ;;  %v608_v49 = vld [vmem:[#allocation2 + $0x18] sm:$0x1] }
  0x4f   : > { %v9367_v17 = vpack.i.bf16 %v8308_v15, %v8307_v14  ;;  %v10053_v26 = vpack.i.bf16 %v8312_v21, %v8311_v20  ;;  %v553_v36 = vsel %vm10049_vm3, 0, %v552_v34  ;;  %v615_v37 = vsel %vm10057_vm4, 0, %v614_v35  ;;  %v9606_v54 = vld [vmem:[#allocation3 + $0x30] sm:$0xff]   ;;  %v617_v55 = vld [vmem:[#allocation2 + $0x48] sm:$0x1]  ;;  %v9607_v57 = vld [vmem:[#allocation3 + $0x38] sm:$0xff]  }
  0x50   : > { %9333 = vperm.xlu1 %9331, %v9332_v8   ;;  %9321 = vperm.xlu0 %9319, %v9332_v8   ;;  %v10074_v38 = vpack.i.bf16 %v8316_v32, %v8315_v31  ;;  %554 = vst [vmem:[#allocation2 + $0x30] sm:$0x1] %v553_v36  ;;  %616 = vst [vmem:[#allocation2 + $0x38] sm:$0x1] %v615_v37  ;;  %v8319_v39 = vunpack.c.l.bf16 %v8388_v33  ;;  %v8320_v40 = vunpack.c.h.bf16 %v8388_v33  ;;  %v544_v45 = vsel %vm10049_vm3, 0, %v543_v42  ;;  %v8390_v6 = vld [vmem:[%s10033_s13 + $0x38] sm:$0xff]  }
  0x51   : > { %3682 = vmatpush1.bf16.msra.mxu0 %v9602_v16  ;;  %v606_v46 = vsel %vm10057_vm4, 0, %v605_v43  ;;  %545 = vst [vmem:[#allocation2] sm:$0x1] %v544_v45  ;;  %v547_v48 = vsel %vm10049_vm3, 0, %v546_v47  ;;  %v609_v50 = vsel %vm10057_vm4, 0, %v608_v49  ;;  %v8323_v52 = vunpack.c.l.bf16 %v8389_v44  ;;  %vm10099_vm6 = vmand %vm797_vm5, %vm603_vm1  ;;  %v9608_v9 = vld [vmem:[#allocation3 + $0x40] sm:$0xff]  }
  0x52   : > { %3683 = vmatprep.subr.bf16.mxu0 %v9873_v1  ;;  %607 = vst [vmem:[#allocation2 + $0x8] sm:$0x1] %v606_v46  ;;  %548 = vst [vmem:[#allocation2 + $0x10] sm:$0x1] %v547_v48  ;;  %v10088_v51 = vpack.i.bf16 %v8320_v40, %v8319_v39  ;;  %v8324_v53 = vunpack.c.h.bf16 %v8389_v44  ;;  %v618_v56 = vsel %vm10057_vm4, 0, %v617_v55  ;;  %v8327_v16 = vunpack.c.l.bf16 %v8390_v6  ;;  %v8391_v18 = vld [vmem:[%s10033_s13 + $0x40] sm:$0xff]  }
  0x53   : > { %610 = vst [vmem:[#allocation2 + $0x18] sm:$0x1] %v609_v50  ;;  %v555_v58 = vld [vmem:[#allocation2 + $0x40] sm:$0x1]  ;;  %619 = vst [vmem:[#allocation2 + $0x48] sm:$0x1] %v618_v56  ;;  %v8331_v28 = vunpack.c.l.bf16 %v8391_v18 }
  0x54   : > { %9337 = vset.pattern.permute.xlu1 %v9873_v1  ;;  %9325 = vset.pattern.permute.xlu0 %v9874_v12  ;;  %v556_v61 = vsel %vm10049_vm3, 0, %v555_v58  ;;  %v10106_v62 = vpack.i.bf16 %v8324_v53, %v8323_v52  ;;  %v620_v11 = vld [vmem:[#allocation2 + $0x58] sm:$0x1]  ;;  %v558_v15 = vld [vmem:[#allocation2 + $0x50] sm:$0x1]  ;;  %v8392_v32 = vld [vmem:[%s10033_s13 + $0x48] sm:$0xff]  }
  0x55   : > { %9339 = vperm.xlu1 %9337, %v9338_v10   ;;  %9327 = vperm.xlu0 %9325, %v9332_v8   ;;  %557 = vst [vmem:[#allocation2 + $0x40] sm:$0x1] %v556_v61  ;;  %v621_v14 = vsel %vm10057_vm4, 0, %v620_v11  ;;  %v559_v20 = vsel %vm10049_vm3, 0, %v558_v15  ;;  %v9610_v30 = vld [vmem:[#allocation3 + $0x50] sm:$0xff]   ;;  %v9611_v36 = vld [vmem:[#allocation3 + $0x58] sm:$0xff]   ;;  %v8335_v37 = vunpack.c.l.bf16 %v8392_v32 }
  0x56   : > { %3684 = vmatpush1.bf16.msra.mxu0 %v9603_v19  ;;  %622 = vst [vmem:[#allocation2 + $0x58] sm:$0x1] %v621_v14  ;;  %v9609_v19 = vld [vmem:[#allocation3 + $0x48] sm:$0xff]   ;;  %560 = vst [vmem:[#allocation2 + $0x50] sm:$0x1] %v559_v20  ;;  %v8393_v35 = vld [vmem:[%s10033_s13 + $0x50] sm:$0xff]  }
  0x57   : > { %3685 = vmatprep.subr.bf16.mxu0 %v9873_v1  ;;  %vm2066_vm7 = vsmask.f32 7424  ;;  %v561_v40 = vld [vmem:[#allocation2 + $0x60] sm:$0x1]  ;;  %v8394_v43 = vld [vmem:[%s10033_s13 + $0x58] sm:$0xff]   ;;  %v8339_v47 = vunpack.c.l.bf16 %v8393_v35  ;;  %v8340_v48 = vunpack.c.h.bf16 %v8393_v35  ;;  %v9613_v50 = vld [vmem:[#allocation3 + $0x68] sm:$0xff]  }
  0x58   : > { %v799_v63 = vld [vmem:[#allocation2] sm:$0xff]  ;;  %v562_v45 = vsel %vm10049_vm3, 0, %v561_v40  ;;  %v8344_v55 = vunpack.c.h.bf16 %v8394_v43  ;;  %v9614_v58 = vld [vmem:[#allocation3 + $0x70] sm:$0xff]   ;;  %v629_v20 = vld [vmem:[#allocation2 + $0x88] sm:$0x1] }
  0x59   : > { %9343 = vset.pattern.permute.xlu1 %v9874_v12  ;;  %9349 = vset.pattern.permute.xlu0 %v9872_v0  ;;  %v802_v2 = vld [vmem:[#allocation2 + $0x8] sm:$0x1]  ;;  %v10114_v3 = vsel %vm10099_vm6, %v10095_v59, %v799_v63  ;;  %v805_v5 = vld [vmem:[#allocation2 + $0x10] sm:$0xff]  ;;  %v9612_v44 = vld [vmem:[#allocation3 + $0x60] sm:$0xff]   ;;  %563 = vst [vmem:[#allocation2 + $0x60] sm:$0x1] %v562_v45  ;;  %v10171_v53 = vpack.i.bf16 %v8340_v48, %v8339_v47 }
  0x5a   : > { %9345 = vperm.xlu1 %9343, %v9338_v10   ;;  %9351 = vperm.xlu0 %9349, %v9338_v10   ;;  %v803_v4 = vsel %vm10049_vm3, %v10095_v59, %v802_v2  ;;  %801 = vst [vmem:[#allocation2] sm:$0xff] %v10114_v3  ;;  %v10124_v7 = vsel %vm10099_vm6, %v10095_v59, %v805_v5  ;;  %v808_v8 = vld [vmem:[#allocation2 + $0x18] sm:$0x1]  ;;  %v2070_v10 = vshll.u32 %v10114_v3, 16  ;;  %v2068_v21 = vshrl.u32 %v10114_v3, 16  ;;  %v9617_v49 = vld [vmem:[#allocation3 + $0x200] sm:$0xff]  }
  0x5b   : > { %3686 = vmatpush1.bf16.msra.mxu0 %v9604_v29  ;;  %804 = vst [vmem:[#allocation2 + $0x8] sm:$0x1] %v803_v4  ;;  %807 = vst [vmem:[#allocation2 + $0x10] sm:$0xff] %v10124_v7  ;;  %v809_v13 = vsel %vm10049_vm3, %v10095_v59, %v808_v8  ;;  %v8332_v29 = vunpack.c.h.bf16 %v8391_v18  ;;  %v2082_v56 = vshll.u32 %v10124_v7, 16  ;;  %9000 = vmatprep.subr.bf16.mxu1 %v9617_v49  ;;  %v2080_v61 = vshrl.u32 %v10124_v7, 16  ;;  %v8395_v8 = vld [vmem:[%s10033_s13 + $0x60] sm:$0xff]  }
  0x5c   : > { %3687 = vmatprep.subr.bf16.mxu0 %v9873_v1  ;;  %810 = vst [vmem:[#allocation2 + $0x18] sm:$0x1] %v809_v13  ;;  %v2072_v22 = vrot.slane %v2070_v10, 1  ;;  %9008 = vmatpush3.bf16.msra.mxu1 %v9617_v49  ;;  %v564_v2 = vld [vmem:[#allocation2 + $0x70] sm:$0x1]  ;;  %v9615_v10 = vld [vmem:[#allocation3 + $0x78] sm:$0xff]   ;;  %v8347_v14 = vunpack.c.l.bf16 %v8395_v8  ;;  %v8348_v15 = vunpack.c.h.bf16 %v8395_v8 }
  0x5d   : > { %v10151_v34 = vpack.i.bf16 %v8332_v29, %v8331_v28  ;;  %v565_v4 = vsel %vm10049_vm3, 0, %v564_v2  ;;  %v626_v5 = vld [vmem:[#allocation2 + $0x78] sm:$0x1]  ;;  %v9616_v28 = vld [vmem:[#allocation3 + $0x80] sm:$0xff]  }
  0x5e   : > { %9355 = vset.pattern.permute.xlu1 %v9873_v1  ;;  %9368 = vperm.xlu0 %9349, %v9367_v17   ;;  %v2073_v31 = vor.u32 %v2072_v22, %v2068_v21  ;;  %566 = vst [vmem:[#allocation2 + $0x70] sm:$0x1] %v565_v4  ;;  %v9622_v13 = vld [vmem:[#allocation3 + $0x218] sm:$0xff]   ;;  %v10195_v18 = vpack.i.bf16 %v8348_v15, %v8347_v14  ;;  %v8397_v21 = vld [vmem:[%s10033_s13 + $0x70] sm:$0xff]   ;;  %v567_v22 = vld [vmem:[#allocation2 + $0x80] sm:$0x1] }
  0x5f   : > { %9357 = vperm.xlu1 %9355, %v9367_v17   ;;  %3688 = vmatpush1.bf16.msra.mxu0 %v9605_v41  ;;  %v623_v41 = vld [vmem:[#allocation2 + $0x68] sm:$0x1]  ;;  %v568_v29 = vsel %vm10049_vm3, 0, %v567_v22  ;;  %v8355_v35 = vunpack.c.l.bf16 %v8397_v21  ;;  %v9628_v47 = vld [vmem:[#allocation3 + $0x238] sm:$0xff]  }
  0x60   : > { %3689 = vmatprep.subr.bf16.mxu0 %v9873_v1  ;;  %v624_v46 = vsel %vm10057_vm4, 0, %v623_v41  ;;  %569 = vst [vmem:[#allocation2 + $0x80] sm:$0x1] %v568_v29  ;;  %v9624_v48 = vld [vmem:[#allocation3 + $0x98] sm:$0xff]   ;;  %v641_v4 = vld [vmem:[#allocation2 + $0xc8] sm:$0x1] }
  0x61   : > { %625 = vst [vmem:[#allocation2 + $0x68] sm:$0x1] %v624_v46  ;;  %v9621_v46 = vld [vmem:[#allocation3 + $0x90] sm:$0xff]  }
  0x62   : > { %9378 = vset.pattern.permute.xlu0 %v9874_v12  ;;  %v1921_v25 = vld [vmem:[#allocation2 + $0x8] sm:$0x1] }
  0x63   : > { %9361 = vset.pattern.permute.xlu1 %v9874_v12  ;;  %9380 = vperm.xlu0 %9378, %v10053_v26   ;;  %v1922_v52 = vld [vmem:[#allocation2 + $0x18] sm:$0x1] }
  0x64   : > { %9363 = vperm.xlu1 %9361, %v9367_v17   ;;  %3690 = vmatpush1.bf16.msra.mxu0 %v9606_v54  ;;  %v8328_v17 = vunpack.c.h.bf16 %v8390_v6  ;;  %v8343_v54 = vunpack.c.l.bf16 %v8394_v43  ;;  %v2087_v63 = vshll.u32 %v1922_v52, 16  ;;  %v9620_v6 = vld [vmem:[#allocation3 + $0x210] sm:$0xff]   ;;  %v635_v52 = vld [vmem:[#allocation2 + $0xa8] sm:$0x1] }
  0x65   : > { %3691 = vmatprep.subr.bf16.mxu0 %v9873_v1  ;;  %v9626_v43 = vld [vmem:[#allocation3 + $0x230] sm:$0xff]  }
  0x66   : > { %v10143_v24 = vpack.i.bf16 %v8328_v17, %v8327_v16  ;;  %v2089_v11 = vrot.slane %v2087_v63, 1  ;;  %v9623_v17 = vld [vmem:[#allocation3 + $0x220] sm:$0xff]  }
  0x67   : > { %9397 = vperm.xlu0 %9378, %v10074_v38   ;;  %v579_v63 = vld [vmem:[#allocation2 + $0xc0] sm:$0x1] }
  0x68   : > { %9372 = vset.pattern.permute.xlu1 %v9873_v1  ;;  %3692 = vmatpush1.bf16.msra.mxu0 %v9607_v57  ;;  %v9619_v57 = vld [vmem:[#allocation3 + $0x208] sm:$0xff]   ;;  %v580_v2 = vsel %vm10049_vm3, 0, %v579_v63 }
  0x69   : > { %9374 = vperm.xlu1 %9372, %v10053_v26   ;;  %3693 = vmatprep.subr.bf16.mxu0 %v9873_v1  ;;  %581 = vst [vmem:[#allocation2 + $0xc0] sm:$0x1] %v580_v2 }
  0x6a   : > { %9001 = vmatprep.subr.bf16.mxu1 %v9619_v57 }
  0x6b   : > { %9407 = vset.pattern.permute.xlu0 %v9873_v1  ;;  %9009 = vmatpush3.bf16.msra.mxu1 %v9619_v57  ;;  %v638_v57 = vld [vmem:[#allocation2 + $0xb8] sm:$0x1] }
  0x6c   : > { %9409 = vperm.xlu0 %9407, %v10088_v51   ;;  %3694 = vmatpush1.bf16.msra.mxu0 %v9608_v9  ;;  %v627_v9 = vsel %vm10057_vm4, 0, %v626_v5  ;;  %v642_v5 = vsel %vm10057_vm4, 0, %v641_v4 }
  0x6d   : > { %9384 = vset.pattern.permute.xlu1 %v9872_v0  ;;  %3695 = vmatprep.subr.bf16.mxu0 %v9873_v1  ;;  %628 = vst [vmem:[#allocation2 + $0x78] sm:$0x1] %v627_v9  ;;  %643 = vst [vmem:[#allocation2 + $0xc8] sm:$0x1] %v642_v5  ;;  %v9632_v9 = vld [vmem:[#allocation3 + $0xc0] sm:$0xff]  }
  0x6e   : > { %9386 = vperm.xlu1 %9384, %v10053_v26   ;;  %v2075_v26 = vshll.u32 %v1921_v25, 16  ;;  %9002 = vmatprep.subr.bf16.mxu1 %v9620_v6  ;;  %v630_v25 = vsel %vm10057_vm4, 0, %v629_v20  ;;  %v588_v20 = vld [vmem:[#allocation2 + $0xf0] sm:$0x1] }
  0x6f   : > { %9010 = vmatpush3.bf16.msra.mxu1 %v9620_v6  ;;  %631 = vst [vmem:[#allocation2 + $0x88] sm:$0x1] %v630_v25  ;;  %v582_v6 = vld [vmem:[#allocation2 + $0xd0] sm:$0x1]  ;;  %v650_v25 = vld [vmem:[#allocation2 + $0xf8] sm:$0x1] }
  0x70   : > { %9426 = vperm.xlu0 %9407, %v10106_v62   ;;  %3696 = vmatpush1.bf16.msra.mxu0 %v9609_v19  ;;  %v2077_v33 = vrot.slane %v2075_v26, 1  ;;  %v8396_v19 = vld [vmem:[%s10033_s13 + $0x68] sm:$0xff]  }
  0x71   : > { %3697 = vmatprep.subr.bf16.mxu0 %v9873_v1  ;;  %9003 = vmatprep.subr.bf16.mxu1 %v9622_v13 }
  0x72   : > { %9390 = vset.pattern.permute.xlu1 %v9873_v1  ;;  %v2078_v39 = vsel %vm2066_vm7, %v2073_v31, %v2077_v33  ;;  %v8352_v31 = vunpack.c.h.bf16 %v8396_v19 }
  0x73   : > { %9392 = vperm.xlu1 %9390, %v10074_v38   ;;  %3709 = vmatprep.mubr.bf16.mxu0 %v2078_v39 }
  0x74   : > { %9436 = vset.pattern.permute.xlu0 %v9872_v0  ;;  %3698 = vmatpush1.bf16.msra.mxu0 %v9610_v30  ;;  %v8351_v30 = vunpack.c.l.bf16 %v8396_v19  ;;  %v9633_v19 = vld [vmem:[#allocation3 + $0xc8] sm:$0xff]  }
  0x75   : > { %9438 = vperm.xlu0 %9436, %v10106_v62   ;;  %3699 = vmatprep.subr.bf16.mxu0 %v9873_v1 }
  0x76   : > { %9011 = vmatpush3.bf16.msra.mxu1 %v9622_v13  ;;  %v10209_v33 = vpack.i.bf16 %v8352_v31, %v8351_v30  ;;  %v10300_v31 = vld [vmem:[%s12219_s3 + $0x1] ss:$0 sm:$0xff] }
  0x77   : > { %9401 = vset.pattern.permute.xlu1 %v9872_v0  ;;  %9004 = vmatprep.subr.bf16.mxu1 %v9623_v17 }
  0x78   : > { %9403 = vperm.xlu1 %9401, %v10074_v38   ;;  %v8336_v38 = vunpack.c.h.bf16 %v8392_v32  ;;  %3700 = vmatpush1.bf16.msra.mxu0 %v9611_v36  ;;  %v9618_v32 = vld [vmem:[#allocation3 + $0x88] sm:$0xff]   ;;  %v8356_v36 = vunpack.c.h.bf16 %v8397_v21 }
  0x79   : > { %9455 = vperm.xlu0 %9436, %v10143_v24   ;;  %3701 = vmatprep.subr.bf16.mxu0 %v9873_v1 }
  0x7a   : > { %v10159_v42 = vpack.i.bf16 %v8336_v38, %v8335_v37  ;;  %v8398_v37 = vld [vmem:[%s10033_s13 + $0x78] sm:$0xff]   ;;  %9012 = vmatpush3.bf16.msra.mxu1 %v9623_v17  ;;  %v570_v38 = vld [vmem:[#allocation2 + $0x90] sm:$0x1]  ;;  %v10216_v39 = vpack.i.bf16 %v8356_v36, %v8355_v35  ;;  %v10287_v17 = vld [vmem:[%s12219_s3] ss:$0 sm:$0xff] }
  0x7b   : > { %v571_v40 = vsel %vm10049_vm3, 0, %v570_v38  ;;  %v8360_v45 = vunpack.c.h.bf16 %v8398_v37 }
  0x7c   : > { %9413 = vset.pattern.permute.xlu1 %v9874_v12  ;;  %3702 = vmatpush1.bf16.msra.mxu0 %v9612_v44  ;;  %v8359_v44 = vunpack.c.l.bf16 %v8398_v37  ;;  %572 = vst [vmem:[#allocation2 + $0x90] sm:$0x1] %v571_v40 }
  0x7d   : > { %9415 = vperm.xlu1 %9413, %v10088_v51   ;;  %9465 = vset.pattern.permute.xlu0 %v9874_v12 }
  0x7e   : > { %9467 = vperm.xlu0 %9465, %v10151_v34   ;;  %3703 = vmatprep.subr.bf16.mxu0 %v9873_v1  ;;  %v10227_v49 = vpack.i.bf16 %v8360_v45, %v8359_v44 }
  0x80   : > { %3704 = vmatpush1.bf16.msra.mxu0 %v9613_v50 }
  0x81   : > { %9419 = vset.pattern.permute.xlu1 %v9872_v0  ;;  %3705 = vmatprep.subr.bf16.mxu0 %v9873_v1 }
  0x82   : > { %9421 = vperm.xlu1 %9419, %v10088_v51   ;;  %9484 = vperm.xlu0 %9465, %v10159_v42   ;;  %v10179_v51 = vpack.i.bf16 %v8344_v55, %v8343_v54  ;;  %v636_v54 = vsel %vm10057_vm4, 0, %v635_v52  ;;  %v9629_v55 = vld [vmem:[#allocation3 + $0xa8] sm:$0xff]  }
  0x83   : > { %637 = vst [vmem:[#allocation2 + $0xa8] sm:$0x1] %v636_v54 }
  0x84   : > { %3706 = vmatpush1.bf16.msra.mxu0 %v9614_v58 }
  0x85   : > { %3707 = vmatprep.subr.bf16.mxu0 %v9873_v1 }
  0x86   : > { %9430 = vset.pattern.permute.xlu1 %v9874_v12  ;;  %9494 = vset.pattern.permute.xlu0 %v9873_v1 }
  0x87   : > { %9432 = vperm.xlu1 %9430, %v10106_v62   ;;  %9496 = vperm.xlu0 %9494, %v10171_v53   ;;  %v2084_v62 = vrot.slane %v2082_v56, 1  ;;  %v576_v56 = vld [vmem:[#allocation2 + $0xb0] sm:$0x1] }
  0x88   : > { %3708 = vmatpush1.bf16.msra.mxu0 %v9615_v10  ;;  %v577_v58 = vsel %vm10049_vm3, 0, %v576_v56  ;;  %v585_v10 = vld [vmem:[#allocation2 + $0xe0] sm:$0x1] }
  0x89   : > { %v2085_v16 = vor.u32 %v2084_v62, %v2080_v61  ;;  %3854 = vmatprep.subr.bf16.mxu0 %v9873_v1  ;;  %v639_v61 = vsel %vm10057_vm4, 0, %v638_v57  ;;  %578 = vst [vmem:[#allocation2 + $0xb0] sm:$0x1] %v577_v58  ;;  %v583_v62 = vsel %vm10049_vm3, 0, %v582_v6  ;;  %v586_v13 = vsel %vm10049_vm3, 0, %v585_v10 }
  0x8a   : > { %640 = vst [vmem:[#allocation2 + $0xb8] sm:$0x1] %v639_v61  ;;  %584 = vst [vmem:[#allocation2 + $0xd0] sm:$0x1] %v583_v62 }
  0x8b   : > { %9442 = vset.pattern.permute.xlu1 %v9873_v1  ;;  %9513 = vperm.xlu0 %9494, %v10179_v51   ;;  %v2090_v26 = vsel %vm2066_vm7, %v2085_v16, %v2089_v11  ;;  %v647_v11 = vld [vmem:[#allocation2 + $0xe8] sm:$0x1]  ;;  %587 = vst [vmem:[#allocation2 + $0xe0] sm:$0x1] %v586_v13  ;;  %v10282_v16 = vld [vmem:[%s12220_s4] ss:$0 sm:$0xff] }
  0x8c   : > { %9444 = vperm.xlu1 %9442, %v10143_v24   ;;  %3710 = vmatmul.mubr.bf16.vlgmr.msra.gmra.mrb[0].mxu0 %v10114_v3  ;;  %v632_v3 = vld [vmem:[#allocation2 + $0x98] sm:$0x1]  ;;  %v648_v14 = vsel %vm10057_vm4, 0, %v647_v11 }
  0x8d   : > { %3717 = vmatprep.mubr.bf16.mxu0 %v2090_v26  ;;  %3855 = vmatpush1.bf16.msra.mxu0 %v9616_v28  ;;  %v633_v41 = vsel %vm10057_vm4, 0, %v632_v3  ;;  %649 = vst [vmem:[#allocation2 + $0xe8] sm:$0x1] %v648_v14  ;;  %v589_v26 = vsel %vm10049_vm3, 0, %v588_v20  ;;  %v651_v28 = vsel %vm10057_vm4, 0, %v650_v25 }
  0x8e   : > { %3856 = vmatprep.subr.bf16.mxu0 %v9873_v1  ;;  %634 = vst [vmem:[#allocation2 + $0x98] sm:$0x1] %v633_v41  ;;  %590 = vst [vmem:[#allocation2 + $0xf0] sm:$0x1] %v589_v26 }
  0x8f   : > { %9523 = vset.pattern.permute.xlu0 %v9872_v0  ;;  %652 = vst [vmem:[#allocation2 + $0xf8] sm:$0x1] %v651_v28 }
  0x90   : > { %9448 = vset.pattern.permute.xlu1 %v9874_v12  ;;  %9525 = vperm.xlu0 %9523, %v10179_v51  }
  0x91   : > { %9450 = vperm.xlu1 %9448, %v10143_v24   ;;  %v9625_v24 = vld [vmem:[#allocation3 + $0x228] sm:$0xff]   ;;  %3857 = vmatpush1.bf16.msra.mxu0 %v9618_v32 }
  0x92   : > { %9005 = vmatprep.subr.bf16.mxu1 %v9625_v24  ;;  %3858 = vmatprep.subr.bf16.mxu0 %v9873_v1 }
  0x93   : > { %9013 = vmatpush3.bf16.msra.mxu1 %v9625_v24  ;;  %v10306_v24 = vld [vmem:[%s12219_s3 + $0x2] ss:$0 sm:$0xff] }
  0x94   : > { %9542 = vperm.xlu0 %9523, %v10195_v18   ;;  %3718 = vmatmul.mubr.bf16.gmra.mrb[4].mxu0 %v10124_v7  ;;  %v9627_v7 = vld [vmem:[#allocation3 + $0xa0] sm:$0xff]  }
  0x95   : > { %9459 = vset.pattern.permute.xlu1 %v9873_v1  ;;  %9006 = vmatprep.subr.bf16.mxu1 %v9626_v43 }
  0x96   : > { %9461 = vperm.xlu1 %9459, %v10151_v34   ;;  %3859 = vmatpush1.bf16.msra.mxu0 %v9621_v46 }
  0x97   : > { %3860 = vmatprep.subr.bf16.mxu0 %v9873_v1  ;;  %9014 = vmatpush3.bf16.msra.mxu1 %v9626_v43 }
  0x98   : > { %9552 = vset.pattern.permute.xlu0 %v9874_v12  ;;  %9007 = vmatprep.subr.bf16.mxu1 %v9628_v47 }
  0x99   : > { %9554 = vperm.xlu0 %9552, %v10209_v33  }
  0x9a   : > { %9471 = vset.pattern.permute.xlu1 %v9872_v0  ;;  %3861 = vmatpush1.bf16.msra.mxu0 %v9624_v48  ;;  %v591_v48 = vld [vmem:[#allocation2 + $0x100] sm:$0x1] }
  0x9b   : > { %9473 = vperm.xlu1 %9471, %v10151_v34   ;;  %v573_v34 = vld [vmem:[#allocation2 + $0xa0] sm:$0x1]  ;;  %3862 = vmatprep.subr.bf16.mxu0 %v9873_v1 }
  0x9c   : > { %v574_v50 = vsel %vm10049_vm3, 0, %v573_v34  ;;  %9015 = vmatpush3.bf16.msra.mxu1 %v9628_v47  ;;  %v9634_v47 = vld [vmem:[#allocation3 + $0xd0] sm:$0xff]   ;;  %v592_v34 = vsel %vm10049_vm3, 0, %v591_v48 }
  0x9d   : > { %9571 = vperm.xlu0 %9552, %v10216_v39   ;;  %575 = vst [vmem:[#allocation2 + $0xa0] sm:$0x1] %v574_v50  ;;  %593 = vst [vmem:[#allocation2 + $0x100] sm:$0x1] %v592_v34 }
  0x9e   : > { %3863 = vmatpush1.bf16.msra.mxu0 %v9627_v7  ;;  %v653_v7 = vld [vmem:[#allocation2 + $0x108] sm:$0x1] }
  0x9f   : > { %9477 = vset.pattern.permute.xlu1 %v9873_v1  ;;  %3864 = vmatprep.subr.bf16.mxu0 %v9873_v1  ;;  %v654_v50 = vsel %vm10057_vm4, 0, %v653_v7  ;;  %v1816_v7 = vld [vmem:[#allocation2 + $0x38] sm:$0x1] }
  0xa0   : > { %9479 = vperm.xlu1 %9477, %v10159_v42   ;;  %655 = vst [vmem:[#allocation2 + $0x108] sm:$0x1] %v654_v50 }
  0xa1   : > { %9581 = vset.pattern.permute.xlu0 %v9873_v1 }
  0xa2   : > { %9583 = vperm.xlu0 %9581, %v10227_v49   ;;  %3865 = vmatpush1.bf16.msra.mxu0 %v9629_v55 }
  0xa3   : > { %3866 = vmatprep.subr.bf16.mxu0 %v9873_v1 }
  0xa4   : > { %9488 = vset.pattern.permute.xlu1 %v9872_v0 }
  0xa5   : > { %9490 = vperm.xlu1 %9488, %v10159_v42   ;;  %v9630_v42 = vld [vmem:[#allocation3 + $0xb0] sm:$0xff]  }
  0xa6   : > { %9599 = vset.pattern.permute.xlu0 %v9872_v0  ;;  %3867 = vmatpush1.bf16.msra.mxu0 %v9630_v42 }
  0xa7   : > { %3868 = vmatprep.subr.bf16.mxu0 %v9873_v1 }
  0xa9   : > { %9500 = vset.pattern.permute.xlu1 %v9874_v12 }
  0xaa   : > { %9502 = vperm.xlu1 %9500, %v10171_v53  }
  0xae   : > { %9506 = vset.pattern.permute.xlu1 %v9872_v0 }
  0xaf   : > { %9508 = vperm.xlu1 %9506, %v10171_v53   ;;  %v644_v53 = vld [vmem:[#allocation2 + $0xd8] sm:$0x1] }
  0xb0   : > { %v645_v8 = vsel %vm10057_vm4, 0, %v644_v53 }
  0xb1   : > { %646 = vst [vmem:[#allocation2 + $0xd8] sm:$0x1] %v645_v8 }
  0xb3   : > { %9517 = vset.pattern.permute.xlu1 %v9874_v12 }
  0xb4   : > { %9519 = vperm.xlu1 %9517, %v10179_v51   ;;  %v9631_v51 = vld [vmem:[#allocation3 + $0xb8] sm:$0xff]  }
  0xb5   : > { %3869 = vmatpush1.bf16.msra.mxu0 %v9631_v51 }
  0xb6   : > { %3870 = vmatprep.subr.bf16.mxu0 %v9873_v1 }
  0xb8   : > { %9529 = vset.pattern.permute.xlu1 %v9873_v1 }
  0xb9   : > { %9531 = vperm.xlu1 %9529, %v10195_v18   ;;  %3871 = vmatpush1.bf16.msra.mxu0 %v9632_v9 }
  0xba   : > { %3872 = vmatprep.subr.bf16.mxu0 %v9873_v1 }
  0xbd   : > { %9535 = vset.pattern.permute.xlu1 %v9874_v12  ;;  %3873 = vmatpush1.bf16.msra.mxu0 %v9633_v19 }
  0xbe   : > { %9537 = vperm.xlu1 %9535, %v10195_v18   ;;  %3874 = vmatprep.subr.bf16.mxu0 %v9873_v1 }
  0xc1   : > { %3875 = vmatpush1.bf16.msra.mxu0 %v9634_v47 }
  0xc2   : > { %9546 = vset.pattern.permute.xlu1 %v9873_v1  ;;  %3876 = vmatprep.subr.bf16.mxu0 %v9873_v1 }
  0xc3   : > { %9548 = vperm.xlu1 %9546, %v10209_v33  }
  0xc7   : > { %9558 = vset.pattern.permute.xlu1 %v9872_v0 }
  0xc8   : > { %9560 = vperm.xlu1 %9558, %v10209_v33  }
  0xcc   : > { %9564 = vset.pattern.permute.xlu1 %v9873_v1 }
  0xcd   : > { %9566 = vperm.xlu1 %9564, %v10216_v39  }
  0xcf   : > { %v9334_v15 = vpop.permute.xlu1 %9333  ;;  %v9322_v18 = vpop.permute.xlu0 %9321 }
  0xd0   : > { %v9324_v21 = vunpack.i.h.bf16 %v9322_v18  ;;  %v9323_v22 = vunpack.i.l.bf16 %v9322_v18  ;;  %v9336_v32 = vunpack.i.h.bf16 %v9334_v15  ;;  %v9335_v33 = vunpack.i.l.bf16 %v9334_v15 }
  0xd1   : > { %9575 = vset.pattern.permute.xlu1 %v9872_v0 }
  0xd2   : > { %v1183_v29 = vmul.f32 %v9324_v21, %v10287_v17  ;;  %v1182_v30 = vmul.f32 %v9323_v22, %v10287_v17  ;;  %9577 = vperm.xlu1 %9575, %v10216_v39   ;;  %v1582_v52 = vmul.f32 %v9335_v33, %v10306_v24  ;;  %v1810_v21 = vld [vmem:[#allocation2 + $0x28] sm:$0x1]  ;;  %v1807_v33 = vld [vmem:[#allocation2 + $0x20] sm:$0xff] }
  0xd4   : > { %v1221_v35 = vadd.f32 %v10282_v16, %v1183_v29  ;;  %v1220_v36 = vadd.f32 %v10282_v16, %v1182_v30  ;;  %v9340_v37 = vpop.permute.xlu1 %9339  ;;  %v9328_v38 = vpop.permute.xlu0 %9327 }
  0xd5   : > { %v9342_v3 = vunpack.i.h.bf16 %v9340_v37  ;;  %v9341_v39 = vunpack.i.l.bf16 %v9340_v37  ;;  %v9330_v40 = vunpack.i.h.bf16 %v9328_v38  ;;  %v9329_v41 = vunpack.i.l.bf16 %v9328_v38  ;;  %v656_v38 = vld [vmem:[#allocation2 + $0x118] sm:$0x1] }
  0xd6   : > { %9587 = vset.pattern.permute.xlu1 %v9874_v12  ;;  %v1583_v12 = vmul.f32 %v9336_v32, %v10306_v24  ;;  %v594_v32 = vld [vmem:[#allocation2 + $0x110] sm:$0x1] }
  0xd7   : > { %v1185_v43 = vmul.f32 %v9342_v3, %v10287_v17  ;;  %v1184_v44 = vmul.f32 %v9341_v39, %v10287_v17  ;;  %v1386_v45 = vmul.f32 %v9330_v40, %v10300_v31  ;;  %v1385_v46 = vmul.f32 %v9329_v41, %v10300_v31  ;;  %9589 = vperm.xlu1 %9587, %v10227_v49  }
  0xd8   : > { %v595_v37 = vsel %vm10049_vm3, 0, %v594_v32 }
  0xd9   : > { %v1417_v54 = vadd.f32 %v1385_v46, %v1220_v36  ;;  %v1418_v55 = vadd.f32 %v1386_v45, %v1221_v35  ;;  %v9346_v56 = vpop.permute.xlu1 %9345  ;;  %v9352_v57 = vpop.permute.xlu0 %9351  ;;  %v1223_v2 = vadd.f32 %v10282_v16, %v1185_v43  ;;  %v1222_v4 = vadd.f32 %v10282_v16, %v1184_v44  ;;  %596 = vst [vmem:[#allocation2 + $0x110] sm:$0x1] %v595_v37 }
  0xda   : > { %v9348_v58 = vunpack.i.h.bf16 %v9346_v56  ;;  %v9347_v61 = vunpack.i.l.bf16 %v9346_v56  ;;  %v9354_v42 = vunpack.i.h.bf16 %v9352_v57  ;;  %v9353_v63 = vunpack.i.l.bf16 %v9352_v57  ;;  %v1813_v57 = vld [vmem:[#allocation2 + $0x30] sm:$0xff] }
  0xdb   : > { %v1614_v5 = vadd.f32 %v1582_v52, %v1417_v54  ;;  %v1615_v53 = vadd.f32 %v1583_v12, %v1418_v55  ;;  %9593 = vset.pattern.permute.xlu1 %v9872_v0  ;;  %v657_v12 = vsel %vm10057_vm4, 0, %v656_v38 }
  0xdc   : > { %v1388_v51 = vmul.f32 %v9348_v58, %v10300_v31  ;;  %v1387_v6 = vmul.f32 %v9347_v61, %v10300_v31  ;;  %v1585_v8 = vmul.f32 %v9354_v42, %v10306_v24  ;;  %v1584_v62 = vmul.f32 %v9353_v63, %v10306_v24  ;;  %9595 = vperm.xlu1 %9593, %v10227_v49   ;;  %v9635_v49 = vld [vmem:[#allocation3 + $0xd8] sm:$0xff]  }
  0xdd   : > { %v1646_v9 = vpack.c.bf16 %v1615_v53, %v1614_v5  ;;  %v9369_v10 = vpop.permute.xlu0 %9368  ;;  %3877 = vmatpush1.bf16.msra.mxu0 %v9635_v49  ;;  %658 = vst [vmem:[#allocation2 + $0x118] sm:$0x1] %v657_v12 }
  0xde   : > { %v1419_v11 = vadd.f32 %v1387_v6, %v1222_v4  ;;  %v1420_v13 = vadd.f32 %v1388_v51, %v1223_v2  ;;  %v9358_v14 = vpop.permute.xlu1 %9357  ;;  %v9371_v15 = vunpack.i.h.bf16 %v9369_v10  ;;  %v9370_v0 = vunpack.i.l.bf16 %v9369_v10  ;;  %3878 = vmatprep.subr.bf16.mxu0 %v9873_v1 }
  0xdf   : > { %v1663_v18 = vshrl.u32 %v1646_v9, 16  ;;  %v9360_v19 = vunpack.i.h.bf16 %v9358_v14  ;;  %v9359_v20 = vunpack.i.l.bf16 %v9358_v14  ;;  %v1666_v28 = vshll.u32 %v1646_v9, 16 }
  0xe0   : > { %v1617_v22 = vadd.f32 %v1585_v8, %v1420_v13  ;;  %v1616_v25 = vadd.f32 %v1584_v62, %v1419_v11  ;;  %v1587_v41 = vmul.f32 %v9371_v15, %v10306_v24  ;;  %v1586_v43 = vmul.f32 %v9370_v0, %v10306_v24 }
  0xe1   : > { %v1665_v26 = vrot.slane %v1663_v18, 7  ;;  %v1187_v29 = vmul.f32 %v9360_v19, %v10287_v17  ;;  %v1186_v30 = vmul.f32 %v9359_v20, %v10287_v17  ;;  %v9636_v19 = vld [vmem:[#allocation3 + $0xe0] sm:$0xff]  }
  0xe2   : > { %v1647_v35 = vpack.c.bf16 %v1617_v22, %v1616_v25  ;;  %v9381_v36 = vpop.permute.xlu0 %9380  ;;  %3879 = vmatpush1.bf16.msra.mxu0 %v9636_v19 }
  0xe3   : > { %v1668_v3 = vor.u32 %v1666_v28, %v1665_v26  ;;  %v1811_v39 = vsel %vm10049_vm3, %v1665_v26, %v1810_v21  ;;  %v9364_v40 = vpop.permute.xlu1 %9363  ;;  %v1225_v45 = vadd.f32 %v10282_v16, %v1187_v29  ;;  %v1224_v34 = vadd.f32 %v10282_v16, %v1186_v30  ;;  %v9637_v30 = vld [vmem:[#allocation3 + $0xe8] sm:$0xff]   ;;  %3880 = vmatprep.subr.bf16.mxu0 %v9873_v1 }
  0xe4   : > { %1812 = vst [vmem:[#allocation2 + $0x28] sm:$0x1] %v1811_v39  ;;  %v1670_v44 = vshrl.u32 %v1647_v35, 16  ;;  %v9366_v46 = vunpack.i.h.bf16 %v9364_v40  ;;  %v9365_v47 = vunpack.i.l.bf16 %v9364_v40  ;;  %v9383_v50 = vunpack.i.h.bf16 %v9381_v36 }
  0xe5   : > { %v10343_v48 = vsel %vm10099_vm6, %v1668_v3, %v1807_v33  ;;  %v1673_v54 = vshll.u32 %v1647_v35, 16  ;;  %v9382_v58 = vunpack.i.l.bf16 %v9381_v36  ;;  %v1822_v36 = vld [vmem:[#allocation2 + $0x48] sm:$0x1] }
  0xe6   : > { %1809 = vst [vmem:[#allocation2 + $0x20] sm:$0xff] %v10343_v48  ;;  %v1672_v52 = vrot.slane %v1670_v44, 7  ;;  %v1390_v55 = vmul.f32 %v9366_v46, %v10300_v31  ;;  %v1389_v56 = vmul.f32 %v9365_v47, %v10300_v31  ;;  %v1392_v51 = vmul.f32 %v9383_v50, %v10300_v31  ;;  %v10358_v9 = vpop.permute.xlu0 %9397  ;;  %v1819_v47 = vld [vmem:[#allocation2 + $0x40] sm:$0xff]  ;;  %3881 = vmatpush1.bf16.msra.mxu0 %v9637_v30 }
  0xe7   : > { %v2094_v10 = vshll.u32 %v10343_v48, 16  ;;  %v1391_v14 = vmul.f32 %v9382_v58, %v10300_v31  ;;  %v9400_v28 = vunpack.i.h.bf16 %v10358_v9  ;;  %v2092_v29 = vshrl.u32 %v10343_v48, 16  ;;  %3882 = vmatprep.subr.bf16.mxu0 %v9873_v1 }
  0xe8   : > { %v1675_v61 = vor.u32 %v1673_v54, %v1672_v52  ;;  %v1817_v42 = vsel %vm10049_vm3, %v1672_v52, %v1816_v7  ;;  %v1421_v63 = vadd.f32 %v1389_v56, %v1224_v34  ;;  %v1422_v2 = vadd.f32 %v1390_v55, %v1225_v45  ;;  %v9375_v4 = vpop.permute.xlu1 %9374  ;;  %v9638_v52 = vld [vmem:[#allocation3 + $0xf0] sm:$0xff]  }
  0xe9   : > { %1818 = vst [vmem:[#allocation2 + $0x38] sm:$0x1] %v1817_v42  ;;  %v9377_v5 = vunpack.i.h.bf16 %v9375_v4  ;;  %v9376_v53 = vunpack.i.l.bf16 %v9375_v4  ;;  %v2096_v0 = vrot.slane %v2094_v10, 1  ;;  %v9399_v7 = vunpack.i.l.bf16 %v10358_v9 }
  0xea   : > { %v10356_v6 = vsel %vm10099_vm6, %v1675_v61, %v1813_v57  ;;  %v1619_v8 = vadd.f32 %v1587_v41, %v1422_v2  ;;  %v1618_v62 = vadd.f32 %v1586_v43, %v1421_v63  ;;  %v1394_v63 = vmul.f32 %v9400_v28, %v10300_v31  ;;  %3883 = vmatpush1.bf16.msra.mxu0 %v9638_v52 }
  0xeb   : > { %1815 = vst [vmem:[#allocation2 + $0x30] sm:$0xff] %v10356_v6  ;;  %v1189_v11 = vmul.f32 %v9377_v5, %v10287_v17  ;;  %v1188_v13 = vmul.f32 %v9376_v53, %v10287_v17  ;;  %v1923_v15 = vld [vmem:[#allocation2 + $0x28] sm:$0x1]  ;;  %v2106_v18 = vshll.u32 %v10356_v6, 16  ;;  %v2097_v3 = vor.u32 %v2096_v0, %v2092_v29  ;;  %v9410_v45 = vpop.permute.xlu0 %9409  ;;  %3884 = vmatprep.subr.bf16.mxu0 %v9873_v1  ;;  %v1825_v29 = vld [vmem:[#allocation2 + $0x50] sm:$0xff] }
  0xec   : > { %v1648_v20 = vpack.c.bf16 %v1619_v8, %v1618_v62  ;;  %v2099_v21 = vshll.u32 %v1923_v15, 16  ;;  %v2104_v50 = vshrl.u32 %v10356_v6, 16  ;;  %v1393_v9 = vmul.f32 %v9399_v7, %v10300_v31  ;;  %v1828_v15 = vld [vmem:[#allocation2 + $0x58] sm:$0x1] }
  0xed   : > { %v1227_v22 = vadd.f32 %v10282_v16, %v1189_v11  ;;  %v1226_v25 = vadd.f32 %v10282_v16, %v1188_v13  ;;  %v9387_v26 = vpop.permute.xlu1 %9386  ;;  %v2108_v35 = vrot.slane %v2106_v18, 1  ;;  %v9411_v11 = vunpack.i.l.bf16 %v9410_v45 }
  0xee   : > { %v1677_v49 = vshrl.u32 %v1648_v20, 16  ;;  %v9389_v32 = vunpack.i.h.bf16 %v9387_v26  ;;  %v9388_v33 = vunpack.i.l.bf16 %v9387_v26  ;;  %v2101_v39 = vrot.slane %v2099_v21, 1 }
  0xef   : > { %v1424_v37 = vadd.f32 %v1392_v51, %v1227_v22  ;;  %v1423_v38 = vadd.f32 %v1391_v14, %v1226_v25  ;;  %v1680_v41 = vshll.u32 %v1648_v20, 16  ;;  %v2109_v5 = vor.u32 %v2108_v35, %v2104_v50  ;;  %v10385_v51 = vpop.permute.xlu0 %9426  ;;  %v9639_v14 = vld [vmem:[#allocation3 + $0xf8] sm:$0xff]  }
  0xf0   : > { %v1679_v40 = vrot.slane %v1677_v49, 7  ;;  %v1589_v43 = vmul.f32 %v9389_v32, %v10306_v24  ;;  %v1588_v44 = vmul.f32 %v9388_v33, %v10306_v24  ;;  %v1924_v46 = vld [vmem:[#allocation2 + $0x38] sm:$0x1]  ;;  %v2102_v34 = vsel %vm2066_vm7, %v2097_v3, %v2101_v39  ;;  %3885 = vmatpush1.bf16.msra.mxu0 %v9639_v14  ;;  %v1831_v14 = vld [vmem:[#allocation2 + $0x60] sm:$0xff] }
  0xf1   : > { %v2111_v12 = vshll.u32 %v1924_v46, 16  ;;  %3725 = vmatprep.mubr.bf16.mxu0 %v2102_v34  ;;  %v9429_v0 = vunpack.i.h.bf16 %v10385_v51  ;;  %4031 = vmatprep.subr.bf16.mxu0 %v9873_v1  ;;  %v1192_v39 = vmul.f32 %v9411_v11, %v10287_v17 }
  0xf2   : > { %v1682_v54 = vor.u32 %v1680_v41, %v1679_v40  ;;  %v1823_v55 = vsel %vm10049_vm3, %v1679_v40, %v1822_v36  ;;  %v1620_v56 = vadd.f32 %v1588_v44, %v1423_v38  ;;  %v1621_v57 = vadd.f32 %v1589_v43, %v1424_v37  ;;  %v9393_v58 = vpop.permute.xlu1 %9392  ;;  %3726 = vmatmul.mubr.bf16.gmra.mrb[8].mxu0 %v10343_v48 }
  0xf3   : > { %1824 = vst [vmem:[#allocation2 + $0x48] sm:$0x1] %v1823_v55  ;;  %v9395_v61 = vunpack.i.h.bf16 %v9393_v58  ;;  %v9394_v42 = vunpack.i.l.bf16 %v9393_v58  ;;  %v2113_v53 = vrot.slane %v2111_v12, 1  ;;  %v9412_v48 = vunpack.i.h.bf16 %v9410_v45 }
  0xf4   : > { %v10383_v2 = vsel %vm10099_vm6, %v1682_v54, %v1819_v47  ;;  %v1649_v4 = vpack.c.bf16 %v1621_v57, %v1620_v56  ;;  %v9428_v40 = vunpack.i.l.bf16 %v10385_v51  ;;  %v1195_v7 = vmul.f32 %v9429_v0, %v10287_v17  ;;  %v9439_v55 = vpop.permute.xlu0 %9438 }
  0xf5   : > { %1821 = vst [vmem:[#allocation2 + $0x40] sm:$0xff] %v10383_v2  ;;  %v1191_v8 = vmul.f32 %v9395_v61, %v10287_v17  ;;  %v1190_v62 = vmul.f32 %v9394_v42, %v10287_v17  ;;  %v2114_v13 = vsel %vm2066_vm7, %v2109_v5, %v2113_v53  ;;  %v2118_v21 = vshll.u32 %v10383_v2, 16 }
  0xf6   : > { %v1684_v10 = vshrl.u32 %v1649_v4, 16  ;;  %3733 = vmatprep.mubr.bf16.mxu0 %v2114_v13  ;;  %v1687_v25 = vshll.u32 %v1649_v4, 16  ;;  %v1193_v32 = vmul.f32 %v9412_v48, %v10287_v17  ;;  %v2116_v41 = vshrl.u32 %v10383_v2, 16  ;;  %v1834_v4 = vld [vmem:[#allocation2 + $0x68] sm:$0x1] }
  0xf7   : > { %v1229_v18 = vadd.f32 %v10282_v16, %v1191_v8  ;;  %v1228_v19 = vadd.f32 %v10282_v16, %v1190_v62  ;;  %v9404_v20 = vpop.permute.xlu1 %9403  ;;  %v2120_v33 = vrot.slane %v2118_v21, 1  ;;  %v1230_v57 = vadd.f32 %v10282_v16, %v1192_v39 }
  0xf8   : > { %v1686_v22 = vrot.slane %v1684_v10, 7  ;;  %v9406_v26 = vunpack.i.h.bf16 %v9404_v20  ;;  %v9405_v28 = vunpack.i.l.bf16 %v9404_v20  ;;  %v1231_v54 = vadd.f32 %v10282_v16, %v1193_v32  ;;  %v10421_v13 = vpop.permute.xlu0 %9455 }
  0xf9   : > { %v1426_v30 = vadd.f32 %v1394_v63, %v1229_v18  ;;  %v1425_v49 = vadd.f32 %v1393_v9, %v1228_v19  ;;  %v2121_v12 = vor.u32 %v2120_v33, %v2116_v41  ;;  %v1233_v53 = vadd.f32 %v10282_v16, %v1195_v7 }
  0xfa   : > { %v1689_v35 = vor.u32 %v1687_v25, %v1686_v22  ;;  %v1829_v36 = vsel %vm10049_vm3, %v1686_v22, %v1828_v15  ;;  %v1591_v37 = vmul.f32 %v9406_v26, %v10306_v24  ;;  %v1590_v38 = vmul.f32 %v9405_v28, %v10306_v24  ;;  %v1925_v3 = vld [vmem:[#allocation2 + $0x48] sm:$0x1]  ;;  %3734 = vmatmul.mubr.bf16.gmra.mrb[12].mxu0 %v10356_v6 }
  0xfb   : > { %1830 = vst [vmem:[#allocation2 + $0x58] sm:$0x1] %v1829_v36  ;;  %v2123_v43 = vshll.u32 %v1925_v3, 16  ;;  %v1194_v51 = vmul.f32 %v9428_v40, %v10287_v17  ;;  %v9441_v26 = vunpack.i.h.bf16 %v9439_v55  ;;  %v9440_v28 = vunpack.i.l.bf16 %v9439_v55 }
  0xfc   : > { %v10409_v44 = vsel %vm10099_vm6, %v1689_v35, %v1825_v29  ;;  %v1622_v45 = vadd.f32 %v1590_v38, %v1425_v49  ;;  %v1623_v46 = vadd.f32 %v1591_v37, %v1426_v30  ;;  %v9416_v47 = vpop.permute.xlu1 %9415  ;;  %v9458_v35 = vunpack.i.h.bf16 %v10421_v13 }
  0xfd   : > { %1827 = vst [vmem:[#allocation2 + $0x50] sm:$0xff] %v10409_v44  ;;  %v9418_v34 = vunpack.i.h.bf16 %v9416_v47  ;;  %v9417_v50 = vunpack.i.l.bf16 %v9416_v47  ;;  %v2125_v6 = vrot.slane %v2123_v43, 1  ;;  %v2130_v56 = vshll.u32 %v10409_v44, 16  ;;  %v10438_v41 = vpop.permute.xlu0 %9467 }
  0xfe   : > { %v1650_v52 = vpack.c.bf16 %v1623_v46, %v1622_v45  ;;  %v2128_v19 = vshrl.u32 %v10409_v44, 16  ;;  %v1232_v36 = vadd.f32 %v10282_v16, %v1194_v51  ;;  %v1595_v46 = vmul.f32 %v9441_v26, %v10306_v24 }
  0xff   : > { %v1396_v58 = vmul.f32 %v9418_v34, %v10300_v31  ;;  %v1395_v61 = vmul.f32 %v9417_v50, %v10300_v31  ;;  %v2126_v42 = vsel %vm2066_vm7, %v2121_v12, %v2125_v6  ;;  %v2132_v8 = vrot.slane %v2130_v56, 1  ;;  %v1840_v6 = vld [vmem:[#allocation2 + $0x78] sm:$0x1] }
 0x100   : > { %v1691_v63 = vshrl.u32 %v1650_v52, 16  ;;  %3741 = vmatprep.mubr.bf16.mxu0 %v2126_v42  ;;  %v1694_v9 = vshll.u32 %v1650_v52, 16  ;;  %v1594_v47 = vmul.f32 %v9440_v28, %v10306_v24  ;;  %v10445_v34 = vmul.f32 %v9458_v35, %v10306_v24 }
 0x101   : > { %v9422_v5 = vpop.permute.xlu1 %9421  ;;  %v1427_v15 = vadd.f32 %v1395_v61, %v1230_v57  ;;  %v1428_v18 = vadd.f32 %v1396_v58, %v1231_v54  ;;  %v2133_v29 = vor.u32 %v2132_v8, %v2128_v19  ;;  %v9457_v50 = vunpack.i.l.bf16 %v10421_v13 }
 0x102   : > { %v1693_v62 = vrot.slane %v1691_v63, 7  ;;  %v9424_v48 = vunpack.i.h.bf16 %v9422_v5  ;;  %v9423_v10 = vunpack.i.l.bf16 %v9422_v5  ;;  %v1926_v11 = vld [vmem:[#allocation2 + $0x58] sm:$0x1]  ;;  %3742 = vmatmul.mubr.bf16.gmra.mrb[16].mxu0 %v10383_v2  ;;  %v9470_v56 = vunpack.i.h.bf16 %v10438_v41 }
 0x103   : > { %v2135_v20 = vshll.u32 %v1926_v11, 16 }
 0x104   : > { %v1696_v0 = vor.u32 %v1694_v9, %v1693_v62  ;;  %v1835_v21 = vsel %vm10049_vm3, %v1693_v62, %v1834_v4  ;;  %v1593_v22 = vmul.f32 %v9424_v48, %v10306_v24  ;;  %v1592_v25 = vmul.f32 %v9423_v10, %v10306_v24  ;;  %v1837_v4 = vld [vmem:[#allocation2 + $0x70] sm:$0xff] }
 0x105   : > { %1836 = vst [vmem:[#allocation2 + $0x68] sm:$0x1] %v1835_v21  ;;  %v2137_v30 = vrot.slane %v2135_v20, 1 }
 0x106   : > { %v10431_v49 = vsel %vm10099_vm6, %v1696_v0, %v1831_v14  ;;  %v1624_v2 = vadd.f32 %v1592_v25, %v1427_v15  ;;  %v1625_v32 = vadd.f32 %v1593_v22, %v1428_v18  ;;  %v9433_v33 = vpop.permute.xlu1 %9432  ;;  %v9469_v18 = vunpack.i.l.bf16 %v10438_v41 }
 0x107   : > { %1833 = vst [vmem:[#allocation2 + $0x60] sm:$0xff] %v10431_v49  ;;  %v9435_v37 = vunpack.i.h.bf16 %v9433_v33  ;;  %v9434_v38 = vunpack.i.l.bf16 %v9433_v33  ;;  %v2138_v3 = vsel %vm2066_vm7, %v2133_v29, %v2137_v30  ;;  %v2142_v40 = vshll.u32 %v10431_v49, 16  ;;  %v10463_v30 = vpop.permute.xlu0 %9484 }
 0x108   : > { %v1651_v39 = vpack.c.bf16 %v1625_v32, %v1624_v2  ;;  %3749 = vmatprep.mubr.bf16.mxu0 %v2138_v3  ;;  %v2140_v62 = vshrl.u32 %v10431_v49, 16  ;;  %v1596_v0 = vmul.f32 %v9457_v50, %v10306_v24  ;;  %v1846_v2 = vld [vmem:[#allocation2 + $0x88] sm:$0x1]  ;;  %v1402_v41 = vmul.f32 %v9470_v56, %v10300_v31 }
 0x109   : > { %v1398_v43 = vmul.f32 %v9435_v37, %v10300_v31  ;;  %v1397_v45 = vmul.f32 %v9434_v38, %v10300_v31  ;;  %v2144_v63 = vrot.slane %v2142_v40, 1  ;;  %v1843_v40 = vld [vmem:[#allocation2 + $0x80] sm:$0xff]  ;;  %v9486_v56 = vunpack.i.l.bf16 %v10463_v30 }
 0x10a   : > { %v1698_v7 = vshrl.u32 %v1651_v39, 16  ;;  %v1701_v12 = vshll.u32 %v1651_v39, 16  ;;  %3750 = vmatmul.mubr.bf16.gmra.mrb[20].mxu0 %v10409_v44 }
 0x10b   : > { %v1429_v52 = vadd.f32 %v1397_v45, %v1232_v36  ;;  %v1430_v54 = vadd.f32 %v1398_v43, %v1233_v53  ;;  %v9445_v55 = vpop.permute.xlu1 %9444  ;;  %v2145_v22 = vor.u32 %v2144_v63, %v2140_v62  ;;  %v9487_v45 = vunpack.i.h.bf16 %v10463_v30 }
 0x10c   : > { %v1700_v57 = vrot.slane %v1698_v7, 7  ;;  %v9447_v58 = vunpack.i.h.bf16 %v9445_v55  ;;  %v9446_v61 = vunpack.i.l.bf16 %v9445_v55  ;;  %v1927_v42 = vld [vmem:[#allocation2 + $0x68] sm:$0x1] }
 0x10d   : > { %v1626_v5 = vadd.f32 %v1594_v47, %v1429_v52  ;;  %v1627_v51 = vadd.f32 %v1595_v46, %v1430_v54  ;;  %v2034_v8 = vld [vmem:[#allocation2 + $0x68] sm:$0x1]  ;;  %v2147_v9 = vshll.u32 %v1927_v42, 16  ;;  %v1401_v54 = vmul.f32 %v9469_v18, %v10300_v31 }
 0x10e   : > { %v1703_v48 = vor.u32 %v1701_v12, %v1700_v57  ;;  %v1841_v53 = vsel %vm10049_vm3, %v1700_v57, %v1840_v6  ;;  %v1197_v44 = vmul.f32 %v9447_v58, %v10287_v17  ;;  %v1196_v10 = vmul.f32 %v9446_v61, %v10287_v17  ;;  %v2052_v11 = vld [vmem:[#allocation2 + $0x60] sm:$0xfe] }
 0x10f   : > { %1842 = vst [vmem:[#allocation2 + $0x78] sm:$0x1] %v1841_v53  ;;  %v1652_v13 = vpack.c.bf16 %v1627_v51, %v1626_v5  ;;  %v3034_v14 = vrot.slane %v2052_v11, 1  ;;  %v2149_v15 = vrot.slane %v2147_v9, 1  ;;  %v3035_v21 = vrot.slane %v2034_v8, 1  ;;  %v11004_v27 = vld [vmem:[#allocation2 + $0x60] sm:$0xff] }
 0x110   : > { %v10458_v19 = vsel %vm10099_vm6, %v1703_v48, %v1837_v4  ;;  %v9451_v20 = vpop.permute.xlu1 %9450  ;;  %v1235_v26 = vadd.f32 %v10282_v16, %v1197_v44  ;;  %v1234_v32 = vadd.f32 %v10282_v16, %v1196_v10  ;;  %v10488_v8 = vmul.f32 %v9487_v45, %v10300_v31 }
 0x111   : > { %1839 = vst [vmem:[#allocation2 + $0x70] sm:$0xff] %v10458_v19  ;;  %v1705_v25 = vshrl.u32 %v1652_v13, 16  ;;  %v9453_v28 = vunpack.i.h.bf16 %v9451_v20  ;;  %v9452_v29 = vunpack.i.l.bf16 %v9451_v20  ;;  %v3036_v33 = vsel %vm2337_vm8, %v3034_v14, %v3035_v21  ;;  %v1852_v21 = vld [vmem:[#allocation2 + $0x98] sm:$0x1] }
 0x112   : > { %v2150_v35 = vsel %vm2066_vm7, %v2145_v22, %v2149_v15  ;;  %v2154_v36 = vshll.u32 %v10458_v19, 16  ;;  %v1708_v38 = vshll.u32 %v1652_v13, 16  ;;  %8924 = vmatprep.mubr.bf16.mxu1 %v3036_v33  ;;  %v2152_v42 = vshrl.u32 %v10458_v19, 16 }
 0x113   : > { %v1707_v37 = vrot.slane %v1705_v25, 7  ;;  %v1400_v3 = vmul.f32 %v9453_v28, %v10300_v31  ;;  %v1399_v39 = vmul.f32 %v9452_v29, %v10300_v31  ;;  %3757 = vmatprep.mubr.bf16.mxu0 %v2150_v35 }
 0x114   : > { %3758 = vmatmul.mubr.bf16.gmra.mrb[24].mxu0 %v10431_v49  ;;  %v2156_v43 = vrot.slane %v2154_v36, 1  ;;  %v1849_v36 = vld [vmem:[#allocation2 + $0x90] sm:$0xff] }
 0x115   : > { %v1710_v46 = vor.u32 %v1708_v38, %v1707_v37  ;;  %v1847_v47 = vsel %vm10049_vm3, %v1707_v37, %v1846_v2  ;;  %v1431_v7 = vadd.f32 %v1399_v39, %v1234_v32  ;;  %v1432_v50 = vadd.f32 %v1400_v3, %v1235_v26  ;;  %v9462_v12 = vpop.permute.xlu1 %9461 }
 0x116   : > { %1848 = vst [vmem:[#allocation2 + $0x88] sm:$0x1] %v1847_v47  ;;  %v9464_v6 = vunpack.i.h.bf16 %v9462_v12  ;;  %v9463_v52 = vunpack.i.l.bf16 %v9462_v12  ;;  %v1928_v55 = vld [vmem:[#allocation2 + $0x78] sm:$0x1]  ;;  %v2157_v48 = vor.u32 %v2156_v43, %v2152_v42  ;;  %v1403_v37 = vmul.f32 %v9486_v56, %v10300_v31 }
 0x117   : > { %v10480_v49 = vsel %vm10099_vm6, %v1710_v46, %v1843_v40  ;;  %v1629_v57 = vadd.f32 %v10445_v34, %v1432_v50  ;;  %v1628_v58 = vadd.f32 %v1596_v0, %v1431_v7  ;;  %v2035_v61 = vld [vmem:[#allocation2 + $0x78] sm:$0x1]  ;;  %v2159_v51 = vshll.u32 %v1928_v55, 16  ;;  %v9497_v0 = vpop.permute.xlu0 %9496 }
 0x118   : > { %1845 = vst [vmem:[#allocation2 + $0x80] sm:$0xff] %v10480_v49  ;;  %v1199_v63 = vmul.f32 %v9464_v6, %v10287_v17  ;;  %v1198_v4 = vmul.f32 %v9463_v52, %v10287_v17  ;;  %v2053_v5 = vld [vmem:[#allocation2 + $0x70] sm:$0xfe]  ;;  %v2166_v34 = vshll.u32 %v10480_v49, 16  ;;  %v3038_v11 = vrot.slane %v2035_v61, 1 }
 0x119   : > { %v1653_v62 = vpack.c.bf16 %v1629_v57, %v1628_v58  ;;  %v3037_v9 = vrot.slane %v2053_v5, 1  ;;  %v2161_v13 = vrot.slane %v2159_v51, 1  ;;  %v9499_v38 = vunpack.i.h.bf16 %v9497_v0  ;;  %v1858_v51 = vld [vmem:[#allocation2 + $0xa8] sm:$0x1] }
 0x11a   : > { %v1237_v53 = vadd.f32 %v10282_v16, %v1199_v63  ;;  %v1236_v44 = vadd.f32 %v10282_v16, %v1198_v4  ;;  %v9474_v10 = vpop.permute.xlu1 %9473  ;;  %v2168_v35 = vrot.slane %v2166_v34, 1  ;;  %v2164_v3 = vshrl.u32 %v10480_v49, 16 }
 0x11b   : > { %v1712_v14 = vshrl.u32 %v1653_v62, 16  ;;  %v1715_v15 = vshll.u32 %v1653_v62, 16  ;;  %v9476_v18 = vunpack.i.h.bf16 %v9474_v10  ;;  %v9475_v20 = vunpack.i.l.bf16 %v9474_v10 }
 0x11c   : > { %v1434_v22 = vadd.f32 %v1402_v41, %v1237_v53  ;;  %v1433_v25 = vadd.f32 %v1401_v54, %v1236_v44  ;;  %v3039_v26 = vsel %vm2337_vm8, %v3037_v9, %v3038_v11  ;;  %v2162_v28 = vsel %vm2066_vm7, %v2157_v48, %v2161_v13  ;;  %v9514_v11 = vpop.permute.xlu0 %9513 }
 0x11d   : > { %v1714_v29 = vrot.slane %v1712_v14, 7  ;;  %v1599_v30 = vmul.f32 %v9476_v18, %v10306_v24  ;;  %v1598_v2 = vmul.f32 %v9475_v20, %v10306_v24  ;;  %8925 = vmatmul.mubr.bf16.vlgmr.msra.gmra.mrb[0].mxu1 %v3039_v26  ;;  %3765 = vmatprep.mubr.bf16.mxu0 %v2162_v28  ;;  %v2036_v32 = vld [vmem:[#allocation2 + $0x88] sm:$0x1]  ;;  %v2169_v54 = vor.u32 %v2168_v35, %v2164_v3  ;;  %v1855_v14 = vld [vmem:[#allocation2 + $0xa0] sm:$0xff] }
 0x11e   : > { %v1929_v33 = vld [vmem:[#allocation2 + $0x88] sm:$0x1]  ;;  %3766 = vmatmul.mubr.bf16.gmra.mrb[28].mxu0 %v10458_v19  ;;  %v3041_v6 = vrot.slane %v2036_v32, 1  ;;  %v9498_v61 = vunpack.i.l.bf16 %v9497_v0  ;;  %v1203_v34 = vmul.f32 %v9499_v38, %v10287_v17 }
 0x11f   : > { %v2171_v39 = vshll.u32 %v1929_v33, 16  ;;  %v1717_v40 = vor.u32 %v1715_v15, %v1714_v29  ;;  %v1853_v41 = vsel %vm10049_vm3, %v1714_v29, %v1852_v21  ;;  %v1630_v43 = vadd.f32 %v1598_v2, %v1433_v25  ;;  %v9480_v46 = vpop.permute.xlu1 %9479  ;;  %v2054_v47 = vld [vmem:[#allocation2 + $0x80] sm:$0xfe] }
 0x120   : > { %v1631_v45 = vadd.f32 %v1599_v30, %v1434_v22  ;;  %1854 = vst [vmem:[#allocation2 + $0x98] sm:$0x1] %v1853_v41  ;;  %v9482_v7 = vunpack.i.h.bf16 %v9480_v46  ;;  %v9481_v50 = vunpack.i.l.bf16 %v9480_v46  ;;  %v3040_v12 = vrot.slane %v2054_v47, 1  ;;  %v10531_v41 = vpop.permute.xlu0 %9525 }
 0x121   : > { %v10504_v19 = vsel %vm10099_vm6, %v1717_v40, %v1849_v36  ;;  %v2173_v55 = vrot.slane %v2171_v39, 1  ;;  %v1202_v20 = vmul.f32 %v9498_v61, %v10287_v17  ;;  %v9516_v30 = vunpack.i.h.bf16 %v9514_v11 }
 0x122   : > { %v1654_v52 = vpack.c.bf16 %v1631_v45, %v1630_v43  ;;  %1851 = vst [vmem:[#allocation2 + $0x90] sm:$0xff] %v10504_v19  ;;  %v1201_v56 = vmul.f32 %v9482_v7, %v10287_v17  ;;  %v1200_v57 = vmul.f32 %v9481_v50, %v10287_v17  ;;  %v3042_v58 = vsel %vm2337_vm8, %v3040_v12, %v3041_v6 }
 0x123   : > { %8928 = vmatprep.mubr.bf16.mxu1 %v3042_v58  ;;  %v2174_v63 = vsel %vm2066_vm7, %v2169_v54, %v2173_v55  ;;  %v2178_v4 = vshll.u32 %v10504_v19, 16  ;;  %v2176_v0 = vshrl.u32 %v10504_v19, 16  ;;  %v9515_v2 = vunpack.i.l.bf16 %v9514_v11  ;;  %v1864_v55 = vld [vmem:[#allocation2 + $0xb8] sm:$0x1] }
 0x124   : > { %v1719_v42 = vshrl.u32 %v1654_v52, 16  ;;  %v1722_v5 = vshll.u32 %v1654_v52, 16  ;;  %v1239_v62 = vadd.f32 %v10282_v16, %v1201_v56  ;;  %v1238_v9 = vadd.f32 %v10282_v16, %v1200_v57  ;;  %v9491_v48 = vpop.permute.xlu1 %9490  ;;  %3773 = vmatprep.mubr.bf16.mxu0 %v2174_v63 }
 0x125   : > { %v9493_v44 = vunpack.i.h.bf16 %v9491_v48  ;;  %v9492_v10 = vunpack.i.l.bf16 %v9491_v48  ;;  %v2180_v13 = vrot.slane %v2178_v4, 1  ;;  %v1241_v45 = vadd.f32 %v10282_v16, %v1203_v34 }
 0x126   : > { %v1721_v53 = vrot.slane %v1719_v42, 7  ;;  %v1436_v15 = vadd.f32 %v10488_v8, %v1239_v62  ;;  %v1435_v18 = vadd.f32 %v1403_v37, %v1238_v9  ;;  %3774 = vmatmul.mubr.bf16.gmra.mrb[32].mxu0 %v10480_v49  ;;  %v1240_v46 = vadd.f32 %v10282_v16, %v1202_v20  ;;  %v10544_v16 = vld [vmem:[%s12219_s3] ss:$0 sm:$0xff]  ;;  %v1861_v9 = vld [vmem:[#allocation2 + $0xb0] sm:$0xff] }
 0x127   : > { %v1601_v25 = vmul.f32 %v9493_v44, %v10306_v24  ;;  %v1600_v26 = vmul.f32 %v9492_v10, %v10306_v24  ;;  %v2037_v28 = vld [vmem:[#allocation2 + $0x98] sm:$0x1]  ;;  %v2181_v37 = vor.u32 %v2180_v13, %v2176_v0  ;;  %v9528_v54 = vunpack.i.h.bf16 %v10531_v41 }
 0x128   : > { %v1724_v21 = vor.u32 %v1722_v5, %v1721_v53  ;;  %v1859_v22 = vsel %vm10049_vm3, %v1721_v53, %v1858_v51  ;;  %v10523_v29 = vld [vmem:[#allocation2 + $0x98] sm:$0x1]  ;;  %v3044_v8 = vrot.slane %v2037_v28, 1  ;;  %v1205_v57 = vmul.f32 %v10544_v16, %v9516_v30 }
 0x129   : > { %1860 = vst [vmem:[#allocation2 + $0xa8] sm:$0x1] %v1859_v22  ;;  %v2183_v17 = vshll.u32 %v10523_v29, 16  ;;  %v1632_v32 = vadd.f32 %v1600_v26, %v1435_v18  ;;  %v1633_v33 = vadd.f32 %v1601_v25, %v1436_v15  ;;  %v9503_v35 = vpop.permute.xlu1 %9502  ;;  %v2055_v36 = vld [vmem:[#allocation2 + $0x90] sm:$0xfe]  ;;  %v9527_v58 = vunpack.i.l.bf16 %v10531_v41 }
 0x12a   : > { %v10528_v49 = vsel %vm10099_vm6, %v1724_v21, %v1855_v14  ;;  %v9505_v38 = vunpack.i.h.bf16 %v9503_v35  ;;  %v9504_v3 = vunpack.i.l.bf16 %v9503_v35  ;;  %v3043_v39 = vrot.slane %v2055_v36, 1 }
 0x12b   : > { %1857 = vst [vmem:[#allocation2 + $0xa0] sm:$0xff] %v10528_v49  ;;  %v2185_v40 = vrot.slane %v2183_v17, 1  ;;  %v1655_v43 = vpack.c.bf16 %v1633_v33, %v1632_v32  ;;  %v2190_v47 = vshll.u32 %v10528_v49, 16  ;;  %v2188_v53 = vshrl.u32 %v10528_v49, 16  ;;  %v10570_v32 = vld [vmem:[%s12220_s4] ss:$0 sm:$0xff] }
 0x12c   : > { %v1406_v7 = vmul.f32 %v9505_v38, %v10300_v31  ;;  %v1405_v50 = vmul.f32 %v9504_v3, %v10300_v31  ;;  %v3045_v12 = vsel %vm2337_vm8, %v3043_v39, %v3044_v8  ;;  %v1204_v31 = vmul.f32 %v10544_v16, %v9515_v2  ;;  %v10565_v2 = vpop.permute.xlu0 %9542  ;;  %v10585_v39 = vld [vmem:[%s12219_s3 + $0x2] ss:$0 sm:$0xff] }
 0x12d   : > { %v2186_v6 = vsel %vm2066_vm7, %v2181_v37, %v2185_v40  ;;  %v1726_v52 = vshrl.u32 %v1655_v43, 16  ;;  %8929 = vmatmul.mubr.bf16.gmra.mrb[4].mxu1 %v3045_v12  ;;  %v2192_v61 = vrot.slane %v2190_v47, 1  ;;  %v1729_v63 = vshll.u32 %v1655_v43, 16  ;;  %v10578_v37 = vld [vmem:[%s12219_s3 + $0x1] ss:$0 sm:$0xff] }
 0x12e   : > { %3781 = vmatprep.mubr.bf16.mxu0 %v2186_v6  ;;  %v9509_v56 = vpop.permute.xlu1 %9508  ;;  %v1437_v48 = vadd.f32 %v1405_v50, %v1240_v46  ;;  %v1438_v34 = vadd.f32 %v1406_v7, %v1241_v45  ;;  %v1243_v33 = vadd.f32 %v10570_v32, %v1205_v57  ;;  %v1242_v35 = vadd.f32 %v10570_v32, %v1204_v31  ;;  %v1870_v47 = vld [vmem:[#allocation2 + $0xc8] sm:$0x1] }
 0x12f   : > { %3782 = vmatmul.mubr.bf16.gmra.mrb[36].mxu0 %v10504_v19  ;;  %v1728_v42 = vrot.slane %v1726_v52, 7  ;;  %v9511_v4 = vunpack.i.h.bf16 %v9509_v56  ;;  %v9510_v5 = vunpack.i.l.bf16 %v9509_v56  ;;  %v2193_v20 = vor.u32 %v2192_v61, %v2188_v53 }
 0x130   : > { %v2038_v51 = vld [vmem:[#allocation2 + $0xa8] sm:$0x1]  ;;  %v1605_v40 = vmul.f32 %v10585_v39, %v9528_v54  ;;  %v1604_v41 = vmul.f32 %v10585_v39, %v9527_v58  ;;  %v9545_v45 = vunpack.i.h.bf16 %v10565_v2  ;;  %v9544_v6 = vunpack.i.l.bf16 %v10565_v2  ;;  %v9555_v31 = vpop.permute.xlu0 %9554  ;;  %v1867_v58 = vld [vmem:[#allocation2 + $0xc0] sm:$0xff] }
 0x131   : > { %v10550_v62 = vld [vmem:[#allocation2 + $0xa8] sm:$0x1]  ;;  %v1731_v10 = vor.u32 %v1729_v63, %v1728_v42  ;;  %v1865_v19 = vsel %vm10049_vm3, %v1728_v42, %v1864_v55  ;;  %v1603_v11 = vmul.f32 %v9511_v4, %v10306_v24  ;;  %v1602_v13 = vmul.f32 %v9510_v5, %v10306_v24 }
 0x132   : > { %v2195_v44 = vshll.u32 %v10550_v62, 16  ;;  %v2056_v14 = vld [vmem:[#allocation2 + $0xa0] sm:$0xfe]  ;;  %1866 = vst [vmem:[#allocation2 + $0xb8] sm:$0x1] %v1865_v19  ;;  %v3047_v18 = vrot.slane %v2038_v51, 1  ;;  %v9557_v19 = vunpack.i.h.bf16 %v9555_v31 }
 0x133   : > { %v3046_v15 = vrot.slane %v2056_v14, 1  ;;  %v10560_v21 = vsel %vm10099_vm6, %v1731_v10, %v1861_v9  ;;  %v1634_v22 = vadd.f32 %v1602_v13, %v1437_v48  ;;  %v1635_v25 = vadd.f32 %v1603_v11, %v1438_v34  ;;  %v9520_v26 = vpop.permute.xlu1 %9519 }
 0x134   : > { %v2197_v0 = vrot.slane %v2195_v44, 1  ;;  %1863 = vst [vmem:[#allocation2 + $0xb0] sm:$0xff] %v10560_v21  ;;  %v9522_v28 = vunpack.i.h.bf16 %v9520_v26  ;;  %v9521_v8 = vunpack.i.l.bf16 %v9520_v26  ;;  %v2202_v36 = vshll.u32 %v10560_v21, 16  ;;  %v1876_v26 = vld [vmem:[#allocation2 + $0xd8] sm:$0x1] }
 0x135   : > { %v3048_v30 = vsel %vm2337_vm8, %v3046_v15, %v3047_v18  ;;  %v1656_v17 = vpack.c.bf16 %v1635_v25, %v1634_v22  ;;  %v2200_v63 = vshrl.u32 %v10560_v21, 16  ;;  %v9556_v18 = vunpack.i.l.bf16 %v9555_v31 }
 0x136   : > { %v2198_v24 = vsel %vm2066_vm7, %v2193_v20, %v2197_v0  ;;  %8932 = vmatprep.mubr.bf16.mxu1 %v3048_v30  ;;  %v1408_v38 = vmul.f32 %v10578_v37, %v9522_v28  ;;  %v1407_v3 = vmul.f32 %v10578_v37, %v9521_v8  ;;  %v2204_v54 = vrot.slane %v2202_v36, 1  ;;  %v10612_v36 = vpop.permute.xlu0 %9571 }
 0x137   : > { %3789 = vmatprep.mubr.bf16.mxu0 %v2198_v24  ;;  %v1733_v43 = vshrl.u32 %v1656_v17, 16  ;;  %v1736_v46 = vshll.u32 %v1656_v17, 16 }
 0x138   : > { %3790 = vmatmul.mubr.bf16.gmra.mrb[40].mxu0 %v10528_v49  ;;  %v1439_v7 = vadd.f32 %v1407_v3, %v1242_v35  ;;  %v1440_v50 = vadd.f32 %v1408_v38, %v1243_v33  ;;  %v9532_v12 = vpop.permute.xlu1 %9531  ;;  %v2205_v15 = vor.u32 %v2204_v54, %v2200_v63  ;;  %v1873_v38 = vld [vmem:[#allocation2 + $0xd0] sm:$0xff]  ;;  %v1607_v3 = vmul.f32 %v10585_v39, %v9545_v45 }
 0x139   : > { %v1735_v52 = vrot.slane %v1733_v43, 7  ;;  %v9534_v55 = vunpack.i.h.bf16 %v9532_v12  ;;  %v9533_v56 = vunpack.i.l.bf16 %v9532_v12  ;;  %v10592_v57 = vld [vmem:[#allocation2 + $0xb8] sm:$0x1]  ;;  %v9574_v45 = vunpack.i.h.bf16 %v10612_v36 }
 0x13a   : > { %v1636_v61 = vadd.f32 %v1604_v41, %v1439_v7  ;;  %v1637_v49 = vadd.f32 %v1605_v40, %v1440_v50  ;;  %v2039_v42 = vld [vmem:[#allocation2 + $0xb8] sm:$0x1]  ;;  %v2207_v4 = vshll.u32 %v10592_v57, 16  ;;  %v1606_v40 = vmul.f32 %v10585_v39, %v9544_v6 }
 0x13b   : > { %v1738_v5 = vor.u32 %v1736_v46, %v1735_v52  ;;  %v1871_v51 = vsel %vm10049_vm3, %v1735_v52, %v1870_v47  ;;  %v1207_v9 = vmul.f32 %v10544_v16, %v9534_v55  ;;  %v1206_v48 = vmul.f32 %v10544_v16, %v9533_v56  ;;  %v2057_v34 = vld [vmem:[#allocation2 + $0xb0] sm:$0xfe] }
 0x13c   : > { %1872 = vst [vmem:[#allocation2 + $0xc8] sm:$0x1] %v1871_v51  ;;  %v1657_v53 = vpack.c.bf16 %v1637_v49, %v1636_v61  ;;  %v3049_v44 = vrot.slane %v2057_v34, 1  ;;  %v2209_v10 = vrot.slane %v2207_v4, 1  ;;  %v3050_v14 = vrot.slane %v2039_v42, 1 }
 0x13d   : > { %v10602_v11 = vsel %vm10099_vm6, %v1738_v5, %v1867_v58  ;;  %v9538_v13 = vpop.permute.xlu1 %9537  ;;  %v1245_v0 = vadd.f32 %v10570_v32, %v1207_v9  ;;  %v1244_v28 = vadd.f32 %v10570_v32, %v1206_v48  ;;  %v1412_v41 = vmul.f32 %v10578_v37, %v9557_v19 }
 0x13e   : > { %1869 = vst [vmem:[#allocation2 + $0xc0] sm:$0xff] %v10602_v11  ;;  %v1740_v20 = vshrl.u32 %v1657_v53, 16  ;;  %v9540_v22 = vunpack.i.h.bf16 %v9538_v13  ;;  %v9539_v25 = vunpack.i.l.bf16 %v9538_v13  ;;  %v3051_v8 = vsel %vm2337_vm8, %v3049_v44, %v3050_v14 }
 0x13f   : > { %v2210_v30 = vsel %vm2066_vm7, %v2205_v15, %v2209_v10  ;;  %v2214_v24 = vshll.u32 %v10602_v11, 16  ;;  %v1743_v17 = vshll.u32 %v1657_v53, 16  ;;  %8933 = vmatmul.mubr.bf16.gmra.mrb[8].mxu1 %v3051_v8  ;;  %v1411_v56 = vmul.f32 %v10578_v37, %v9556_v18 }
 0x140   : > { %v1742_v2 = vrot.slane %v1740_v20, 7  ;;  %v1410_v33 = vmul.f32 %v10578_v37, %v9540_v22  ;;  %v1409_v35 = vmul.f32 %v10578_v37, %v9539_v25  ;;  %3797 = vmatprep.mubr.bf16.mxu0 %v2210_v30  ;;  %v2212_v61 = vshrl.u32 %v10602_v11, 16  ;;  %v1882_v22 = vld [vmem:[#allocation2 + $0xe8] sm:$0x1] }
 0x141   : > { %3798 = vmatmul.mubr.bf16.gmra.mrb[44].mxu0 %v10560_v21  ;;  %v2216_v43 = vrot.slane %v2214_v24, 1  ;;  %v9573_v63 = vunpack.i.l.bf16 %v10612_v36  ;;  %v1879_v36 = vld [vmem:[#allocation2 + $0xe0] sm:$0xff] }
 0x142   : > { %v1745_v46 = vor.u32 %v1743_v17, %v1742_v2  ;;  %v1877_v47 = vsel %vm10049_vm3, %v1742_v2, %v1876_v26  ;;  %v1441_v7 = vadd.f32 %v1409_v35, %v1244_v28  ;;  %v1442_v50 = vadd.f32 %v1410_v33, %v1245_v0  ;;  %v9549_v12 = vpop.permute.xlu1 %9548  ;;  %v9584_v0 = vpop.permute.xlu0 %9583 }
 0x143   : > { %1878 = vst [vmem:[#allocation2 + $0xd8] sm:$0x1] %v1877_v47  ;;  %v9551_v52 = vunpack.i.h.bf16 %v9549_v12  ;;  %v9550_v55 = vunpack.i.l.bf16 %v9549_v12  ;;  %v10622_v6 = vld [vmem:[#allocation2 + $0xc8] sm:$0x1]  ;;  %v2217_v48 = vor.u32 %v2216_v43, %v2212_v61 }
 0x144   : > { %v10626_v21 = vsel %vm10099_vm6, %v1745_v46, %v1873_v38  ;;  %v1638_v54 = vadd.f32 %v1606_v40, %v1441_v7  ;;  %v1639_v31 = vadd.f32 %v1607_v3, %v1442_v50  ;;  %v2040_v58 = vld [vmem:[#allocation2 + $0xc8] sm:$0x1]  ;;  %v2219_v5 = vshll.u32 %v10622_v6, 16 }
 0x145   : > { %1875 = vst [vmem:[#allocation2 + $0xd0] sm:$0xff] %v10626_v21  ;;  %v1209_v49 = vmul.f32 %v10544_v16, %v9551_v52  ;;  %v1208_v42 = vmul.f32 %v10544_v16, %v9550_v55  ;;  %v2058_v4 = vld [vmem:[#allocation2 + $0xc0] sm:$0xfe]  ;;  %v2226_v34 = vshll.u32 %v10626_v21, 16  ;;  %v3053_v19 = vrot.slane %v2040_v58, 1 }
 0x146   : > { %v1658_v51 = vpack.c.bf16 %v1639_v31, %v1638_v54  ;;  %v3052_v9 = vrot.slane %v2058_v4, 1  ;;  %v2221_v13 = vrot.slane %v2219_v5, 1  ;;  %v1414_v38 = vmul.f32 %v10578_v37, %v9574_v45 }
 0x147   : > { %v1247_v53 = vadd.f32 %v10570_v32, %v1209_v49  ;;  %v1246_v44 = vadd.f32 %v10570_v32, %v1208_v42  ;;  %v9561_v10 = vpop.permute.xlu1 %9560  ;;  %v2228_v35 = vrot.slane %v2226_v34, 1  ;;  %v9586_v3 = vunpack.i.h.bf16 %v9584_v0 }
 0x148   : > { %v1747_v14 = vshrl.u32 %v1658_v51, 16  ;;  %v1750_v15 = vshll.u32 %v1658_v51, 16  ;;  %v9563_v18 = vunpack.i.h.bf16 %v9561_v10  ;;  %v9562_v20 = vunpack.i.l.bf16 %v9561_v10 }
 0x149   : > { %v1444_v25 = vadd.f32 %v1412_v41, %v1247_v53  ;;  %v1443_v26 = vadd.f32 %v1411_v56, %v1246_v44  ;;  %v3054_v28 = vsel %vm2337_vm8, %v3052_v9, %v3053_v19  ;;  %v2222_v8 = vsel %vm2066_vm7, %v2217_v48, %v2221_v13  ;;  %v1888_v53 = vld [vmem:[#allocation2 + $0xf8] sm:$0x1] }
 0x14a   : > { %v1749_v30 = vrot.slane %v1747_v14, 7  ;;  %v1609_v24 = vmul.f32 %v10585_v39, %v9563_v18  ;;  %v1608_v2 = vmul.f32 %v10585_v39, %v9562_v20  ;;  %8936 = vmatprep.mubr.bf16.mxu1 %v3054_v28  ;;  %3805 = vmatprep.mubr.bf16.mxu0 %v2222_v8  ;;  %v2041_v17 = vld [vmem:[#allocation2 + $0xd8] sm:$0x1]  ;;  %v2224_v40 = vshrl.u32 %v10626_v21, 16  ;;  %v1885_v20 = vld [vmem:[#allocation2 + $0xf0] sm:$0xff] }
 0x14b   : > { %v10641_v33 = vld [vmem:[#allocation2 + $0xd8] sm:$0x1]  ;;  %3806 = vmatmul.mubr.bf16.gmra.mrb[48].mxu0 %v10602_v11  ;;  %v3056_v45 = vrot.slane %v2041_v17, 1  ;;  %v9585_v4 = vunpack.i.l.bf16 %v9584_v0  ;;  %v1413_v51 = vmul.f32 %v10578_v37, %v9573_v63  ;;  %v1213_v13 = vmul.f32 %v10544_v16, %v9586_v3 }
 0x14c   : > { %v2231_v41 = vshll.u32 %v10641_v33, 16  ;;  %v1752_v43 = vor.u32 %v1750_v15, %v1749_v30  ;;  %v1883_v46 = vsel %vm10049_vm3, %v1749_v30, %v1882_v22  ;;  %v1640_v47 = vadd.f32 %v1608_v2, %v1443_v26  ;;  %v9567_v50 = vpop.permute.xlu1 %9566  ;;  %v2059_v12 = vld [vmem:[#allocation2 + $0xd0] sm:$0xfe] }
 0x14d   : > { %v1641_v7 = vadd.f32 %v1609_v24, %v1444_v25  ;;  %1884 = vst [vmem:[#allocation2 + $0xe8] sm:$0x1] %v1883_v46  ;;  %v9569_v52 = vunpack.i.h.bf16 %v9567_v50  ;;  %v9568_v55 = vunpack.i.l.bf16 %v9567_v50  ;;  %v3055_v56 = vrot.slane %v2059_v12, 1 }
 0x14e   : > { %v10651_v11 = vsel %vm10099_vm6, %v1752_v43, %v1879_v36  ;;  %v10653_v31 = vor.u32 %v2228_v35, %v2224_v40  ;;  %v2233_v58 = vrot.slane %v2231_v41, 1  ;;  %v1212_v25 = vmul.f32 %v10544_v16, %v9585_v4 }
 0x14f   : > { %v1659_v54 = vpack.c.bf16 %v1641_v7, %v1640_v47  ;;  %1881 = vst [vmem:[#allocation2 + $0xe0] sm:$0xff] %v10651_v11  ;;  %v1211_v61 = vmul.f32 %v10544_v16, %v9569_v52  ;;  %v1210_v49 = vmul.f32 %v10544_v16, %v9568_v55  ;;  %v3057_v42 = vsel %vm2337_vm8, %v3055_v56, %v3056_v45 }
 0x150   : > { %8937 = vmatmul.mubr.bf16.gmra.mrb[12].mxu1 %v3057_v42  ;;  %v2234_v9 = vsel %vm2066_vm7, %v10653_v31, %v2233_v58  ;;  %v2238_v48 = vshll.u32 %v10651_v11, 16  ;;  %v2236_v26 = vshrl.u32 %v10651_v11, 16  ;;  %v1251_v52 = vadd.f32 %v10570_v32, %v1213_v13  ;;  %v1894_v42 = vld [vmem:[#allocation2 + $0x108] sm:$0x1] }
 0x151   : > { %v1754_v5 = vshrl.u32 %v1659_v54, 16  ;;  %v1757_v34 = vshll.u32 %v1659_v54, 16  ;;  %v1249_v44 = vadd.f32 %v10570_v32, %v1211_v61  ;;  %v1248_v10 = vadd.f32 %v10570_v32, %v1210_v49  ;;  %v9578_v19 = vpop.permute.xlu1 %9577  ;;  %3813 = vmatprep.mubr.bf16.mxu0 %v2234_v9 }
 0x152   : > { %v9580_v15 = vunpack.i.h.bf16 %v9578_v19  ;;  %v9579_v18 = vunpack.i.l.bf16 %v9578_v19  ;;  %v2240_v63 = vrot.slane %v2238_v48, 1  ;;  %v1250_v55 = vadd.f32 %v10570_v32, %v1212_v25 }
 0x153   : > { %v1756_v14 = vrot.slane %v1754_v5, 7  ;;  %v1445_v0 = vadd.f32 %v1413_v51, %v1248_v10  ;;  %v1446_v22 = vadd.f32 %v1414_v38, %v1249_v44  ;;  %3814 = vmatmul.mubr.bf16.gmra.mrb[52].mxu0 %v10626_v21 }
 0x154   : > { %v1611_v30 = vmul.f32 %v10585_v39, %v9580_v15  ;;  %v1610_v24 = vmul.f32 %v10585_v39, %v9579_v18  ;;  %v2042_v2 = vld [vmem:[#allocation2 + $0xe8] sm:$0x1]  ;;  %v10680_v43 = vor.u32 %v2240_v63, %v2236_v26 }
 0x155   : > { %v1759_v28 = vor.u32 %v1757_v34, %v1756_v14  ;;  %v1889_v8 = vsel %vm10049_vm3, %v1756_v14, %v1888_v53  ;;  %v10673_v17 = vld [vmem:[#allocation2 + $0xe8] sm:$0x1]  ;;  %v3059_v35 = vrot.slane %v2042_v2, 1 }
 0x156   : > { %1890 = vst [vmem:[#allocation2 + $0xf8] sm:$0x1] %v1889_v8  ;;  %v2243_v36 = vshll.u32 %v10673_v17, 16  ;;  %v1642_v38 = vadd.f32 %v1610_v24, %v1445_v0  ;;  %v1643_v3 = vadd.f32 %v1611_v30, %v1446_v22  ;;  %v9590_v40 = vpop.permute.xlu1 %9589  ;;  %v2060_v41 = vld [vmem:[#allocation2 + $0xe0] sm:$0xfe] }
 0x157   : > { %v10678_v16 = vsel %vm10099_vm6, %v1759_v28, %v1885_v20  ;;  %v9592_v46 = vunpack.i.h.bf16 %v9590_v40  ;;  %v9591_v47 = vunpack.i.l.bf16 %v9590_v40  ;;  %v3058_v7 = vrot.slane %v2060_v41, 1 }
 0x158   : > { %1887 = vst [vmem:[#allocation2 + $0xf0] sm:$0xff] %v10678_v16  ;;  %v2245_v50 = vrot.slane %v2243_v36, 1  ;;  %v1660_v12 = vpack.c.bf16 %v1643_v3, %v1642_v38  ;;  %v2250_v56 = vshll.u32 %v10678_v16, 16  ;;  %v2248_v19 = vshrl.u32 %v10678_v16, 16  ;;  %v1900_v38 = vld [vmem:[#allocation2 + $0x118] sm:$0x1] }
 0x159   : > { %v1416_v45 = vmul.f32 %v10578_v37, %v9592_v46  ;;  %v1415_v54 = vmul.f32 %v10578_v37, %v9591_v47  ;;  %v3060_v58 = vsel %vm2337_vm8, %v3058_v7, %v3059_v35  ;;  %v1891_v37 = vld [vmem:[#allocation2 + $0x100] sm:$0xff]  ;;  %v1897_v7 = vld [vmem:[#allocation2 + $0x110] sm:$0xff] }
 0x15a   : > { %v2246_v61 = vsel %vm2066_vm7, %v10680_v43, %v2245_v50  ;;  %v1761_v49 = vshrl.u32 %v1660_v12, 16  ;;  %8940 = vmatprep.mubr.bf16.mxu1 %v3060_v58  ;;  %v2252_v5 = vrot.slane %v2250_v56, 1  ;;  %v1764_v51 = vshll.u32 %v1660_v12, 16 }
 0x15b   : > { %3821 = vmatprep.mubr.bf16.mxu0 %v2246_v61  ;;  %v9596_v4 = vpop.permute.xlu1 %9595  ;;  %v1447_v44 = vadd.f32 %v1415_v54, %v1250_v55  ;;  %v1448_v10 = vadd.f32 %v1416_v45, %v1251_v52 }
 0x15c   : > { %3822 = vmatmul.mubr.bf16.gmra.mrb[56].mxu0 %v10651_v11  ;;  %v1763_v32 = vrot.slane %v1761_v49, 7  ;;  %v9598_v9 = vunpack.i.h.bf16 %v9596_v4  ;;  %v9597_v48 = vunpack.i.l.bf16 %v9596_v4  ;;  %v10700_v25 = vor.u32 %v2252_v5, %v2248_v19 }
 0x15d   : > { %v2043_v34 = vld [vmem:[#allocation2 + $0xf8] sm:$0x1] }
 0x15e   : > { %v10692_v53 = vld [vmem:[#allocation2 + $0xf8] sm:$0x1]  ;;  %v1766_v14 = vor.u32 %v1764_v51, %v1763_v32  ;;  %v1895_v15 = vsel %vm10049_vm3, %v1763_v32, %v1894_v42  ;;  %v1613_v18 = vmul.f32 %v10585_v39, %v9598_v9  ;;  %v1612_v63 = vmul.f32 %v10585_v39, %v9597_v48 }
 0x15f   : > { %v2255_v13 = vshll.u32 %v10692_v53, 16  ;;  %v2061_v20 = vld [vmem:[#allocation2 + $0xf0] sm:$0xfe]  ;;  %1896 = vst [vmem:[#allocation2 + $0x108] sm:$0x1] %v1895_v15  ;;  %v3062_v22 = vrot.slane %v2043_v34, 1 }
 0x160   : > { %v3061_v0 = vrot.slane %v2061_v20, 1  ;;  %v10704_v28 = vsel %vm10099_vm6, %v1766_v14, %v1891_v37  ;;  %v1644_v8 = vadd.f32 %v1612_v63, %v1447_v44  ;;  %v1645_v30 = vadd.f32 %v1613_v18, %v1448_v10  ;;  %v10739_v18 = vld [vmem:[#allocation2 + $0x10] sm:$0xff]  ;;  %v1939_v63 = vld [vmem:[#allocation2] sm:$0xfe] }
 0x161   : > { %v2257_v26 = vrot.slane %v2255_v13, 1  ;;  %1893 = vst [vmem:[#allocation2 + $0x100] sm:$0xff] %v10704_v28  ;;  %v2262_v2 = vshll.u32 %v10704_v28, 16  ;;  %v2260_v50 = vshrl.u32 %v10704_v28, 16  ;;  %v2338_v20 = vrot.slane %v1939_v63, 1 }
 0x162   : > { %v3063_v24 = vsel %vm2337_vm8, %v3061_v0, %v3062_v22  ;;  %v1661_v35 = vpack.c.bf16 %v1645_v30, %v1644_v8  ;;  %v9748_v0 = vld [vmem:[#allocation2 + $0x8] sm:$0x1]  ;;  %v9640_v8 = vld [vmem:[#allocation3 + $0x100] sm:$0xff]   ;;  %v1940_v30 = vld [vmem:[#allocation2 + $0x10] sm:$0xfe] }
 0x163   : > { %v2258_v39 = vsel %vm2066_vm7, %v10700_v25, %v2257_v26  ;;  %8941 = vmatmul.mubr.bf16.gmra.mrb[16].mxu1 %v3063_v24  ;;  %v2264_v3 = vrot.slane %v2262_v2, 1  ;;  %v2339_v22 = vrot.slane %v9748_v0, 1  ;;  %v10744_v24 = vld [vmem:[#allocation2 + $0x20] sm:$0xff]  ;;  %v9749_v2 = vld [vmem:[#allocation2 + $0x18] sm:$0x1] }
 0x164   : > { %3829 = vmatprep.mubr.bf16.mxu0 %v2258_v39  ;;  %v1768_v36 = vshrl.u32 %v1661_v35, 16  ;;  %v1771_v41 = vshll.u32 %v1661_v35, 16  ;;  %v2341_v39 = vrot.slane %v1940_v30, 1  ;;  %v2342_v35 = vrot.slane %v9749_v2, 1 }
 0x165   : > { %3830 = vmatmul.mubr.bf16.gmra.mrb[60].mxu0 %v10678_v16  ;;  %v10718_v58 = vor.u32 %v2264_v3, %v2260_v50  ;;  %v2340_v26 = vsel %vm2337_vm8, %v2338_v20, %v2339_v22  ;;  %v9643_v50 = vld [vmem:[#allocation3 + $0x118] sm:$0xff]   ;;  %v9648_v20 = vld [vmem:[#allocation3 + $0x140] sm:$0xff]  }
 0x166   : > { %v1770_v40 = vrot.slane %v1768_v36, 7  ;;  %v2044_v46 = vld [vmem:[#allocation2 + $0x108] sm:$0x1]  ;;  %v2343_v3 = vsel %vm2337_vm8, %v2341_v39, %v2342_v35  ;;  %v10776_v22 = vld [vmem:[#allocation2 + $0x60] sm:$0xff]  ;;  %v9753_v39 = vld [vmem:[#allocation2 + $0x58] sm:$0x1] }
 0x167   : > { %v10712_v47 = vld [vmem:[#allocation2 + $0x108] sm:$0x1]  ;;  %v3065_v54 = vrot.slane %v2044_v46, 1  ;;  %v10752_v46 = vld [vmem:[#allocation2 + $0x30] sm:$0xff]  ;;  %v2354_v2 = vrot.slane %v9753_v39, 1 }
 0x168   : > { %v2267_v12 = vshll.u32 %v10712_v47, 16  ;;  %v1773_v52 = vor.u32 %v1771_v41, %v1770_v40  ;;  %v1901_v55 = vsel %vm10049_vm3, %v1770_v40, %v1900_v38  ;;  %v2062_v56 = vld [vmem:[#allocation2 + $0x100] sm:$0xfe]  ;;  %v9641_v36 = vld [vmem:[#allocation3 + $0x108] sm:$0xff]   ;;  %v597_v38 = vld [vmem:[#allocation2 + $0x120] sm:$0x1] }
 0x169   : > { %1902 = vst [vmem:[#allocation2 + $0x118] sm:$0x1] %v1901_v55  ;;  %v3064_v45 = vrot.slane %v2062_v56, 1  ;;  %v9642_v40 = vld [vmem:[#allocation3 + $0x110] sm:$0xff]   ;;  %v598_v41 = vsel %vm10049_vm3, 0, %v597_v38  ;;  %v9644_v56 = vld [vmem:[#allocation3 + $0x120] sm:$0xff]  }
 0x16a   : > { %v2269_v61 = vrot.slane %v2267_v12, 1  ;;  %v10722_v49 = vsel %vm10099_vm6, %v1773_v52, %v1897_v7  ;;  %599 = vst [vmem:[#allocation2 + $0x120] sm:$0x1] %v598_v41  ;;  %v1941_v7 = vld [vmem:[#allocation2 + $0x20] sm:$0xfe]  ;;  %v9650_v35 = vld [vmem:[#allocation3 + $0x150] sm:$0xff]  }
 0x16b   : > { %1899 = vst [vmem:[#allocation2 + $0x110] sm:$0xff] %v10722_v49  ;;  %v3066_v42 = vsel %vm2337_vm8, %v3064_v45, %v3065_v54  ;;  %v2274_v5 = vshll.u32 %v10722_v49, 16  ;;  %v2272_v48 = vshrl.u32 %v10722_v49, 16  ;;  %v2344_v12 = vrot.slane %v1941_v7, 1  ;;  %v9750_v52 = vld [vmem:[#allocation2 + $0x28] sm:$0x1] }
 0x16c   : > { %v2270_v4 = vsel %vm2066_vm7, %v10718_v58, %v2269_v61  ;;  %8944 = vmatprep.mubr.bf16.mxu1 %v3066_v42  ;;  %v2345_v55 = vrot.slane %v9750_v52, 1  ;;  %v10764_v42 = vld [vmem:[#allocation2 + $0x40] sm:$0xff]  ;;  %v10782_v38 = vld [vmem:[#allocation2 + $0x70] sm:$0xff]  ;;  %v9754_v7 = vld [vmem:[#allocation2 + $0x68] sm:$0x1] }
 0x16d   : > { %3837 = vmatprep.mubr.bf16.mxu0 %v2270_v4  ;;  %v2276_v32 = vrot.slane %v2274_v5, 1  ;;  %v1942_v4 = vld [vmem:[#allocation2 + $0x30] sm:$0xfe]  ;;  %v9645_v5 = vld [vmem:[#allocation3 + $0x128] sm:$0xff]   ;;  %v1949_v39 = vld [vmem:[#allocation2 + $0xa0] sm:$0xfe] }
 0x16e   : > { %3838 = vmatmul.mubr.bf16.gmra.mrb[64].mxu0 %v10704_v28  ;;  %v2346_v61 = vsel %vm2337_vm8, %v2344_v12, %v2345_v55  ;;  %v9652_v12 = vld [vmem:[#allocation3 + $0x160] sm:$0xff]  }
 0x16f   : > { %v10734_v19 = vor.u32 %v2276_v32, %v2272_v48  ;;  %v2347_v32 = vrot.slane %v1942_v4, 1  ;;  %v10788_v55 = vld [vmem:[#allocation2 + $0x80] sm:$0xff]  ;;  %v9755_v4 = vld [vmem:[#allocation2 + $0x78] sm:$0x1] }
 0x170   : > { %v2045_v51 = vld [vmem:[#allocation2 + $0x118] sm:$0x1] }
 0x171   : > { %v10730_v9 = vld [vmem:[#allocation2 + $0x118] sm:$0x1]  ;;  %v3068_v10 = vrot.slane %v2045_v51, 1  ;;  %v940_v45 = vld [vmem:[#allocation2 + $0x120] sm:$0xff] }
 0x172   : > { %v2279_v34 = vshll.u32 %v10730_v9, 16  ;;  %v2063_v37 = vld [vmem:[#allocation2 + $0x110] sm:$0xfe]  ;;  %v10760_v54 = vsel %vm10099_vm6, %v10095_v59, %v940_v45  ;;  %v9751_v51 = vld [vmem:[#allocation2 + $0x38] sm:$0x1]  ;;  %v9653_v45 = vld [vmem:[#allocation3 + $0x168] sm:$0xff]  }
 0x173   : > { %v3067_v44 = vrot.slane %v2063_v37, 1  ;;  %942 = vst [vmem:[#allocation2 + $0x120] sm:$0xff] %v10760_v54  ;;  %v2348_v48 = vrot.slane %v9751_v51, 1 }
 0x174   : > { %v2281_v13 = vrot.slane %v2279_v34, 1  ;;  %v9646_v34 = vld [vmem:[#allocation3 + $0x130] sm:$0xff]  }
 0x175   : > { %v3069_v14 = vsel %vm2337_vm8, %v3067_v44, %v3068_v10  ;;  %v2349_v37 = vsel %vm2337_vm8, %v2347_v32, %v2348_v48  ;;  %v10770_v44 = vld [vmem:[#allocation2 + $0x50] sm:$0xff]  ;;  %v1943_v10 = vld [vmem:[#allocation2 + $0x40] sm:$0xfe] }
 0x176   : > { %v2282_v15 = vsel %vm2066_vm7, %v10734_v19, %v2281_v13  ;;  %8945 = vmatmul.mubr.bf16.gmra.mrb[20].mxu1 %v3069_v14  ;;  %v9647_v13 = vld [vmem:[#allocation3 + $0x138] sm:$0xff]   ;;  %v2350_v14 = vrot.slane %v1943_v10, 1  ;;  %v9654_v32 = vld [vmem:[#allocation3 + $0x170] sm:$0xff]  }
 0x177   : > { %3845 = vmatprep.mubr.bf16.mxu0 %v2282_v15  ;;  %v9752_v15 = vld [vmem:[#allocation2 + $0x48] sm:$0x1]  ;;  %v10794_v48 = vld [vmem:[#allocation2 + $0x90] sm:$0xff] }
 0x178   : > { %3846 = vmatmul.mubr.bf16.gmra.mrb[68].mxu0 %v10722_v49  ;;  %v2351_v63 = vrot.slane %v9752_v15, 1 }
 0x179   : > { %3886 = vmatprep.mubr.bf16.mxu0 %v10739_v18 }
 0x17a   : > { %v2352_v0 = vsel %vm2337_vm8, %v2350_v14, %v2351_v63  ;;  %v10800_v63 = vld [vmem:[#allocation2 + $0xa0] sm:$0xff] }
 0x180   : > { %3887 = vmatmul.mubr.bf16.vlgmr.msra.gmra.mrb[0].mxu0 %v2340_v26  ;;  %v1944_v26 = vld [vmem:[#allocation2 + $0x50] sm:$0xfe] }
 0x181   : > { %4032 = vmatpush1.bf16.msra.mxu0 %v9640_v8  ;;  %3894 = vmatprep.mubr.bf16.mxu0 %v10744_v24  ;;  %v9649_v8 = vld [vmem:[#allocation3 + $0x148] sm:$0xff]   ;;  %v2353_v30 = vrot.slane %v1944_v26, 1  ;;  %v2366_v26 = vrot.slane %v10523_v29, 1 }
 0x182   : > { %4033 = vmatprep.subr.bf16.mxu0 %v9873_v1 }
 0x185   : > { %4034 = vmatpush1.bf16.msra.mxu0 %v9641_v36  ;;  %v2355_v36 = vsel %vm2337_vm8, %v2353_v30, %v2354_v2  ;;  %v10805_v30 = vld [vmem:[#allocation2 + $0xb0] sm:$0xff]  ;;  %v2368_v2 = vrot.slane %v1949_v39, 1 }
 0x186   : > { %4035 = vmatprep.subr.bf16.mxu0 %v9873_v1 }
 0x188   : > { %3895 = vmatmul.mubr.bf16.gmra.mrb[4].mxu0 %v2343_v3  ;;  %v1945_v3 = vld [vmem:[#allocation2 + $0x60] sm:$0xfe] }
 0x189   : > { %3902 = vmatprep.mubr.bf16.mxu0 %v10752_v46  ;;  %4036 = vmatpush1.bf16.msra.mxu0 %v9642_v40  ;;  %v9651_v40 = vld [vmem:[#allocation3 + $0x158] sm:$0xff]   ;;  %v2356_v41 = vrot.slane %v1945_v3, 1  ;;  %v10810_v3 = vld [vmem:[#allocation2 + $0xc0] sm:$0xff] }
 0x18a   : > { %4037 = vmatprep.subr.bf16.mxu0 %v9873_v1 }
 0x18d   : > { %4038 = vmatpush1.bf16.msra.mxu0 %v9643_v50  ;;  %v2357_v50 = vrot.slane %v9754_v7, 1 }
 0x18e   : > { %4039 = vmatprep.subr.bf16.mxu0 %v9873_v1 }
 0x18f   : > { %v2358_v52 = vsel %vm2337_vm8, %v2356_v41, %v2357_v50  ;;  %v2372_v41 = vrot.slane %v10592_v57, 1  ;;  %v1951_v50 = vld [vmem:[#allocation2 + $0xc0] sm:$0xfe] }
 0x190   : > { %3903 = vmatmul.mubr.bf16.gmra.mrb[8].mxu0 %v2346_v61 }
 0x191   : > { %3910 = vmatprep.mubr.bf16.mxu0 %v10764_v42  ;;  %4040 = vmatpush1.bf16.msra.mxu0 %v9644_v56  ;;  %v1946_v56 = vld [vmem:[#allocation2 + $0x70] sm:$0xfe] }
 0x192   : > { %4041 = vmatprep.subr.bf16.mxu0 %v9873_v1  ;;  %v2359_v61 = vrot.slane %v1946_v56, 1  ;;  %v1952_v56 = vld [vmem:[#allocation2 + $0xd0] sm:$0xfe] }
 0x195   : > { %4042 = vmatpush1.bf16.msra.mxu0 %v9645_v5  ;;  %v2360_v5 = vrot.slane %v9755_v4, 1  ;;  %v1953_v4 = vld [vmem:[#allocation2 + $0xe0] sm:$0xfe] }
 0x196   : > { %4043 = vmatprep.subr.bf16.mxu0 %v9873_v1 }
 0x197   : > { %v2361_v51 = vsel %vm2337_vm8, %v2359_v61, %v2360_v5  ;;  %v2378_v61 = vrot.slane %v10641_v33, 1  ;;  %v2380_v5 = vrot.slane %v1953_v4, 1 }
 0x198   : > { %3911 = vmatmul.mubr.bf16.gmra.mrb[12].mxu0 %v2349_v37  ;;  %v9655_v37 = vld [vmem:[#allocation3 + $0x178] sm:$0xff]  }
 0x199   : > { %3918 = vmatprep.mubr.bf16.mxu0 %v10770_v44  ;;  %4044 = vmatpush1.bf16.msra.mxu0 %v9646_v34  ;;  %v1947_v34 = vld [vmem:[#allocation2 + $0x80] sm:$0xfe] }
 0x19a   : > { %4045 = vmatprep.subr.bf16.mxu0 %v9873_v1  ;;  %v2362_v10 = vrot.slane %v1947_v34, 1 }
 0x19d   : > { %4046 = vmatpush1.bf16.msra.mxu0 %v9647_v13  ;;  %v9756_v13 = vld [vmem:[#allocation2 + $0x88] sm:$0x1] }
 0x19e   : > { %4047 = vmatprep.subr.bf16.mxu0 %v9873_v1  ;;  %v2363_v14 = vrot.slane %v9756_v13, 1 }
 0x1a0   : > { %3919 = vmatmul.mubr.bf16.gmra.mrb[16].mxu0 %v2352_v0  ;;  %v2364_v15 = vsel %vm2337_vm8, %v2362_v10, %v2363_v14  ;;  %v2387_v14 = vrot.slane %v10712_v47, 1 }
 0x1a1   : > { %3926 = vmatprep.mubr.bf16.mxu0 %v10776_v22  ;;  %4048 = vmatpush1.bf16.msra.mxu0 %v9648_v20  ;;  %v1948_v20 = vld [vmem:[#allocation2 + $0x90] sm:$0xfe] }
 0x1a2   : > { %4049 = vmatprep.subr.bf16.mxu0 %v9873_v1  ;;  %v2365_v0 = vrot.slane %v1948_v20, 1  ;;  %v1994_v20 = vld [vmem:[#allocation2 + $0x10] sm:$0xfe] }
 0x1a3   : > { %v2680_v39 = vrot.slane %v1994_v20, 1 }
 0x1a5   : > { %4050 = vmatpush1.bf16.msra.mxu0 %v9649_v8  ;;  %v2367_v8 = vsel %vm2337_vm8, %v2365_v0, %v2366_v26  ;;  %v1956_v0 = vld [vmem:[#allocation2 + $0x110] sm:$0xfe]  ;;  %v2413_v26 = vshll.u32 %v10739_v18, 16 }
 0x1a6   : > { %4051 = vmatprep.subr.bf16.mxu0 %v9873_v1 }
 0x1a8   : > { %3927 = vmatmul.mubr.bf16.gmra.mrb[20].mxu0 %v2355_v36 }
 0x1a9   : > { %3934 = vmatprep.mubr.bf16.mxu0 %v10782_v38  ;;  %4052 = vmatpush1.bf16.msra.mxu0 %v9650_v35  ;;  %v2369_v35 = vrot.slane %v10550_v62, 1  ;;  %v2375_v62 = vrot.slane %v10622_v6, 1 }
 0x1aa   : > { %4053 = vmatprep.subr.bf16.mxu0 %v9873_v1 }
 0x1ab   : > { %v2370_v36 = vsel %vm2337_vm8, %v2368_v2, %v2369_v35  ;;  %v2389_v35 = vrot.slane %v1956_v0, 1  ;;  %v9658_v0 = vld [vmem:[#allocation3 + $0x190] sm:$0xff]  }
 0x1ad   : > { %4054 = vmatpush1.bf16.msra.mxu0 %v9651_v40  ;;  %v1950_v40 = vld [vmem:[#allocation2 + $0xb0] sm:$0xfe] }
 0x1ae   : > { %4055 = vmatprep.subr.bf16.mxu0 %v9873_v1  ;;  %v2371_v29 = vrot.slane %v1950_v40, 1  ;;  %v2415_v40 = vrot.slane %v2413_v26, 1 }
 0x1b0   : > { %3935 = vmatmul.mubr.bf16.gmra.mrb[24].mxu0 %v2358_v52  ;;  %v2373_v7 = vsel %vm2337_vm8, %v2371_v29, %v2372_v41  ;;  %v2390_v29 = vrot.slane %v10730_v9, 1 }
 0x1b1   : > { %3942 = vmatprep.mubr.bf16.mxu0 %v10788_v55  ;;  %4056 = vmatpush1.bf16.msra.mxu0 %v9652_v12  ;;  %v2374_v12 = vrot.slane %v1951_v50, 1 }
 0x1b2   : > { %4057 = vmatprep.subr.bf16.mxu0 %v9873_v1  ;;  %v2391_v50 = vsel %vm2337_vm8, %v2389_v35, %v2390_v29  ;;  %v1997_v29 = vld [vmem:[#allocation2 + $0x40] sm:$0xfe] }
 0x1b3   : > { %v2376_v52 = vsel %vm2337_vm8, %v2374_v12, %v2375_v62 }
 0x1b5   : > { %4058 = vmatpush1.bf16.msra.mxu0 %v9653_v45  ;;  %v2377_v45 = vrot.slane %v1952_v56, 1  ;;  %v2425_v56 = vshll.u32 %v10744_v24, 16 }
 0x1b6   : > { %4059 = vmatprep.subr.bf16.mxu0 %v9873_v1 }
 0x1b7   : > { %v2379_v57 = vsel %vm2337_vm8, %v2377_v45, %v2378_v61  ;;  %v1977_v45 = vld [vmem:[#allocation2 + $0x28] sm:$0x1] }
 0x1b8   : > { %3943 = vmatmul.mubr.bf16.gmra.mrb[28].mxu0 %v2361_v51  ;;  %v2684_v4 = vrot.slane %v1977_v45, 1 }
 0x1b9   : > { %3950 = vmatprep.mubr.bf16.mxu0 %v10794_v48  ;;  %4060 = vmatpush1.bf16.msra.mxu0 %v9654_v32  ;;  %v1954_v32 = vld [vmem:[#allocation2 + $0xf0] sm:$0xfe] }
 0x1ba   : > { %4061 = vmatprep.subr.bf16.mxu0 %v9873_v1  ;;  %v2383_v34 = vrot.slane %v1954_v32, 1  ;;  %v2430_v32 = vshll.u32 %v1977_v45, 16  ;;  %v1979_v45 = vld [vmem:[#allocation2 + $0x48] sm:$0x1] }
 0x1bd   : > { %4062 = vmatpush1.bf16.msra.mxu0 %v9655_v37 }
 0x1be   : > { %4208 = vmatprep.subr.bf16.mxu0 %v9873_v1 }
 0x1c0   : > { %3951 = vmatmul.mubr.bf16.gmra.mrb[32].mxu0 %v2364_v15  ;;  %v1976_v15 = vld [vmem:[#allocation2 + $0x18] sm:$0x1] }
 0x1c1   : > { %3958 = vmatprep.mubr.bf16.mxu0 %v10800_v63  ;;  %v2681_v2 = vrot.slane %v1976_v15, 1  ;;  %v2418_v41 = vshll.u32 %v1976_v15, 16 }
 0x1c3   : > { %v2420_v62 = vrot.slane %v2418_v41, 1  ;;  %v2435_v41 = vshrl.u32 %v10752_v46, 16 }
 0x1c8   : > { %3959 = vmatmul.mubr.bf16.gmra.mrb[36].mxu0 %v2367_v8 }
 0x1c9   : > { %3966 = vmatprep.mubr.bf16.mxu0 %v10805_v30 }
 0x1d0   : > { %3967 = vmatmul.mubr.bf16.gmra.mrb[40].mxu0 %v2370_v36  ;;  %v2411_v36 = vshrl.u32 %v10739_v18, 16  ;;  %v9656_v18 = vld [vmem:[#allocation3 + $0x180] sm:$0xff]  }
 0x1d1   : > { %3974 = vmatprep.mubr.bf16.mxu0 %v10810_v3 }
 0x1d2   : > { %v2416_v12 = vor.u32 %v2415_v40, %v2411_v36 }
 0x1d8   : > { %3975 = vmatmul.mubr.bf16.gmra.mrb[44].mxu0 %v2373_v7  ;;  %v2682_v7 = vsel %vm2337_vm8, %v2680_v39, %v2681_v2 }
 0x1d9   : > { %3982 = vmatprep.mubr.bf16.mxu0 %v10626_v21  ;;  %v2381_v21 = vrot.slane %v10673_v17, 1  ;;  %v1955_v17 = vld [vmem:[#allocation2 + $0x100] sm:$0xfe] }
 0x1da   : > { %v2386_v13 = vrot.slane %v1955_v17, 1  ;;  %v2437_v17 = vshll.u32 %v10752_v46, 16  ;;  %v9660_v46 = vld [vmem:[#allocation3 + $0x1a0] sm:$0xff]  }
 0x1db   : > { %v2382_v6 = vsel %vm2337_vm8, %v2380_v5, %v2381_v21  ;;  %v2427_v5 = vrot.slane %v2425_v56, 1  ;;  %v659_v21 = vld [vmem:[#allocation2 + $0x128] sm:$0x1] }
 0x1dc   : > { %v2439_v2 = vrot.slane %v2437_v17, 1  ;;  %v1980_v17 = vld [vmem:[#allocation2 + $0x58] sm:$0x1] }
 0x1de   : > { %v2440_v56 = vor.u32 %v2439_v2, %v2435_v41  ;;  %v2459_v41 = vshrl.u32 %v10770_v44, 16 }
 0x1e0   : > { %3983 = vmatmul.mubr.bf16.gmra.mrb[48].mxu0 %v2376_v52  ;;  %v1995_v52 = vld [vmem:[#allocation2 + $0x20] sm:$0xfe] }
 0x1e1   : > { %3990 = vmatprep.mubr.bf16.mxu0 %v10651_v11  ;;  %v2683_v61 = vrot.slane %v1995_v52, 1  ;;  %v2449_v52 = vshll.u32 %v10764_v42, 16 }
 0x1e3   : > { %v2685_v9 = vsel %vm2337_vm8, %v2683_v61, %v2684_v4  ;;  %v2689_v61 = vrot.slane %v1997_v29, 1  ;;  %v2451_v4 = vrot.slane %v2449_v52, 1 }
 0x1e8   : > { %3991 = vmatmul.mubr.bf16.gmra.mrb[52].mxu0 %v2379_v57  ;;  %v2421_v57 = vsel %vm2066_vm7, %v2416_v12, %v2420_v62 }
 0x1e9   : > { %3998 = vmatprep.mubr.bf16.mxu0 %v10678_v16  ;;  %v2384_v16 = vrot.slane %v10692_v53, 1 }
 0x1eb   : > { %v2385_v10 = vsel %vm2337_vm8, %v2383_v34, %v2384_v16  ;;  %v1996_v34 = vld [vmem:[#allocation2 + $0x30] sm:$0xfe]  ;;  %v9657_v16 = vld [vmem:[#allocation3 + $0x188] sm:$0xff]  }
 0x1ec   : > { %v2686_v15 = vrot.slane %v1996_v34, 1  ;;  %v9661_v34 = vld [vmem:[#allocation3 + $0x1a8] sm:$0xff]  }
 0x1f0   : > { %3999 = vmatmul.mubr.bf16.gmra.mrb[56].mxu0 %v2382_v6  ;;  %v10824_v51 = vpop.f32.mrb[0].mxu1  ;;  %v2423_v6 = vshrl.u32 %v10744_v24, 16  ;;  %v2432_v24 = vrot.slane %v2430_v32, 1  ;;  %v1998_v32 = vld [vmem:[#allocation2 + $0x50] sm:$0xfe] }
 0x1f1   : > { %4006 = vmatprep.mubr.bf16.mxu0 %v10704_v28  ;;  %v10827_v11 = vpop.f32.mrb[1].mxu1  ;;  %v2388_v28 = vsel %vm2337_vm8, %v2386_v13, %v2387_v14  ;;  %v1978_v14 = vld [vmem:[#allocation2 + $0x38] sm:$0x1] }
 0x1f2   : > { %v10829_v33 = vpop.f32.mrb[2].mxu1  ;;  %v2428_v13 = vor.u32 %v2427_v5, %v2423_v6  ;;  %v2687_v39 = vrot.slane %v1978_v14, 1  ;;  %v2454_v6 = vshll.u32 %v1979_v45, 16 }
 0x1f3   : > { %v10831_v37 = vpop.f32.mrb[3].mxu1 }
 0x1f4   : > { %v2433_v36 = vsel %vm2066_vm7, %v2428_v13, %v2432_v24  ;;  %v2688_v40 = vsel %vm2337_vm8, %v2686_v15, %v2687_v39  ;;  %v2456_v24 = vrot.slane %v2454_v6, 1  ;;  %v2693_v39 = vrot.slane %v1980_v17, 1  ;;  %v9665_v6 = vld [vmem:[#allocation3 + $0x1c8] sm:$0xff]  }
 0x1f8   : > { %4007 = vmatmul.mubr.bf16.gmra.mrb[60].mxu0 %v2385_v10  ;;  %v660_v10 = vsel %vm10057_vm4, 0, %v659_v21  ;;  %v2447_v21 = vshrl.u32 %v10764_v42, 16 }
 0x1f9   : > { %4014 = vmatprep.mubr.bf16.mxu0 %v10722_v49  ;;  %661 = vst [vmem:[#allocation2 + $0x128] sm:$0x1] %v660_v10 }
 0x1fa   : > { %v2452_v10 = vor.u32 %v2451_v4, %v2447_v21  ;;  %v2000_v21 = vld [vmem:[#allocation2 + $0x70] sm:$0xfe] }
 0x200   : > { %4015 = vmatmul.mubr.bf16.gmra.mrb[64].mxu0 %v2388_v28  ;;  %v10839_v8 = vpop.f32.mrb[4].mxu1  ;;  %v943_v12 = vld [vmem:[#allocation2 + $0x128] sm:$0x1] }
 0x201   : > { %4022 = vmatprep.mubr.bf16.mxu0 %v10760_v54  ;;  %v10842_v53 = vpop.f32.mrb[5].mxu1  ;;  %v944_v62 = vsel %vm10049_vm3, %v10095_v59, %v943_v12  ;;  %v9663_v12 = vld [vmem:[#allocation3 + $0x1b8] sm:$0xff]  }
 0x202   : > { %v10844_v49 = vpop.f32.mrb[6].mxu1  ;;  %945 = vst [vmem:[#allocation2 + $0x128] sm:$0x1] %v944_v62  ;;  %v2473_v62 = vshll.u32 %v10776_v22, 16 }
 0x203   : > { %v10846_v47 = vpop.f32.mrb[7].mxu1 }
 0x208   : > { %4023 = vmatmul.mubr.bf16.gmra.mrb[68].mxu0 %v2391_v50  ;;  %v9659_v50 = vld [vmem:[#allocation3 + $0x198] sm:$0xff]  }
 0x209   : > { %4063 = vmatprep.mubr.bf16.mxu0 %v2682_v7  ;;  %v2442_v7 = vshll.u32 %v1978_v14, 16  ;;  %v2692_v14 = vrot.slane %v1998_v32, 1  ;;  %v2485_v32 = vshll.u32 %v10782_v38, 16 }
 0x20b   : > { %v2694_v29 = vsel %vm2337_vm8, %v2692_v14, %v2693_v39  ;;  %v9666_v14 = vld [vmem:[#allocation3 + $0x1d0] sm:$0xff]  }
 0x210   : > { %4064 = vmatmul.mubr.bf16.vlgmr.msra.gmra.mrb[0].mxu0 %v2421_v57  ;;  %v2444_v57 = vrot.slane %v2442_v7, 1  ;;  %v2466_v7 = vshll.u32 %v1980_v17, 16 }
 0x211   : > { %4209 = vmatpush1.bf16.msra.mxu0 %v9656_v18  ;;  %4071 = vmatprep.mubr.bf16.mxu0 %v2685_v9  ;;  %v2690_v18 = vrot.slane %v1979_v45, 1 }
 0x212   : > { %4210 = vmatprep.subr.bf16.mxu0 %v9873_v1  ;;  %v10860_v28 = vpop.f32.mrb[8].mxu1  ;;  %v2445_v5 = vsel %vm2066_vm7, %v2440_v56, %v2444_v57  ;;  %v1981_v56 = vld [vmem:[#allocation2 + $0x68] sm:$0x1]  ;;  %v9664_v57 = vld [vmem:[#allocation3 + $0x1c0] sm:$0xff]  }
 0x213   : > { %v10862_v20 = vpop.f32.mrb[9].mxu1  ;;  %v2691_v9 = vsel %vm2337_vm8, %v2689_v61, %v2690_v18  ;;  %v2468_v61 = vrot.slane %v2466_v7, 1  ;;  %v2475_v18 = vrot.slane %v2473_v62, 1  ;;  %v9667_v62 = vld [vmem:[#allocation3 + $0x1d8] sm:$0xff]  }
 0x214   : > { %v10864_v26 = vpop.f32.mrb[10].mxu1 }
 0x215   : > { %4211 = vmatpush1.bf16.msra.mxu0 %v9657_v16  ;;  %v10867_v35 = vpop.f32.mrb[11].mxu1  ;;  %v2461_v16 = vshll.u32 %v10770_v44, 16 }
 0x216   : > { %4212 = vmatprep.subr.bf16.mxu0 %v9873_v1 }
 0x217   : > { %v2463_v2 = vrot.slane %v2461_v16, 1  ;;  %v1982_v16 = vld [vmem:[#allocation2 + $0x78] sm:$0x1] }
 0x218   : > { %4072 = vmatmul.mubr.bf16.gmra.mrb[4].mxu0 %v2433_v36 }
 0x219   : > { %4079 = vmatprep.mubr.bf16.mxu0 %v2688_v40  ;;  %4213 = vmatpush1.bf16.msra.mxu0 %v9658_v0  ;;  %v9662_v0 = vld [vmem:[#allocation3 + $0x1b0] sm:$0xff]   ;;  %v2457_v40 = vsel %vm2066_vm7, %v2452_v10, %v2456_v24  ;;  %v2464_v52 = vor.u32 %v2463_v2, %v2459_v41  ;;  %v2698_v10 = vrot.slane %v2000_v21, 1  ;;  %v2483_v41 = vshrl.u32 %v10782_v38, 16 }
 0x21a   : > { %4214 = vmatprep.subr.bf16.mxu0 %v9873_v1  ;;  %v2002_v21 = vld [vmem:[#allocation2 + $0x90] sm:$0xfe] }
 0x21b   : > { %v2469_v44 = vsel %vm2066_vm7, %v2464_v52, %v2468_v61  ;;  %v2497_v52 = vshll.u32 %v10788_v55, 16 }
 0x21d   : > { %4215 = vmatpush1.bf16.msra.mxu0 %v9659_v50  ;;  %v1999_v50 = vld [vmem:[#allocation2 + $0x60] sm:$0xfe]  ;;  %v2499_v38 = vrot.slane %v2497_v52, 1  ;;  %v2521_v52 = vshll.u32 %v10800_v63, 16 }
 0x21e   : > { %4216 = vmatprep.subr.bf16.mxu0 %v9873_v1  ;;  %v2695_v45 = vrot.slane %v1999_v50, 1  ;;  %v2490_v50 = vshll.u32 %v1982_v16, 16 }
 0x220   : > { %4080 = vmatmul.mubr.bf16.gmra.mrb[8].mxu0 %v2445_v5  ;;  %v2471_v5 = vshrl.u32 %v10776_v22, 16  ;;  %v2487_v22 = vrot.slane %v2485_v32, 1  ;;  %v2509_v32 = vshll.u32 %v10794_v48, 16 }
 0x221   : > { %4087 = vmatprep.mubr.bf16.mxu0 %v2691_v9  ;;  %4217 = vmatpush1.bf16.msra.mxu0 %v9660_v46  ;;  %v2696_v46 = vrot.slane %v1981_v56, 1  ;;  %v2478_v9 = vshll.u32 %v1981_v56, 16 }
 0x222   : > { %4218 = vmatprep.subr.bf16.mxu0 %v9873_v1  ;;  %v2488_v56 = vor.u32 %v2487_v22, %v2483_v41  ;;  %v2511_v22 = vrot.slane %v2509_v32, 1  ;;  %v2533_v32 = vshll.u32 %v10805_v30, 16 }
 0x223   : > { %v10883_v13 = vpop.f32.mrb[12].mxu1  ;;  %v2697_v4 = vsel %vm2337_vm8, %v2695_v45, %v2696_v46  ;;  %v2480_v17 = vrot.slane %v2478_v9, 1  ;;  %v1983_v45 = vld [vmem:[#allocation2 + $0x88] sm:$0x1]  ;;  %v9668_v46 = vld [vmem:[#allocation3 + $0x1e0] sm:$0xff]  }
 0x224   : > { %v10885_v15 = vpop.f32.mrb[13].mxu1  ;;  %v2502_v9 = vshll.u32 %v1983_v45, 16 }
 0x225   : > { %4219 = vmatpush1.bf16.msra.mxu0 %v9661_v34  ;;  %v10887_v42 = vpop.f32.mrb[14].mxu1  ;;  %v2476_v34 = vor.u32 %v2475_v18, %v2471_v5  ;;  %v2702_v18 = vrot.slane %v1983_v45, 1  ;;  %v2495_v5 = vshrl.u32 %v10788_v55, 16 }
 0x226   : > { %4220 = vmatprep.subr.bf16.mxu0 %v9873_v1  ;;  %v10890_v36 = vpop.f32.mrb[15].mxu1 }
 0x227   : > { %v2481_v2 = vsel %vm2066_vm7, %v2476_v34, %v2480_v17  ;;  %v2500_v34 = vor.u32 %v2499_v38, %v2495_v5  ;;  %v2504_v17 = vrot.slane %v2502_v9, 1  ;;  %v2519_v9 = vshrl.u32 %v10800_v63, 16 }
 0x228   : > { %4088 = vmatmul.mubr.bf16.gmra.mrb[12].mxu0 %v2457_v40 }
 0x229   : > { %4095 = vmatprep.mubr.bf16.mxu0 %v2694_v29  ;;  %4221 = vmatpush1.bf16.msra.mxu0 %v9662_v0  ;;  %v2699_v0 = vrot.slane %v1982_v16, 1  ;;  %v1984_v16 = vld [vmem:[#allocation2 + $0x98] sm:$0x1]  ;;  %v2505_v55 = vsel %vm2066_vm7, %v2500_v34, %v2504_v17 }
 0x22a   : > { %4222 = vmatprep.subr.bf16.mxu0 %v9873_v1  ;;  %v2514_v41 = vshll.u32 %v1984_v16, 16 }
 0x22b   : > { %v2700_v29 = vsel %vm2337_vm8, %v2698_v10, %v2699_v0  ;;  %v2704_v10 = vrot.slane %v2002_v21, 1  ;;  %v2705_v0 = vrot.slane %v1984_v16, 1  ;;  %v1986_v16 = vld [vmem:[#allocation2 + $0xb8] sm:$0x1] }
 0x22c   : > { %v2538_v63 = vshll.u32 %v1986_v16, 16 }
 0x22d   : > { %4223 = vmatpush1.bf16.msra.mxu0 %v9663_v12  ;;  %v2001_v12 = vld [vmem:[#allocation2 + $0x80] sm:$0xfe] }
 0x22e   : > { %4224 = vmatprep.subr.bf16.mxu0 %v9873_v1  ;;  %v2701_v61 = vrot.slane %v2001_v12, 1  ;;  %v9671_v12 = vld [vmem:[#allocation3 + $0x1f8] sm:$0xff]  }
 0x230   : > { %4096 = vmatmul.mubr.bf16.gmra.mrb[16].mxu0 %v2469_v44 }
 0x231   : > { %4103 = vmatprep.mubr.bf16.mxu0 %v2697_v4  ;;  %4225 = vmatpush1.bf16.msra.mxu0 %v9664_v57  ;;  %v2492_v57 = vrot.slane %v2490_v50, 1  ;;  %v2703_v4 = vsel %vm2337_vm8, %v2701_v61, %v2702_v18  ;;  %v2003_v50 = vld [vmem:[#allocation2 + $0xa0] sm:$0xfe]  ;;  %v1985_v61 = vld [vmem:[#allocation2 + $0xa8] sm:$0x1] }
 0x232   : > { %4226 = vmatprep.subr.bf16.mxu0 %v9873_v1  ;;  %v2708_v38 = vrot.slane %v1985_v61, 1  ;;  %v2526_v21 = vshll.u32 %v1985_v61, 16 }
 0x233   : > { %v2493_v44 = vsel %vm2066_vm7, %v2488_v56, %v2492_v57 }
 0x234   : > { %v2528_v17 = vrot.slane %v2526_v21, 1 }
 0x235   : > { %4227 = vmatpush1.bf16.msra.mxu0 %v9665_v6  ;;  %v9669_v6 = vld [vmem:[#allocation3 + $0x1e8] sm:$0xff]  }
 0x236   : > { %v10903_v24 = vpop.f32.mrb[16].mxu1  ;;  %4228 = vmatprep.subr.bf16.mxu0 %v9873_v1 }
 0x237   : > { %v10906_v39 = vpop.f32.mrb[17].mxu1 }
 0x238   : > { %v10909_v40 = vpop.f32.mrb[18].mxu1  ;;  %4104 = vmatmul.mubr.bf16.gmra.mrb[20].mxu0 %v2481_v2  ;;  %v2706_v2 = vsel %vm2337_vm8, %v2704_v10, %v2705_v0  ;;  %v2535_v0 = vrot.slane %v2533_v32, 1 }
 0x239   : > { %v10913_v7 = vpop.f32.mrb[19].mxu1  ;;  %4111 = vmatprep.mubr.bf16.mxu0 %v2700_v29  ;;  %4229 = vmatpush1.bf16.msra.mxu0 %v9666_v14  ;;  %v9670_v14 = vld [vmem:[#allocation3 + $0x1f0] sm:$0xff]   ;;  %v2507_v29 = vshrl.u32 %v10794_v48, 16  ;;  %v2516_v48 = vrot.slane %v2514_v41, 1  ;;  %v2545_v41 = vshll.u32 %v10810_v3, 16 }
 0x23a   : > { %4230 = vmatprep.subr.bf16.mxu0 %v9873_v1 }
 0x23b   : > { %v2512_v45 = vor.u32 %v2511_v22, %v2507_v29  ;;  %v2005_v29 = vld [vmem:[#allocation2 + $0xc0] sm:$0xfe] }
 0x23d   : > { %4231 = vmatpush1.bf16.msra.mxu0 %v9667_v62 }
 0x23e   : > { %4232 = vmatprep.subr.bf16.mxu0 %v9873_v1 }
 0x240   : > { %4112 = vmatmul.mubr.bf16.gmra.mrb[24].mxu0 %v2493_v44  ;;  %v10937_v44 = vld [vmem:[#allocation3 + $0x200] sm:$0xff]  }
 0x241   : > { %4119 = vmatprep.mubr.bf16.mxu0 %v2703_v4  ;;  %4233 = vmatpush1.bf16.msra.mxu0 %v9668_v46  ;;  %v2707_v46 = vrot.slane %v2003_v50, 1  ;;  %v2523_v4 = vrot.slane %v2521_v52, 1  ;;  %v2713_v52 = vrot.slane %v2005_v29, 1  ;;  %v2008_v29 = vld [vmem:[#allocation2 + $0xf0] sm:$0xfe] }
 0x242   : > { %4234 = vmatprep.subr.bf16.mxu0 %v9873_v1 }
 0x243   : > { %v2709_v5 = vsel %vm2337_vm8, %v2707_v46, %v2708_v38  ;;  %v2524_v34 = vor.u32 %v2523_v4, %v2519_v9  ;;  %v2547_v46 = vrot.slane %v2545_v41, 1  ;;  %v2543_v4 = vshrl.u32 %v10810_v3, 16  ;;  %v1988_v9 = vld [vmem:[#allocation2 + $0xd8] sm:$0x1] }
 0x244   : > { %v2717_v32 = vrot.slane %v1988_v9, 1 }
 0x245   : > { %4235 = vmatpush1.bf16.msra.mxu0 %v9669_v6  ;;  %v2004_v6 = vld [vmem:[#allocation2 + $0xb0] sm:$0xfe]  ;;  %v2529_v22 = vsel %vm2066_vm7, %v2524_v34, %v2528_v17  ;;  %v2007_v17 = vld [vmem:[#allocation2 + $0xe0] sm:$0xfe] }
 0x246   : > { %4236 = vmatprep.subr.bf16.mxu0 %v9873_v1  ;;  %v2710_v10 = vrot.slane %v2004_v6, 1 }
 0x248   : > { %4120 = vmatmul.mubr.bf16.gmra.mrb[28].mxu0 %v2505_v55 }
 0x249   : > { %4127 = vmatprep.mubr.bf16.mxu0 %v2706_v2  ;;  %4237 = vmatpush1.bf16.msra.mxu0 %v9670_v14  ;;  %v10927_v62 = vpop.f32.mrb[20].mxu1  ;;  %v2711_v14 = vrot.slane %v1986_v16, 1  ;;  %v2531_v2 = vshrl.u32 %v10805_v30, 16  ;;  %v2562_v16 = vshll.u32 %v1988_v9, 16 }
 0x24a   : > { %4238 = vmatprep.subr.bf16.mxu0 %v9873_v1  ;;  %v10931_v56 = vpop.f32.mrb[21].mxu1  ;;  %v2517_v1 = vsel %vm2066_vm7, %v2512_v45, %v2516_v48  ;;  %v2540_v45 = vrot.slane %v2538_v63, 1 }
 0x24b   : > { %v10933_v57 = vpop.f32.mrb[22].mxu1  ;;  %v2712_v55 = vsel %vm2337_vm8, %v2710_v10, %v2711_v14  ;;  %v2536_v50 = vor.u32 %v2535_v0, %v2531_v2  ;;  %v2564_v14 = vrot.slane %v2562_v16, 1  ;;  %v1989_v0 = vld [vmem:[#allocation2 + $0xe8] sm:$0x1] }
 0x24c   : > { %v10935_v18 = vpop.f32.mrb[23].mxu1  ;;  %v2720_v3 = vrot.slane %v1989_v0, 1  ;;  %v2574_v2 = vshll.u32 %v1989_v0, 16 }
 0x24d   : > { %4239 = vmatpush1.bf16.msra.mxu0 %v9671_v12  ;;  %v1987_v12 = vld [vmem:[#allocation2 + $0xc8] sm:$0x1]  ;;  %v2541_v48 = vsel %vm2066_vm7, %v2536_v50, %v2540_v45  ;;  %v1990_v50 = vld [vmem:[#allocation2 + $0xf8] sm:$0x1] }
 0x24e   : > { %8900 = vmatprep.subr.bf16.mxu0 %v10937_v44  ;;  %v2714_v61 = vrot.slane %v1987_v12, 1  ;;  %v2550_v30 = vshll.u32 %v1987_v12, 16  ;;  %v2576_v41 = vrot.slane %v2574_v2, 1  ;;  %v2722_v12 = vrot.slane %v2008_v29, 1 }
 0x24f   : > { %v2615_v29 = vshrl.u32 %v10760_v54, 16 }
 0x250   : > { %4128 = vmatmul.mubr.bf16.gmra.mrb[32].mxu0 %v2517_v1  ;;  %v2715_v38 = vsel %vm2337_vm8, %v2713_v52, %v2714_v61  ;;  %v2006_v1 = vld [vmem:[#allocation2 + $0xd0] sm:$0xfe]  ;;  %v2552_v6 = vrot.slane %v2550_v30, 1  ;;  %v2723_v52 = vrot.slane %v1990_v50, 1  ;;  %v2577_v45 = vsel %vm2066_vm7, %v10680_v43, %v2576_v41 }
 0x251   : > { %4135 = vmatprep.mubr.bf16.mxu0 %v2709_v5  ;;  %v2548_v5 = vor.u32 %v2547_v46, %v2543_v4  ;;  %v2716_v21 = vrot.slane %v2006_v1, 1  ;;  %v2586_v61 = vshll.u32 %v1990_v50, 16 }
 0x252   : > { %v2724_v46 = vsel %vm2337_vm8, %v2722_v12, %v2723_v52  ;;  %v10970_v52 = vld [vmem:[#allocation2 + $0x28] sm:$0x1] }
 0x253   : > { %v2553_v34 = vsel %vm2066_vm7, %v2548_v5, %v2552_v6  ;;  %v2718_v10 = vsel %vm2337_vm8, %v2716_v21, %v2717_v32  ;;  %v2010_v21 = vld [vmem:[#allocation2 + $0x110] sm:$0xfe]  ;;  %v1992_v6 = vld [vmem:[#allocation2 + $0x118] sm:$0x1] }
 0x254   : > { %v2728_v32 = vrot.slane %v2010_v21, 1  ;;  %v10980_v21 = vld [vmem:[#allocation2 + $0x40] sm:$0xff] }
 0x258   : > { %4136 = vmatmul.mubr.bf16.gmra.mrb[36].mxu0 %v2529_v22  ;;  %v2719_v22 = vrot.slane %v2007_v17, 1  ;;  %v1993_v17 = vld [vmem:[#allocation2 + $0x128] sm:$0x1] }
 0x259   : > { %4143 = vmatprep.mubr.bf16.mxu0 %v2712_v55  ;;  %v2565_v55 = vsel %vm2066_vm7, %v10653_v31, %v2564_v14  ;;  %v2588_v31 = vrot.slane %v2586_v61, 1  ;;  %v2011_v14 = vld [vmem:[#allocation2 + $0x120] sm:$0xfe]  ;;  %v2622_v50 = vshll.u32 %v1993_v17, 16 }
 0x25a   : > { %v2721_v63 = vsel %vm2337_vm8, %v2719_v22, %v2720_v3  ;;  %v2012_v22 = vld [vmem:[#allocation2 + $0x20] sm:$0xff]  ;;  %v2731_v3 = vrot.slane %v2011_v14, 1 }
 0x25b   : > { %v2589_v1 = vsel %vm2066_vm7, %v10700_v25, %v2588_v31  ;;  %v2617_v25 = vshll.u32 %v10760_v54, 16  ;;  %v2753_v31 = vshrl.u32 %v2012_v22, 16 }
 0x25d   : > { %v2619_v41 = vrot.slane %v2617_v25, 1  ;;  %v2064_v25 = vld [vmem:[#allocation2 + $0x120] sm:$0xfe] }
 0x25f   : > { %v10972_v61 = vor.u32 %v2619_v41, %v2615_v29  ;;  %v662_v41 = vld [vmem:[#allocation2 + $0x138] sm:$0x1] }
 0x260   : > { %4144 = vmatmul.mubr.bf16.gmra.mrb[40].mxu0 %v2541_v48  ;;  %v2009_v48 = vld [vmem:[#allocation2 + $0x100] sm:$0xfe] }
 0x261   : > { %4151 = vmatprep.mubr.bf16.mxu0 %v2715_v38  ;;  %v1991_v38 = vld [vmem:[#allocation2 + $0x108] sm:$0x1]  ;;  %v2725_v4 = vrot.slane %v2009_v48, 1  ;;  %v2013_v48 = vld [vmem:[#allocation2 + $0x30] sm:$0xff] }
 0x262   : > { %v2726_v30 = vrot.slane %v1991_v38, 1  ;;  %v2598_v5 = vshll.u32 %v1991_v38, 16  ;;  %v2760_v38 = vshll.u32 %v10970_v52, 16 }
 0x264   : > { %v2727_v9 = vsel %vm2337_vm8, %v2725_v4, %v2726_v30  ;;  %v2600_v43 = vrot.slane %v2598_v5, 1  ;;  %v2767_v4 = vshll.u32 %v2013_v48, 16  ;;  %v10977_v5 = vld [vmem:[#allocation2 + $0x38] sm:$0x1] }
 0x266   : > { %v2601_v16 = vsel %vm2066_vm7, %v10718_v58, %v2600_v43  ;;  %v2765_v43 = vshrl.u32 %v2013_v48, 16 }
 0x268   : > { %4152 = vmatmul.mubr.bf16.gmra.mrb[44].mxu0 %v2553_v34  ;;  %v2729_v34 = vrot.slane %v1992_v6, 1 }
 0x269   : > { %4159 = vmatprep.mubr.bf16.mxu0 %v2718_v10  ;;  %v2610_v10 = vshll.u32 %v1992_v6, 16  ;;  %v2772_v6 = vshll.u32 %v10977_v5, 16 }
 0x26a   : > { %v2730_v0 = vsel %vm2337_vm8, %v2728_v32, %v2729_v34  ;;  %v2779_v34 = vshll.u32 %v10980_v21, 16 }
 0x26b   : > { %v2612_v2 = vrot.slane %v2610_v10, 1  ;;  %v10984_v10 = vld [vmem:[#allocation2 + $0x48] sm:$0x1] }
 0x26d   : > { %v2613_v12 = vsel %vm2066_vm7, %v10734_v19, %v2612_v2  ;;  %v10991_v2 = vld [vmem:[#allocation2 + $0x50] sm:$0xff] }
 0x270   : > { %4160 = vmatmul.mubr.bf16.gmra.mrb[48].mxu0 %v2565_v55  ;;  %v2732_v55 = vrot.slane %v1993_v17, 1  ;;  %v10986_v17 = vld [vmem:[#allocation2 + $0x128] sm:$0x1] }
 0x271   : > { %4167 = vmatprep.mubr.bf16.mxu0 %v2721_v63  ;;  %v2755_v63 = vshll.u32 %v2012_v22, 16 }
 0x272   : > { %v2733_v58 = vsel %vm2337_vm8, %v2731_v3, %v2732_v55  ;;  %v3071_v3 = vrot.slane %v10986_v17, 1  ;;  %v600_v55 = vld [vmem:[#allocation2 + $0x130] sm:$0x1] }
 0x273   : > { %v601_v29 = vsel %vm10049_vm3, 0, %v600_v55  ;;  %v11020_v55 = vld [vmem:[#allocation2 + $0x70] sm:$0xff] }
 0x274   : > { %602 = vst [vmem:[#allocation2 + $0x130] sm:$0x1] %v601_v29 }
 0x278   : > { %4168 = vmatmul.mubr.bf16.gmra.mrb[52].mxu0 %v2577_v45  ;;  %v2757_v45 = vrot.slane %v2755_v63, 1  ;;  %v3070_v63 = vrot.slane %v2064_v25, 1 }
 0x279   : > { %4175 = vmatprep.mubr.bf16.mxu0 %v2724_v46  ;;  %v2624_v46 = vrot.slane %v2622_v50, 1  ;;  %v2777_v50 = vshrl.u32 %v10980_v21, 16 }
 0x27a   : > { %v2758_v54 = vor.u32 %v2757_v45, %v2753_v31 }
 0x27b   : > { %v2625_v30 = vsel %vm2066_vm7, %v10972_v61, %v2624_v46  ;;  %v2791_v46 = vshll.u32 %v10991_v2, 16 }
 0x280   : > { %4176 = vmatmul.mubr.bf16.gmra.mrb[56].mxu0 %v2589_v1  ;;  %v2762_v1 = vrot.slane %v2760_v38, 1  ;;  %v9759_v38 = vld [vmem:[#allocation3 + $0x210] sm:$0xff]  }
 0x281   : > { %4183 = vmatprep.mubr.bf16.mxu0 %v2727_v9  ;;  %v2769_v9 = vrot.slane %v2767_v4, 1 }
 0x282   : > { %v2763_v19 = vsel %vm2066_vm7, %v2758_v54, %v2762_v1  ;;  %v11001_v54 = vld [vmem:[#allocation2 + $0x58] sm:$0x1]  ;;  %v946_v1 = vld [vmem:[#allocation2 + $0x130] sm:$0xff] }
 0x283   : > { %v2770_v32 = vor.u32 %v2769_v9, %v2765_v43  ;;  %v2796_v9 = vshll.u32 %v11001_v54, 16  ;;  %v9760_v43 = vld [vmem:[#allocation3 + $0x218] sm:$0xff]  }
 0x288   : > { %4184 = vmatmul.mubr.bf16.gmra.mrb[60].mxu0 %v2601_v16  ;;  %v2774_v16 = vrot.slane %v2772_v6, 1  ;;  %v11011_v6 = vsel %vm10099_vm6, %v10095_v59, %v946_v1  ;;  %v11030_v1 = vld [vmem:[#allocation2 + $0x80] sm:$0xff] }
 0x289   : > { %4191 = vmatprep.mubr.bf16.mxu0 %v2730_v0  ;;  %v2781_v0 = vrot.slane %v2779_v34, 1  ;;  %948 = vst [vmem:[#allocation2 + $0x130] sm:$0xff] %v11011_v6 }
 0x28a   : > { %v2775_v14 = vsel %vm2066_vm7, %v2770_v32, %v2774_v16  ;;  %v2803_v16 = vshll.u32 %v11004_v27, 16 }
 0x28b   : > { %v2782_v45 = vor.u32 %v2781_v0, %v2777_v50  ;;  %v9761_v0 = vld [vmem:[#allocation3 + $0x220] sm:$0xff]  }
 0x290   : > { %4192 = vmatmul.mubr.bf16.gmra.mrb[64].mxu0 %v2613_v12  ;;  %v663_v12 = vsel %vm10057_vm4, 0, %v662_v41  ;;  %v9763_v41 = vld [vmem:[#allocation3 + $0x228] sm:$0xff]   ;;  %v2065_v50 = vld [vmem:[#allocation2 + $0x130] sm:$0xfe] }
 0x291   : > { %4199 = vmatprep.mubr.bf16.mxu0 %v2733_v58  ;;  %v9758_v58 = vld [vmem:[#allocation3 + $0x208] sm:$0xff]   ;;  %664 = vst [vmem:[#allocation2 + $0x138] sm:$0x1] %v663_v12 }
 0x298   : > { %4200 = vmatmul.mubr.bf16.gmra.mrb[68].mxu0 %v2625_v30  ;;  %v2793_v30 = vrot.slane %v2791_v46, 1 }
 0x299   : > { %4240 = vmatprep.mubr.bf16.mxu0 %v2763_v19  ;;  %v2789_v19 = vshrl.u32 %v10991_v2, 16 }
 0x29b   : > { %v2794_v34 = vor.u32 %v2793_v30, %v2789_v19  ;;  %v2813_v19 = vshrl.u32 %v11020_v55, 16 }
 0x2a0   : > { %4241 = vmatmul.mubr.bf16.vlgmr.msra.gmra.mrb[0].mxu0 %v2012_v22  ;;  %v2784_v22 = vshll.u32 %v10984_v10, 16 }
 0x2a1   : > { %8901 = vmatpush3.bf16.msra.mxu0 %v10937_v44  ;;  %4248 = vmatprep.mubr.bf16.mxu0 %v2775_v14  ;;  %v3072_v44 = vsel %vm2337_vm8, %v3070_v63, %v3071_v3  ;;  %v2798_v14 = vrot.slane %v2796_v9, 1  ;;  %v2805_v3 = vrot.slane %v2803_v16, 1  ;;  %v2801_v63 = vshrl.u32 %v11004_v27, 16  ;;  %v9765_v9 = vld [vmem:[#allocation2 + $0x78] sm:$0x1] }
 0x2a2   : > { %8902 = vmatprep.subr.bf16.mxu0 %v9758_v58  ;;  %8948 = vmatprep.mubr.bf16.mxu1 %v3072_v44  ;;  %v2786_v31 = vrot.slane %v2784_v22, 1  ;;  %v2815_v44 = vshll.u32 %v11020_v55, 16 }
 0x2a3   : > { %v2799_v25 = vsel %vm2066_vm7, %v2794_v34, %v2798_v14  ;;  %v2806_v12 = vor.u32 %v2805_v3, %v2801_v63  ;;  %v2827_v34 = vshll.u32 %v11030_v1, 16  ;;  %v2825_v3 = vshrl.u32 %v11030_v1, 16  ;;  %v9767_v63 = vld [vmem:[#allocation2 + $0x88] sm:$0x1] }
 0x2a4   : > { %v2787_v4 = vsel %vm2066_vm7, %v2782_v45, %v2786_v31  ;;  %v9764_v31 = vld [vmem:[#allocation3 + $0x230] sm:$0xff]   ;;  %v2817_v30 = vrot.slane %v2815_v44, 1  ;;  %v11042_v44 = vld [vmem:[#allocation2 + $0xa0] sm:$0xff] }
 0x2a5   : > { %8903 = vmatpush3.bf16.msra.mxu0 %v9758_v58  ;;  %v3073_v58 = vrot.slane %v2065_v50, 1 }
 0x2a6   : > { %8904 = vmatprep.subr.bf16.mxu0 %v9759_v38 }
 0x2a8   : > { %4249 = vmatmul.mubr.bf16.gmra.mrb[4].mxu0 %v2013_v48  ;;  %v949_v48 = vld [vmem:[#allocation2 + $0x138] sm:$0x1] }
 0x2a9   : > { %4256 = vmatprep.mubr.bf16.mxu0 %v2787_v4  ;;  %8905 = vmatpush3.bf16.msra.mxu0 %v9759_v38  ;;  %v950_v32 = vsel %vm10049_vm3, %v10095_v59, %v949_v48  ;;  %v9762_v59 = vld [vmem:[#allocation2 + $0x68] sm:$0x1]  ;;  %v9766_v48 = vld [vmem:[#allocation3 + $0x238] sm:$0xff]  }
 0x2aa   : > { %8906 = vmatprep.subr.bf16.mxu0 %v9760_v43  ;;  %951 = vst [vmem:[#allocation2 + $0x138] sm:$0x1] %v950_v32  ;;  %v2808_v29 = vshll.u32 %v9762_v59, 16  ;;  %v2818_v32 = vor.u32 %v2817_v30, %v2813_v19  ;;  %v2832_v59 = vshll.u32 %v9767_v63, 16 }
 0x2ac   : > { %v2810_v46 = vrot.slane %v2808_v29, 1  ;;  %v2834_v50 = vrot.slane %v2832_v59, 1  ;;  %v11054_v59 = vld [vmem:[#allocation2 + $0xc0] sm:$0xff] }
 0x2ad   : > { %8907 = vmatpush3.bf16.msra.mxu0 %v9760_v43  ;;  %v2820_v43 = vshll.u32 %v9765_v9, 16 }
 0x2ae   : > { %8908 = vmatprep.subr.bf16.mxu0 %v9761_v0  ;;  %v2811_v4 = vsel %vm2066_vm7, %v2806_v12, %v2810_v46  ;;  %v9768_v46 = vld [vmem:[#allocation2 + $0x98] sm:$0x1] }
 0x2af   : > { %v2822_v16 = vrot.slane %v2820_v43, 1  ;;  %v11048_v43 = vld [vmem:[#allocation2 + $0xb0] sm:$0xff] }
 0x2b0   : > { %4257 = vmatmul.mubr.bf16.gmra.mrb[8].mxu0 %v10980_v21 }
 0x2b1   : > { %4264 = vmatprep.mubr.bf16.mxu0 %v2799_v25  ;;  %8909 = vmatpush3.bf16.msra.mxu0 %v9761_v0  ;;  %v11023_v22 = vld [vmem:[#allocation2 + $0x138] sm:$0x1]  ;;  %v2823_v14 = vsel %vm2066_vm7, %v2818_v32, %v2822_v16  ;;  %v2829_v0 = vrot.slane %v2827_v34, 1  ;;  %v11036_v25 = vld [vmem:[#allocation2 + $0x90] sm:$0xff]  ;;  %v9769_v32 = vld [vmem:[#allocation2 + $0xa8] sm:$0x1] }
 0x2b2   : > { %8910 = vmatprep.subr.bf16.mxu0 %v9763_v41  ;;  %v3074_v45 = vrot.slane %v11023_v22, 1  ;;  %v2856_v34 = vshll.u32 %v9769_v32, 16 }
 0x2b3   : > { %v2830_v29 = vor.u32 %v2829_v0, %v2825_v3 }
 0x2b4   : > { %v3075_v38 = vsel %vm2337_vm8, %v3073_v58, %v3074_v45  ;;  %v2837_v45 = vshrl.u32 %v11036_v25, 16  ;;  %v2858_v0 = vrot.slane %v2856_v34, 1 }
 0x2b5   : > { %8911 = vmatpush3.bf16.msra.mxu0 %v9763_v41  ;;  %8949 = vmatmul.mubr.bf16.gmra.mrb[24].mxu1 %v3075_v38  ;;  %v2839_v41 = vshll.u32 %v11036_v25, 16  ;;  %v2835_v58 = vsel %vm2066_vm7, %v2830_v29, %v2834_v50  ;;  %v2861_v29 = vshrl.u32 %v11048_v43, 16 }
 0x2b6   : > { %8912 = vmatprep.subr.bf16.mxu0 %v9764_v31 }
 0x2b7   : > { %v2841_v12 = vrot.slane %v2839_v41, 1  ;;  %v9770_v41 = vld [vmem:[#allocation2 + $0xb8] sm:$0x1] }
 0x2b8   : > { %4265 = vmatmul.mubr.bf16.gmra.mrb[12].mxu0 %v10991_v2  ;;  %v2868_v50 = vshll.u32 %v9770_v41, 16 }
 0x2b9   : > { %4272 = vmatprep.mubr.bf16.mxu0 %v2811_v4  ;;  %8913 = vmatpush3.bf16.msra.mxu0 %v9764_v31  ;;  %v2844_v31 = vshll.u32 %v9768_v46, 16  ;;  %v2842_v38 = vor.u32 %v2841_v12, %v2837_v45  ;;  %v2851_v4 = vshll.u32 %v11042_v44, 16  ;;  %v2875_v12 = vshll.u32 %v11054_v59, 16 }
 0x2ba   : > { %8914 = vmatprep.subr.bf16.mxu0 %v9766_v48  ;;  %v2870_v45 = vrot.slane %v2868_v50, 1 }
 0x2bb   : > { %v2846_v30 = vrot.slane %v2844_v31, 1  ;;  %v2853_v9 = vrot.slane %v2851_v4, 1  ;;  %v2877_v31 = vrot.slane %v2875_v12, 1  ;;  %v2873_v4 = vshrl.u32 %v11054_v59, 16 }
 0x2bd   : > { %8915 = vmatpush3.bf16.msra.mxu0 %v9766_v48  ;;  %v2847_v19 = vsel %vm2066_vm7, %v2842_v38, %v2846_v30  ;;  %v2849_v48 = vshrl.u32 %v11042_v44, 16  ;;  %v11060_v38 = vld [vmem:[#allocation2 + $0xd0] sm:$0xff]  ;;  %v9771_v30 = vld [vmem:[#allocation2 + $0xc8] sm:$0x1] }
 0x2bf   : > { %v2854_v16 = vor.u32 %v2853_v9, %v2849_v48  ;;  %v2878_v9 = vor.u32 %v2877_v31, %v2873_v4  ;;  %v2887_v48 = vshll.u32 %v11060_v38, 16  ;;  %v9773_v31 = vld [vmem:[#allocation2 + $0xe8] sm:$0x1] }
 0x2c0   : > { %4273 = vmatmul.mubr.bf16.gmra.mrb[16].mxu0 %v11004_v27  ;;  %v2904_v4 = vshll.u32 %v9773_v31, 16  ;;  %v9775_v31 = vld [vmem:[#allocation2 + $0x108] sm:$0x1] }
 0x2c1   : > { %4280 = vmatprep.mubr.bf16.mxu0 %v2823_v14  ;;  %v2863_v14 = vshll.u32 %v11048_v43, 16  ;;  %v2859_v3 = vsel %vm2066_vm7, %v2854_v16, %v2858_v0  ;;  %v2889_v16 = vrot.slane %v2887_v48, 1  ;;  %v2885_v0 = vshrl.u32 %v11060_v38, 16 }
 0x2c3   : > { %v2865_v63 = vrot.slane %v2863_v14, 1  ;;  %v11066_v14 = vld [vmem:[#allocation2 + $0xe0] sm:$0xff] }
 0x2c4   : > { %v2899_v41 = vshll.u32 %v11066_v14, 16 }
 0x2c6   : > { %v2901_v12 = vrot.slane %v2899_v41, 1 }
 0x2c8   : > { %4281 = vmatmul.mubr.bf16.gmra.mrb[20].mxu0 %v11020_v55 }
 0x2c9   : > { %4288 = vmatprep.mubr.bf16.mxu0 %v2835_v58  ;;  %v2866_v58 = vor.u32 %v2865_v63, %v2861_v29  ;;  %v2890_v29 = vor.u32 %v2889_v16, %v2885_v0  ;;  %v9774_v0 = vld [vmem:[#allocation2 + $0xf8] sm:$0x1] }
 0x2cb   : > { %v2871_v46 = vsel %vm2066_vm7, %v2866_v58, %v2870_v45  ;;  %v11072_v45 = vld [vmem:[#allocation2 + $0xf0] sm:$0xff] }
 0x2cc   : > { %v2909_v16 = vshrl.u32 %v11072_v45, 16 }
 0x2d0   : > { %4289 = vmatmul.mubr.bf16.gmra.mrb[24].mxu0 %v11030_v1 }
 0x2d1   : > { %4296 = vmatprep.mubr.bf16.mxu0 %v2847_v19  ;;  %v2880_v19 = vshll.u32 %v9771_v30, 16 }
 0x2d3   : > { %v2882_v32 = vrot.slane %v2880_v19, 1  ;;  %v2911_v19 = vshll.u32 %v11072_v45, 16 }
 0x2d5   : > { %v2883_v34 = vsel %vm2066_vm7, %v2878_v9, %v2882_v32  ;;  %v2906_v9 = vrot.slane %v2904_v4, 1  ;;  %v2913_v32 = vrot.slane %v2911_v19, 1  ;;  %v2928_v4 = vshll.u32 %v9775_v31, 16 }
 0x2d8   : > { %4297 = vmatmul.mubr.bf16.gmra.mrb[28].mxu0 %v11036_v25 }
 0x2d9   : > { %4304 = vmatprep.mubr.bf16.mxu0 %v2859_v3  ;;  %v9772_v3 = vld [vmem:[#allocation2 + $0xd8] sm:$0x1] }
 0x2da   : > { %v2892_v63 = vshll.u32 %v9772_v3, 16  ;;  %v2916_v3 = vshll.u32 %v9774_v0, 16  ;;  %v9776_v0 = vld [vmem:[#allocation2 + $0x118] sm:$0x1] }
 0x2dc   : > { %v2894_v50 = vrot.slane %v2892_v63, 1  ;;  %v2914_v63 = vor.u32 %v2913_v32, %v2909_v16  ;;  %v2918_v41 = vrot.slane %v2916_v3, 1  ;;  %v2940_v3 = vshll.u32 %v9776_v0, 16 }
 0x2de   : > { %v2895_v58 = vsel %vm2066_vm7, %v2890_v29, %v2894_v50  ;;  %v2919_v50 = vsel %vm2066_vm7, %v2914_v63, %v2918_v41  ;;  %v2952_v41 = vshll.u32 %v10986_v17, 16 }
 0x2e0   : > { %4305 = vmatmul.mubr.bf16.gmra.mrb[32].mxu0 %v11042_v44 }
 0x2e1   : > { %4312 = vmatprep.mubr.bf16.mxu0 %v2871_v46  ;;  %v2897_v46 = vshrl.u32 %v11066_v14, 16 }
 0x2e3   : > { %v2902_v30 = vor.u32 %v2901_v12, %v2897_v46  ;;  %v11084_v12 = vld [vmem:[#allocation2 + $0x110] sm:$0xff] }
 0x2e4   : > { %12243 = vst [vmem:[#allocation10_spill] sm:$0xff] %v11084_v12  ;;  %v2935_v19 = vshll.u32 %v11084_v12, 16  ;;  %v2933_v16 = vshrl.u32 %v11084_v12, 16 }
 0x2e5   : > { %v2907_v48 = vsel %vm2066_vm7, %v2902_v30, %v2906_v9  ;;  %v2930_v9 = vrot.slane %v2928_v4, 1  ;;  %v2957_v4 = vshrl.u32 %v11011_v6, 16 }
 0x2e6   : > { %v2937_v32 = vrot.slane %v2935_v19, 1  ;;  %v2964_v19 = vshll.u32 %v11023_v22, 16  ;;  %v2050_v22 = vld [vmem:[#allocation2 + $0x40] sm:$0xfe] }
 0x2e8   : > { %4313 = vmatmul.mubr.bf16.gmra.mrb[36].mxu0 %v11048_v43  ;;  %v2938_v63 = vor.u32 %v2937_v32, %v2933_v16  ;;  %v9777_v32 = vld [vmem:[#allocation2 + $0x120] sm:$0xff] }
 0x2e9   : > { %4320 = vmatprep.mubr.bf16.mxu0 %v2883_v34  ;;  %v11078_v34 = vld [vmem:[#allocation2 + $0x100] sm:$0xff] }
 0x2ea   : > { %12242 = vst [vmem:[#allocation9_spill] sm:$0xff] %v11078_v34  ;;  %v2923_v29 = vshll.u32 %v11078_v34, 16  ;;  %v2921_v46 = vshrl.u32 %v11078_v34, 16  ;;  %v2048_v16 = vld [vmem:[#allocation2 + $0x20] sm:$0xfe] }
 0x2eb   : > { %v3022_v0 = vrot.slane %v2048_v16, 1 }
 0x2f0   : > { %4321 = vmatmul.mubr.bf16.gmra.mrb[40].mxu0 %v11054_v59 }
 0x2f1   : > { %4328 = vmatprep.mubr.bf16.mxu0 %v2895_v58  ;;  %v2925_v58 = vrot.slane %v2923_v29, 1  ;;  %v2942_v29 = vrot.slane %v2940_v3, 1  ;;  %v3023_v3 = vrot.slane %v10970_v52, 1 }
 0x2f3   : > { %v2926_v30 = vor.u32 %v2925_v58, %v2921_v46  ;;  %v2954_v58 = vrot.slane %v2952_v41, 1  ;;  %v2959_v46 = vshll.u32 %v11011_v6, 16  ;;  %v3028_v41 = vrot.slane %v2050_v22, 1 }
 0x2f5   : > { %v2955_v31 = vsel %vm2066_vm7, %v10972_v61, %v2954_v58  ;;  %v3024_v61 = vsel %vm2337_vm8, %v3022_v0, %v3023_v3  ;;  %v3029_v58 = vrot.slane %v10984_v10, 1  ;;  %v9672_v0 = vld [vmem:[#allocation5 + $0x40] sm:$0xff]  }
 0x2f6   : > { %v9673_v3 = vld [vmem:[#allocation5] sm:$0xff]   ;;  %8428 = vmatprep.subr.bf16.mxu1 %v9672_v0 }
 0x2f7   : > { %8429 = vmatpush3.bf16.msra.mxu1 %v9673_v3 }
 0x2f8   : > { %4329 = vmatmul.mubr.bf16.gmra.mrb[44].mxu0 %v11060_v38 }
 0x2f9   : > { %4336 = vmatprep.mubr.bf16.mxu0 %v2907_v48  ;;  %v2931_v48 = vsel %vm2066_vm7, %v2926_v30, %v2930_v9  ;;  %v2961_v30 = vrot.slane %v2959_v46, 1  ;;  %v2966_v9 = vrot.slane %v2964_v19, 1 }
 0x2fb   : > { %v2962_v17 = vor.u32 %v2961_v30, %v2957_v4  ;;  %v2051_v4 = vld [vmem:[#allocation2 + $0x50] sm:$0xfe] }
 0x2fc   : > { %v3031_v52 = vrot.slane %v2051_v4, 1 }
 0x300   : > { %4337 = vmatmul.mubr.bf16.gmra.mrb[48].mxu0 %v11066_v14 }
 0x301   : > { %4344 = vmatprep.mubr.bf16.mxu0 %v2919_v50  ;;  %v2943_v50 = vsel %vm2066_vm7, %v2938_v63, %v2942_v29  ;;  %v2049_v63 = vld [vmem:[#allocation2 + $0x30] sm:$0xfe] }
 0x302   : > { %v3025_v29 = vrot.slane %v2049_v63, 1 }
 0x308   : > { %4345 = vmatmul.mubr.bf16.gmra.mrb[52].mxu0 %v11072_v45 }
 0x309   : > { %4352 = vmatprep.mubr.bf16.mxu0 %v2931_v48  ;;  %v2967_v48 = vsel %vm2066_vm7, %v2962_v17, %v2966_v9 }
 0x310   : > { %4353 = vmatmul.mubr.bf16.gmra.mrb[56].mxu0 %v11078_v34 }
 0x311   : > { %4360 = vmatprep.mubr.bf16.mxu0 %v2943_v50  ;;  %v3026_v50 = vrot.slane %v10977_v5, 1 }
 0x313   : > { %v3027_v46 = vsel %vm2337_vm8, %v3025_v29, %v3026_v50  ;;  %v9674_v29 = vld [vmem:[#allocation5 + $0x48] sm:$0xff]  }
 0x314   : > { %8430 = vmatprep.subr.bf16.mxu1 %v9674_v29 }
 0x318   : > { %4361 = vmatmul.mubr.bf16.gmra.mrb[60].mxu0 %v11084_v12 }
 0x319   : > { %4368 = vmatprep.mubr.bf16.mxu0 %v2955_v31  ;;  %v3030_v31 = vsel %vm2337_vm8, %v3028_v41, %v3029_v58 }
 0x320   : > { %4369 = vmatmul.mubr.bf16.gmra.mrb[64].mxu0 %v9777_v32 }
 0x321   : > { %4376 = vmatprep.mubr.bf16.mxu0 %v2967_v48 }
 0x328   : > { %4377 = vmatmul.mubr.bf16.gmra.mrb[68].mxu0 %v11011_v6  ;;  %v3032_v6 = vrot.slane %v11001_v54, 1 }
 0x329   : > { %8916 = vmatprep.mubr.bf16.mxu0 %v3024_v61 }
 0x32a   : > { %v3033_v30 = vsel %vm2337_vm8, %v3031_v52, %v3032_v6 }
 0x330   : > { %8917 = vmatmul.mubr.bf16.vlgmr.msra.gmra.mrb[72].mxu0 %v3027_v46 }
 0x331   : > { %8920 = vmatprep.mubr.bf16.mxu0 %v3030_v31 }
 0x338   : > { %8921 = vmatmul.mubr.bf16.gmra.mrb[76].mxu0 %v3033_v30  ;;  %v9675_v30 = vld [vmem:[#allocation5 + $0x8] sm:$0xff]  }
 0x339   : > { %8431 = vmatpush3.bf16.msra.mxu1 %v9675_v30 }
 0x373   : > { %v11110_v19 = vpop.f32.mrb[0].mxu0 }
 0x374   : > { %v4244_v17 = vpop.f32.mrb[1].mxu0 }
 0x375   : > { %v11112_v9 = vpop.f32.mrb[2].mxu0  ;;  %v9676_v17 = vld [vmem:[#allocation5 + $0x50] sm:$0xff]  }
 0x376   : > { %12244 = vst [vmem:[#allocation11_spill] sm:$0xff] %v11112_v9  ;;  %v4247_v5 = vpop.f32.mrb[3].mxu0  ;;  %8432 = vmatprep.subr.bf16.mxu1 %v9676_v17  ;;  %v9679_v9 = vld [vmem:[#allocation5 + $0x18] sm:$0xff]  }
 0x377   : > { %v9677_v5 = vld [vmem:[#allocation5 + $0x10] sm:$0xff]  }
 0x378   : > { %8433 = vmatpush3.bf16.msra.mxu1 %v9677_v5 }
 0x37b   : > { %v11114_v10 = vpop.f32.mrb[4].mxu0 }
 0x37c   : > { %v4252_v48 = vpop.f32.mrb[5].mxu0 }
 0x37d   : > { %v11116_v32 = vpop.f32.mrb[6].mxu0  ;;  %v11137_v48 = vld [vmem:[%s12222_s6] ss:$0 sm:$0xff] }
 0x37e   : > { %v4255_v16 = vpop.f32.mrb[7].mxu0 }
 0x383   : > { %v11118_v54 = vpop.f32.mrb[8].mxu0 }
 0x384   : > { %12245 = vst [vmem:[#allocation12_spill] sm:$0xff] %v11118_v54  ;;  %v4260_v61 = vpop.f32.mrb[9].mxu0 }
 0x385   : > { %v11120_v63 = vpop.f32.mrb[10].mxu0 }
 0x386   : > { %12246 = vst [vmem:[#allocation13_spill] sm:$0xff] %v11120_v63  ;;  %v4263_v22 = vpop.f32.mrb[11].mxu0 }
 0x388   : > { %v11122_v41 = vpop.f32.mrb[24].mxu1 }
 0x389   : > { %v11126_v58 = vpop.f32.mrb[25].mxu1 }
 0x38a   : > { %v11128_v31 = vpop.f32.mrb[26].mxu1 }
 0x38b   : > { %v11124_v50 = vpop.f32.mrb[12].mxu0  ;;  %v11132_v52 = vpop.f32.mrb[27].mxu1 }
 0x38c   : > { %12247 = vst [vmem:[#allocation14_spill] sm:$0xff] %v11124_v50  ;;  %v4268_v46 = vpop.f32.mrb[13].mxu0  ;;  %v9678_v50 = vld [vmem:[#allocation5 + $0x58] sm:$0xff]  }
 0x38d   : > { %v11130_v4 = vpop.f32.mrb[14].mxu0  ;;  %8434 = vmatprep.subr.bf16.mxu1 %v9678_v50 }
 0x38e   : > { %12248 = vst [vmem:[#allocation15_spill] sm:$0xff] %v11130_v4  ;;  %v4271_v6 = vpop.f32.mrb[15].mxu0  ;;  %8435 = vmatpush3.bf16.msra.mxu1 %v9679_v9 }
 0x393   : > { %v4274_v16 = vpop.f32.mrb[16].mxu0 }
 0x394   : > { %v9024_v0 = vadd.f32 %v11137_v48, %v4274_v16  ;;  %v4276_v3 = vpop.f32.mrb[17].mxu0 }
 0x395   : > { %v4277_v61 = vpop.f32.mrb[18].mxu0 }
 0x396   : > { %v4452_v22 = vadd.f32 %v9024_v0, %v10827_v11  ;;  %v9025_v29 = vadd.f32 %v11137_v48, %v4277_v61  ;;  %v4279_v46 = vpop.f32.mrb[19].mxu0 }
 0x397   : > { %v9680_v46 = vld [vmem:[#allocation5 + $0x60] sm:$0xff]  }
 0x398   : > { %v4606_v6 = vmul.f32 0.2, %v4452_v22  ;;  %v4455_v30 = vadd.f32 %v9025_v29, %v10831_v37  ;;  %vm4570_vm9 = vcmp.gt.f32.partialorder %v4452_v22, 0.0  ;;  %8436 = vmatprep.subr.bf16.mxu1 %v9680_v46  ;;  %v9684_v46 = vld [vmem:[#allocation5 + $0x70] sm:$0xff]  }
 0x39a   : > { %vm4571_vm10 = vcmp.gt.f32.partialorder %v4455_v30, 0.0  ;;  %v4607_v17 = vmul.f32 0.2, %v4455_v30  ;;  %v4642_v63 = vsel %vm4570_vm9, %v4452_v22, %v4606_v6  ;;  %v9681_v22 = vld [vmem:[#allocation5 + $0x20] sm:$0xff]  }
 0x39b   : > { %v4282_v12 = vpop.f32.mrb[20].mxu0  ;;  %8437 = vmatpush3.bf16.msra.mxu1 %v9681_v22  ;;  %v9685_v22 = vld [vmem:[#allocation5 + $0x30] sm:$0xff]  }
 0x39c   : > { %v4643_v4 = vsel %vm4571_vm10, %v4455_v30, %v4607_v17  ;;  %v9026_v54 = vadd.f32 %v11137_v48, %v4282_v12  ;;  %v4284_v16 = vpop.f32.mrb[21].mxu0 }
 0x39d   : > { %v4674_v3 = vpack.c.bf16 %v4643_v4, %v4642_v63  ;;  %v4285_v5 = vpop.f32.mrb[22].mxu0  ;;  %v9682_v63 = vld [vmem:[#allocation5 + $0x68] sm:$0xff]  }
 0x39e   : > { %v4460_v11 = vadd.f32 %v9026_v54, %v10824_v51  ;;  %v9027_v0 = vadd.f32 %v11137_v48, %v4285_v5  ;;  %v4287_v61 = vpop.f32.mrb[23].mxu0  ;;  %v4876_v4 = vld [vmem:[#allocation2 + $0x48] sm:$0x1]  ;;  %8438 = vmatprep.subr.bf16.mxu1 %v9682_v63 }
 0x39f   : > { %v4717_v37 = vshrl.u32 %v4674_v3, 16  ;;  %v4720_v12 = vshll.u32 %v4674_v3, 16  ;;  %v9683_v5 = vld [vmem:[#allocation5 + $0x28] sm:$0xff]  }
 0x3a0   : > { %v4608_v29 = vmul.f32 0.2, %v4460_v11  ;;  %v4463_v34 = vadd.f32 %v9027_v0, %v10829_v33  ;;  %vm4572_vm11 = vcmp.gt.f32.partialorder %v4460_v11, 0.0  ;;  %8439 = vmatpush3.bf16.msra.mxu1 %v9683_v5 }
 0x3a1   : > { %v4719_v6 = vrot.slane %v4717_v37, 7  ;;  %8440 = vmatprep.subr.bf16.mxu1 %v9684_v46 }
 0x3a2   : > { %vm4573_vm12 = vcmp.gt.f32.partialorder %v4463_v34, 0.0  ;;  %v4609_v30 = vmul.f32 0.2, %v4463_v34  ;;  %v4644_v50 = vsel %vm4572_vm11, %v4460_v11, %v4608_v29 }
 0x3a3   : > { %v4722_v51 = vor.u32 %v4720_v12, %v4719_v6  ;;  %v4877_v54 = vsel %vm10049_vm3, %v4719_v6, %v4876_v4  ;;  %v4290_v17 = vpop.f32.mrb[24].mxu0 }
 0x3a4   : > { %4878 = vst [vmem:[#allocation2 + $0x48] sm:$0x1] %v4877_v54  ;;  %v4645_v16 = vsel %vm4573_vm12, %v4463_v34, %v4609_v30  ;;  %v9028_v33 = vadd.f32 %v11137_v48, %v4290_v17  ;;  %v4292_v9 = vpop.f32.mrb[25].mxu0  ;;  %8441 = vmatpush3.bf16.msra.mxu1 %v9685_v22 }
 0x3a5   : > { %v4874_v3 = vsel %vm10099_vm6, %v4722_v51, %v10980_v21  ;;  %v4675_v0 = vpack.c.bf16 %v4645_v16, %v4644_v50  ;;  %v4293_v61 = vpop.f32.mrb[26].mxu0  ;;  %v9686_v21 = vld [vmem:[#allocation5 + $0x78] sm:$0xff]  }
 0x3a6   : > { %4875 = vst [vmem:[#allocation2 + $0x40] sm:$0xff] %v4874_v3  ;;  %v4468_v37 = vadd.f32 %v9028_v33, %v10842_v53  ;;  %v9029_v6 = vadd.f32 %v11137_v48, %v4293_v61  ;;  %v4295_v11 = vpop.f32.mrb[27].mxu0  ;;  %v4882_v51 = vld [vmem:[#allocation2 + $0x58] sm:$0x1]  ;;  %8442 = vmatprep.subr.bf16.mxu1 %v9686_v21  ;;  %v9688_v61 = vld [vmem:[#allocation5 + $0xc0] sm:$0xff]  }
 0x3a7   : > { %v4724_v34 = vshrl.u32 %v4675_v0, 16  ;;  %v4727_v30 = vshll.u32 %v4675_v0, 16  ;;  %v9687_v9 = vld [vmem:[#allocation5 + $0x38] sm:$0xff]  }
 0x3a8   : > { %v4610_v29 = vmul.f32 0.2, %v4468_v37  ;;  %v4471_v12 = vadd.f32 %v9029_v6, %v10846_v47  ;;  %vm4574_vm13 = vcmp.gt.f32.partialorder %v4468_v37, 0.0  ;;  %8443 = vmatpush3.bf16.msra.mxu1 %v9687_v9 }
 0x3a9   : > { %v4726_v4 = vrot.slane %v4724_v34, 7  ;;  %8540 = vmatprep.subr.bf16.mxu1 %v9688_v61 }
 0x3aa   : > { %vm4575_vm14 = vcmp.gt.f32.partialorder %v4471_v12, 0.0  ;;  %v4611_v63 = vmul.f32 0.2, %v4471_v12  ;;  %v4646_v50 = vsel %vm4574_vm13, %v4468_v37, %v4610_v29 }
 0x3ab   : > { %v4729_v54 = vor.u32 %v4727_v30, %v4726_v4  ;;  %v4883_v53 = vsel %vm10049_vm3, %v4726_v4, %v4882_v51  ;;  %v4298_v17 = vpop.f32.mrb[28].mxu0 }
 0x3ac   : > { %4884 = vst [vmem:[#allocation2 + $0x58] sm:$0x1] %v4883_v53  ;;  %v4647_v16 = vsel %vm4575_vm14, %v4471_v12, %v4611_v63  ;;  %v9030_v47 = vadd.f32 %v11137_v48, %v4298_v17  ;;  %v4300_v33 = vpop.f32.mrb[29].mxu0 }
 0x3ad   : > { %v4880_v5 = vsel %vm10099_vm6, %v4729_v54, %v10991_v2  ;;  %v4676_v3 = vpack.c.bf16 %v4647_v16, %v4646_v50  ;;  %v4301_v0 = vpop.f32.mrb[30].mxu0  ;;  %v4888_v2 = vld [vmem:[#allocation2 + $0x68] sm:$0x1] }
 0x3ae   : > { %4881 = vst [vmem:[#allocation2 + $0x50] sm:$0xff] %v4880_v5  ;;  %v4476_v46 = vadd.f32 %v9030_v47, %v10839_v8  ;;  %v9031_v6 = vadd.f32 %v11137_v48, %v4301_v0  ;;  %v4303_v37 = vpop.f32.mrb[31].mxu0 }
 0x3af   : > { %v4731_v11 = vshrl.u32 %v4676_v3, 16  ;;  %v4734_v22 = vshll.u32 %v4676_v3, 16 }
 0x3b0   : > { %v4612_v34 = vmul.f32 0.2, %v4476_v46  ;;  %v4479_v29 = vadd.f32 %v9031_v6, %v10844_v49  ;;  %vm4576_vm15 = vcmp.gt.f32.partialorder %v4476_v46, 0.0 }
 0x3b1   : > { %v4733_v12 = vrot.slane %v4731_v11, 7 }
 0x3b2   : > { %vm4577_vm0 = vcmp.gt.f32.partialorder %v4479_v29, 0.0  ;;  %v4613_v4 = vmul.f32 0.2, %v4479_v29  ;;  %v4648_v51 = vsel %vm4576_vm15, %v4476_v46, %v4612_v34  ;;  %v4894_v46 = vld [vmem:[#allocation2 + $0x78] sm:$0x1] }
 0x3b3   : > { %v4736_v30 = vor.u32 %v4734_v22, %v4733_v12  ;;  %v4889_v21 = vsel %vm10049_vm3, %v4733_v12, %v4888_v2  ;;  %v4306_v8 = vpop.f32.mrb[32].mxu0 }
 0x3b4   : > { %4890 = vst [vmem:[#allocation2 + $0x68] sm:$0x1] %v4889_v21  ;;  %v4649_v63 = vsel %vm4577_vm0, %v4479_v29, %v4613_v4  ;;  %v9032_v54 = vadd.f32 %v11137_v48, %v4306_v8  ;;  %v4308_v53 = vpop.f32.mrb[33].mxu0 }
 0x3b5   : > { %v4886_v49 = vsel %vm10099_vm6, %v4736_v30, %v11004_v27  ;;  %v4677_v17 = vpack.c.bf16 %v4649_v63, %v4648_v51  ;;  %v4309_v50 = vpop.f32.mrb[34].mxu0 }
 0x3b6   : > { %4887 = vst [vmem:[#allocation2 + $0x60] sm:$0xff] %v4886_v49  ;;  %v4484_v16 = vadd.f32 %v9032_v54, %v10862_v20  ;;  %v9033_v47 = vadd.f32 %v11137_v48, %v4309_v50  ;;  %v4311_v33 = vpop.f32.mrb[35].mxu0  ;;  %v4900_v49 = vld [vmem:[#allocation2 + $0x88] sm:$0x1] }
 0x3b7   : > { %v4738_v9 = vshrl.u32 %v4677_v17, 16  ;;  %v4741_v61 = vshll.u32 %v4677_v17, 16 }
 0x3b8   : > { %v4614_v5 = vmul.f32 0.2, %v4484_v16  ;;  %v4487_v3 = vadd.f32 %v9033_v47, %v10867_v35  ;;  %vm4578_vm1 = vcmp.gt.f32.partialorder %v4484_v16, 0.0 }
 0x3b9   : > { %v4740_v0 = vrot.slane %v4738_v9, 7 }
 0x3ba   : > { %vm4579_vm2 = vcmp.gt.f32.partialorder %v4487_v3, 0.0  ;;  %v4615_v6 = vmul.f32 0.2, %v4487_v3  ;;  %v4650_v20 = vsel %vm4578_vm1, %v4484_v16, %v4614_v5 }
 0x3bb   : > { %v4743_v37 = vor.u32 %v4741_v61, %v4740_v0  ;;  %v4895_v27 = vsel %vm10049_vm3, %v4740_v0, %v4894_v46  ;;  %v4314_v11 = vpop.f32.mrb[36].mxu0 }
 0x3bc   : > { %4896 = vst [vmem:[#allocation2 + $0x78] sm:$0x1] %v4895_v27  ;;  %v4651_v34 = vsel %vm4579_vm2, %v4487_v3, %v4615_v6  ;;  %v9034_v29 = vadd.f32 %v11137_v48, %v4314_v11  ;;  %v4316_v12 = vpop.f32.mrb[37].mxu0 }
 0x3bd   : > { %v4892_v35 = vsel %vm10099_vm6, %v4743_v37, %v11020_v55  ;;  %v4678_v22 = vpack.c.bf16 %v4651_v34, %v4650_v20  ;;  %v4317_v2 = vpop.f32.mrb[38].mxu0  ;;  %v4906_v34 = vld [vmem:[#allocation2 + $0x98] sm:$0x1] }
 0x3be   : > { %4893 = vst [vmem:[#allocation2 + $0x70] sm:$0xff] %v4892_v35  ;;  %v4492_v4 = vadd.f32 %v9034_v29, %v10860_v28  ;;  %v9035_v30 = vadd.f32 %v11137_v48, %v4317_v2  ;;  %v4319_v21 = vpop.f32.mrb[39].mxu0 }
 0x3bf   : > { %v4745_v8 = vshrl.u32 %v4678_v22, 16  ;;  %v4748_v53 = vshll.u32 %v4678_v22, 16 }
 0x3c0   : > { %v4616_v51 = vmul.f32 0.2, %v4492_v4  ;;  %v4495_v63 = vadd.f32 %v9035_v30, %v10864_v26  ;;  %vm4580_vm4 = vcmp.gt.f32.partialorder %v4492_v4, 0.0 }
 0x3c1   : > { %v4747_v54 = vrot.slane %v4745_v8, 7 }
 0x3c2   : > { %vm4581_vm5 = vcmp.gt.f32.partialorder %v4495_v63, 0.0  ;;  %v4617_v17 = vmul.f32 0.2, %v4495_v63  ;;  %v4652_v28 = vsel %vm4580_vm4, %v4492_v4, %v4616_v51 }
 0x3c3   : > { %v4750_v50 = vor.u32 %v4748_v53, %v4747_v54  ;;  %v4901_v55 = vsel %vm10049_vm3, %v4747_v54, %v4900_v49  ;;  %v4322_v16 = vpop.f32.mrb[40].mxu0 }
 0x3c4   : > { %4902 = vst [vmem:[#allocation2 + $0x88] sm:$0x1] %v4901_v55  ;;  %v4653_v47 = vsel %vm4581_vm5, %v4495_v63, %v4617_v17  ;;  %v9036_v33 = vadd.f32 %v11137_v48, %v4322_v16  ;;  %v4324_v9 = vpop.f32.mrb[41].mxu0  ;;  %v4912_v55 = vld [vmem:[#allocation2 + $0xa8] sm:$0x1] }
 0x3c5   : > { %v11189_v26 = vsel %vm10099_vm6, %v4750_v50, %v11030_v1  ;;  %v4679_v5 = vpack.c.bf16 %v4653_v47, %v4652_v28  ;;  %v4325_v3 = vpop.f32.mrb[42].mxu0 }
 0x3c6   : > { %4899 = vst [vmem:[#allocation2 + $0x80] sm:$0xff] %v11189_v26  ;;  %v4500_v0 = vadd.f32 %v9036_v33, %v10885_v15  ;;  %v9037_v61 = vadd.f32 %v11137_v48, %v4325_v3  ;;  %v4327_v46 = vpop.f32.mrb[43].mxu0 }
 0x3c7   : > { %v4752_v6 = vshrl.u32 %v4679_v5, 16  ;;  %v4755_v20 = vshll.u32 %v4679_v5, 16 }
 0x3c8   : > { %v4618_v37 = vmul.f32 0.2, %v4500_v0  ;;  %v4503_v27 = vadd.f32 %v9037_v61, %v10890_v36  ;;  %vm4582_vm9 = vcmp.gt.f32.partialorder %v4500_v0, 0.0 }
 0x3c9   : > { %v4754_v11 = vrot.slane %v4752_v6, 7 }
 0x3ca   : > { %vm4583_vm10 = vcmp.gt.f32.partialorder %v4503_v27, 0.0  ;;  %v4619_v1 = vmul.f32 0.2, %v4503_v27  ;;  %v4654_v15 = vsel %vm4582_vm9, %v4500_v0, %v4618_v37 }
 0x3cb   : > { %v4757_v29 = vor.u32 %v4755_v20, %v4754_v11  ;;  %v4907_v12 = vsel %vm10049_vm3, %v4754_v11, %v4906_v34  ;;  %v4330_v35 = vpop.f32.mrb[44].mxu0 }
 0x3cc   : > { %4908 = vst [vmem:[#allocation2 + $0x98] sm:$0x1] %v4907_v12  ;;  %v4655_v22 = vsel %vm4583_vm10, %v4503_v27, %v4619_v1  ;;  %v9038_v2 = vadd.f32 %v11137_v48, %v4330_v35  ;;  %v4332_v4 = vpop.f32.mrb[45].mxu0  ;;  %v4918_v1 = vld [vmem:[#allocation2 + $0xb8] sm:$0x1] }
 0x3cd   : > { %v11201_v36 = vsel %vm10099_vm6, %v4757_v29, %v11036_v25  ;;  %v4680_v30 = vpack.c.bf16 %v4655_v22, %v4654_v15  ;;  %v4333_v21 = vpop.f32.mrb[46].mxu0 }
 0x3ce   : > { %4905 = vst [vmem:[#allocation2 + $0x90] sm:$0xff] %v11201_v36  ;;  %v4508_v8 = vadd.f32 %v9038_v2, %v10883_v13  ;;  %v9039_v51 = vadd.f32 %v11137_v48, %v4333_v21  ;;  %v4335_v63 = vpop.f32.mrb[47].mxu0 }
 0x3cf   : > { %v4759_v54 = vshrl.u32 %v4680_v30, 16  ;;  %v4762_v50 = vshll.u32 %v4680_v30, 16 }
 0x3d0   : > { %v4620_v53 = vmul.f32 0.2, %v4508_v8  ;;  %v4511_v49 = vadd.f32 %v9039_v51, %v10887_v42  ;;  %vm4584_vm11 = vcmp.gt.f32.partialorder %v4508_v8, 0.0 }
 0x3d1   : > { %v4761_v17 = vrot.slane %v4759_v54, 7 }
 0x3d2   : > { %vm4585_vm12 = vcmp.gt.f32.partialorder %v4511_v49, 0.0  ;;  %v4621_v25 = vmul.f32 0.2, %v4511_v49  ;;  %v4656_v13 = vsel %vm4584_vm11, %v4508_v8, %v4620_v53 }
 0x3d3   : > { %v4764_v16 = vor.u32 %v4762_v50, %v4761_v17  ;;  %v4913_v28 = vsel %vm10049_vm3, %v4761_v17, %v4912_v55  ;;  %v4338_v47 = vpop.f32.mrb[48].mxu0  ;;  %v4924_v50 = vld [vmem:[#allocation2 + $0xc8] sm:$0x1] }
 0x3d4   : > { %4914 = vst [vmem:[#allocation2 + $0xa8] sm:$0x1] %v4913_v28  ;;  %v4657_v33 = vsel %vm4585_vm12, %v4511_v49, %v4621_v25  ;;  %v9040_v9 = vadd.f32 %v11137_v48, %v4338_v47  ;;  %v4340_v5 = vpop.f32.mrb[49].mxu0 }
 0x3d5   : > { %v11213_v42 = vsel %vm10099_vm6, %v4764_v16, %v11042_v44  ;;  %v4681_v3 = vpack.c.bf16 %v4657_v33, %v4656_v13  ;;  %v4341_v0 = vpop.f32.mrb[50].mxu0 }
 0x3d6   : > { %4911 = vst [vmem:[#allocation2 + $0xa0] sm:$0xff] %v11213_v42  ;;  %v4516_v61 = vadd.f32 %v9040_v9, %v10906_v39  ;;  %v9041_v46 = vadd.f32 %v11137_v48, %v4341_v0  ;;  %v4343_v6 = vpop.f32.mrb[51].mxu0 }
 0x3d7   : > { %v4766_v37 = vshrl.u32 %v4681_v3, 16  ;;  %v4769_v34 = vshll.u32 %v4681_v3, 16 }
 0x3d8   : > { %v4622_v27 = vmul.f32 0.2, %v4516_v61  ;;  %v4519_v11 = vadd.f32 %v9041_v46, %v10913_v7  ;;  %vm4586_vm13 = vcmp.gt.f32.partialorder %v4516_v61, 0.0 }
 0x3d9   : > { %v4768_v20 = vrot.slane %v4766_v37, 7 }
 0x3da   : > { %vm4587_vm14 = vcmp.gt.f32.partialorder %v4519_v11, 0.0  ;;  %v4623_v44 = vmul.f32 0.2, %v4519_v11  ;;  %v4658_v39 = vsel %vm4586_vm13, %v4516_v61, %v4622_v27 }
 0x3db   : > { %v4771_v29 = vor.u32 %v4769_v34, %v4768_v20  ;;  %v4919_v12 = vsel %vm10049_vm3, %v4768_v20, %v4918_v1  ;;  %v4346_v35 = vpop.f32.mrb[52].mxu0 }
 0x3dc   : > { %4920 = vst [vmem:[#allocation2 + $0xb8] sm:$0x1] %v4919_v12  ;;  %v4659_v15 = vsel %vm4587_vm14, %v4519_v11, %v4623_v44  ;;  %v9042_v22 = vadd.f32 %v11137_v48, %v4346_v35  ;;  %v4348_v2 = vpop.f32.mrb[53].mxu0  ;;  %v4930_v11 = vld [vmem:[#allocation2 + $0xd8] sm:$0x1] }
 0x3dd   : > { %v11225_v7 = vsel %vm10099_vm6, %v4771_v29, %v11048_v43  ;;  %v4682_v4 = vpack.c.bf16 %v4659_v15, %v4658_v39  ;;  %v4349_v30 = vpop.f32.mrb[54].mxu0 }
 0x3de   : > { %4917 = vst [vmem:[#allocation2 + $0xb0] sm:$0xff] %v11225_v7  ;;  %v4524_v21 = vadd.f32 %v9042_v22, %v10903_v24  ;;  %v9043_v8 = vadd.f32 %v11137_v48, %v4349_v30  ;;  %v4351_v51 = vpop.f32.mrb[55].mxu0 }
 0x3df   : > { %v4773_v63 = vshrl.u32 %v4682_v4, 16  ;;  %v4776_v17 = vshll.u32 %v4682_v4, 16 }
 0x3e0   : > { %v4624_v54 = vmul.f32 0.2, %v4524_v21  ;;  %v4527_v53 = vadd.f32 %v9043_v8, %v10909_v40  ;;  %vm4588_vm15 = vcmp.gt.f32.partialorder %v4524_v21, 0.0 }
 0x3e1   : > { %v4775_v49 = vrot.slane %v4773_v63, 7  ;;  %v4936_v63 = vld [vmem:[#allocation2 + $0xe8] sm:$0x1] }
 0x3e2   : > { %vm4589_vm0 = vcmp.gt.f32.partialorder %v4527_v53, 0.0  ;;  %v4625_v43 = vmul.f32 0.2, %v4527_v53  ;;  %v4660_v24 = vsel %vm4588_vm15, %v4524_v21, %v4624_v54 }
 0x3e3   : > { %v4778_v55 = vor.u32 %v4776_v17, %v4775_v49  ;;  %v4925_v25 = vsel %vm10049_vm3, %v4775_v49, %v4924_v50  ;;  %v4354_v16 = vpop.f32.mrb[56].mxu0 }
 0x3e4   : > { %4926 = vst [vmem:[#allocation2 + $0xc8] sm:$0x1] %v4925_v25  ;;  %v4661_v28 = vsel %vm4589_vm0, %v4527_v53, %v4625_v43  ;;  %v9044_v47 = vadd.f32 %v11137_v48, %v4354_v16  ;;  %v4356_v13 = vpop.f32.mrb[57].mxu0 }
 0x3e5   : > { %v11237_v40 = vsel %vm10099_vm6, %v4778_v55, %v11054_v59  ;;  %v4683_v33 = vpack.c.bf16 %v4661_v28, %v4660_v24  ;;  %v4357_v9 = vpop.f32.mrb[58].mxu0 }
 0x3e6   : > { %4923 = vst [vmem:[#allocation2 + $0xc0] sm:$0xff] %v11237_v40  ;;  %v4532_v5 = vadd.f32 %v9044_v47, %v10931_v56  ;;  %v9045_v3 = vadd.f32 %v11137_v48, %v4357_v9  ;;  %v4359_v0 = vpop.f32.mrb[59].mxu0 }
 0x3e7   : > { %v4780_v61 = vshrl.u32 %v4683_v33, 16  ;;  %v4783_v27 = vshll.u32 %v4683_v33, 16 }
 0x3e8   : > { %v4626_v46 = vmul.f32 0.2, %v4532_v5  ;;  %v4535_v6 = vadd.f32 %v9045_v3, %v10935_v18  ;;  %vm4590_vm1 = vcmp.gt.f32.partialorder %v4532_v5, 0.0  ;;  %v4942_v3 = vld [vmem:[#allocation2 + $0xf8] sm:$0x1] }
 0x3e9   : > { %v4782_v37 = vrot.slane %v4780_v61, 7 }
 0x3ea   : > { %vm4591_vm2 = vcmp.gt.f32.partialorder %v4535_v6, 0.0  ;;  %v4627_v59 = vmul.f32 0.2, %v4535_v6  ;;  %v4662_v56 = vsel %vm4590_vm1, %v4532_v5, %v4626_v46 }
 0x3eb   : > { %v4785_v20 = vor.u32 %v4783_v27, %v4782_v37  ;;  %v4931_v34 = vsel %vm10049_vm3, %v4782_v37, %v4930_v11  ;;  %v4362_v1 = vpop.f32.mrb[60].mxu0 }
 0x3ec   : > { %4932 = vst [vmem:[#allocation2 + $0xd8] sm:$0x1] %v4931_v34  ;;  %v4663_v44 = vsel %vm4591_vm2, %v4535_v6, %v4627_v59  ;;  %v9046_v29 = vadd.f32 %v11137_v48, %v4362_v1  ;;  %v4364_v12 = vpop.f32.mrb[61].mxu0 }
 0x3ed   : > { %v11249_v18 = vsel %vm10099_vm6, %v4785_v20, %v11060_v38  ;;  %v4684_v35 = vpack.c.bf16 %v4663_v44, %v4662_v56  ;;  %v4365_v39 = vpop.f32.mrb[62].mxu0 }
 0x3ee   : > { %4929 = vst [vmem:[#allocation2 + $0xd0] sm:$0xff] %v11249_v18  ;;  %v4540_v15 = vadd.f32 %v9046_v29, %v10927_v62  ;;  %v9047_v22 = vadd.f32 %v11137_v48, %v4365_v39  ;;  %v4367_v2 = vpop.f32.mrb[63].mxu0  ;;  %v4948_v39 = vld [vmem:[#allocation2 + $0x108] sm:$0x1] }
 0x3ef   : > { %v4787_v4 = vshrl.u32 %v4684_v35, 16  ;;  %v4790_v51 = vshll.u32 %v4684_v35, 16 }
 0x3f0   : > { %v4628_v30 = vmul.f32 0.2, %v4540_v15  ;;  %v4543_v21 = vadd.f32 %v9047_v22, %v10933_v57  ;;  %vm4592_vm4 = vcmp.gt.f32.partialorder %v4540_v15, 0.0  ;;  %v9016_v22 = vadd.f32 %v11137_v48, %v11110_v19 }
 0x3f1   : > { %v4789_v8 = vrot.slane %v4787_v4, 7 }
 0x3f2   : > { %vm4593_vm5 = vcmp.gt.f32.partialorder %v4543_v21, 0.0  ;;  %v4629_v38 = vmul.f32 0.2, %v4543_v21  ;;  %v4664_v62 = vsel %vm4592_vm4, %v4540_v15, %v4628_v30 }
 0x3f3   : > { %v4792_v54 = vor.u32 %v4790_v51, %v4789_v8  ;;  %v4937_v53 = vsel %vm10049_vm3, %v4789_v8, %v4936_v63  ;;  %v4370_v49 = vpop.f32.mrb[64].mxu0 }
 0x3f4   : > { %4938 = vst [vmem:[#allocation2 + $0xe8] sm:$0x1] %v4937_v53  ;;  %v4665_v17 = vsel %vm4593_vm5, %v4543_v21, %v4629_v38  ;;  %v9048_v50 = vadd.f32 %v11137_v48, %v4370_v49  ;;  %v4372_v43 = vpop.f32.mrb[65].mxu0  ;;  %v12250_v53 = vld [vmem:[#allocation11_spill] sm:$0xff] }
 0x3f5   : > { %v11261_v57 = vsel %vm10099_vm6, %v4792_v54, %v11066_v14  ;;  %v4685_v55 = vpack.c.bf16 %v4665_v17, %v4664_v62  ;;  %v4373_v25 = vpop.f32.mrb[66].mxu0  ;;  %v9017_v49 = vadd.f32 %v11137_v48, %v12250_v53 }
 0x3f6   : > { %4935 = vst [vmem:[#allocation2 + $0xe0] sm:$0xff] %v11261_v57  ;;  %v9049_v16 = vadd.f32 %v11137_v48, %v4373_v25  ;;  %v4548_v24 = vadd.f32 %v9048_v50, %v11126_v58  ;;  %v4375_v28 = vpop.f32.mrb[67].mxu0 }
 0x3f7   : > { %v4794_v47 = vshrl.u32 %v4685_v55, 16  ;;  %v4797_v5 = vshll.u32 %v4685_v55, 16 }
 0x3f8   : > { %v4630_v13 = vmul.f32 0.2, %v4548_v24  ;;  %v4551_v33 = vadd.f32 %v9049_v16, %v11132_v52  ;;  %vm4594_vm9 = vcmp.gt.f32.partialorder %v4548_v24, 0.0  ;;  %v12251_v16 = vld [vmem:[#allocation14_spill] sm:$0xff] }
 0x3f9   : > { %v4796_v9 = vrot.slane %v4794_v47, 7 }
 0x3fa   : > { %vm4595_vm10 = vcmp.gt.f32.partialorder %v4551_v33, 0.0  ;;  %v4631_v14 = vmul.f32 0.2, %v4551_v33  ;;  %v4666_v6 = vsel %vm4594_vm9, %v4548_v24, %v4630_v13  ;;  %v9022_v24 = vadd.f32 %v11137_v48, %v12251_v16  ;;  %v4954_v13 = vld [vmem:[#allocation2 + $0x118] sm:$0x1] }
 0x3fb   : > { %v4799_v0 = vor.u32 %v4797_v5, %v4796_v9  ;;  %v4943_v61 = vsel %vm10049_vm3, %v4796_v9, %v4942_v3  ;;  %v4378_v46 = vpop.f32.mrb[68].mxu0  ;;  %v12252_v3 = vld [vmem:[#allocation12_spill] sm:$0xff] }
 0x3fc   : > { %4944 = vst [vmem:[#allocation2 + $0xf8] sm:$0x1] %v4943_v61  ;;  %v4667_v37 = vsel %vm4595_vm10, %v4551_v33, %v4631_v14  ;;  %v9050_v58 = vadd.f32 %v11137_v48, %v4378_v46  ;;  %v4380_v27 = vpop.f32.mrb[69].mxu0  ;;  %v9020_v14 = vadd.f32 %v11137_v48, %v12252_v3 }
 0x3fd   : > { %v11273_v52 = vsel %vm10099_vm6, %v4799_v0, %v11072_v45  ;;  %v4686_v11 = vpack.c.bf16 %v4667_v37, %v4666_v6  ;;  %v4381_v59 = vpop.f32.mrb[70].mxu0  ;;  %v9018_v45 = vadd.f32 %v11137_v48, %v11114_v10  ;;  %v12249_v10 = vld [vmem:[#allocation9_spill] sm:$0xff]  ;;  %v12253_v37 = vld [vmem:[#allocation15_spill] sm:$0xff] }
 0x3fe   : > { %4941 = vst [vmem:[#allocation2 + $0xf0] sm:$0xff] %v11273_v52  ;;  %v4556_v20 = vadd.f32 %v9050_v58, %v11122_v41  ;;  %v9051_v34 = vadd.f32 %v11137_v48, %v4381_v59  ;;  %v4383_v1 = vpop.f32.mrb[71].mxu0  ;;  %v9023_v58 = vadd.f32 %v11137_v48, %v12253_v37  ;;  %v4867_v37 = vld [vmem:[#allocation2 + $0x30] sm:$0xff] }
 0x3ff   : > { %v4801_v56 = vshrl.u32 %v4686_v11, 16  ;;  %v4804_v35 = vshll.u32 %v4686_v11, 16 }
 0x400   : > { %v4632_v44 = vmul.f32 0.2, %v4556_v20  ;;  %v4559_v29 = vadd.f32 %v9051_v34, %v11128_v31  ;;  %vm4596_vm11 = vcmp.gt.f32.partialorder %v4556_v20, 0.0  ;;  %v9019_v31 = vadd.f32 %v11137_v48, %v11116_v32  ;;  %v12254_v34 = vld [vmem:[#allocation13_spill] sm:$0xff] }
 0x401   : > { %v4803_v12 = vrot.slane %v4801_v56, 7  ;;  %v9021_v1 = vadd.f32 %v11137_v48, %v12254_v34  ;;  %v12255_v56 = vld [vmem:[#allocation10_spill] sm:$0xff]  ;;  %v4855_v48 = vld [vmem:[#allocation2 + $0x10] sm:$0xff] }
 0x402   : > { %vm4597_vm12 = vcmp.gt.f32.partialorder %v4559_v29, 0.0  ;;  %v4633_v15 = vmul.f32 0.2, %v4559_v29  ;;  %v4668_v30 = vsel %vm4596_vm11, %v4556_v20, %v4632_v44 }
 0x403   : > { %v4806_v41 = vor.u32 %v4804_v35, %v4803_v12  ;;  %v4949_v2 = vsel %vm10049_vm3, %v4803_v12, %v4948_v39  ;;  %v8918_v4 = vpop.f32.mrb[72].mxu0  ;;  %v4858_v39 = vld [vmem:[#allocation2 + $0x18] sm:$0x1] }
 0x404   : > { %4950 = vst [vmem:[#allocation2 + $0x108] sm:$0x1] %v4949_v2  ;;  %v4669_v21 = vsel %vm4597_vm12, %v4559_v29, %v4633_v15  ;;  %v4428_v8 = vadd.f32 %v9018_v45, %v8918_v4  ;;  %v4419_v51 = vpop.f32.mrb[73].mxu0 }
 0x405   : > { %v4946_v63 = vsel %vm10099_vm6, %v4806_v41, %v12249_v10  ;;  %v4687_v38 = vpack.c.bf16 %v4669_v21, %v4668_v30  ;;  %v4420_v54 = vadd.f32 %v9016_v22, %v4419_v51  ;;  %v8919_v19 = vpop.f32.mrb[74].mxu0  ;;  %v4852_v30 = vld [vmem:[#allocation2 + $0x8] sm:$0x1] }
 0x406   : > { %4947 = vst [vmem:[#allocation2 + $0x100] sm:$0xff] %v4946_v63  ;;  %v4600_v62 = vmul.f32 0.2, %v4428_v8  ;;  %v4431_v17 = vadd.f32 %v9019_v31, %v8919_v19  ;;  %v4422_v50 = vpop.f32.mrb[75].mxu0  ;;  %vm4564_vm13 = vcmp.gt.f32.partialorder %v4428_v8, 0.0 }
 0x407   : > { %v4808_v32 = vshrl.u32 %v4687_v38, 16  ;;  %v4598_v43 = vmul.f32 0.2, %v4420_v54  ;;  %v4423_v25 = vadd.f32 %v9017_v49, %v4422_v50  ;;  %v4811_v47 = vshll.u32 %v4687_v38, 16 }
 0x408   : > { %vm4565_vm14 = vcmp.gt.f32.partialorder %v4431_v17, 0.0  ;;  %v4601_v55 = vmul.f32 0.2, %v4431_v17  ;;  %vm4562_vm15 = vcmp.gt.f32.partialorder %v4420_v54, 0.0  ;;  %v4636_v33 = vsel %vm4564_vm13, %v4428_v8, %v4600_v62 }
 0x409   : > { %v4810_v28 = vrot.slane %v4808_v32, 7  ;;  %vm4563_vm0 = vcmp.gt.f32.partialorder %v4423_v25, 0.0  ;;  %v4599_v5 = vmul.f32 0.2, %v4423_v25  ;;  %v4634_v27 = vsel %vm4562_vm15, %v4420_v54, %v4598_v43 }
 0x40a   : > { %v4637_v9 = vsel %vm4565_vm14, %v4431_v17, %v4601_v55 }
 0x40b   : > { %v4813_v0 = vor.u32 %v4811_v47, %v4810_v28  ;;  %v4955_v61 = vsel %vm10049_vm3, %v4810_v28, %v4954_v13  ;;  %v4671_v46 = vpack.c.bf16 %v4637_v9, %v4636_v33  ;;  %v8922_v6 = vpop.f32.mrb[76].mxu0  ;;  %v4635_v11 = vsel %vm4563_vm0, %v4423_v25, %v4599_v5  ;;  %v9778_v25 = vld [vmem:[#allocation2] sm:$0xff]  ;;  %v4870_v5 = vld [vmem:[#allocation2 + $0x38] sm:$0x1] }
 0x40c   : > { %4956 = vst [vmem:[#allocation2 + $0x118] sm:$0x1] %v4955_v61  ;;  %v4444_v59 = vadd.f32 %v9022_v24, %v8922_v6  ;;  %v4435_v20 = vpop.f32.mrb[77].mxu0  ;;  %v4670_v12 = vpack.c.bf16 %v4635_v11, %v4634_v27 }
 0x40d   : > { %v4952_v44 = vsel %vm10099_vm6, %v4813_v0, %v12255_v56  ;;  %v4696_v29 = vshrl.u32 %v4671_v46, 16  ;;  %v8923_v35 = vpop.f32.mrb[78].mxu0  ;;  %v4699_v45 = vshll.u32 %v4671_v46, 16  ;;  %v4436_v22 = vadd.f32 %v9020_v14, %v4435_v20  ;;  %v4864_v46 = vld [vmem:[#allocation2 + $0x28] sm:$0x1]  ;;  %v4861_v20 = vld [vmem:[#allocation2 + $0x20] sm:$0xff] }
 0x40e   : > { %4953 = vst [vmem:[#allocation2 + $0x110] sm:$0xff] %v4952_v44  ;;  %v4604_v15 = vmul.f32 0.2, %v4444_v59  ;;  %v4447_v41 = vadd.f32 %v9023_v58, %v8923_v35  ;;  %v4438_v2 = vpop.f32.mrb[79].mxu0  ;;  %v4689_v31 = vshrl.u32 %v4670_v12, 16  ;;  %vm4568_vm1 = vcmp.gt.f32.partialorder %v4444_v59, 0.0 }
 0x40f   : > { %v4698_v4 = vrot.slane %v4696_v29, 7  ;;  %v4439_v21 = vadd.f32 %v9021_v1, %v4438_v2  ;;  %v4692_v8 = vshll.u32 %v4670_v12, 16  ;;  %vm4566_vm2 = vcmp.gt.f32.partialorder %v4436_v22, 0.0 }
 0x410   : > { %v4602_v51 = vmul.f32 0.2, %v4436_v22  ;;  %vm4569_vm4 = vcmp.gt.f32.partialorder %v4447_v41, 0.0  ;;  %v4691_v38 = vrot.slane %v4689_v31, 7  ;;  %v4605_v54 = vmul.f32 0.2, %v4447_v41 }
 0x411   : > { %v4701_v10 = vor.u32 %v4699_v45, %v4698_v4  ;;  %v4859_v63 = vsel %vm10049_vm3, %v4698_v4, %v4858_v39  ;;  %v4640_v19 = vsel %vm4568_vm1, %v4444_v59, %v4604_v15  ;;  %vm4567_vm5 = vcmp.gt.f32.partialorder %v4439_v21, 0.0  ;;  %v9689_v31 = vld [vmem:[#allocation5 + $0x80] sm:$0xff]  }
 0x412   : > { %4860 = vst [vmem:[#allocation2 + $0x18] sm:$0x1] %v4859_v63  ;;  %v4603_v53 = vmul.f32 0.2, %v4439_v21  ;;  %v4694_v62 = vor.u32 %v4692_v8, %v4691_v38  ;;  %v4853_v17 = vsel %vm10049_vm3, %v4691_v38, %v4852_v30  ;;  %v4641_v50 = vsel %vm4569_vm4, %v4447_v41, %v4605_v54  ;;  %v9691_v38 = vld [vmem:[#allocation5 + $0x88] sm:$0xff]  }
 0x413   : > { %v11309_v49 = vsel %vm10099_vm6, %v4701_v10, %v4855_v48  ;;  %4854 = vst [vmem:[#allocation2 + $0x8] sm:$0x1] %v4853_v17  ;;  %v4638_v32 = vsel %vm4566_vm2, %v4436_v22, %v4602_v51  ;;  %v4673_v43 = vpack.c.bf16 %v4641_v50, %v4640_v19  ;;  %v9690_v51 = vld [vmem:[#allocation5 + $0xc8] sm:$0xff]   ;;  %v9692_v19 = vld [vmem:[#allocation5 + $0xd0] sm:$0xff]  }
 0x414   : > { %4857 = vst [vmem:[#allocation2 + $0x10] sm:$0xff] %v11309_v49  ;;  %v4639_v55 = vsel %vm4567_vm5, %v4439_v21, %v4603_v53  ;;  %v4850_v16 = vsel %vm10099_vm6, %v4694_v62, %v9778_v25  ;;  %v5132_v44 = vshll.u32 %v11309_v49, 16  ;;  %v5130_v2 = vshrl.u32 %v11309_v49, 16  ;;  %v9693_v50 = vld [vmem:[#allocation5 + $0x90] sm:$0xff]  }
 0x415   : > { %v4672_v24 = vpack.c.bf16 %v4639_v55, %v4638_v32  ;;  %v4961_v28 = vsel %vm10099_vm6, 0, %v4850_v16  ;;  %v4710_v47 = vshrl.u32 %v4673_v43, 16  ;;  %v4713_v9 = vshll.u32 %v4673_v43, 16  ;;  %v9694_v55 = vld [vmem:[#allocation5 + $0xd8] sm:$0xff]  }
 0x416   : > { %4962 = vst [vmem:[#allocation2] sm:$0xff] %v4961_v28  ;;  %v5120_v1 = vshll.u32 %v4961_v28, 16  ;;  %v5118_v45 = vshrl.u32 %v4961_v28, 16  ;;  %v5134_v15 = vrot.slane %v5132_v44, 1 }
 0x417   : > { %v4703_v13 = vshrl.u32 %v4672_v24, 16  ;;  %v4712_v33 = vrot.slane %v4710_v47, 7  ;;  %v4706_v14 = vshll.u32 %v4672_v24, 16  ;;  %v11362_v24 = vld [vmem:[#allocation2 + $0x40] sm:$0xff] }
 0x418   : > { %v5122_v29 = vrot.slane %v5120_v1, 1  ;;  %v11346_v48 = vor.u32 %v5134_v15, %v5130_v2  ;;  %v9703_v2 = vld [vmem:[#allocation5 + $0xb8] sm:$0xff]  }
 0x419   : > { %v4705_v3 = vrot.slane %v4703_v13, 7  ;;  %v4715_v0 = vor.u32 %v4713_v9, %v4712_v33  ;;  %v4871_v61 = vsel %vm10049_vm3, %v4712_v33, %v4870_v5  ;;  %v11335_v56 = vld [vmem:[#allocation2 + $0x18] sm:$0x1]  ;;  %v9696_v13 = vld [vmem:[#allocation5 + $0xe0] sm:$0xff]   ;;  %v5168_v5 = vshll.u32 %v11362_v24, 16 }
 0x41a   : > { %v4963_v6 = vld [vmem:[#allocation2 + $0x8] sm:$0x1]  ;;  %4872 = vst [vmem:[#allocation2 + $0x38] sm:$0x1] %v4871_v61  ;;  %v5137_v12 = vshll.u32 %v11335_v56, 16  ;;  %v5123_v22 = vor.u32 %v5122_v29, %v5118_v45  ;;  %v9701_v29 = vld [vmem:[#allocation5 + $0xb0] sm:$0xff]  }
 0x41b   : > { %v4708_v58 = vor.u32 %v4706_v14, %v4705_v3  ;;  %v4865_v27 = vsel %vm10049_vm3, %v4705_v3, %v4864_v46  ;;  %v4964_v11 = vsel %vm10049_vm3, 0, %v4963_v6  ;;  %v11327_v59 = vsel %vm10099_vm6, %v4715_v0, %v4867_v37  ;;  %v9697_v3 = vld [vmem:[#allocation5 + $0xa0] sm:$0xff]   ;;  %v9698_v0 = vld [vmem:[#allocation5 + $0xe8] sm:$0xff]   ;;  %v11373_v37 = vld [vmem:[#allocation2 + $0x50] sm:$0xff] }
 0x41c   : > { %4866 = vst [vmem:[#allocation2 + $0x28] sm:$0x1] %v4865_v27  ;;  %4965 = vst [vmem:[#allocation2 + $0x8] sm:$0x1] %v4964_v11  ;;  %v5139_v4 = vrot.slane %v5137_v12, 1  ;;  %v5156_v43 = vshll.u32 %v11327_v59, 16 }
 0x41d   : > { %4869 = vst [vmem:[#allocation2 + $0x30] sm:$0xff] %v11327_v59  ;;  %v11332_v34 = vsel %vm10099_vm6, %v4708_v58, %v4861_v20  ;;  %v5154_v33 = vshrl.u32 %v11327_v59, 16  ;;  %v11368_v61 = vld [vmem:[#allocation2 + $0x48] sm:$0x1]  ;;  %v5170_v6 = vrot.slane %v5168_v5, 1  ;;  %v5166_v27 = vshrl.u32 %v11362_v24, 16 }
 0x41e   : > { %4863 = vst [vmem:[#allocation2 + $0x20] sm:$0xff] %v11332_v34  ;;  %v5144_v8 = vshll.u32 %v11332_v34, 16  ;;  %v5140_v10 = vsel %vm2066_vm7, %v11346_v48, %v5139_v4  ;;  %v5142_v53 = vshrl.u32 %v11332_v34, 16  ;;  %v5158_v47 = vrot.slane %v5156_v43, 1  ;;  %v9699_v58 = vld [vmem:[#allocation5 + $0xa8] sm:$0xff]   ;;  %v9700_v20 = vld [vmem:[#allocation5 + $0xf0] sm:$0xff]  }
 0x41f   : > { %v5173_v11 = vshll.u32 %v11368_v61, 16  ;;  %v11377_v1 = vor.u32 %v5170_v6, %v5166_v27  ;;  %v5180_v44 = vshll.u32 %v11373_v37, 16  ;;  %v9702_v45 = vld [vmem:[#allocation5 + $0xf8] sm:$0xff]   ;;  %v5178_v4 = vshrl.u32 %v11373_v37, 16 }
 0x420   : > { %v5146_v54 = vrot.slane %v5144_v8, 1  ;;  %v11366_v14 = vor.u32 %v5158_v47, %v5154_v33  ;;  %v4970_v27 = vld [vmem:[#allocation2 + $0x118] sm:$0x1] }
 0x421   : > { %v11353_v17 = vld [vmem:[#allocation2 + $0x38] sm:$0x1]  ;;  %v5175_v12 = vrot.slane %v5173_v11, 1  ;;  %v5214_v11 = vshrl.u32 %v11189_v26, 16 }
 0x422   : > { %v11355_v32 = vor.u32 %v5146_v54, %v5142_v53  ;;  %v5161_v16 = vshll.u32 %v11353_v17, 16 }
 0x423   : > { %v11339_v35 = vld [vmem:[#allocation2 + $0x8] sm:$0x1]  ;;  %v5176_v15 = vsel %vm2066_vm7, %v11377_v1, %v5175_v12  ;;  %v5228_v12 = vshll.u32 %v11201_v36, 16 }
 0x424   : > { %v5125_v39 = vshll.u32 %v11339_v35, 16  ;;  %v11343_v30 = vld [vmem:[#allocation2 + $0x28] sm:$0x1]  ;;  %v5163_v9 = vrot.slane %v5161_v16, 1 }
 0x425   : > { %v5149_v63 = vshll.u32 %v11343_v30, 16 }
 0x426   : > { %v5127_v41 = vrot.slane %v5125_v39, 1  ;;  %v5164_v46 = vsel %vm2066_vm7, %v11366_v14, %v5163_v9  ;;  %v11380_v39 = vld [vmem:[#allocation2 + $0x58] sm:$0x1]  ;;  %v11413_v9 = vld [vmem:[#allocation2 + $0x88] sm:$0x1] }
 0x427   : > { %v5151_v62 = vrot.slane %v5149_v63, 1  ;;  %v11392_v63 = vld [vmem:[#allocation2 + $0x68] sm:$0x1] }
 0x428   : > { %v5128_v21 = vsel %vm2066_vm7, %v5123_v22, %v5127_v41  ;;  %v5182_v22 = vrot.slane %v5180_v44, 1  ;;  %v11385_v41 = vld [vmem:[#allocation2 + $0x60] sm:$0xff]  ;;  %v11421_v44 = vld [vmem:[#allocation2 + $0x98] sm:$0x1] }
 0x429   : > { %6644 = vmatprep.mubr.bf16.mxu1 %v5128_v21  ;;  %v5152_v25 = vsel %vm2066_vm7, %v11355_v32, %v5151_v62  ;;  %v9704_v21 = vld [vmem:[#allocation5 + $0x140] sm:$0xff]   ;;  %v5190_v53 = vshrl.u32 %v11385_v41, 16  ;;  %v5197_v62 = vshll.u32 %v11392_v63, 16 }
 0x42a   : > { %6645 = vmatmul.mubr.bf16.vlgmr.msra.gmra.mrb[28].mxu1 %v4961_v28  ;;  %v9695_v28 = vld [vmem:[#allocation5 + $0x98] sm:$0xff]   ;;  %v11389_v8 = vor.u32 %v5182_v22, %v5178_v4  ;;  %v5230_v4 = vrot.slane %v5228_v12, 1  ;;  %v5276_v12 = vshll.u32 %v11249_v18, 16 }
 0x42b   : > { %8541 = vmatpush3.bf16.msra.mxu1 %v9689_v31  ;;  %6652 = vmatprep.mubr.bf16.mxu1 %v5140_v10  ;;  %v5185_v31 = vshll.u32 %v11380_v39, 16 }
 0x42c   : > { %8542 = vmatprep.subr.bf16.mxu1 %v9690_v51  ;;  %v5192_v51 = vshll.u32 %v11385_v41, 16 }
 0x42d   : > { %v5187_v10 = vrot.slane %v5185_v31, 1  ;;  %v5226_v31 = vshrl.u32 %v11201_v36, 16 }
 0x42e   : > { %v5194_v54 = vrot.slane %v5192_v51, 1  ;;  %v11432_v51 = vld [vmem:[#allocation2 + $0xa8] sm:$0x1] }
 0x42f   : > { %8543 = vmatpush3.bf16.msra.mxu1 %v9691_v38  ;;  %v5188_v38 = vsel %vm2066_vm7, %v11389_v8, %v5187_v10  ;;  %v5231_v60 = vor.u32 %v5230_v4, %v5226_v31  ;;  %v5240_v10 = vshll.u32 %v11213_v42, 16  ;;  %v11460_v4 = vld [vmem:[#allocation2 + $0xe8] sm:$0x1] }
 0x430   : > { %8544 = vmatprep.subr.bf16.mxu1 %v9692_v19  ;;  %v11397_v19 = vld [vmem:[#allocation2 + $0x70] sm:$0xff] }
 0x431   : > { %v5204_v43 = vshll.u32 %v11397_v19, 16  ;;  %v5202_v47 = vshrl.u32 %v11397_v19, 16 }
 0x432   : > { %6653 = vmatmul.mubr.bf16.gmra.mrb[32].mxu1 %v11309_v49 }
 0x433   : > { %6660 = vmatprep.mubr.bf16.mxu1 %v5152_v25  ;;  %8545 = vmatpush3.bf16.msra.mxu1 %v9693_v50  ;;  %v11401_v50 = vor.u32 %v5194_v54, %v5190_v53  ;;  %v11404_v25 = vld [vmem:[#allocation2 + $0x78] sm:$0x1]  ;;  %v5242_v54 = vrot.slane %v5240_v10, 1  ;;  %v5238_v53 = vshrl.u32 %v11213_v42, 16 }
 0x434   : > { %8546 = vmatprep.subr.bf16.mxu1 %v9694_v55  ;;  %v5199_v55 = vrot.slane %v5197_v62, 1 }
 0x436   : > { %v5200_v16 = vsel %vm2066_vm7, %v11401_v50, %v5199_v55  ;;  %v5243_v55 = vor.u32 %v5242_v54, %v5238_v53  ;;  %v11467_v54 = vld [vmem:[#allocation2 + $0xf8] sm:$0x1] }
 0x437   : > { %8547 = vmatpush3.bf16.msra.mxu1 %v9695_v28  ;;  %v5206_v28 = vrot.slane %v5204_v43, 1  ;;  %v11439_v43 = vld [vmem:[#allocation2 + $0xb8] sm:$0x1] }
 0x438   : > { %8548 = vmatprep.subr.bf16.mxu1 %v9696_v13  ;;  %v5209_v13 = vshll.u32 %v11404_v25, 16 }
 0x439   : > { %v11411_v33 = vor.u32 %v5206_v28, %v5202_v47 }
 0x43a   : > { %6661 = vmatmul.mubr.bf16.gmra.mrb[36].mxu1 %v11332_v34  ;;  %v5211_v5 = vrot.slane %v5209_v13, 1  ;;  %v5250_v13 = vshrl.u32 %v11225_v7, 16 }
 0x43b   : > { %6668 = vmatprep.mubr.bf16.mxu1 %v5164_v46  ;;  %8549 = vmatpush3.bf16.msra.mxu1 %v9697_v3  ;;  %v5216_v3 = vshll.u32 %v11189_v26, 16  ;;  %v5221_v46 = vshll.u32 %v11413_v9, 16 }
 0x43c   : > { %8550 = vmatprep.subr.bf16.mxu1 %v9698_v0  ;;  %v5212_v0 = vsel %vm2066_vm7, %v11411_v33, %v5211_v5 }
 0x43d   : > { %v5218_v6 = vrot.slane %v5216_v3, 1  ;;  %v11446_v3 = vld [vmem:[#allocation2 + $0xc8] sm:$0x1] }
 0x43f   : > { %8551 = vmatpush3.bf16.msra.mxu1 %v9699_v58  ;;  %v4967_v58 = vld [vmem:[#allocation2 + $0x110] sm:$0xff] }
 0x440   : > { %8552 = vmatprep.subr.bf16.mxu1 %v9700_v20  ;;  %v5223_v20 = vrot.slane %v5221_v46, 1  ;;  %v5264_v46 = vshll.u32 %v11237_v40, 16 }
 0x442   : > { %6669 = vmatmul.mubr.bf16.gmra.mrb[40].mxu1 %v11327_v59 }
 0x443   : > { %6676 = vmatprep.mubr.bf16.mxu1 %v5176_v15  ;;  %8553 = vmatpush3.bf16.msra.mxu1 %v9701_v29  ;;  %v5219_v29 = vor.u32 %v5218_v6, %v5214_v11  ;;  %v4971_v15 = vsel %vm10049_vm3, 0, %v4970_v27  ;;  %v5262_v27 = vshrl.u32 %v11237_v40, 16 }
 0x444   : > { %8554 = vmatprep.subr.bf16.mxu1 %v9702_v45  ;;  %v4968_v45 = vsel %vm10099_vm6, 0, %v4967_v58  ;;  %4972 = vst [vmem:[#allocation2 + $0x118] sm:$0x1] %v4971_v15  ;;  %v5266_v58 = vrot.slane %v5264_v46, 1  ;;  %v5278_v15 = vrot.slane %v5276_v12, 1  ;;  %v9705_v46 = vld [vmem:[#allocation5 + $0x100] sm:$0xff]  }
 0x445   : > { %4969 = vst [vmem:[#allocation2 + $0x110] sm:$0xff] %v4968_v45  ;;  %v5224_v22 = vsel %vm2066_vm7, %v5219_v29, %v5223_v20  ;;  %v11453_v20 = vld [vmem:[#allocation2 + $0xd8] sm:$0x1]  ;;  %v5007_v12 = vld [vmem:[#allocation2 + $0x20] sm:$0xfe] }
 0x446   : > { %v5267_v29 = vor.u32 %v5266_v58, %v5262_v27  ;;  %v5006_v58 = vld [vmem:[#allocation2 + $0x10] sm:$0xfe] }
 0x447   : > { %8555 = vmatpush3.bf16.msra.mxu1 %v9703_v2  ;;  %v5233_v2 = vshll.u32 %v11421_v44, 16  ;;  %v9708_v27 = vld [vmem:[#allocation5 + $0x150] sm:$0xff]  }
 0x448   : > { %8652 = vmatprep.subr.bf16.mxu1 %v9704_v21 }
 0x449   : > { %v5235_v21 = vrot.slane %v5233_v2, 1 }
 0x44a   : > { %6677 = vmatmul.mubr.bf16.gmra.mrb[44].mxu1 %v11362_v24 }
 0x44b   : > { %6684 = vmatprep.mubr.bf16.mxu1 %v5188_v38  ;;  %v5236_v23 = vsel %vm2066_vm7, %v5231_v60, %v5235_v21  ;;  %v5245_v38 = vshll.u32 %v11432_v51, 16  ;;  %v5288_v21 = vshll.u32 %v11261_v57, 16 }
 0x44d   : > { %v5247_v62 = vrot.slane %v5245_v38, 1  ;;  %v5290_v10 = vrot.slane %v5288_v21, 1  ;;  %v9715_v21 = vld [vmem:[#allocation5 + $0x128] sm:$0xff]  }
 0x44f   : > { %v5248_v28 = vsel %vm2066_vm7, %v5243_v55, %v5247_v62  ;;  %v5300_v62 = vshll.u32 %v11273_v52, 16 }
 0x452   : > { %6685 = vmatmul.mubr.bf16.gmra.mrb[48].mxu1 %v11373_v37 }
 0x453   : > { %6692 = vmatprep.mubr.bf16.mxu1 %v5200_v16  ;;  %v5252_v16 = vshll.u32 %v11225_v7, 16 }
 0x455   : > { %v5254_v47 = vrot.slane %v5252_v16, 1  ;;  %v5302_v16 = vrot.slane %v5300_v62, 1 }
 0x45a   : > { %6693 = vmatmul.mubr.bf16.gmra.mrb[52].mxu1 %v11385_v41 }
 0x45b   : > { %6700 = vmatprep.mubr.bf16.mxu1 %v5212_v0  ;;  %v5255_v0 = vor.u32 %v5254_v47, %v5250_v13 }
 0x462   : > { %6701 = vmatmul.mubr.bf16.gmra.mrb[56].mxu1 %v11397_v19 }
 0x463   : > { %6708 = vmatprep.mubr.bf16.mxu1 %v5224_v22  ;;  %v5274_v22 = vshrl.u32 %v11249_v18, 16 }
 0x465   : > { %v5279_v31 = vor.u32 %v5278_v15, %v5274_v22  ;;  %v5364_v15 = vrot.slane %v11343_v30, 1  ;;  %v9713_v22 = vld [vmem:[#allocation5 + $0x120] sm:$0xff]   ;;  %v9718_v30 = vld [vmem:[#allocation5 + $0x178] sm:$0xff]  }
 0x46a   : > { %6709 = vmatmul.mubr.bf16.gmra.mrb[60].mxu1 %v11189_v26  ;;  %v5257_v26 = vshll.u32 %v11439_v43, 16 }
 0x46b   : > { %6716 = vmatprep.mubr.bf16.mxu1 %v5236_v23  ;;  %v5286_v23 = vshrl.u32 %v11261_v57, 16 }
 0x46c   : > { %v5259_v5 = vrot.slane %v5257_v26, 1 }
 0x46d   : > { %v5291_v53 = vor.u32 %v5290_v10, %v5286_v23  ;;  %v9717_v10 = vld [vmem:[#allocation5 + $0x130] sm:$0xff]  }
 0x46e   : > { %v5260_v6 = vsel %vm2066_vm7, %v5255_v0, %v5259_v5  ;;  %v5358_v5 = vrot.slane %v11339_v35, 1  ;;  %v9710_v35 = vld [vmem:[#allocation5 + $0x158] sm:$0xff]  }
 0x472   : > { %6717 = vmatmul.mubr.bf16.gmra.mrb[64].mxu1 %v11201_v36  ;;  %v5269_v36 = vshll.u32 %v11446_v3, 16 }
 0x473   : > { %6724 = vmatprep.mubr.bf16.mxu1 %v5248_v28  ;;  %v5298_v28 = vshrl.u32 %v11273_v52, 16 }
 0x474   : > { %v5271_v11 = vrot.slane %v5269_v36, 1 }
 0x475   : > { %v5303_v47 = vor.u32 %v5302_v16, %v5298_v28  ;;  %v5373_v28 = vrot.slane %v11380_v39, 1  ;;  %v5379_v39 = vrot.slane %v11404_v25, 1 }
 0x476   : > { %v5272_v45 = vsel %vm2066_vm7, %v5267_v29, %v5271_v11  ;;  %v5360_v11 = vrot.slane %v5006_v58, 1  ;;  %v11508_v58 = vld [vmem:[#allocation2 + $0xa0] sm:$0xff] }
 0x47a   : > { %6725 = vmatmul.mubr.bf16.gmra.mrb[68].mxu1 %v11213_v42  ;;  %v5281_v42 = vshll.u32 %v11453_v20, 16 }
 0x47b   : > { %6732 = vmatprep.mubr.bf16.mxu1 %v5260_v6  ;;  %v9706_v6 = vld [vmem:[#allocation5 + $0x148] sm:$0xff]  }
 0x47c   : > { %v5283_v2 = vrot.slane %v5281_v42, 1  ;;  %v5363_v42 = vrot.slane %v5007_v12, 1  ;;  %v11518_v12 = vld [vmem:[#allocation2 + $0xc0] sm:$0xff] }
 0x47e   : > { %v5284_v60 = vsel %vm2066_vm7, %v5279_v31, %v5283_v2  ;;  %v5365_v2 = vsel %vm2337_vm8, %v5363_v42, %v5364_v15  ;;  %v5008_v31 = vld [vmem:[#allocation2 + $0x30] sm:$0xfe] }
 0x482   : > { %6733 = vmatmul.mubr.bf16.gmra.mrb[72].mxu1 %v11225_v7  ;;  %v5293_v7 = vshll.u32 %v11460_v4, 16 }
 0x483   : > { %6740 = vmatprep.mubr.bf16.mxu1 %v5272_v45  ;;  %v9711_v45 = vld [vmem:[#allocation5 + $0x118] sm:$0xff]  }
 0x484   : > { %v5295_v38 = vrot.slane %v5293_v7, 1  ;;  %v5367_v7 = vrot.slane %v11353_v17, 1 }
 0x486   : > { %v5296_v55 = vsel %vm2066_vm7, %v5291_v53, %v5295_v38  ;;  %v5009_v38 = vld [vmem:[#allocation2 + $0x40] sm:$0xfe]  ;;  %v9719_v53 = vld [vmem:[#allocation5 + $0x138] sm:$0xff]  }
 0x487   : > { %v5369_v62 = vrot.slane %v5009_v38, 1  ;;  %v5394_v38 = vrot.slane %v11446_v3, 1 }
 0x48a   : > { %6741 = vmatmul.mubr.bf16.gmra.mrb[76].mxu1 %v11237_v40  ;;  %v5305_v40 = vshll.u32 %v11467_v54, 16 }
 0x48b   : > { %6748 = vmatprep.mubr.bf16.mxu1 %v5284_v60  ;;  %v5366_v60 = vrot.slane %v5008_v31, 1 }
 0x48c   : > { %v5307_v26 = vrot.slane %v5305_v40, 1  ;;  %v5010_v40 = vld [vmem:[#allocation2 + $0x50] sm:$0xfe] }
 0x48d   : > { %v5368_v23 = vsel %vm2337_vm8, %v5366_v60, %v5367_v7  ;;  %v5372_v16 = vrot.slane %v5010_v40, 1 }
 0x48e   : > { %v5308_v13 = vsel %vm2066_vm7, %v5303_v47, %v5307_v26  ;;  %v5011_v26 = vld [vmem:[#allocation2 + $0x60] sm:$0xfe] }
 0x48f   : > { %v5375_v47 = vrot.slane %v5011_v26, 1  ;;  %v5397_v26 = vrot.slane %v11453_v20, 1 }
 0x492   : > { %6749 = vmatmul.mubr.bf16.gmra.mrb[80].mxu1 %v11249_v18  ;;  %v5005_v18 = vld [vmem:[#allocation2] sm:$0xfe] }
 0x493   : > { %6756 = vmatprep.mubr.bf16.mxu1 %v5296_v55  ;;  %v5357_v0 = vrot.slane %v5005_v18, 1  ;;  %v5370_v55 = vrot.slane %v11368_v61, 1  ;;  %v5376_v61 = vrot.slane %v11392_v63, 1  ;;  %v11498_v18 = vld [vmem:[#allocation2 + $0x80] sm:$0xff] }
 0x495   : > { %v5359_v36 = vsel %vm2337_vm8, %v5357_v0, %v5358_v5  ;;  %v5371_v17 = vsel %vm2337_vm8, %v5369_v62, %v5370_v55  ;;  %v5012_v5 = vld [vmem:[#allocation2 + $0x70] sm:$0xfe]  ;;  %v11536_v62 = vld [vmem:[#allocation2 + $0xe0] sm:$0xff] }
 0x496   : > { %v5018_v55 = vld [vmem:[#allocation2 + $0xd0] sm:$0xfe] }
 0x497   : > { %v5396_v40 = vrot.slane %v5018_v55, 1  ;;  %v9721_v55 = vld [vmem:[#allocation5 + $0x180] sm:$0xff]  }
 0x49a   : > { %6757 = vmatmul.mubr.bf16.gmra.mrb[84].mxu1 %v11261_v57  ;;  %v9707_v57 = vld [vmem:[#allocation5 + $0x108] sm:$0xff]  }
 0x49b   : > { %6764 = vmatprep.mubr.bf16.mxu1 %v5308_v13  ;;  %v5377_v13 = vsel %vm2337_vm8, %v5375_v47, %v5376_v61  ;;  %v5398_v61 = vsel %vm2337_vm8, %v5396_v40, %v5397_v26 }
 0x4a2   : > { %6765 = vmatmul.mubr.bf16.gmra.mrb[88].mxu1 %v11273_v52  ;;  %v5361_v52 = vrot.slane %v11335_v56, 1  ;;  %v9714_v56 = vld [vmem:[#allocation5 + $0x168] sm:$0xff]  }
 0x4a3   : > { %6805 = vmatprep.mubr.bf16.mxu1 %v11309_v49  ;;  %v9709_v49 = vld [vmem:[#allocation5 + $0x110] sm:$0xff]  }
 0x4a4   : > { %v5362_v29 = vsel %vm2337_vm8, %v5360_v11, %v5361_v52  ;;  %v11513_v52 = vld [vmem:[#allocation2 + $0xb0] sm:$0xff] }
 0x4aa   : > { %6806 = vmatmul.mubr.bf16.vlgmr.msra.gmra.mrb[92].mxu1 %v5359_v36 }
 0x4ab   : > { %8653 = vmatpush3.bf16.msra.mxu1 %v9705_v46  ;;  %6813 = vmatprep.mubr.bf16.mxu1 %v11332_v34  ;;  %v9712_v34 = vld [vmem:[#allocation5 + $0x160] sm:$0xff]   ;;  %v11503_v46 = vld [vmem:[#allocation2 + $0x90] sm:$0xff] }
 0x4ac   : > { %8654 = vmatprep.subr.bf16.mxu1 %v9706_v6  ;;  %v5382_v6 = vrot.slane %v11413_v9, 1 }
 0x4af   : > { %8655 = vmatpush3.bf16.msra.mxu1 %v9707_v57  ;;  %v5014_v57 = vld [vmem:[#allocation2 + $0x90] sm:$0xfe] }
 0x4b0   : > { %8656 = vmatprep.subr.bf16.mxu1 %v9708_v27  ;;  %v5384_v25 = vrot.slane %v5014_v57, 1  ;;  %v5385_v27 = vrot.slane %v11421_v44, 1 }
 0x4b2   : > { %6814 = vmatmul.mubr.bf16.gmra.mrb[96].mxu1 %v5362_v29  ;;  %v5386_v11 = vsel %vm2337_vm8, %v5384_v25, %v5385_v27  ;;  %v11554_v25 = vld [vmem:[#allocation2 + $0x100] sm:$0xff]  ;;  %v5020_v27 = vld [vmem:[#allocation2 + $0xf0] sm:$0xfe] }
 0x4b3   : > { %6821 = vmatprep.mubr.bf16.mxu1 %v11327_v59  ;;  %8657 = vmatpush3.bf16.msra.mxu1 %v9709_v49  ;;  %v9716_v59 = vld [vmem:[#allocation5 + $0x170] sm:$0xff]   ;;  %v5015_v49 = vld [vmem:[#allocation2 + $0xa0] sm:$0xfe] }
 0x4b4   : > { %8658 = vmatprep.subr.bf16.mxu1 %v9710_v35  ;;  %v5387_v9 = vrot.slane %v5015_v49, 1  ;;  %v5388_v35 = vrot.slane %v11432_v51, 1 }
 0x4b6   : > { %v5389_v29 = vsel %vm2337_vm8, %v5387_v9, %v5388_v35  ;;  %v5402_v9 = vrot.slane %v5020_v27, 1  ;;  %v5037_v35 = vld [vmem:[#allocation2 + $0x18] sm:$0x1] }
 0x4b7   : > { %8659 = vmatpush3.bf16.msra.mxu1 %v9711_v45  ;;  %v5016_v45 = vld [vmem:[#allocation2 + $0xb0] sm:$0xfe] }
 0x4b8   : > { %8660 = vmatprep.subr.bf16.mxu1 %v9712_v34  ;;  %v5390_v34 = vrot.slane %v5016_v45, 1 }
 0x4ba   : > { %6822 = vmatmul.mubr.bf16.gmra.mrb[100].mxu1 %v5365_v2 }
 0x4bb   : > { %6829 = vmatprep.mubr.bf16.mxu1 %v11362_v24  ;;  %8661 = vmatpush3.bf16.msra.mxu1 %v9713_v22  ;;  %v9720_v24 = vld [vmem:[#allocation5 + $0x1c0] sm:$0xff]  }
 0x4bc   : > { %8662 = vmatprep.subr.bf16.mxu1 %v9714_v56  ;;  %v5391_v56 = vrot.slane %v11439_v43, 1 }
 0x4be   : > { %v5392_v51 = vsel %vm2337_vm8, %v5390_v34, %v5391_v56  ;;  %v5403_v34 = vrot.slane %v11467_v54, 1 }
 0x4bf   : > { %8663 = vmatpush3.bf16.msra.mxu1 %v9715_v21  ;;  %v11527_v21 = vld [vmem:[#allocation2 + $0xd0] sm:$0xff] }
 0x4c0   : > { %8664 = vmatprep.subr.bf16.mxu1 %v9716_v59  ;;  %v5017_v59 = vld [vmem:[#allocation2 + $0xc0] sm:$0xfe] }
 0x4c1   : > { %v5393_v7 = vrot.slane %v5017_v59, 1 }
 0x4c2   : > { %6830 = vmatmul.mubr.bf16.gmra.mrb[104].mxu1 %v5368_v23 }
 0x4c3   : > { %6837 = vmatprep.mubr.bf16.mxu1 %v11373_v37  ;;  %8665 = vmatpush3.bf16.msra.mxu1 %v9717_v10  ;;  %v5374_v37 = vsel %vm2337_vm8, %v5372_v16, %v5373_v28 }
 0x4c4   : > { %8666 = vmatprep.subr.bf16.mxu1 %v9718_v30 }
 0x4c7   : > { %8667 = vmatpush3.bf16.msra.mxu1 %v9719_v53 }
 0x4c8   : > { %8764 = vmatprep.subr.bf16.mxu1 %v9720_v24  ;;  %v5395_v24 = vsel %vm2337_vm8, %v5393_v7, %v5394_v38 }
 0x4ca   : > { %6838 = vmatmul.mubr.bf16.gmra.mrb[108].mxu1 %v5371_v17 }
 0x4cb   : > { %6845 = vmatprep.mubr.bf16.mxu1 %v11385_v41  ;;  %v5378_v41 = vrot.slane %v5012_v5, 1  ;;  %v5019_v5 = vld [vmem:[#allocation2 + $0xe0] sm:$0xfe] }
 0x4cd   : > { %v5380_v0 = vsel %vm2337_vm8, %v5378_v41, %v5379_v39  ;;  %v5399_v39 = vrot.slane %v5019_v5, 1  ;;  %v5055_v5 = vld [vmem:[#allocation2 + $0x30] sm:$0xfe] }
 0x4d2   : > { %6846 = vmatmul.mubr.bf16.gmra.mrb[112].mxu1 %v5374_v37 }
 0x4d3   : > { %6853 = vmatprep.mubr.bf16.mxu1 %v11397_v19  ;;  %v5013_v19 = vld [vmem:[#allocation2 + $0x80] sm:$0xfe] }
 0x4d4   : > { %v5381_v63 = vrot.slane %v5013_v19, 1 }
 0x4d6   : > { %v5383_v36 = vsel %vm2337_vm8, %v5381_v63, %v5382_v6  ;;  %v5400_v6 = vrot.slane %v11460_v4, 1 }
 0x4d8   : > { %v5401_v57 = vsel %vm2337_vm8, %v5399_v39, %v5400_v6  ;;  %v9724_v39 = vld [vmem:[#allocation5 + $0x1d0] sm:$0xff]   ;;  %v5039_v6 = vld [vmem:[#allocation2 + $0x38] sm:$0x1] }
 0x4da   : > { %6854 = vmatmul.mubr.bf16.gmra.mrb[116].mxu1 %v5377_v13  ;;  %v11545_v13 = vld [vmem:[#allocation2 + $0xf0] sm:$0xff] }
 0x4db   : > { %6861 = vmatprep.mubr.bf16.mxu1 %v11498_v18 }
 0x4e2   : > { %6862 = vmatmul.mubr.bf16.gmra.mrb[120].mxu1 %v5380_v0 }
 0x4e3   : > { %6869 = vmatprep.mubr.bf16.mxu1 %v11503_v46 }
 0x4ea   : > { %6870 = vmatmul.mubr.bf16.gmra.mrb[124].mxu1 %v5383_v36 }
 0x4eb   : > { %6877 = vmatprep.mubr.bf16.mxu1 %v11508_v58 }
 0x4f2   : > { %6878 = vmatmul.mubr.bf16.gmra.mrb[128].mxu1 %v5386_v11  ;;  %v5053_v11 = vld [vmem:[#allocation2 + $0x10] sm:$0xfe] }
 0x4f3   : > { %6885 = vmatprep.mubr.bf16.mxu1 %v11513_v52  ;;  %v5661_v45 = vrot.slane %v5053_v11, 1 }
 0x4fa   : > { %6886 = vmatmul.mubr.bf16.gmra.mrb[132].mxu1 %v5389_v29 }
 0x4fb   : > { %6893 = vmatprep.mubr.bf16.mxu1 %v11518_v12 }
 0x4fd   : > { %v8444_v44 = vpop.f32.mrb[28].mxu1 }
 0x4fe   : > { %v8445_v42 = vpop.f32.mrb[29].mxu1 }
 0x4ff   : > { %v11521_v15 = vadd.f32 %v8445_v42, %v8444_v44  ;;  %v8447_v22 = vpop.f32.mrb[30].mxu1 }
 0x500   : > { %v8448_v2 = vpop.f32.mrb[31].mxu1 }
 0x501   : > { %v11524_v31 = vadd.f32 %v8448_v2, %v8447_v22  ;;  %v5662_v22 = vrot.slane %v5037_v35, 1  ;;  %v5404_v2 = vsel %vm2337_vm8, %v5402_v9, %v5403_v34  ;;  %v5668_v9 = vrot.slane %v5039_v6, 1 }
 0x502   : > { %6894 = vmatmul.mubr.bf16.gmra.mrb[136].mxu1 %v5392_v51  ;;  %v5429_v51 = vshll.u32 %v5037_v35, 16  ;;  %v9726_v35 = vld [vmem:[#allocation5 + $0x1d8] sm:$0xff]  }
 0x503   : > { %6901 = vmatprep.mubr.bf16.mxu1 %v11527_v21  ;;  %v5663_v59 = vsel %vm2337_vm8, %v5661_v45, %v5662_v22  ;;  %v9727_v22 = vld [vmem:[#allocation5 + $0x198] sm:$0xff]  }
 0x504   : > { %v5431_v7 = vrot.slane %v5429_v51, 1 }
 0x505   : > { %v8450_v60 = vpop.f32.mrb[32].mxu1 }
 0x506   : > { %v8451_v10 = vpop.f32.mrb[33].mxu1  ;;  %v5432_v26 = vsel %vm2066_vm7, %v11346_v48, %v5431_v7  ;;  %v9725_v48 = vld [vmem:[#allocation5 + $0x190] sm:$0xff]  }
 0x507   : > { %v11530_v30 = vadd.f32 %v8451_v10, %v8450_v60  ;;  %v8453_v23 = vpop.f32.mrb[34].mxu1  ;;  %v5054_v60 = vld [vmem:[#allocation2 + $0x20] sm:$0xfe] }
 0x508   : > { %v8454_v43 = vpop.f32.mrb[35].mxu1 }
 0x509   : > { %v11533_v53 = vadd.f32 %v8454_v43, %v8453_v23  ;;  %v5038_v23 = vld [vmem:[#allocation2 + $0x28] sm:$0x1]  ;;  %v5664_v43 = vrot.slane %v5054_v60, 1 }
 0x50a   : > { %6902 = vmatmul.mubr.bf16.gmra.mrb[140].mxu1 %v5395_v24  ;;  %v5665_v40 = vrot.slane %v5038_v23, 1  ;;  %v5040_v60 = vld [vmem:[#allocation2 + $0x48] sm:$0x1] }
 0x50b   : > { %6909 = vmatprep.mubr.bf16.mxu1 %v11536_v62 }
 0x50d   : > { %v8456_v17 = vpop.f32.mrb[36].mxu1 }
 0x50e   : > { %v8457_v16 = vpop.f32.mrb[37].mxu1 }
 0x50f   : > { %v11539_v28 = vadd.f32 %v8457_v16, %v8456_v17  ;;  %v8459_v37 = vpop.f32.mrb[38].mxu1  ;;  %v9722_v16 = vld [vmem:[#allocation5 + $0x1c8] sm:$0xff]  }
 0x510   : > { %v8460_v3 = vpop.f32.mrb[39].mxu1 }
 0x511   : > { %v11542_v47 = vadd.f32 %v8460_v3, %v8459_v37  ;;  %v5441_v3 = vshll.u32 %v5038_v23, 16 }
 0x512   : > { %6910 = vmatmul.mubr.bf16.gmra.mrb[144].mxu1 %v5398_v61  ;;  %v5666_v61 = vsel %vm2337_vm8, %v5664_v43, %v5665_v40 }
 0x513   : > { %6917 = vmatprep.mubr.bf16.mxu1 %v11545_v13 }
 0x515   : > { %v8462_v41 = vpop.f32.mrb[40].mxu1 }
 0x516   : > { %v8463_v0 = vpop.f32.mrb[41].mxu1 }
 0x517   : > { %v11548_v19 = vadd.f32 %v8463_v0, %v8462_v41  ;;  %v8465_v63 = vpop.f32.mrb[42].mxu1  ;;  %v9723_v41 = vld [vmem:[#allocation5 + $0x188] sm:$0xff]  }
 0x518   : > { %v8466_v20 = vpop.f32.mrb[43].mxu1 }
 0x519   : > { %v11551_v36 = vadd.f32 %v8466_v20, %v8465_v63  ;;  %v5443_v63 = vrot.slane %v5441_v3, 1  ;;  %v5057_v3 = vld [vmem:[#allocation2 + $0x50] sm:$0xfe] }
 0x51a   : > { %6918 = vmatmul.mubr.bf16.gmra.mrb[148].mxu1 %v5401_v57  ;;  %v5667_v57 = vrot.slane %v5055_v5, 1  ;;  %v9732_v5 = vld [vmem:[#allocation5 + $0x1f0] sm:$0xff]  }
 0x51b   : > { %6925 = vmatprep.mubr.bf16.mxu1 %v11554_v25  ;;  %v5444_v45 = vsel %vm2066_vm7, %v11355_v32, %v5443_v63  ;;  %v9729_v32 = vld [vmem:[#allocation5 + $0x1a0] sm:$0xff]   ;;  %v5673_v63 = vrot.slane %v5057_v3, 1  ;;  %v5043_v3 = vld [vmem:[#allocation2 + $0x78] sm:$0x1] }
 0x51c   : > { %v5669_v34 = vsel %vm2337_vm8, %v5667_v57, %v5668_v9 }
 0x51d   : > { %v8468_v49 = vpop.f32.mrb[44].mxu1 }
 0x51e   : > { %v8469_v29 = vpop.f32.mrb[45].mxu1 }
 0x51f   : > { %v11557_v44 = vadd.f32 %v8469_v29, %v8468_v49  ;;  %v8471_v4 = vpop.f32.mrb[46].mxu1 }
 0x520   : > { %v8472_v42 = vpop.f32.mrb[47].mxu1 }
 0x521   : > { %v11560_v56 = vadd.f32 %v8472_v42, %v8471_v4  ;;  %v5453_v4 = vshll.u32 %v5039_v6, 16  ;;  %v5056_v42 = vld [vmem:[#allocation2 + $0x40] sm:$0xfe] }
 0x522   : > { %6926 = vmatmul.mubr.bf16.gmra.mrb[152].mxu1 %v5404_v2  ;;  %v9728_v2 = vld [vmem:[#allocation5 + $0x1e0] sm:$0xff]  }
 0x523   : > { %6966 = vmatprep.mubr.bf16.mxu1 %v5663_v59  ;;  %v5455_v59 = vrot.slane %v5453_v4, 1 }
 0x525   : > { %v8474_v10 = vpop.f32.mrb[48].mxu1  ;;  %v5456_v40 = vsel %vm2066_vm7, %v11366_v14, %v5455_v59  ;;  %v9733_v14 = vld [vmem:[#allocation5 + $0x1b0] sm:$0xff]  }
 0x526   : > { %v8475_v38 = vpop.f32.mrb[49].mxu1 }
 0x527   : > { %v11564_v24 = vadd.f32 %v8475_v38, %v8474_v10  ;;  %v8477_v54 = vpop.f32.mrb[50].mxu1  ;;  %v5670_v10 = vrot.slane %v5056_v42, 1  ;;  %v9735_v42 = vld [vmem:[#allocation5 + $0x1b8] sm:$0xff]  }
 0x528   : > { %v8478_v17 = vpop.f32.mrb[51].mxu1 }
 0x529   : > { %v11566_v37 = vadd.f32 %v8478_v17, %v8477_v54  ;;  %v5671_v54 = vrot.slane %v5040_v60, 1 }
 0x52a   : > { %6967 = vmatmul.mubr.bf16.vlgmr.msra.gmra.mrb[156].mxu1 %v5432_v26  ;;  %v5465_v26 = vshll.u32 %v5040_v60, 16 }
 0x52b   : > { %8765 = vmatpush3.bf16.msra.mxu1 %v9721_v55  ;;  %6974 = vmatprep.mubr.bf16.mxu1 %v5666_v61  ;;  %v9730_v55 = vld [vmem:[#allocation5 + $0x1e8] sm:$0xff]  }
 0x52c   : > { %8766 = vmatprep.subr.bf16.mxu1 %v9722_v16  ;;  %v5672_v16 = vsel %vm2337_vm8, %v5670_v10, %v5671_v54  ;;  %v9731_v61 = vld [vmem:[#allocation5 + $0x1a8] sm:$0xff]   ;;  %v5467_v57 = vrot.slane %v5465_v26, 1 }
 0x52d   : > { %v8480_v0 = vpop.f32.mrb[52].mxu1 }
 0x52e   : > { %v8481_v20 = vpop.f32.mrb[53].mxu1 }
 0x52f   : > { %v11571_v27 = vadd.f32 %v8481_v20, %v8480_v0  ;;  %v8483_v11 = vpop.f32.mrb[54].mxu1  ;;  %8767 = vmatpush3.bf16.msra.mxu1 %v9723_v41 }
 0x530   : > { %v8484_v49 = vpop.f32.mrb[55].mxu1  ;;  %8768 = vmatprep.subr.bf16.mxu1 %v9724_v39  ;;  %v5041_v39 = vld [vmem:[#allocation2 + $0x58] sm:$0x1] }
 0x531   : > { %v11573_v29 = vadd.f32 %v8484_v49, %v8483_v11  ;;  %v9734_v49 = vld [vmem:[#allocation5 + $0x1f8] sm:$0xff]   ;;  %v5477_v4 = vshll.u32 %v5041_v39, 16 }
 0x532   : > { %6975 = vmatmul.mubr.bf16.gmra.mrb[160].mxu1 %v5444_v45 }
 0x533   : > { %6982 = vmatprep.mubr.bf16.mxu1 %v5669_v34  ;;  %8769 = vmatpush3.bf16.msra.mxu1 %v9725_v48  ;;  %v5674_v48 = vrot.slane %v5041_v39, 1  ;;  %v5058_v34 = vld [vmem:[#allocation2 + $0x60] sm:$0xfe] }
 0x534   : > { %8770 = vmatprep.subr.bf16.mxu1 %v9726_v35  ;;  %v5468_v35 = vsel %vm2066_vm7, %v11377_v1, %v5467_v57  ;;  %v5676_v60 = vrot.slane %v5058_v34, 1 }
 0x535   : > { %v8486_v51 = vpop.f32.mrb[56].mxu1  ;;  %v5675_v45 = vsel %vm2337_vm8, %v5673_v63, %v5674_v48  ;;  %v5060_v48 = vld [vmem:[#allocation2 + $0x80] sm:$0xfe] }
 0x536   : > { %v8487_v7 = vpop.f32.mrb[57].mxu1  ;;  %v5682_v34 = vrot.slane %v5060_v48, 1  ;;  %v5518_v48 = vshrl.u32 %v11503_v46, 16 }
 0x537   : > { %v11578_v23 = vadd.f32 %v8487_v7, %v8486_v51  ;;  %v8489_v38 = vpop.f32.mrb[58].mxu1  ;;  %8771 = vmatpush3.bf16.msra.mxu1 %v9727_v22  ;;  %v11592_v22 = vld [vmem:[#allocation5 + $0x200] sm:$0xff]   ;;  %v5042_v51 = vld [vmem:[#allocation2 + $0x68] sm:$0x1] }
 0x538   : > { %v8490_v43 = vpop.f32.mrb[59].mxu1  ;;  %8772 = vmatprep.subr.bf16.mxu1 %v9728_v2 }
 0x539   : > { %v11580_v17 = vadd.f32 %v8490_v43, %v8489_v38  ;;  %v5479_v38 = vrot.slane %v5477_v4, 1 }
 0x53a   : > { %6983 = vmatmul.mubr.bf16.gmra.mrb[164].mxu1 %v5456_v40  ;;  %v5489_v40 = vshll.u32 %v5042_v51, 16 }
 0x53b   : > { %6990 = vmatprep.mubr.bf16.mxu1 %v5672_v16  ;;  %8773 = vmatpush3.bf16.msra.mxu1 %v9729_v32  ;;  %v5677_v32 = vrot.slane %v5042_v51, 1  ;;  %v5480_v54 = vsel %vm2066_vm7, %v11389_v8, %v5479_v38  ;;  %v5059_v16 = vld [vmem:[#allocation2 + $0x70] sm:$0xfe] }
 0x53c   : > { %8774 = vmatprep.subr.bf16.mxu1 %v9730_v55 }
 0x53d   : > { %v8492_v41 = vpop.f32.mrb[60].mxu1  ;;  %v5678_v55 = vsel %vm2337_vm8, %v5676_v60, %v5677_v32  ;;  %v5506_v32 = vshrl.u32 %v11498_v18, 16 }
 0x53e   : > { %v8493_v0 = vpop.f32.mrb[61].mxu1 }
 0x53f   : > { %v11585_v6 = vadd.f32 %v8493_v0, %v8492_v41  ;;  %v8495_v20 = vpop.f32.mrb[62].mxu1  ;;  %8775 = vmatpush3.bf16.msra.mxu1 %v9731_v61  ;;  %v5491_v0 = vrot.slane %v5489_v40, 1 }
 0x540   : > { %v8496_v11 = vpop.f32.mrb[63].mxu1  ;;  %8776 = vmatprep.subr.bf16.mxu1 %v9732_v5  ;;  %v5679_v5 = vrot.slane %v5059_v16, 1  ;;  %v5520_v16 = vshll.u32 %v11503_v46, 16 }
 0x541   : > { %v11587_v9 = vadd.f32 %v8496_v11, %v8495_v20  ;;  %v5680_v20 = vrot.slane %v5043_v3, 1  ;;  %v5492_v8 = vsel %vm2066_vm7, %v11401_v50, %v5491_v0  ;;  %v5501_v11 = vshll.u32 %v5043_v3, 16  ;;  %v5045_v3 = vld [vmem:[#allocation2 + $0x98] sm:$0x1] }
 0x542   : > { %6991 = vmatmul.mubr.bf16.gmra.mrb[168].mxu1 %v5468_v35 }
 0x543   : > { %6998 = vmatprep.mubr.bf16.mxu1 %v5675_v45  ;;  %8777 = vmatpush3.bf16.msra.mxu1 %v9733_v14  ;;  %v5681_v14 = vsel %vm2337_vm8, %v5679_v5, %v5680_v20  ;;  %v5044_v45 = vld [vmem:[#allocation2 + $0x88] sm:$0x1]  ;;  %v5503_v51 = vrot.slane %v5501_v11, 1  ;;  %v5686_v20 = vrot.slane %v5045_v3, 1 }
 0x544   : > { %8778 = vmatprep.subr.bf16.mxu1 %v9734_v49  ;;  %v5508_v49 = vshll.u32 %v11498_v18, 16  ;;  %v5683_v60 = vrot.slane %v5044_v45, 1 }
 0x545   : > { %v8498_v2 = vpop.f32.mrb[64].mxu1  ;;  %v5504_v38 = vsel %vm2066_vm7, %v11411_v33, %v5503_v51 }
 0x546   : > { %v8499_v59 = vpop.f32.mrb[65].mxu1 }
 0x547   : > { %v11594_v7 = vadd.f32 %v8499_v59, %v8498_v2  ;;  %v8501_v10 = vpop.f32.mrb[66].mxu1  ;;  %8779 = vmatpush3.bf16.msra.mxu1 %v9735_v42 }
 0x548   : > { %v8502_v1 = vpop.f32.mrb[67].mxu1  ;;  %8952 = vmatprep.subr.bf16.mxu1 %v11592_v22 }
 0x549   : > { %v11597_v43 = vadd.f32 %v8502_v1, %v8501_v10  ;;  %v5510_v10 = vrot.slane %v5508_v49, 1  ;;  %v5684_v1 = vsel %vm2337_vm8, %v5682_v34, %v5683_v60  ;;  %v5525_v49 = vshll.u32 %v5045_v3, 16  ;;  %v5063_v3 = vld [vmem:[#allocation2 + $0xb0] sm:$0xfe] }
 0x54a   : > { %6999 = vmatmul.mubr.bf16.gmra.mrb[172].mxu1 %v5480_v54  ;;  %v5513_v54 = vshll.u32 %v5044_v45, 16 }
 0x54b   : > { %7006 = vmatprep.mubr.bf16.mxu1 %v5678_v55  ;;  %v5061_v55 = vld [vmem:[#allocation2 + $0x90] sm:$0xfe]  ;;  %v5511_v40 = vor.u32 %v5510_v10, %v5506_v32 }
 0x54c   : > { %v5685_v5 = vrot.slane %v5061_v55, 1 }
 0x54d   : > { %v8504_v26 = vpop.f32.mrb[68].mxu1 }
 0x54e   : > { %v8505_v61 = vpop.f32.mrb[69].mxu1  ;;  %v5687_v11 = vsel %vm2337_vm8, %v5685_v5, %v5686_v20  ;;  %v5544_v5 = vshll.u32 %v11513_v52, 16  ;;  %v5691_v20 = vrot.slane %v5063_v3, 1 }
 0x54f   : > { %v11602_v41 = vadd.f32 %v8505_v61, %v8504_v26  ;;  %v8507_v39 = vpop.f32.mrb[70].mxu1 }
 0x550   : > { %v8508_v63 = vpop.f32.mrb[71].mxu1 }
 0x551   : > { %v11604_v57 = vadd.f32 %v8508_v63, %v8507_v39  ;;  %v5515_v63 = vrot.slane %v5513_v54, 1 }
 0x552   : > { %7007 = vmatmul.mubr.bf16.gmra.mrb[176].mxu1 %v5492_v8  ;;  %v5522_v8 = vrot.slane %v5520_v16, 1  ;;  %v5530_v16 = vshrl.u32 %v11508_v58, 16 }
 0x553   : > { %7014 = vmatprep.mubr.bf16.mxu1 %v5681_v14  ;;  %v5516_v18 = vsel %vm2066_vm7, %v5511_v40, %v5515_v63  ;;  %v5047_v63 = vld [vmem:[#allocation2 + $0xb8] sm:$0x1] }
 0x554   : > { %v5523_v45 = vor.u32 %v5522_v8, %v5518_v48 }
 0x555   : > { %v8510_v35 = vpop.f32.mrb[72].mxu1 }
 0x556   : > { %v8511_v4 = vpop.f32.mrb[73].mxu1 }
 0x557   : > { %v11610_v42 = vadd.f32 %v8511_v4, %v8510_v35  ;;  %v8513_v2 = vpop.f32.mrb[74].mxu1  ;;  %v5062_v35 = vld [vmem:[#allocation2 + $0xa0] sm:$0xfe]  ;;  %v5532_v4 = vshll.u32 %v11508_v58, 16 }
 0x558   : > { %v8514_v59 = vpop.f32.mrb[75].mxu1 }
 0x559   : > { %v11612_v50 = vadd.f32 %v8514_v59, %v8513_v2  ;;  %v5046_v2 = vld [vmem:[#allocation2 + $0xa8] sm:$0x1]  ;;  %v5688_v59 = vrot.slane %v5062_v35, 1  ;;  %v5534_v54 = vrot.slane %v5532_v4, 1  ;;  %v5546_v35 = vrot.slane %v5544_v5, 1 }
 0x55a   : > { %7015 = vmatmul.mubr.bf16.gmra.mrb[180].mxu1 %v5504_v38  ;;  %v5527_v38 = vrot.slane %v5525_v49, 1  ;;  %v5689_v32 = vrot.slane %v5046_v2, 1  ;;  %v5692_v49 = vrot.slane %v5047_v63, 1 }
 0x55b   : > { %7022 = vmatprep.mubr.bf16.mxu1 %v5684_v1 }
 0x55c   : > { %v5528_v46 = vsel %vm2066_vm7, %v5523_v45, %v5527_v38  ;;  %v5690_v40 = vsel %vm2337_vm8, %v5688_v59, %v5689_v32  ;;  %v5693_v4 = vsel %vm2337_vm8, %v5691_v20, %v5692_v49  ;;  %v5065_v20 = vld [vmem:[#allocation2 + $0xd0] sm:$0xfe] }
 0x55d   : > { %v8516_v26 = vpop.f32.mrb[76].mxu1 }
 0x55e   : > { %v8517_v61 = vpop.f32.mrb[77].mxu1 }
 0x55f   : > { %v11619_v39 = vadd.f32 %v8517_v61, %v8516_v26  ;;  %v8519_v0 = vpop.f32.mrb[78].mxu1  ;;  %v5537_v26 = vshll.u32 %v5046_v2, 16  ;;  %v5535_v61 = vor.u32 %v5534_v54, %v5530_v16  ;;  %v5549_v2 = vshll.u32 %v5047_v63, 16 }
 0x560   : > { %v8520_v33 = vpop.f32.mrb[79].mxu1  ;;  %v5554_v63 = vshrl.u32 %v11518_v12, 16 }
 0x561   : > { %v11621_v14 = vadd.f32 %v8520_v33, %v8519_v0  ;;  %v5551_v16 = vrot.slane %v5549_v2, 1 }
 0x562   : > { %7023 = vmatmul.mubr.bf16.gmra.mrb[184].mxu1 %v5516_v18 }
 0x563   : > { %7030 = vmatprep.mubr.bf16.mxu1 %v5687_v11  ;;  %v5539_v11 = vrot.slane %v5537_v26, 1 }
 0x565   : > { %v8522_v34 = vpop.f32.mrb[80].mxu1  ;;  %v5540_v58 = vsel %vm2066_vm7, %v5535_v61, %v5539_v11  ;;  %v11654_v11 = vld [vmem:[%s12224_s8] ss:$0 sm:$0xff] }
 0x566   : > { %v8523_v51 = vpop.f32.mrb[81].mxu1 }
 0x567   : > { %v11627_v60 = vadd.f32 %v8523_v51, %v8522_v34  ;;  %v8525_v10 = vpop.f32.mrb[82].mxu1  ;;  %v5542_v34 = vshrl.u32 %v11513_v52, 16  ;;  %v5064_v51 = vld [vmem:[#allocation2 + $0xc0] sm:$0xfe] }
 0x568   : > { %v8526_v1 = vpop.f32.mrb[83].mxu1  ;;  %v5694_v54 = vrot.slane %v5064_v51, 1 }
 0x569   : > { %v11629_v55 = vadd.f32 %v8526_v1, %v8525_v10  ;;  %v5547_v59 = vor.u32 %v5546_v35, %v5542_v34  ;;  %v5556_v10 = vshll.u32 %v11518_v12, 16  ;;  %v5048_v1 = vld [vmem:[#allocation2 + $0xc8] sm:$0x1]  ;;  %v5049_v35 = vld [vmem:[#allocation2 + $0xd8] sm:$0x1]  ;;  %v6647_v34 = vadd.f32 %v11521_v15, %v11654_v11 }
 0x56a   : > { %7031 = vmatmul.mubr.bf16.gmra.mrb[188].mxu1 %v5528_v46  ;;  %v5695_v3 = vrot.slane %v5048_v1, 1  ;;  %v5573_v15 = vshll.u32 %v5049_v35, 16 }
 0x56b   : > { %7038 = vmatprep.mubr.bf16.mxu1 %v5690_v40  ;;  %v5558_v61 = vrot.slane %v5556_v10, 1  ;;  %v5552_v52 = vsel %vm2066_vm7, %v5547_v59, %v5551_v16  ;;  %v5566_v16 = vshrl.u32 %v11527_v21, 16 }
 0x56d   : > { %v8528_v0 = vpop.f32.mrb[84].mxu1 }
 0x56e   : > { %v8529_v33 = vpop.f32.mrb[85].mxu1 }
 0x56f   : > { %v11635_v8 = vadd.f32 %v8529_v33, %v8528_v0  ;;  %v8531_v18 = vpop.f32.mrb[86].mxu1  ;;  %v5696_v0 = vsel %vm2337_vm8, %v5694_v54, %v5695_v3  ;;  %v5561_v33 = vshll.u32 %v5048_v1, 16 }
 0x570   : > { %v8532_v48 = vpop.f32.mrb[87].mxu1 }
 0x571   : > { %v11637_v45 = vadd.f32 %v8532_v48, %v8531_v18  ;;  %v5568_v18 = vshll.u32 %v11527_v21, 16  ;;  %v5559_v48 = vor.u32 %v5558_v61, %v5554_v63  ;;  %v5563_v51 = vrot.slane %v5561_v33, 1  ;;  %v5066_v61 = vld [vmem:[#allocation2 + $0xe0] sm:$0xfe]  ;;  %v5050_v33 = vld [vmem:[#allocation2 + $0xe8] sm:$0x1] }
 0x572   : > { %7039 = vmatmul.mubr.bf16.gmra.mrb[192].mxu1 %v5540_v58 }
 0x573   : > { %7046 = vmatprep.mubr.bf16.mxu1 %v5693_v4  ;;  %v5697_v4 = vrot.slane %v5065_v20, 1  ;;  %v5570_v59 = vrot.slane %v5568_v18, 1  ;;  %v5700_v18 = vrot.slane %v5066_v61, 1 }
 0x575   : > { %v8534_v38 = vpop.f32.mrb[88].mxu1 }
 0x576   : > { %v8535_v32 = vpop.f32.mrb[89].mxu1 }
 0x577   : > { %v11643_v46 = vadd.f32 %v8535_v32, %v8534_v38  ;;  %v8537_v40 = vpop.f32.mrb[90].mxu1  ;;  %v5698_v38 = vrot.slane %v5049_v35, 1  ;;  %v6650_v32 = vadd.f32 %v11524_v31, %v11654_v11  ;;  %v5575_v31 = vrot.slane %v5573_v15, 1 }
 0x578   : > { %v8538_v26 = vpop.f32.mrb[91].mxu1 }
 0x579   : > { %v11645_v5 = vadd.f32 %v8538_v26, %v8537_v40  ;;  %v5564_v40 = vsel %vm2066_vm7, %v5559_v48, %v5563_v51  ;;  %v5699_v26 = vsel %vm2337_vm8, %v5697_v4, %v5698_v38  ;;  %v6655_v48 = vadd.f32 %v11530_v30, %v11654_v11 }
 0x57a   : > { %7047 = vmatmul.mubr.bf16.gmra.mrb[196].mxu1 %v5552_v52  ;;  %v5571_v52 = vor.u32 %v5570_v59, %v5566_v16  ;;  %v5701_v4 = vrot.slane %v5050_v33, 1  ;;  %v5585_v30 = vshll.u32 %v5050_v33, 16  ;;  %v6666_v33 = vadd.f32 %v11542_v47, %v11654_v11  ;;  %v5052_v47 = vld [vmem:[#allocation2 + $0x108] sm:$0x1] }
 0x57b   : > { %7054 = vmatprep.mubr.bf16.mxu1 %v5696_v0  ;;  %v5580_v0 = vshll.u32 %v11536_v62, 16 }
 0x57c   : > { %v5576_v35 = vsel %vm2066_vm7, %v5571_v52, %v5575_v31  ;;  %v5702_v59 = vsel %vm2337_vm8, %v5700_v18, %v5701_v4  ;;  %v5068_v4 = vld [vmem:[#allocation2 + $0x100] sm:$0xfe] }
 0x57d   : > { %v8556_v49 = vpop.f32.mrb[92].mxu1 }
 0x57e   : > { %v8557_v58 = vpop.f32.mrb[93].mxu1 }
 0x57f   : > { %v8558_v2 = vadd.f32 %v8557_v58, %v8556_v49  ;;  %v8559_v12 = vpop.f32.mrb[94].mxu1 }
 0x580   : > { %v8560_v10 = vpop.f32.mrb[95].mxu1 }
 0x581   : > { %v11658_v1 = vadd.f32 %v8558_v2, %v6647_v34  ;;  %v8561_v54 = vadd.f32 %v8560_v10, %v8559_v12  ;;  %v5582_v34 = vrot.slane %v5580_v0, 1  ;;  %v6658_v12 = vadd.f32 %v11533_v53, %v11654_v11 }
 0x582   : > { %7055 = vmatmul.mubr.bf16.gmra.mrb[200].mxu1 %v5564_v40  ;;  %v5578_v10 = vshrl.u32 %v11536_v62, 16  ;;  %v6663_v53 = vadd.f32 %v11539_v28, %v11654_v11 }
 0x583   : > { %v11665_v3 = vadd.f32 %v8561_v54, %v6650_v32  ;;  %7062 = vmatprep.mubr.bf16.mxu1 %v5699_v26  ;;  %v5067_v32 = vld [vmem:[#allocation2 + $0xf0] sm:$0xfe]  ;;  %v5592_v54 = vshll.u32 %v11545_v13, 16  ;;  %v5051_v26 = vld [vmem:[#allocation2 + $0xf8] sm:$0x1] }
 0x584   : > { %v5583_v40 = vor.u32 %v5582_v34, %v5578_v10  ;;  %v5703_v61 = vrot.slane %v5067_v32, 1  ;;  %v5704_v31 = vrot.slane %v5051_v26, 1  ;;  %v5597_v28 = vshll.u32 %v5051_v26, 16  ;;  %v11691_v34 = vld [vmem:[#allocation2 + $0x20] sm:$0xff] }
 0x585   : > { %v8562_v63 = vpop.f32.mrb[96].mxu1  ;;  %v5706_v32 = vrot.slane %v5068_v4, 1 }
 0x586   : > { %v8563_v20 = vpop.f32.mrb[97].mxu1 }
 0x587   : > { %v8564_v21 = vadd.f32 %v8563_v20, %v8562_v63  ;;  %v8565_v49 = vpop.f32.mrb[98].mxu1  ;;  %v5587_v63 = vrot.slane %v5585_v30, 1  ;;  %v5594_v20 = vrot.slane %v5592_v54, 1  ;;  %v5599_v30 = vrot.slane %v5597_v28, 1 }
 0x588   : > { %v8566_v58 = vpop.f32.mrb[99].mxu1  ;;  %v6671_v54 = vadd.f32 %v11548_v19, %v11654_v11  ;;  %v5602_v19 = vshrl.u32 %v11554_v25, 16 }
 0x589   : > { %v11671_v2 = vadd.f32 %v8564_v21, %v6655_v48  ;;  %v8567_v51 = vadd.f32 %v8566_v58, %v8565_v49  ;;  %v5588_v21 = vsel %vm2066_vm7, %v5583_v40, %v5587_v63  ;;  %v5590_v49 = vshrl.u32 %v11545_v13, 16 }
 0x58a   : > { %7063 = vmatmul.mubr.bf16.gmra.mrb[204].mxu1 %v5576_v35  ;;  %v5705_v58 = vsel %vm2337_vm8, %v5703_v61, %v5704_v31  ;;  %v5728_v13 = vshll.u32 %v11691_v34, 16  ;;  %v5707_v61 = vrot.slane %v5052_v47, 1 }
 0x58b   : > { %v11677_v38 = vadd.f32 %v8567_v51, %v6658_v12  ;;  %7070 = vmatprep.mubr.bf16.mxu1 %v5702_v59  ;;  %v5595_v12 = vor.u32 %v5594_v20, %v5590_v49  ;;  %v5604_v51 = vshll.u32 %v11554_v25, 16  ;;  %v11702_v20 = vld [vmem:[#allocation2 + $0x28] sm:$0x1]  ;;  %v5726_v49 = vshrl.u32 %v11691_v34, 16 }
 0x58c   : > { %v5730_v31 = vrot.slane %v5728_v13, 1 }
 0x58d   : > { %v8568_v16 = vpop.f32.mrb[100].mxu1 }
 0x58e   : > { %v8569_v15 = vpop.f32.mrb[101].mxu1 }
 0x58f   : > { %v8570_v52 = vadd.f32 %v8569_v15, %v8568_v16  ;;  %v8571_v0 = vpop.f32.mrb[102].mxu1  ;;  %v5600_v15 = vsel %vm2066_vm7, %v5595_v12, %v5599_v30  ;;  %v5731_v12 = vor.u32 %v5730_v31, %v5726_v49 }
 0x590   : > { %v8572_v62 = vpop.f32.mrb[103].mxu1 }
 0x591   : > { %v11682_v18 = vadd.f32 %v8570_v52, %v6663_v53  ;;  %v8573_v48 = vadd.f32 %v8572_v62, %v8571_v0  ;;  %v5606_v53 = vrot.slane %v5604_v51, 1  ;;  %v6674_v0 = vadd.f32 %v11551_v36, %v11654_v11 }
 0x592   : > { %7071 = vmatmul.mubr.bf16.gmra.mrb[208].mxu1 %v5588_v21  ;;  %v5708_v62 = vsel %vm2337_vm8, %v5706_v32, %v5707_v61  ;;  %v11708_v21 = vld [vmem:[#allocation2 + $0x30] sm:$0xff] }
 0x593   : > { %v11689_v35 = vadd.f32 %v8573_v48, %v6666_v33  ;;  %7078 = vmatprep.mubr.bf16.mxu1 %v5705_v58  ;;  %v5609_v48 = vshll.u32 %v5052_v47, 16  ;;  %v5733_v58 = vshll.u32 %v11702_v20, 16  ;;  %v5607_v36 = vor.u32 %v5606_v53, %v5602_v19  ;;  %v11725_v53 = vld [vmem:[#allocation2 + $0x40] sm:$0xff] }
 0x594   : > { %v5740_v51 = vshll.u32 %v11708_v21, 16  ;;  %v5752_v19 = vshll.u32 %v11725_v53, 16 }
 0x595   : > { %v8574_v59 = vpop.f32.mrb[104].mxu1  ;;  %v5611_v30 = vrot.slane %v5609_v48, 1  ;;  %v5735_v47 = vrot.slane %v5733_v58, 1  ;;  %v6687_v48 = vadd.f32 %v11564_v24, %v11654_v11  ;;  %v11743_v24 = vld [vmem:[#allocation2 + $0x50] sm:$0xff] }
 0x596   : > { %v8575_v10 = vpop.f32.mrb[105].mxu1  ;;  %v5742_v61 = vrot.slane %v5740_v51, 1  ;;  %v6690_v51 = vadd.f32 %v11566_v37, %v11654_v11  ;;  %v9738_v37 = vld [vmem:[#allocation5 + $0x210] sm:$0xff]  }
 0x597   : > { %v8576_v40 = vadd.f32 %v8575_v10, %v8574_v59  ;;  %v8577_v16 = vpop.f32.mrb[106].mxu1  ;;  %v6679_v59 = vadd.f32 %v11557_v44, %v11654_v11 }
 0x598   : > { %v8578_v26 = vpop.f32.mrb[107].mxu1 }
 0x599   : > { %v11698_v52 = vadd.f32 %v8576_v40, %v6671_v54  ;;  %v8579_v63 = vadd.f32 %v8578_v26, %v8577_v16  ;;  %v6682_v54 = vadd.f32 %v11560_v56, %v11654_v11  ;;  %v5612_v16 = vsel %vm2066_vm7, %v5607_v36, %v5611_v30  ;;  %v11720_v26 = vld [vmem:[#allocation2 + $0x38] sm:$0x1] }
 0x59a   : > { %7079 = vmatmul.mubr.bf16.gmra.mrb[212].mxu1 %v5600_v15  ;;  %v5736_v15 = vsel %vm2066_vm7, %v5731_v12, %v5735_v47  ;;  %v5754_v30 = vrot.slane %v5752_v19, 1  ;;  %v5750_v47 = vshrl.u32 %v11725_v53, 16  ;;  %v6698_v19 = vadd.f32 %v11573_v29, %v11654_v11  ;;  %v9740_v29 = vld [vmem:[#allocation5 + $0x220] sm:$0xff]  }
 0x59b   : > { %v11706_v33 = vadd.f32 %v8579_v63, %v6674_v0  ;;  %7086 = vmatprep.mubr.bf16.mxu1 %v5708_v62  ;;  %v5738_v0 = vshrl.u32 %v11708_v21, 16  ;;  %v5745_v63 = vshll.u32 %v11720_v26, 16 }
 0x59d   : > { %v8580_v28 = vpop.f32.mrb[108].mxu1  ;;  %v5743_v31 = vor.u32 %v5742_v61, %v5738_v0  ;;  %v6695_v61 = vadd.f32 %v11571_v27, %v11654_v11 }
 0x59e   : > { %v8581_v4 = vpop.f32.mrb[109].mxu1 }
 0x59f   : > { %v8582_v25 = vadd.f32 %v8581_v4, %v8580_v28  ;;  %v8583_v10 = vpop.f32.mrb[110].mxu1  ;;  %v5747_v28 = vrot.slane %v5745_v63, 1  ;;  %v9737_v4 = vld [vmem:[#allocation5 + $0x208] sm:$0xff]  }
 0x5a0   : > { %v8584_v32 = vpop.f32.mrb[111].mxu1 }
 0x5a1   : > { %v11715_v13 = vadd.f32 %v8582_v25, %v6679_v59  ;;  %v8585_v40 = vadd.f32 %v8584_v32, %v8583_v10  ;;  %v11736_v25 = vld [vmem:[#allocation2 + $0x48] sm:$0x1]  ;;  %v5748_v10 = vsel %vm2066_vm7, %v5743_v31, %v5747_v28  ;;  %v11760_v28 = vld [vmem:[#allocation2 + $0x60] sm:$0xff] }
 0x5a2   : > { %7087 = vmatmul.mubr.bf16.gmra.mrb[216].mxu1 %v5612_v16 }
 0x5a3   : > { %v11723_v44 = vadd.f32 %v8585_v40, %v6682_v54  ;;  %7127 = vmatprep.mubr.bf16.mxu1 %v5736_v15  ;;  %v5757_v54 = vshll.u32 %v11736_v25, 16  ;;  %v5755_v15 = vor.u32 %v5754_v30, %v5750_v47  ;;  %v6703_v47 = vadd.f32 %v11578_v23, %v11654_v11 }
 0x5a5   : > { %v8586_v62 = vpop.f32.mrb[112].mxu1 }
 0x5a6   : > { %v8587_v56 = vpop.f32.mrb[113].mxu1 }
 0x5a7   : > { %v8588_v49 = vadd.f32 %v8587_v56, %v8586_v62  ;;  %v8589_v58 = vpop.f32.mrb[114].mxu1  ;;  %v5759_v62 = vrot.slane %v5757_v54, 1  ;;  %v9739_v56 = vld [vmem:[#allocation5 + $0x218] sm:$0xff]  }
 0x5a8   : > { %v8590_v36 = vpop.f32.mrb[115].mxu1 }
 0x5a9   : > { %v11732_v12 = vadd.f32 %v8588_v49, %v6687_v48  ;;  %v8591_v59 = vadd.f32 %v8590_v36, %v8589_v58  ;;  %v11754_v49 = vld [vmem:[#allocation2 + $0x58] sm:$0x1]  ;;  %v5760_v58 = vsel %vm2066_vm7, %v5755_v15, %v5759_v62 }
 0x5aa   : > { %7128 = vmatmul.mubr.bf16.vlgmr.msra.gmra.mrb[220].mxu1 %v11691_v34  ;;  %v5764_v34 = vshll.u32 %v11743_v24, 16 }
 0x5ab   : > { %v11740_v32 = vadd.f32 %v8591_v59, %v6690_v51  ;;  %8953 = vmatpush3.bf16.msra.mxu1 %v11592_v22  ;;  %7135 = vmatprep.mubr.bf16.mxu1 %v5748_v10  ;;  %v5769_v51 = vshll.u32 %v11754_v49, 16 }
 0x5ac   : > { %8954 = vmatprep.subr.bf16.mxu1 %v9737_v4  ;;  %v5766_v27 = vrot.slane %v5764_v34, 1 }
 0x5ad   : > { %v8592_v40 = vpop.f32.mrb[116].mxu1  ;;  %v5771_v15 = vrot.slane %v5769_v51, 1  ;;  %v6711_v51 = vadd.f32 %v11585_v6, %v11654_v11 }
 0x5ae   : > { %v8593_v16 = vpop.f32.mrb[117].mxu1 }
 0x5af   : > { %v8594_v0 = vadd.f32 %v8593_v16, %v8592_v40  ;;  %v8595_v63 = vpop.f32.mrb[118].mxu1  ;;  %8955 = vmatpush3.bf16.msra.mxu1 %v9737_v4  ;;  %v5762_v4 = vshrl.u32 %v11743_v24, 16 }
 0x5b0   : > { %v8596_v22 = vpop.f32.mrb[119].mxu1  ;;  %8956 = vmatprep.subr.bf16.mxu1 %v9738_v37 }
 0x5b1   : > { %v11750_v31 = vadd.f32 %v8594_v0, %v6695_v61  ;;  %v8597_v48 = vadd.f32 %v8596_v22, %v8595_v63  ;;  %v5767_v30 = vor.u32 %v5766_v27, %v5762_v4  ;;  %v6706_v61 = vadd.f32 %v11580_v17, %v11654_v11  ;;  %v11771_v63 = vld [vmem:[#allocation2 + $0x68] sm:$0x1]  ;;  %v9742_v17 = vld [vmem:[#allocation5 + $0x230] sm:$0xff]  }
 0x5b2   : > { %7136 = vmatmul.mubr.bf16.gmra.mrb[224].mxu1 %v11708_v21  ;;  %v5776_v21 = vshll.u32 %v11760_v28, 16 }
 0x5b3   : > { %v11758_v36 = vadd.f32 %v8597_v48, %v6698_v19  ;;  %7143 = vmatprep.mubr.bf16.mxu1 %v5760_v58  ;;  %8957 = vmatpush3.bf16.msra.mxu1 %v9738_v37  ;;  %v9741_v37 = vld [vmem:[#allocation5 + $0x228] sm:$0xff]   ;;  %v5772_v22 = vsel %vm2066_vm7, %v5767_v30, %v5771_v15  ;;  %v5774_v19 = vshrl.u32 %v11760_v28, 16  ;;  %v5781_v48 = vshll.u32 %v11771_v63, 16 }
 0x5b4   : > { %8958 = vmatprep.subr.bf16.mxu1 %v9739_v56  ;;  %v5778_v23 = vrot.slane %v5776_v21, 1 }
 0x5b5   : > { %v8598_v59 = vpop.f32.mrb[120].mxu1  ;;  %v5783_v21 = vrot.slane %v5781_v48, 1 }
 0x5b6   : > { %v8599_v10 = vpop.f32.mrb[121].mxu1  ;;  %v5779_v4 = vor.u32 %v5778_v23, %v5774_v19 }
 0x5b7   : > { %v8600_v54 = vadd.f32 %v8599_v10, %v8598_v59  ;;  %v8601_v40 = vpop.f32.mrb[122].mxu1  ;;  %8959 = vmatpush3.bf16.msra.mxu1 %v9739_v56  ;;  %v11777_v56 = vld [vmem:[#allocation2 + $0x70] sm:$0xff] }
 0x5b8   : > { %v8602_v16 = vpop.f32.mrb[123].mxu1  ;;  %8960 = vmatprep.subr.bf16.mxu1 %v9740_v29  ;;  %v5784_v15 = vsel %vm2066_vm7, %v5779_v4, %v5783_v21 }
 0x5b9   : > { %v11767_v34 = vadd.f32 %v8600_v54, %v6703_v47  ;;  %v8603_v0 = vadd.f32 %v8602_v16, %v8601_v40  ;;  %v6714_v47 = vadd.f32 %v11587_v9, %v11654_v11  ;;  %v11788_v16 = vld [vmem:[#allocation2 + $0x78] sm:$0x1] }
 0x5ba   : > { %7144 = vmatmul.mubr.bf16.gmra.mrb[228].mxu1 %v11725_v53  ;;  %v5788_v53 = vshll.u32 %v11777_v56, 16 }
 0x5bb   : > { %v11775_v62 = vadd.f32 %v8603_v0, %v6706_v61  ;;  %7151 = vmatprep.mubr.bf16.mxu1 %v5772_v22  ;;  %8961 = vmatpush3.bf16.msra.mxu1 %v9740_v29  ;;  %v9743_v29 = vld [vmem:[#allocation5 + $0x238] sm:$0xff]   ;;  %v5786_v0 = vshrl.u32 %v11777_v56, 16  ;;  %v5793_v22 = vshll.u32 %v11788_v16, 16 }
 0x5bc   : > { %8962 = vmatprep.subr.bf16.mxu1 %v9741_v37  ;;  %v5790_v6 = vrot.slane %v5788_v53, 1 }
 0x5bd   : > { %v8604_v58 = vpop.f32.mrb[124].mxu1  ;;  %v5795_v53 = vrot.slane %v5793_v22, 1  ;;  %v6727_v22 = vadd.f32 %v11602_v41, %v11654_v11  ;;  %v5077_v41 = vld [vmem:[#allocation2 + $0xa0] sm:$0xff] }
 0x5be   : > { %v8605_v27 = vpop.f32.mrb[125].mxu1  ;;  %v5791_v19 = vor.u32 %v5790_v6, %v5786_v0 }
 0x5bf   : > { %v8606_v59 = vadd.f32 %v8605_v27, %v8604_v58  ;;  %v8607_v10 = vpop.f32.mrb[126].mxu1  ;;  %8963 = vmatpush3.bf16.msra.mxu1 %v9741_v37  ;;  %v5075_v37 = vld [vmem:[#allocation2 + $0x80] sm:$0xff] }
 0x5c0   : > { %v8608_v30 = vpop.f32.mrb[127].mxu1  ;;  %8964 = vmatprep.subr.bf16.mxu1 %v9742_v17  ;;  %v5800_v48 = vshll.u32 %v5075_v37, 16 }
 0x5c1   : > { %v11786_v54 = vadd.f32 %v8606_v59, %v6711_v51  ;;  %v8609_v40 = vadd.f32 %v8608_v30, %v8607_v10  ;;  %v11802_v10 = vld [vmem:[#allocation2 + $0x88] sm:$0x1]  ;;  %v5796_v30 = vsel %vm2066_vm7, %v5791_v19, %v5795_v53  ;;  %v6730_v19 = vadd.f32 %v11604_v57, %v11654_v11 }
 0x5c2   : > { %7152 = vmatmul.mubr.bf16.gmra.mrb[232].mxu1 %v11743_v24  ;;  %v6719_v24 = vadd.f32 %v11594_v7, %v11654_v11  ;;  %v5802_v21 = vrot.slane %v5800_v48, 1  ;;  %v5076_v7 = vld [vmem:[#allocation2 + $0x90] sm:$0xff] }
 0x5c3   : > { %v11792_v61 = vadd.f32 %v8609_v40, %v6714_v47  ;;  %7159 = vmatprep.mubr.bf16.mxu1 %v5784_v15  ;;  %8965 = vmatpush3.bf16.msra.mxu1 %v9742_v17  ;;  %v6722_v17 = vadd.f32 %v11597_v43, %v11654_v11  ;;  %v5805_v40 = vshll.u32 %v11802_v10, 16  ;;  %v5812_v0 = vshll.u32 %v5076_v7, 16 }
 0x5c4   : > { %8966 = vmatprep.subr.bf16.mxu1 %v9743_v29 }
 0x5c5   : > { %v8610_v9 = vpop.f32.mrb[128].mxu1  ;;  %v5814_v53 = vrot.slane %v5812_v0, 1 }
 0x5c6   : > { %v8611_v23 = vpop.f32.mrb[129].mxu1 }
 0x5c7   : > { %v8612_v58 = vadd.f32 %v8611_v23, %v8610_v9  ;;  %v8613_v27 = vpop.f32.mrb[130].mxu1  ;;  %8967 = vmatpush3.bf16.msra.mxu1 %v9743_v29  ;;  %v5798_v29 = vshrl.u32 %v5075_v37, 16 }
 0x5c8   : > { %v8614_v4 = vpop.f32.mrb[131].mxu1 }
 0x5c9   : > { %v11800_v51 = vadd.f32 %v8612_v58, %v6719_v24  ;;  %v8615_v59 = vadd.f32 %v8614_v4, %v8613_v27  ;;  %v5803_v43 = vor.u32 %v5802_v21, %v5798_v29  ;;  %v5807_v24 = vrot.slane %v5805_v40, 1  ;;  %v11815_v27 = vld [vmem:[#allocation2 + $0x98] sm:$0x1] }
 0x5ca   : > { %7160 = vmatmul.mubr.bf16.gmra.mrb[236].mxu1 %v11760_v28  ;;  %v5824_v40 = vshll.u32 %v5077_v41, 16 }
 0x5cb   : > { %v11806_v47 = vadd.f32 %v8615_v59, %v6722_v17  ;;  %7167 = vmatprep.mubr.bf16.mxu1 %v5796_v30  ;;  %v5808_v4 = vsel %vm2066_vm7, %v5803_v43, %v5807_v24  ;;  %v5810_v59 = vshrl.u32 %v5076_v7, 16  ;;  %v5817_v30 = vshll.u32 %v11815_v27, 16 }
 0x5cc   : > { %v6738_v43 = vadd.f32 %v11612_v50, %v11654_v11 }
 0x5cd   : > { %v8616_v15 = vpop.f32.mrb[132].mxu1  ;;  %v5815_v57 = vor.u32 %v5814_v53, %v5810_v59 }
 0x5ce   : > { %v8617_v6 = vpop.f32.mrb[133].mxu1 }
 0x5cf   : > { %v8618_v9 = vadd.f32 %v8617_v6, %v8616_v15  ;;  %v8619_v23 = vpop.f32.mrb[134].mxu1  ;;  %v6735_v15 = vadd.f32 %v11610_v42, %v11654_v11  ;;  %v5078_v42 = vld [vmem:[#allocation2 + $0xb0] sm:$0xff] }
 0x5d0   : > { %v8620_v28 = vpop.f32.mrb[135].mxu1  ;;  %v5836_v50 = vshll.u32 %v5078_v42, 16 }
 0x5d1   : > { %v11813_v48 = vadd.f32 %v8618_v9, %v6727_v22  ;;  %v8621_v58 = vadd.f32 %v8620_v28, %v8619_v23  ;;  %v5819_v9 = vrot.slane %v5817_v30, 1  ;;  %v11828_v28 = vld [vmem:[#allocation2 + $0xa8] sm:$0x1] }
 0x5d2   : > { %7168 = vmatmul.mubr.bf16.gmra.mrb[240].mxu1 %v11777_v56  ;;  %v5829_v53 = vshll.u32 %v11828_v28, 16 }
 0x5d3   : > { %v11819_v17 = vadd.f32 %v8621_v58, %v6730_v19  ;;  %7175 = vmatprep.mubr.bf16.mxu1 %v5808_v4  ;;  %v5820_v24 = vsel %vm2066_vm7, %v5815_v57, %v5819_v9  ;;  %v5826_v19 = vrot.slane %v5824_v40, 1  ;;  %v5822_v4 = vshrl.u32 %v5077_v41, 16  ;;  %v11840_v9 = vld [vmem:[#allocation2 + $0xb8] sm:$0x1] }
 0x5d4   : > { %v6746_v57 = vadd.f32 %v11621_v14, %v11654_v11 }
 0x5d5   : > { %v8622_v21 = vpop.f32.mrb[136].mxu1 }
 0x5d6   : > { %v8623_v29 = vpop.f32.mrb[137].mxu1 }
 0x5d7   : > { %v8624_v6 = vadd.f32 %v8623_v29, %v8622_v21  ;;  %v8625_v22 = vpop.f32.mrb[138].mxu1  ;;  %v5827_v21 = vor.u32 %v5826_v19, %v5822_v4  ;;  %v6743_v29 = vadd.f32 %v11619_v39, %v11654_v11  ;;  %v5079_v39 = vld [vmem:[#allocation2 + $0xc0] sm:$0xff]  ;;  %v5834_v19 = vshrl.u32 %v5078_v42, 16 }
 0x5d8   : > { %v8626_v56 = vpop.f32.mrb[139].mxu1  ;;  %v5841_v4 = vshll.u32 %v11840_v9, 16  ;;  %v5848_v14 = vshll.u32 %v5079_v39, 16 }
 0x5d9   : > { %v11826_v0 = vadd.f32 %v8624_v6, %v6735_v15  ;;  %v8627_v23 = vadd.f32 %v8626_v56, %v8625_v22  ;;  %v5831_v22 = vrot.slane %v5829_v53, 1 }
 0x5da   : > { %7176 = vmatmul.mubr.bf16.gmra.mrb[244].mxu1 %v5075_v37 }
 0x5db   : > { %v11831_v58 = vadd.f32 %v8627_v23, %v6738_v43  ;;  %7183 = vmatprep.mubr.bf16.mxu1 %v5820_v24  ;;  %v5832_v43 = vsel %vm2066_vm7, %v5827_v21, %v5831_v22  ;;  %v5838_v23 = vrot.slane %v5836_v50, 1  ;;  %v6754_v21 = vadd.f32 %v11629_v55, %v11654_v11 }
 0x5dd   : > { %v8628_v59 = vpop.f32.mrb[140].mxu1 }
 0x5de   : > { %v8629_v30 = vpop.f32.mrb[141].mxu1 }
 0x5df   : > { %v8630_v15 = vadd.f32 %v8629_v30, %v8628_v59  ;;  %v8631_v6 = vpop.f32.mrb[142].mxu1  ;;  %v5839_v30 = vor.u32 %v5838_v23, %v5834_v19  ;;  %v5846_v19 = vshrl.u32 %v5079_v39, 16 }
 0x5e0   : > { %v8632_v37 = vpop.f32.mrb[143].mxu1 }
 0x5e1   : > { %v11838_v40 = vadd.f32 %v8630_v15, %v6743_v29  ;;  %v8633_v56 = vadd.f32 %v8632_v37, %v8631_v6  ;;  %v6751_v29 = vadd.f32 %v11627_v60, %v11654_v11  ;;  %v5843_v37 = vrot.slane %v5841_v4, 1  ;;  %v5080_v60 = vld [vmem:[#allocation2 + $0xd0] sm:$0xff] }
 0x5e2   : > { %7184 = vmatmul.mubr.bf16.gmra.mrb[248].mxu1 %v5076_v7  ;;  %v5860_v55 = vshll.u32 %v5080_v60, 16 }
 0x5e3   : > { %v11843_v24 = vadd.f32 %v8633_v56, %v6746_v57  ;;  %7191 = vmatprep.mubr.bf16.mxu1 %v5832_v43  ;;  %v11852_v57 = vld [vmem:[#allocation2 + $0xc8] sm:$0x1]  ;;  %v5844_v56 = vsel %vm2066_vm7, %v5839_v30, %v5843_v37  ;;  %v5850_v43 = vrot.slane %v5848_v14, 1  ;;  %v6762_v30 = vadd.f32 %v11637_v45, %v11654_v11 }
 0x5e5   : > { %12256 = vst [vmem:[#allocation9_spill] sm:$0xff] %v11843_v24  ;;  %v8634_v53 = vpop.f32.mrb[144].mxu1  ;;  %v5851_v24 = vor.u32 %v5850_v43, %v5846_v19  ;;  %v5858_v19 = vshrl.u32 %v5080_v60, 16 }
 0x5e6   : > { %v8635_v59 = vpop.f32.mrb[145].mxu1 }
 0x5e7   : > { %v8636_v15 = vadd.f32 %v8635_v59, %v8634_v53  ;;  %v8637_v6 = vpop.f32.mrb[146].mxu1  ;;  %v5853_v53 = vshll.u32 %v11852_v57, 16 }
 0x5e8   : > { %v8638_v7 = vpop.f32.mrb[147].mxu1 }
 0x5e9   : > { %v11850_v50 = vadd.f32 %v8636_v15, %v6751_v29  ;;  %v8639_v22 = vadd.f32 %v8638_v7, %v8637_v6  ;;  %v6759_v29 = vadd.f32 %v11635_v8, %v11654_v11  ;;  %v5855_v7 = vrot.slane %v5853_v53, 1  ;;  %v5081_v8 = vld [vmem:[#allocation2 + $0xe0] sm:$0xff] }
 0x5ea   : > { %7192 = vmatmul.mubr.bf16.gmra.mrb[252].mxu1 %v5077_v41  ;;  %v5872_v45 = vshll.u32 %v5081_v8, 16 }
 0x5eb   : > { %v11855_v23 = vadd.f32 %v8639_v22, %v6754_v21  ;;  %7199 = vmatprep.mubr.bf16.mxu1 %v5844_v56  ;;  %v11864_v21 = vld [vmem:[#allocation2 + $0xd8] sm:$0x1]  ;;  %v5856_v22 = vsel %vm2066_vm7, %v5851_v24, %v5855_v7  ;;  %v5862_v56 = vrot.slane %v5860_v55, 1  ;;  %v6770_v24 = vadd.f32 %v11645_v5, %v11654_v11 }
 0x5ed   : > { %12257 = vst [vmem:[#allocation11_spill] sm:$0xff] %v11855_v23  ;;  %v8640_v4 = vpop.f32.mrb[148].mxu1  ;;  %v5863_v23 = vor.u32 %v5862_v56, %v5858_v19  ;;  %v5870_v19 = vshrl.u32 %v5081_v8, 16 }
 0x5ee   : > { %v8641_v59 = vpop.f32.mrb[149].mxu1 }
 0x5ef   : > { %v8642_v15 = vadd.f32 %v8641_v59, %v8640_v4  ;;  %v8643_v6 = vpop.f32.mrb[150].mxu1  ;;  %v5865_v4 = vshll.u32 %v11864_v21, 16 }
 0x5f0   : > { %v8644_v41 = vpop.f32.mrb[151].mxu1 }
 0x5f1   : > { %v11862_v14 = vadd.f32 %v8642_v15, %v6759_v29  ;;  %v8645_v37 = vadd.f32 %v8644_v41, %v8643_v6  ;;  %v6767_v29 = vadd.f32 %v11643_v46, %v11654_v11  ;;  %v5867_v41 = vrot.slane %v5865_v4, 1  ;;  %v5082_v46 = vld [vmem:[#allocation2 + $0xf0] sm:$0xff] }
 0x5f2   : > { %7200 = vmatmul.mubr.bf16.gmra.mrb[0].mxu1 %v5078_v42  ;;  %v5884_v5 = vshll.u32 %v5082_v46, 16 }
 0x5f3   : > { %v11867_v43 = vadd.f32 %v8645_v37, %v6762_v30  ;;  %7207 = vmatprep.mubr.bf16.mxu1 %v5856_v22  ;;  %v11876_v30 = vld [vmem:[#allocation2 + $0xe8] sm:$0x1]  ;;  %v5868_v37 = vsel %vm2066_vm7, %v5863_v23, %v5867_v41  ;;  %v5874_v22 = vrot.slane %v5872_v45, 1  ;;  %v11885_v45 = vld [vmem:[#allocation2 + $0xf8] sm:$0x1] }
 0x5f4   : > { %v5886_v41 = vrot.slane %v5884_v5, 1  ;;  %v11895_v5 = vld [vmem:[#allocation2 + $0x108] sm:$0x1] }
 0x5f5   : > { %12258 = vst [vmem:[#allocation14_spill] sm:$0xff] %v11867_v43  ;;  %v8646_v53 = vpop.f32.mrb[152].mxu1  ;;  %v5875_v43 = vor.u32 %v5874_v22, %v5870_v19  ;;  %v5889_v22 = vshll.u32 %v11885_v45, 16 }
 0x5f6   : > { %v8647_v59 = vpop.f32.mrb[153].mxu1 }
 0x5f7   : > { %v8648_v15 = vadd.f32 %v8647_v59, %v8646_v53  ;;  %v8649_v6 = vpop.f32.mrb[154].mxu1  ;;  %v5877_v53 = vshll.u32 %v11876_v30, 16 }
 0x5f8   : > { %v8650_v42 = vpop.f32.mrb[155].mxu1 }
 0x5f9   : > { %v11874_v55 = vadd.f32 %v8648_v15, %v6767_v29  ;;  %v8651_v7 = vadd.f32 %v8650_v42, %v8649_v6  ;;  %v5879_v6 = vrot.slane %v5877_v53, 1 }
 0x5fa   : > { %7208 = vmatmul.mubr.bf16.gmra.mrb[4].mxu1 %v5079_v39 }
 0x5fb   : > { %v11879_v56 = vadd.f32 %v8651_v7, %v6770_v24  ;;  %7215 = vmatprep.mubr.bf16.mxu1 %v5868_v37  ;;  %v5880_v42 = vsel %vm2066_vm7, %v5875_v43, %v5879_v6  ;;  %v5083_v7 = vld [vmem:[#allocation2 + $0x100] sm:$0xff]  ;;  %v5882_v37 = vshrl.u32 %v5082_v46, 16 }
 0x5fd   : > { %v8668_v4 = vpop.f32.mrb[156].mxu1 }
 0x5fe   : > { %v8669_v59 = vpop.f32.mrb[157].mxu1 }
 0x5ff   : > { %v8670_v11 = vadd.f32 %v8669_v59, %v8668_v4  ;;  %v8671_v29 = vpop.f32.mrb[158].mxu1  ;;  %v5887_v4 = vor.u32 %v5886_v41, %v5882_v37  ;;  %v5901_v41 = vshll.u32 %v11895_v5, 16 }
 0x600   : > { %v8672_v15 = vpop.f32.mrb[159].mxu1 }
 0x601   : > { %v11883_v39 = vadd.f32 %v8670_v11, %v11658_v1  ;;  %v8673_v23 = vadd.f32 %v8672_v15, %v8671_v29  ;;  %v5896_v1 = vshll.u32 %v5083_v7, 16  ;;  %v5891_v15 = vrot.slane %v5889_v22, 1 }
 0x602   : > { %7216 = vmatmul.mubr.bf16.gmra.mrb[8].mxu1 %v5080_v60 }
 0x603   : > { %v11889_v24 = vadd.f32 %v8673_v23, %v11665_v3  ;;  %7223 = vmatprep.mubr.bf16.mxu1 %v5880_v42  ;;  %v5892_v3 = vsel %vm2066_vm7, %v5887_v4, %v5891_v15  ;;  %v5898_v6 = vrot.slane %v5896_v1, 1  ;;  %v5894_v42 = vshrl.u32 %v5083_v7, 16 }
 0x605   : > { %12259 = vst [vmem:[#allocation12_spill] sm:$0xff] %v11889_v24  ;;  %v8674_v19 = vpop.f32.mrb[160].mxu1  ;;  %v5899_v22 = vor.u32 %v5898_v6, %v5894_v42 }
 0x606   : > { %v8675_v53 = vpop.f32.mrb[161].mxu1 }
 0x607   : > { %v8676_v59 = vadd.f32 %v8675_v53, %v8674_v19  ;;  %v8677_v11 = vpop.f32.mrb[162].mxu1 }
 0x608   : > { %v8678_v29 = vpop.f32.mrb[163].mxu1 }
 0x609   : > { %v11893_v60 = vadd.f32 %v8676_v59, %v11671_v2  ;;  %v8679_v43 = vadd.f32 %v8678_v29, %v8677_v11  ;;  %v11902_v59 = vld [vmem:[#allocation2 + $0x118] sm:$0x1]  ;;  %v5903_v29 = vrot.slane %v5901_v41, 1 }
 0x60a   : > { %7224 = vmatmul.mubr.bf16.gmra.mrb[12].mxu1 %v5081_v8  ;;  %v9779_v8 = vld [vmem:[#allocation2 + $0x110] sm:$0xff]  ;;  %v5913_v15 = vshll.u32 %v11902_v59, 16 }
 0x60b   : > { %12260 = vst [vmem:[#allocation15_spill] sm:$0xff] %v11893_v60  ;;  %v11899_v23 = vadd.f32 %v8679_v43, %v11677_v38  ;;  %7231 = vmatprep.mubr.bf16.mxu1 %v5892_v3  ;;  %v5908_v24 = vshll.u32 %v9779_v8, 16  ;;  %v5904_v1 = vsel %vm2066_vm7, %v5899_v22, %v5903_v29 }
 0x60c   : > { %v5915_v41 = vrot.slane %v5913_v15, 1 }
 0x60d   : > { %12261 = vst [vmem:[#allocation13_spill] sm:$0xff] %v11899_v23  ;;  %v8680_v37 = vpop.f32.mrb[164].mxu1  ;;  %v5910_v3 = vrot.slane %v5908_v24, 1  ;;  %v5101_v24 = vld [vmem:[#allocation2 + $0x20] sm:$0xfe] }
 0x60e   : > { %v8681_v19 = vpop.f32.mrb[165].mxu1  ;;  %v5965_v29 = vrot.slane %v5101_v24, 1 }
 0x60f   : > { %v8682_v53 = vadd.f32 %v8681_v19, %v8680_v37  ;;  %v8683_v2 = vpop.f32.mrb[166].mxu1  ;;  %v5906_v37 = vshrl.u32 %v9779_v8, 16 }
 0x610   : > { %v8684_v11 = vpop.f32.mrb[167].mxu1 }
 0x611   : > { %v11905_v4 = vadd.f32 %v8682_v53, %v11682_v18  ;;  %v8685_v38 = vadd.f32 %v8684_v11, %v8683_v2  ;;  %v5911_v18 = vor.u32 %v5910_v3, %v5906_v37  ;;  %v5966_v3 = vrot.slane %v11702_v20, 1 }
 0x612   : > { %7232 = vmatmul.mubr.bf16.gmra.mrb[16].mxu1 %v5082_v46 }
 0x613   : > { %v11910_v43 = vadd.f32 %v8685_v38, %v11689_v35  ;;  %7239 = vmatprep.mubr.bf16.mxu1 %v5904_v1  ;;  %v5916_v22 = vsel %vm2066_vm7, %v5911_v18, %v5915_v41  ;;  %v5969_v18 = vrot.slane %v11720_v26, 1  ;;  %v5105_v26 = vld [vmem:[#allocation2 + $0x60] sm:$0xfe] }
 0x615   : > { %v8686_v6 = vpop.f32.mrb[168].mxu1 }
 0x616   : > { %v8687_v42 = vpop.f32.mrb[169].mxu1 }
 0x617   : > { %v8688_v19 = vadd.f32 %v8687_v42, %v8686_v6  ;;  %v8689_v23 = vpop.f32.mrb[170].mxu1  ;;  %v5103_v6 = vld [vmem:[#allocation2 + $0x40] sm:$0xfe] }
 0x618   : > { %v8690_v60 = vpop.f32.mrb[171].mxu1 }
 0x619   : > { %v11913_v53 = vadd.f32 %v8688_v19, %v11698_v52  ;;  %v8691_v46 = vadd.f32 %v8690_v60, %v8689_v23  ;;  %v5967_v23 = vsel %vm2337_vm8, %v5965_v29, %v5966_v3  ;;  %v5971_v19 = vrot.slane %v5103_v6, 1 }
 0x61a   : > { %7240 = vmatmul.mubr.bf16.gmra.mrb[20].mxu1 %v5083_v7  ;;  %v5102_v7 = vld [vmem:[#allocation2 + $0x30] sm:$0xfe]  ;;  %v5977_v3 = vrot.slane %v5105_v26, 1 }
 0x61b   : > { %v11917_v35 = vadd.f32 %v8691_v46, %v11706_v33  ;;  %7247 = vmatprep.mubr.bf16.mxu1 %v5916_v22  ;;  %v5968_v42 = vrot.slane %v5102_v7, 1  ;;  %v5972_v22 = vrot.slane %v11736_v25, 1  ;;  %v5975_v25 = vrot.slane %v11754_v49, 1  ;;  %v5107_v49 = vld [vmem:[#allocation2 + $0x80] sm:$0xfe] }
 0x61d   : > { %v8692_v2 = vpop.f32.mrb[172].mxu1 }
 0x61e   : > { %v8693_v11 = vpop.f32.mrb[173].mxu1 }
 0x61f   : > { %v8694_v38 = vadd.f32 %v8693_v11, %v8692_v2  ;;  %v8695_v1 = vpop.f32.mrb[174].mxu1  ;;  %v5973_v2 = vsel %vm2337_vm8, %v5971_v19, %v5972_v22  ;;  %v5104_v11 = vld [vmem:[#allocation2 + $0x50] sm:$0xfe] }
 0x620   : > { %v8696_v15 = vpop.f32.mrb[175].mxu1 }
 0x621   : > { %v11921_v52 = vadd.f32 %v8694_v38, %v11715_v13  ;;  %v8697_v60 = vadd.f32 %v8696_v15, %v8695_v1  ;;  %v5974_v1 = vrot.slane %v5104_v11, 1 }
 0x622   : > { %7248 = vmatmul.mubr.bf16.gmra.mrb[24].mxu1 %v9779_v8  ;;  %v5970_v8 = vsel %vm2337_vm8, %v5968_v42, %v5969_v18 }
 0x623   : > { %v11925_v33 = vadd.f32 %v8697_v60, %v11723_v44  ;;  %8968 = vmatprep.mubr.bf16.mxu1 %v5967_v23  ;;  %v5978_v23 = vrot.slane %v11771_v63, 1  ;;  %v5981_v63 = vrot.slane %v11788_v16, 1  ;;  %v5109_v16 = vld [vmem:[#allocation2 + $0xa0] sm:$0xfe] }
 0x625   : > { %v8698_v37 = vpop.f32.mrb[176].mxu1 }
 0x626   : > { %v8699_v41 = vpop.f32.mrb[177].mxu1 }
 0x627   : > { %v8700_v20 = vadd.f32 %v8699_v41, %v8698_v37  ;;  %v8701_v46 = vpop.f32.mrb[178].mxu1  ;;  %v5979_v37 = vsel %vm2337_vm8, %v5977_v3, %v5978_v23  ;;  %v5106_v41 = vld [vmem:[#allocation2 + $0x70] sm:$0xfe]  ;;  %v5990_v23 = vrot.slane %v11828_v28, 1  ;;  %v5993_v28 = vrot.slane %v11840_v9, 1 }
 0x628   : > { %v8702_v13 = vpop.f32.mrb[179].mxu1  ;;  %v5113_v9 = vld [vmem:[#allocation2 + $0xe0] sm:$0xfe] }
 0x629   : > { %v11931_v24 = vadd.f32 %v8700_v20, %v11732_v12  ;;  %v8703_v44 = vadd.f32 %v8702_v13, %v8701_v46  ;;  %v5980_v20 = vrot.slane %v5106_v41, 1  ;;  %v5983_v13 = vrot.slane %v5107_v49, 1  ;;  %v5110_v41 = vld [vmem:[#allocation2 + $0xb0] sm:$0xfe] }
 0x62a   : > { %8969 = vmatmul.mubr.bf16.vlgmr.msra.gmra.mrb[28].mxu1 %v5970_v8 }
 0x62b   : > { %v11935_v29 = vadd.f32 %v8703_v44, %v11740_v32  ;;  %8972 = vmatprep.mubr.bf16.mxu1 %v5973_v2  ;;  %v5976_v32 = vsel %vm2337_vm8, %v5974_v1, %v5975_v25  ;;  %v5984_v44 = vrot.slane %v11802_v10, 1  ;;  %v5987_v10 = vrot.slane %v11815_v27, 1  ;;  %v5111_v27 = vld [vmem:[#allocation2 + $0xc0] sm:$0xfe] }
 0x62d   : > { %v8704_v38 = vpop.f32.mrb[180].mxu1  ;;  %v5985_v26 = vsel %vm2337_vm8, %v5983_v13, %v5984_v44  ;;  %v5995_v13 = vrot.slane %v5111_v27, 1 }
 0x62e   : > { %v8705_v15 = vpop.f32.mrb[181].mxu1 }
 0x62f   : > { %v8706_v60 = vadd.f32 %v8705_v15, %v8704_v38  ;;  %v8707_v7 = vpop.f32.mrb[182].mxu1  ;;  %v5108_v38 = vld [vmem:[#allocation2 + $0x90] sm:$0xfe] }
 0x630   : > { %v8708_v12 = vpop.f32.mrb[183].mxu1  ;;  %v5986_v3 = vrot.slane %v5108_v38, 1 }
 0x631   : > { %v11940_v6 = vadd.f32 %v8706_v60, %v11750_v31  ;;  %v8709_v42 = vadd.f32 %v8708_v12, %v8707_v7  ;;  %v5989_v60 = vrot.slane %v5109_v16, 1 }
 0x632   : > { %8973 = vmatmul.mubr.bf16.gmra.mrb[32].mxu1 %v5976_v32 }
 0x633   : > { %v11945_v19 = vadd.f32 %v8709_v42, %v11758_v36  ;;  %8976 = vmatprep.mubr.bf16.mxu1 %v5979_v37  ;;  %v5982_v36 = vsel %vm2337_vm8, %v5980_v20, %v5981_v63  ;;  %v5991_v37 = vsel %vm2337_vm8, %v5989_v60, %v5990_v23  ;;  %v5992_v20 = vrot.slane %v5110_v41, 1  ;;  %v5114_v23 = vld [vmem:[#allocation2 + $0xf0] sm:$0xfe] }
 0x635   : > { %v8710_v18 = vpop.f32.mrb[184].mxu1 }
 0x636   : > { %v8711_v46 = vpop.f32.mrb[185].mxu1 }
 0x637   : > { %v8712_v31 = vadd.f32 %v8711_v46, %v8710_v18  ;;  %v8713_v22 = vpop.f32.mrb[186].mxu1 }
 0x638   : > { %v8714_v8 = vpop.f32.mrb[187].mxu1 }
 0x639   : > { %v11950_v2 = vadd.f32 %v8712_v31, %v11767_v34  ;;  %v8715_v11 = vadd.f32 %v8714_v8, %v8713_v22  ;;  %v5996_v22 = vrot.slane %v11852_v57, 1  ;;  %v5999_v57 = vrot.slane %v11864_v21, 1  ;;  %v5115_v21 = vld [vmem:[#allocation2 + $0x100] sm:$0xfe] }
 0x63a   : > { %8977 = vmatmul.mubr.bf16.gmra.mrb[36].mxu1 %v5982_v36  ;;  %v5112_v36 = vld [vmem:[#allocation2 + $0xd0] sm:$0xfe]  ;;  %v6007_v27 = vrot.slane %v5115_v21, 1 }
 0x63b   : > { %v11955_v1 = vadd.f32 %v8715_v11, %v11775_v62  ;;  %8980 = vmatprep.mubr.bf16.mxu1 %v5985_v26  ;;  %v5988_v62 = vsel %vm2337_vm8, %v5986_v3, %v5987_v10  ;;  %v5997_v11 = vsel %vm2337_vm8, %v5995_v13, %v5996_v22  ;;  %v5998_v16 = vrot.slane %v5112_v36, 1 }
 0x63c   : > { %v6001_v3 = vrot.slane %v5113_v9, 1  ;;  %v6002_v10 = vrot.slane %v11876_v30, 1  ;;  %v6005_v30 = vrot.slane %v11885_v45, 1 }
 0x63d   : > { %v8716_v15 = vpop.f32.mrb[188].mxu1 }
 0x63e   : > { %v8717_v25 = vpop.f32.mrb[189].mxu1 }
 0x63f   : > { %v8718_v34 = vadd.f32 %v8717_v25, %v8716_v15  ;;  %v8719_v7 = vpop.f32.mrb[190].mxu1 }
 0x640   : > { %v8720_v12 = vpop.f32.mrb[191].mxu1 }
 0x641   : > { %v11960_v42 = vadd.f32 %v8718_v34, %v11786_v54  ;;  %v8721_v32 = vadd.f32 %v8720_v12, %v8719_v7  ;;  %v6003_v12 = vsel %vm2337_vm8, %v6001_v3, %v6002_v10  ;;  %v12263_v10 = vld [vmem:[#allocation11_spill] sm:$0xff] }
 0x642   : > { %8981 = vmatmul.mubr.bf16.gmra.mrb[40].mxu1 %v5988_v62 }
 0x643   : > { %v11965_v49 = vadd.f32 %v8721_v32, %v11792_v61  ;;  %8984 = vmatprep.mubr.bf16.mxu1 %v5991_v37  ;;  %v5994_v61 = vsel %vm2337_vm8, %v5992_v20, %v5993_v28  ;;  %v6004_v37 = vrot.slane %v5114_v23, 1 }
 0x645   : > { %v8722_v18 = vpop.f32.mrb[192].mxu1 }
 0x646   : > { %v8723_v46 = vpop.f32.mrb[193].mxu1 }
 0x647   : > { %v8724_v54 = vadd.f32 %v8723_v46, %v8722_v18  ;;  %v8725_v63 = vpop.f32.mrb[194].mxu1  ;;  %v6008_v46 = vrot.slane %v11895_v5, 1 }
 0x648   : > { %v8726_v31 = vpop.f32.mrb[195].mxu1 }
 0x649   : > { %v11970_v8 = vadd.f32 %v8724_v54, %v11800_v51  ;;  %v8727_v44 = vadd.f32 %v8726_v31, %v8725_v63  ;;  %v6009_v54 = vsel %vm2337_vm8, %v6007_v27, %v6008_v46  ;;  %v5116_v63 = vld [vmem:[#allocation2 + $0x110] sm:$0xfe] }
 0x64a   : > { %8985 = vmatmul.mubr.bf16.gmra.mrb[44].mxu1 %v5994_v61  ;;  %v6010_v22 = vrot.slane %v5116_v63, 1  ;;  %v6011_v61 = vrot.slane %v11902_v59, 1 }
 0x64b   : > { %v11975_v26 = vadd.f32 %v8727_v44, %v11806_v47  ;;  %8988 = vmatprep.mubr.bf16.mxu1 %v5997_v11  ;;  %v6000_v47 = vsel %vm2337_vm8, %v5998_v16, %v5999_v57  ;;  %v12262_v16 = vld [vmem:[#allocation9_spill] sm:$0xff] }
 0x64d   : > { %v8728_v38 = vpop.f32.mrb[196].mxu1 }
 0x64e   : > { %v8729_v15 = vpop.f32.mrb[197].mxu1 }
 0x64f   : > { %v8730_v51 = vadd.f32 %v8729_v15, %v8728_v38  ;;  %v8731_v25 = vpop.f32.mrb[198].mxu1  ;;  %v6012_v38 = vsel %vm2337_vm8, %v6010_v22, %v6011_v61 }
 0x650   : > { %v8732_v60 = vpop.f32.mrb[199].mxu1 }
 0x651   : > { %v11980_v34 = vadd.f32 %v8730_v51, %v11813_v48  ;;  %v8733_v7 = vadd.f32 %v8732_v60, %v8731_v25 }
 0x652   : > { %8989 = vmatmul.mubr.bf16.gmra.mrb[48].mxu1 %v6000_v47 }
 0x653   : > { %v11985_v32 = vadd.f32 %v8733_v7, %v11819_v17  ;;  %8992 = vmatprep.mubr.bf16.mxu1 %v6003_v12  ;;  %v6006_v17 = vsel %vm2337_vm8, %v6004_v37, %v6005_v30 }
 0x655   : > { %v8734_v62 = vpop.f32.mrb[200].mxu1 }
 0x656   : > { %v8735_v41 = vpop.f32.mrb[201].mxu1 }
 0x657   : > { %v8736_v48 = vadd.f32 %v8735_v41, %v8734_v62  ;;  %v8737_v18 = vpop.f32.mrb[202].mxu1  ;;  %v12264_v41 = vld [vmem:[#allocation14_spill] sm:$0xff] }
 0x658   : > { %v8738_v20 = vpop.f32.mrb[203].mxu1 }
 0x659   : > { %v11990_v13 = vadd.f32 %v8736_v48, %v11826_v0  ;;  %v8739_v28 = vadd.f32 %v8738_v20, %v8737_v18 }
 0x65a   : > { %8993 = vmatmul.mubr.bf16.gmra.mrb[52].mxu1 %v6006_v17 }
 0x65b   : > { %v11995_v31 = vadd.f32 %v8739_v28, %v11831_v58  ;;  %8996 = vmatprep.mubr.bf16.mxu1 %v6009_v54 }
 0x65d   : > { %v8740_v45 = vpop.f32.mrb[204].mxu1 }
 0x65e   : > { %v8741_v44 = vpop.f32.mrb[205].mxu1 }
 0x65f   : > { %v8742_v5 = vadd.f32 %v8741_v44, %v8740_v45  ;;  %v8743_v11 = vpop.f32.mrb[206].mxu1 }
 0x660   : > { %v8744_v0 = vpop.f32.mrb[207].mxu1 }
 0x661   : > { %v11999_v36 = vadd.f32 %v8742_v5, %v11838_v40  ;;  %v8745_v9 = vadd.f32 %v8744_v0, %v8743_v11 }
 0x662   : > { %8997 = vmatmul.mubr.bf16.gmra.mrb[56].mxu1 %v6012_v38 }
 0x663   : > { %v12003_v15 = vadd.f32 %v8745_v9, %v12262_v16  ;;  %v12265_v16 = vld [vmem:[#allocation15_spill] sm:$0xff] }
 0x665   : > { %v8746_v58 = vpop.f32.mrb[208].mxu1 }
 0x666   : > { %v8747_v3 = vpop.f32.mrb[209].mxu1 }
 0x667   : > { %v8748_v57 = vadd.f32 %v8747_v3, %v8746_v58  ;;  %v8749_v51 = vpop.f32.mrb[210].mxu1 }
 0x668   : > { %v8750_v25 = vpop.f32.mrb[211].mxu1 }
 0x669   : > { %v12006_v59 = vadd.f32 %v8748_v57, %v11850_v50  ;;  %v8751_v60 = vadd.f32 %v8750_v25, %v8749_v51  ;;  %v12267_v57 = vld [vmem:[#allocation12_spill] sm:$0xff] }
 0x66b   : > { %v12009_v7 = vadd.f32 %v8751_v60, %v12263_v10 }
 0x66d   : > { %v8752_v40 = vpop.f32.mrb[212].mxu1 }
 0x66e   : > { %v8753_v47 = vpop.f32.mrb[213].mxu1 }
 0x66f   : > { %v8754_v12 = vadd.f32 %v8753_v47, %v8752_v40  ;;  %v8755_v23 = vpop.f32.mrb[214].mxu1 }
 0x670   : > { %v8756_v21 = vpop.f32.mrb[215].mxu1 }
 0x671   : > { %v12012_v62 = vadd.f32 %v8754_v12, %v11862_v14  ;;  %v8757_v37 = vadd.f32 %v8756_v21, %v8755_v23 }
 0x673   : > { %v12015_v27 = vadd.f32 %v8757_v37, %v12264_v41 }
 0x675   : > { %v8758_v30 = vpop.f32.mrb[216].mxu1 }
 0x676   : > { %v8759_v48 = vpop.f32.mrb[217].mxu1 }
 0x677   : > { %v8760_v50 = vadd.f32 %v8759_v48, %v8758_v30  ;;  %v8761_v18 = vpop.f32.mrb[218].mxu1 }
 0x678   : > { %v8762_v20 = vpop.f32.mrb[219].mxu1 }
 0x679   : > { %v12018_v46 = vadd.f32 %v8760_v50, %v11874_v55  ;;  %v8763_v28 = vadd.f32 %v8762_v20, %v8761_v18 }
 0x67b   : > { %v12021_v17 = vadd.f32 %v8763_v28, %v11879_v56  ;;  %v12266_v56 = vld [vmem:[#allocation13_spill] sm:$0xff] }
 0x67d   : > { %v8780_v54 = vpop.f32.mrb[220].mxu1 }
 0x67e   : > { %v8781_v63 = vpop.f32.mrb[221].mxu1 }
 0x67f   : > { %v8782_v14 = vadd.f32 %v8781_v63, %v8780_v54  ;;  %v8783_v45 = vpop.f32.mrb[222].mxu1 }
 0x680   : > { %v8784_v22 = vpop.f32.mrb[223].mxu1 }
 0x681   : > { %v8785_v44 = vadd.f32 %v8784_v22, %v8783_v45  ;;  %v12024_v9 = vadd.f32 %v8782_v14, %v11883_v39 }
 0x683   : > { %v12033_v51 = vadd.f32 %v8785_v44, %v12267_v57 }
 0x685   : > { %v8786_v61 = vpop.f32.mrb[224].mxu1 }
 0x686   : > { %v8787_v5 = vpop.f32.mrb[225].mxu1 }
 0x687   : > { %v8788_v11 = vadd.f32 %v8787_v5, %v8786_v61  ;;  %v8789_v0 = vpop.f32.mrb[226].mxu1 }
 0x688   : > { %v8790_v38 = vpop.f32.mrb[227].mxu1 }
 0x689   : > { %v8791_v55 = vadd.f32 %v8790_v38, %v8789_v0  ;;  %v12027_v58 = vadd.f32 %v8788_v11, %v12265_v16 }
 0x68b   : > { %v12030_v3 = vadd.f32 %v8791_v55, %v12266_v56 }
 0x68d   : > { %v8792_v25 = vpop.f32.mrb[228].mxu1 }
 0x68e   : > { %v8793_v60 = vpop.f32.mrb[229].mxu1 }
 0x68f   : > { %v8794_v10 = vadd.f32 %v8793_v60, %v8792_v25  ;;  %v8795_v40 = vpop.f32.mrb[230].mxu1 }
 0x690   : > { %v8796_v47 = vpop.f32.mrb[231].mxu1 }
 0x691   : > { %v8797_v12 = vadd.f32 %v8796_v47, %v8795_v40  ;;  %v12036_v39 = vadd.f32 %v8794_v10, %v11905_v4 }
 0x693   : > { %v12039_v23 = vadd.f32 %v8797_v12, %v11910_v43 }
 0x695   : > { %v8798_v21 = vpop.f32.mrb[232].mxu1 }
 0x696   : > { %v8799_v37 = vpop.f32.mrb[233].mxu1 }
 0x697   : > { %v8800_v41 = vadd.f32 %v8799_v37, %v8798_v21  ;;  %v8801_v30 = vpop.f32.mrb[234].mxu1 }
 0x698   : > { %v8802_v48 = vpop.f32.mrb[235].mxu1 }
 0x699   : > { %v8803_v50 = vadd.f32 %v8802_v48, %v8801_v30  ;;  %v12042_v18 = vadd.f32 %v8800_v41, %v11913_v53 }
 0x69b   : > { %v12045_v20 = vadd.f32 %v8803_v50, %v11917_v35 }
 0x69d   : > { %v8804_v28 = vpop.f32.mrb[236].mxu1 }
 0x69e   : > { %v8805_v54 = vpop.f32.mrb[237].mxu1 }
 0x69f   : > { %v8806_v63 = vadd.f32 %v8805_v54, %v8804_v28  ;;  %v8807_v4 = vpop.f32.mrb[238].mxu1 }
 0x6a0   : > { %v8808_v14 = vpop.f32.mrb[239].mxu1 }
 0x6a1   : > { %v8809_v45 = vadd.f32 %v8808_v14, %v8807_v4  ;;  %v12048_v43 = vadd.f32 %v8806_v63, %v11921_v52 }
 0x6a3   : > { %v12051_v22 = vadd.f32 %v8809_v45, %v11925_v33 }
 0x6a5   : > { %v8810_v44 = vpop.f32.mrb[240].mxu1 }
 0x6a6   : > { %v8811_v61 = vpop.f32.mrb[241].mxu1 }
 0x6a7   : > { %v8812_v5 = vadd.f32 %v8811_v61, %v8810_v44  ;;  %v8813_v53 = vpop.f32.mrb[242].mxu1 }
 0x6a8   : > { %v8814_v11 = vpop.f32.mrb[243].mxu1 }
 0x6a9   : > { %v8815_v0 = vadd.f32 %v8814_v11, %v8813_v53  ;;  %v12054_v35 = vadd.f32 %v8812_v5, %v11931_v24 }
 0x6ab   : > { %v12057_v38 = vadd.f32 %v8815_v0, %v11935_v29 }
 0x6ad   : > { %v8816_v55 = vpop.f32.mrb[244].mxu1 }
 0x6ae   : > { %v8817_v16 = vpop.f32.mrb[245].mxu1 }
 0x6af   : > { %v8818_v56 = vadd.f32 %v8817_v16, %v8816_v55  ;;  %v8819_v52 = vpop.f32.mrb[246].mxu1 }
 0x6b0   : > { %v8820_v57 = vpop.f32.mrb[247].mxu1 }
 0x6b1   : > { %v8821_v25 = vadd.f32 %v8820_v57, %v8819_v52  ;;  %v12060_v33 = vadd.f32 %v8818_v56, %v11940_v6 }
 0x6b3   : > { %v12063_v60 = vadd.f32 %v8821_v25, %v11945_v19 }
 0x6b5   : > { %v8822_v10 = vpop.f32.mrb[248].mxu1 }
 0x6b6   : > { %v8823_v40 = vpop.f32.mrb[249].mxu1 }
 0x6b7   : > { %v8824_v47 = vadd.f32 %v8823_v40, %v8822_v10  ;;  %v8825_v24 = vpop.f32.mrb[250].mxu1 }
 0x6b8   : > { %v8826_v12 = vpop.f32.mrb[251].mxu1 }
 0x6b9   : > { %v8827_v21 = vadd.f32 %v8826_v12, %v8825_v24  ;;  %v12066_v29 = vadd.f32 %v8824_v47, %v11950_v2 }
 0x6bb   : > { %v12069_v37 = vadd.f32 %v8827_v21, %v11955_v1 }
 0x6bd   : > { %v8828_v41 = vpop.f32.mrb[252].mxu1 }
 0x6be   : > { %v8829_v30 = vpop.f32.mrb[253].mxu1 }
 0x6bf   : > { %v8830_v48 = vadd.f32 %v8829_v30, %v8828_v41  ;;  %v8831_v6 = vpop.f32.mrb[254].mxu1 }
 0x6c0   : > { %v8832_v50 = vpop.f32.mrb[255].mxu1 }
 0x6c1   : > { %v8833_v28 = vadd.f32 %v8832_v50, %v8831_v6  ;;  %v12072_v19 = vadd.f32 %v8830_v48, %v11960_v42 }
 0x6c3   : > { %v12075_v54 = vadd.f32 %v8833_v28, %v11965_v49 }
 0x6c5   : > { %v8834_v63 = vpop.f32.mrb[0].mxu1 }
 0x6c6   : > { %v8835_v4 = vpop.f32.mrb[1].mxu1 }
 0x6c7   : > { %v8836_v14 = vadd.f32 %v8835_v4, %v8834_v63  ;;  %v8837_v2 = vpop.f32.mrb[2].mxu1 }
 0x6c8   : > { %v8838_v45 = vpop.f32.mrb[3].mxu1 }
 0x6c9   : > { %v8839_v44 = vadd.f32 %v8838_v45, %v8837_v2  ;;  %v12078_v1 = vadd.f32 %v8836_v14, %v11970_v8 }
 0x6cb   : > { %v12081_v61 = vadd.f32 %v8839_v44, %v11975_v26 }
 0x6cd   : > { %v8840_v5 = vpop.f32.mrb[4].mxu1 }
 0x6ce   : > { %v8841_v53 = vpop.f32.mrb[5].mxu1 }
 0x6cf   : > { %v8842_v11 = vadd.f32 %v8841_v53, %v8840_v5  ;;  %v8843_v42 = vpop.f32.mrb[6].mxu1 }
 0x6d0   : > { %v8844_v0 = vpop.f32.mrb[7].mxu1 }
 0x6d1   : > { %v8845_v55 = vadd.f32 %v8844_v0, %v8843_v42  ;;  %v12084_v49 = vadd.f32 %v8842_v11, %v11980_v34 }
 0x6d3   : > { %v12087_v16 = vadd.f32 %v8845_v55, %v11985_v32  ;;  %v9875_v55 = vmov 1966171168  }
 0x6d5   : > { %v8846_v56 = vpop.f32.mrb[8].mxu1 }
 0x6d6   : > { %v8847_v52 = vpop.f32.mrb[9].mxu1 }
 0x6d7   : > { %v8848_v57 = vadd.f32 %v8847_v52, %v8846_v56  ;;  %v8849_v8 = vpop.f32.mrb[10].mxu1  ;;  %v7514_v56 = vunpack.c.l.s4 %v9875_v55 }
 0x6d8   : > { %v8850_v25 = vpop.f32.mrb[11].mxu1 }
 0x6d9   : > { %v8851_v10 = vadd.f32 %v8850_v25, %v8849_v8  ;;  %v12090_v26 = vadd.f32 %v8848_v57, %v11990_v13  ;;  %v7515_v25 = vunpack.c.0.s8 %v7514_v56 }
 0x6db   : > { %v12093_v40 = vadd.f32 %v8851_v10, %v11995_v31 }
 0x6dd   : > { %v8852_v47 = vpop.f32.mrb[12].mxu1 }
 0x6de   : > { %v8853_v24 = vpop.f32.mrb[13].mxu1 }
 0x6df   : > { %v8854_v12 = vadd.f32 %v8853_v24, %v8852_v47  ;;  %v8855_v34 = vpop.f32.mrb[14].mxu1 }
 0x6e0   : > { %v8856_v21 = vpop.f32.mrb[15].mxu1 }
 0x6e1   : > { %v8857_v41 = vadd.f32 %v8856_v21, %v8855_v34  ;;  %v12096_v32 = vadd.f32 %v8854_v12, %v11999_v36 }
 0x6e3   : > { %v12099_v30 = vadd.f32 %v8857_v41, %v12003_v15 }
 0x6e5   : > { %v8858_v48 = vpop.f32.mrb[16].mxu1 }
 0x6e6   : > { %v8859_v6 = vpop.f32.mrb[17].mxu1 }
 0x6e7   : > { %v8860_v50 = vadd.f32 %v8859_v6, %v8858_v48  ;;  %v8861_v13 = vpop.f32.mrb[18].mxu1 }
 0x6e8   : > { %v8862_v28 = vpop.f32.mrb[19].mxu1 }
 0x6e9   : > { %v8863_v63 = vadd.f32 %v8862_v28, %v8861_v13  ;;  %v12102_v31 = vadd.f32 %v8860_v50, %v12006_v59 }
 0x6eb   : > { %v12105_v4 = vadd.f32 %v8863_v63, %v12009_v7  ;;  %v7516_v7 = vlaneseq }
 0x6ed   : > { %v8864_v14 = vpop.f32.mrb[20].mxu1  ;;  %v7517_v10 = vshrl.u32 %v7516_v7, 7 }
 0x6ee   : > { %v8865_v2 = vpop.f32.mrb[21].mxu1 }
 0x6ef   : > { %v8866_v45 = vadd.f32 %v8865_v2, %v8864_v14  ;;  %v8867_v36 = vpop.f32.mrb[22].mxu1  ;;  %v12120_v12 = vsub.s32 %v7515_v25, %v7517_v10 }
 0x6f0   : > { %v8868_v44 = vpop.f32.mrb[23].mxu1 }
 0x6f1   : > { %v8869_v5 = vadd.f32 %v8868_v44, %v8867_v36  ;;  %v12108_v15 = vadd.f32 %v8866_v45, %v12012_v62 }
 0x6f3   : > { %v12111_v53 = vadd.f32 %v8869_v5, %v12015_v27 }
 0x6f5   : > { %v8870_v11 = vpop.f32.mrb[24].mxu1 }
 0x6f6   : > { %v8871_v42 = vpop.f32.mrb[25].mxu1 }
 0x6f7   : > { %v8872_v0 = vadd.f32 %v8871_v42, %v8870_v11  ;;  %v8873_v59 = vpop.f32.mrb[26].mxu1 }
 0x6f8   : > { %v8874_v52 = vpop.f32.mrb[27].mxu1 }
 0x6f9   : > { %v8875_v57 = vadd.f32 %v8874_v52, %v8873_v59  ;;  %v12114_v8 = vadd.f32 %v8872_v0, %v12018_v46 }
 0x6fb   : > { %v12117_v62 = vadd.f32 %v8875_v57, %v12021_v17 }
 0x6fd   : > { %v8970_v47 = vpop.f32.mrb[28].mxu1 }
 0x6fe   : > { %v7299_v27 = vadd.f32 %v8970_v47, %v12027_v58  ;;  %v7290_v24 = vpop.f32.mrb[29].mxu1 }
 0x6ff   : > { %v7291_v34 = vadd.f32 %v7290_v24, %v12024_v9  ;;  %v8971_v21 = vpop.f32.mrb[30].mxu1 }
 0x700   : > { %vm7419_vm3 = vcmp.gt.f32.partialorder %v7299_v27, 0.0  ;;  %v7451_v41 = vmul.f32 0.2, %v7299_v27  ;;  %v7302_v48 = vadd.f32 %v8971_v21, %v12030_v3  ;;  %v7293_v46 = vpop.f32.mrb[31].mxu1 }
 0x701   : > { %vm7417_vm6 = vcmp.gt.f32.partialorder %v7291_v34, 0.0  ;;  %v7449_v6 = vmul.f32 0.2, %v7291_v34  ;;  %v7294_v50 = vadd.f32 %v7293_v46, %v12033_v51 }
 0x702   : > { %v7483_v17 = vsel %vm7419_vm3, %v7299_v27, %v7451_v41  ;;  %vm7420_vm7 = vcmp.gt.f32.partialorder %v7302_v48, 0.0  ;;  %v7452_v13 = vmul.f32 0.2, %v7302_v48 }
 0x703   : > { %v7533_v58 = vrot.slane %v7483_v17, %v12120_v12  ;;  %v7481_v28 = vsel %vm7417_vm6, %v7291_v34, %v7449_v6  ;;  %vm7418_vm8 = vcmp.gt.f32.partialorder %v7294_v50, 0.0  ;;  %v7450_v63 = vmul.f32 0.2, %v7294_v50 }
 0x704   : > { %v7519_v9 = vrot.slane %v7481_v28, %v12120_v12  ;;  %v7484_v14 = vsel %vm7420_vm7, %v7302_v48, %v7452_v13 }
 0x705   : > { %v7771_v2 = vrot.slane %v7533_v58, 4  ;;  %v7540_v45 = vrot.slane %v7484_v14, %v12120_v12  ;;  %v7482_v3 = vsel %vm7418_vm8, %v7294_v50, %v7450_v63  ;;  %v8974_v36 = vpop.f32.mrb[32].mxu1 }
 0x706   : > { %v7769_v44 = vrot.slane %v7519_v9, 4  ;;  %v7526_v5 = vrot.slane %v7482_v3, %v12120_v12  ;;  %v7315_v51 = vadd.f32 %v8974_v36, %v12042_v18  ;;  %v7306_v11 = vpop.f32.mrb[33].mxu1 }
 0x707   : > { %v7835_v42 = vadd.f32 %v7771_v2, %v7533_v58  ;;  %v7772_v0 = vrot.slane %v7540_v45, 4  ;;  %v7307_v59 = vadd.f32 %v7306_v11, %v12036_v39  ;;  %v8975_v55 = vpop.f32.mrb[34].mxu1 }
 0x708   : > { %v7833_v56 = vadd.f32 %v7769_v44, %v7519_v9  ;;  %v7770_v7 = vrot.slane %v7526_v5, 4  ;;  %vm7423_vm9 = vcmp.gt.f32.partialorder %v7315_v51, 0.0  ;;  %v7455_v52 = vmul.f32 0.2, %v7315_v51  ;;  %v7309_v57 = vpop.f32.mrb[35].mxu1 }
 0x709   : > { %v7836_v25 = vadd.f32 %v7772_v0, %v7540_v45  ;;  %vm7421_vm10 = vcmp.gt.f32.partialorder %v7307_v59, 0.0  ;;  %v7453_v10 = vmul.f32 0.2, %v7307_v59  ;;  %v7318_v47 = vadd.f32 %v8975_v55, %v12045_v20 }
 0x70a   : > { %v7865_v27 = vadd.f32 %v7835_v42, %v7833_v56  ;;  %v7834_v24 = vadd.f32 %v7770_v7, %v7526_v5  ;;  %v7487_v34 = vsel %vm7423_vm9, %v7315_v51, %v7455_v52  ;;  %v7310_v18 = vadd.f32 %v7309_v57, %v12039_v23 }
 0x70b   : > { %v7561_v21 = vrot.slane %v7487_v34, %v12120_v12  ;;  %v7485_v41 = vsel %vm7421_vm10, %v7307_v59, %v7453_v10  ;;  %vm7424_vm11 = vcmp.gt.f32.partialorder %v7318_v47, 0.0  ;;  %v7456_v39 = vmul.f32 0.2, %v7318_v47 }
 0x70c   : > { %v7866_v48 = vadd.f32 %v7836_v25, %v7834_v24  ;;  %v7547_v46 = vrot.slane %v7485_v41, %v12120_v12  ;;  %vm7422_vm12 = vcmp.gt.f32.partialorder %v7310_v18, 0.0  ;;  %v12135_v6 = vmul.f32 0.25, %v7865_v27 }
 0x70d   : > { %v7775_v50 = vrot.slane %v7561_v21, 4  ;;  %v7488_v17 = vsel %vm7424_vm11, %v7318_v47, %v7456_v39  ;;  %v7454_v13 = vmul.f32 0.2, %v7310_v18  ;;  %v8978_v20 = vpop.f32.mrb[36].mxu1 }
 0x70e   : > { %v7882_v58 = vmul.f32 0.25, %v7866_v48  ;;  %v7773_v28 = vrot.slane %v7547_v46, 4  ;;  %v7568_v63 = vrot.slane %v7488_v17, %v12120_v12  ;;  %v7331_v23 = vadd.f32 %v8978_v20, %v12054_v35  ;;  %v7322_v9 = vpop.f32.mrb[37].mxu1 }
 0x70f   : > { %v7839_v14 = vadd.f32 %v7775_v50, %v7561_v21  ;;  %v7486_v2 = vsel %vm7422_vm12, %v7310_v18, %v7454_v13  ;;  %v7323_v45 = vadd.f32 %v7322_v9, %v12048_v43  ;;  %v8979_v3 = vpop.f32.mrb[38].mxu1 }
 0x710   : > { %v7913_v36 = vcombine.low %v12135_v6, %v7882_v58  ;;  %v7837_v44 = vadd.f32 %v7773_v28, %v7547_v46  ;;  %v7776_v5 = vrot.slane %v7568_v63, 4  ;;  %v7554_v51 = vrot.slane %v7486_v2, %v12120_v12  ;;  %v7325_v11 = vpop.f32.mrb[39].mxu1 }
 0x711   : > { %vm7427_vm13 = vcmp.gt.f32.partialorder %v7331_v23, 0.0  ;;  %v7459_v42 = vmul.f32 0.2, %v7331_v23  ;;  %vm7425_vm14 = vcmp.gt.f32.partialorder %v7323_v45, 0.0  ;;  %v7457_v0 = vmul.f32 0.2, %v7323_v45 }
 0x712   : > { %v7867_v59 = vadd.f32 %v7839_v14, %v7837_v44  ;;  %v7840_v55 = vadd.f32 %v7776_v5, %v7568_v63  ;;  %v7774_v35 = vrot.slane %v7554_v51, 4  ;;  %v7334_v56 = vadd.f32 %v8979_v3, %v12057_v38 }
 0x713   : > { %v7491_v7 = vsel %vm7427_vm13, %v7331_v23, %v7459_v42  ;;  %v7489_v52 = vsel %vm7425_vm14, %v7323_v45, %v7457_v0  ;;  %v7326_v43 = vadd.f32 %v7325_v11, %v12051_v22 }
 0x714   : > { %v7838_v57 = vadd.f32 %v7774_v35, %v7554_v51  ;;  %v7589_v25 = vrot.slane %v7491_v7, %v12120_v12  ;;  %v7575_v10 = vrot.slane %v7489_v52, %v12120_v12  ;;  %vm7428_vm15 = vcmp.gt.f32.partialorder %v7334_v56, 0.0 }
 0x715   : > { %v7460_v47 = vmul.f32 0.2, %v7334_v56  ;;  %vm7426_vm0 = vcmp.gt.f32.partialorder %v7326_v43, 0.0  ;;  %v7458_v27 = vmul.f32 0.2, %v7326_v43  ;;  %v8982_v21 = vpop.f32.mrb[40].mxu1 }
 0x716   : > { %v7868_v24 = vadd.f32 %v7840_v55, %v7838_v57  ;;  %v7779_v34 = vrot.slane %v7589_v25, 4  ;;  %v7777_v18 = vrot.slane %v7575_v10, 4  ;;  %v7883_v41 = vmul.f32 0.25, %v7867_v59  ;;  %v7338_v22 = vpop.f32.mrb[41].mxu1 }
 0x717   : > { %v7492_v38 = vsel %vm7428_vm15, %v7334_v56, %v7460_v47  ;;  %v7490_v39 = vsel %vm7426_vm0, %v7326_v43, %v7458_v27  ;;  %v7347_v48 = vadd.f32 %v8982_v21, %v12066_v29  ;;  %v8983_v13 = vpop.f32.mrb[42].mxu1  ;;  %v7339_v28 = vadd.f32 %v7338_v22, %v12060_v33 }
 0x718   : > { %v7884_v46 = vmul.f32 0.25, %v7868_v24  ;;  %v7843_v6 = vadd.f32 %v7779_v34, %v7589_v25  ;;  %v7841_v50 = vadd.f32 %v7777_v18, %v7575_v10  ;;  %v7596_v17 = vrot.slane %v7492_v38, %v12120_v12  ;;  %v7341_v63 = vpop.f32.mrb[43].mxu1 }
 0x719   : > { %v7582_v20 = vrot.slane %v7490_v39, %v12120_v12  ;;  %vm7431_vm1 = vcmp.gt.f32.partialorder %v7347_v48, 0.0  ;;  %v7463_v58 = vmul.f32 0.2, %v7347_v48  ;;  %v7350_v29 = vadd.f32 %v8983_v13, %v12069_v37 }
 0x71a   : > { %v7914_v23 = vcombine.low %v7883_v41, %v7884_v46  ;;  %v7869_v9 = vadd.f32 %v7843_v6, %v7841_v50  ;;  %v7780_v14 = vrot.slane %v7596_v17, 4  ;;  %vm7429_vm2 = vcmp.gt.f32.partialorder %v7339_v28, 0.0 }
 0x71b   : > { %v7778_v2 = vrot.slane %v7582_v20, 4  ;;  %v7495_v45 = vsel %vm7431_vm1, %v7347_v48, %v7463_v58  ;;  %v7461_v3 = vmul.f32 0.2, %v7339_v28  ;;  %vm7432_vm4 = vcmp.gt.f32.partialorder %v7350_v29, 0.0 }
 0x71c   : > { %v8364_v44 = vpack.c.bf16 %v7914_v23, %v7913_v36  ;;  %v7844_v5 = vadd.f32 %v7780_v14, %v7596_v17  ;;  %v7617_v33 = vrot.slane %v7495_v45, %v12120_v12  ;;  %v7464_v42 = vmul.f32 0.2, %v7350_v29 }
 0x71d   : > { %v7842_v51 = vadd.f32 %v7778_v2, %v7582_v20  ;;  %v7493_v11 = vsel %vm7429_vm2, %v7339_v28, %v7461_v3  ;;  %v8986_v0 = vpop.f32.mrb[44].mxu1  ;;  %v7342_v55 = vadd.f32 %v7341_v63, %v12063_v60  ;;  %v12162_v7 = vmul.f32 0.25, %v7869_v9 }
 0x71e   : > { %8365 = vst [vmem:[%s12155_s2] sm:$0xff] %v8364_v44   ;;  %v7783_v37 = vrot.slane %v7617_v33, 4  ;;  %v7603_v59 = vrot.slane %v7493_v11, %v12120_v12  ;;  %v7363_v35 = vadd.f32 %v8986_v0, %v12078_v1  ;;  %v7354_v56 = vpop.f32.mrb[45].mxu1  ;;  %v7496_v52 = vsel %vm7432_vm4, %v7350_v29, %v7464_v42 }
 0x71f   : > { %v7870_v36 = vadd.f32 %v7844_v5, %v7842_v51  ;;  %v7355_v43 = vadd.f32 %v7354_v56, %v12072_v19  ;;  %v8987_v57 = vpop.f32.mrb[46].mxu1  ;;  %v7624_v47 = vrot.slane %v7496_v52, %v12120_v12  ;;  %vm7430_vm5 = vcmp.gt.f32.partialorder %v7342_v55, 0.0 }
 0x720   : > { %v7847_v25 = vadd.f32 %v7783_v37, %v7617_v33  ;;  %v7781_v10 = vrot.slane %v7603_v59, 4  ;;  %v7357_v27 = vpop.f32.mrb[47].mxu1  ;;  %v7462_v34 = vmul.f32 0.2, %v7342_v55  ;;  %vm7435_vm3 = vcmp.gt.f32.partialorder %v7363_v35, 0.0 }
 0x721   : > { %v12166_v24 = vmul.f32 0.25, %v7870_v36  ;;  %v7467_v60 = vmul.f32 0.2, %v7363_v35  ;;  %v7784_v18 = vrot.slane %v7624_v47, 4  ;;  %vm7433_vm6 = vcmp.gt.f32.partialorder %v7355_v43, 0.0 }
 0x722   : > { %v7845_v1 = vadd.f32 %v7781_v10, %v7603_v59  ;;  %v7465_v21 = vmul.f32 0.2, %v7355_v43  ;;  %v7494_v19 = vsel %vm7430_vm5, %v7342_v55, %v7462_v34  ;;  %v7366_v39 = vadd.f32 %v8987_v57, %v12081_v61 }
 0x723   : > { %v7915_v41 = vcombine.low %v12162_v7, %v12166_v24  ;;  %v7499_v38 = vsel %vm7435_vm3, %v7363_v35, %v7467_v60  ;;  %v7848_v22 = vadd.f32 %v7784_v18, %v7624_v47  ;;  %v7610_v46 = vrot.slane %v7494_v19, %v12120_v12 }
 0x724   : > { %v7871_v48 = vadd.f32 %v7847_v25, %v7845_v1  ;;  %v7645_v6 = vrot.slane %v7499_v38, %v12120_v12  ;;  %v7497_v50 = vsel %vm7433_vm6, %v7355_v43, %v7465_v21  ;;  %vm7436_vm7 = vcmp.gt.f32.partialorder %v7366_v39, 0.0 }
 0x725   : > { %v7468_v17 = vmul.f32 0.2, %v7366_v39  ;;  %v7358_v13 = vadd.f32 %v7357_v27, %v12075_v54  ;;  %v8990_v20 = vpop.f32.mrb[48].mxu1  ;;  %v7782_v28 = vrot.slane %v7610_v46, 4  ;;  %v7631_v23 = vrot.slane %v7497_v50, %v12120_v12 }
 0x726   : > { %v7887_v58 = vmul.f32 0.25, %v7871_v48  ;;  %v7787_v63 = vrot.slane %v7645_v6, 4  ;;  %v7370_v9 = vpop.f32.mrb[49].mxu1  ;;  %v7379_v29 = vadd.f32 %v8990_v20, %v12090_v26 }
 0x727   : > { %v7500_v14 = vsel %vm7436_vm7, %v7366_v39, %v7468_v17  ;;  %vm7434_vm8 = vcmp.gt.f32.partialorder %v7358_v13, 0.0  ;;  %v7466_v61 = vmul.f32 0.2, %v7358_v13  ;;  %v8991_v2 = vpop.f32.mrb[50].mxu1  ;;  %v7846_v45 = vadd.f32 %v7782_v28, %v7610_v46 }
 0x728   : > { %v7851_v3 = vadd.f32 %v7787_v63, %v7645_v6  ;;  %v7785_v44 = vrot.slane %v7631_v23, 4  ;;  %v7652_v5 = vrot.slane %v7500_v14, %v12120_v12  ;;  %v7373_v33 = vpop.f32.mrb[51].mxu1  ;;  %vm7439_vm9 = vcmp.gt.f32.partialorder %v7379_v29, 0.0 }
 0x729   : > { %v7498_v54 = vsel %vm7434_vm8, %v7358_v13, %v7466_v61  ;;  %v7471_v51 = vmul.f32 0.2, %v7379_v29  ;;  %v7371_v11 = vadd.f32 %v7370_v9, %v12084_v49  ;;  %v7872_v42 = vadd.f32 %v7848_v22, %v7846_v45 }
 0x72a   : > { %v7849_v0 = vadd.f32 %v7785_v44, %v7631_v23  ;;  %v7788_v37 = vrot.slane %v7652_v5, 4  ;;  %v7638_v59 = vrot.slane %v7498_v54, %v12120_v12  ;;  %v7382_v35 = vadd.f32 %v8991_v2, %v12093_v40 }
 0x72b   : > { %v7503_v55 = vsel %vm7439_vm9, %v7379_v29, %v7471_v51  ;;  %vm7437_vm10 = vcmp.gt.f32.partialorder %v7371_v11, 0.0  ;;  %v7469_v26 = vmul.f32 0.2, %v7371_v11  ;;  %v7888_v56 = vmul.f32 0.25, %v7872_v42 }
 0x72c   : > { %v7873_v7 = vadd.f32 %v7851_v3, %v7849_v0  ;;  %v7852_v36 = vadd.f32 %v7788_v37, %v7652_v5  ;;  %v7786_v52 = vrot.slane %v7638_v59, 4  ;;  %v7673_v43 = vrot.slane %v7503_v55, %v12120_v12 }
 0x72d   : > { %v7501_v57 = vsel %vm7437_vm10, %v7371_v11, %v7469_v26  ;;  %vm7440_vm11 = vcmp.gt.f32.partialorder %v7382_v35, 0.0  ;;  %v7472_v25 = vmul.f32 0.2, %v7382_v35  ;;  %v8994_v49 = vpop.f32.mrb[52].mxu1  ;;  %v7916_v10 = vcombine.low %v7887_v58, %v7888_v56 }
 0x72e   : > { %v12181_v47 = vmul.f32 0.25, %v7873_v7  ;;  %v7850_v27 = vadd.f32 %v7786_v52, %v7638_v59  ;;  %v7659_v24 = vrot.slane %v7501_v57, %v12120_v12  ;;  %v7386_v34 = vpop.f32.mrb[53].mxu1  ;;  %v7791_v60 = vrot.slane %v7673_v43, 4 }
 0x72f   : > { %v7504_v40 = vsel %vm7440_vm11, %v7382_v35, %v7472_v25  ;;  %v7374_v1 = vadd.f32 %v7373_v33, %v12087_v16  ;;  %v7395_v18 = vadd.f32 %v8994_v49, %v12102_v31  ;;  %v8995_v21 = vpop.f32.mrb[54].mxu1  ;;  %v8369_v19 = vpack.c.bf16 %v7916_v10, %v7915_v41 }
 0x730   : > { %v7874_v38 = vadd.f32 %v7852_v36, %v7850_v27  ;;  %v7789_v39 = vrot.slane %v7659_v24, 4  ;;  %v7680_v48 = vrot.slane %v7504_v40, %v12120_v12  ;;  %v7389_v22 = vpop.f32.mrb[55].mxu1  ;;  %v7855_v46 = vadd.f32 %v7791_v60, %v7673_v43 }
 0x731   : > { %vm7438_vm12 = vcmp.gt.f32.partialorder %v7374_v1, 0.0  ;;  %v7470_v6 = vmul.f32 0.2, %v7374_v1  ;;  %vm7443_vm13 = vcmp.gt.f32.partialorder %v7395_v18, 0.0  ;;  %8399 = vst [vmem:[%s12155_s2 + $0x8] sm:$0xff] %v8369_v19   ;;  %v7387_v16 = vadd.f32 %v7386_v34, %v12096_v32 }
 0x732   : > { %v7890_v50 = vmul.f32 0.25, %v7874_v38  ;;  %v7853_v17 = vadd.f32 %v7789_v39, %v7659_v24  ;;  %v7792_v13 = vrot.slane %v7680_v48, 4  ;;  %v7475_v20 = vmul.f32 0.2, %v7395_v18 }
 0x733   : > { %v7502_v58 = vsel %vm7438_vm12, %v7374_v1, %v7470_v6  ;;  %v7398_v31 = vadd.f32 %v8995_v21, %v12105_v4  ;;  %v7390_v41 = vadd.f32 %v7389_v22, %v12099_v30  ;;  %vm7441_vm14 = vcmp.gt.f32.partialorder %v7387_v16, 0.0 }
 0x734   : > { %v7917_v28 = vcombine.low %v12181_v47, %v7890_v50  ;;  %v7875_v63 = vadd.f32 %v7855_v46, %v7853_v17  ;;  %v7856_v23 = vadd.f32 %v7792_v13, %v7680_v48  ;;  %v7666_v9 = vrot.slane %v7502_v58, %v12120_v12 }
 0x735   : > { %v7507_v14 = vsel %vm7443_vm13, %v7395_v18, %v7475_v20  ;;  %v7473_v61 = vmul.f32 0.2, %v7387_v16  ;;  %vm7444_vm15 = vcmp.gt.f32.partialorder %v7398_v31, 0.0  ;;  %v8998_v29 = vpop.f32.mrb[56].mxu1  ;;  %v7476_v32 = vmul.f32 0.2, %v7398_v31 }
 0x736   : > { %v7891_v2 = vmul.f32 0.25, %v7875_v63  ;;  %v7790_v45 = vrot.slane %v7666_v9, 4  ;;  %v7701_v3 = vrot.slane %v7507_v14, %v12120_v12  ;;  %v7402_v44 = vpop.f32.mrb[57].mxu1  ;;  %vm7442_vm0 = vcmp.gt.f32.partialorder %v7390_v41, 0.0 }
 0x737   : > { %v7505_v4 = vsel %vm7441_vm14, %v7387_v16, %v7473_v61  ;;  %v7474_v30 = vmul.f32 0.2, %v7390_v41  ;;  %v7411_v5 = vadd.f32 %v8998_v29, %v12114_v8  ;;  %v8999_v33 = vpop.f32.mrb[58].mxu1  ;;  %v7508_v42 = vsel %vm7444_vm15, %v7398_v31, %v7476_v32 }
 0x738   : > { %v7854_v54 = vadd.f32 %v7790_v45, %v7666_v9  ;;  %v7795_v51 = vrot.slane %v7701_v3, 4  ;;  %v7687_v11 = vrot.slane %v7505_v4, %v12120_v12  ;;  %v7405_v0 = vpop.f32.mrb[59].mxu1  ;;  %v7708_v37 = vrot.slane %v7508_v42, %v12120_v12 }
 0x739   : > { %v7506_v59 = vsel %vm7442_vm0, %v7390_v41, %v7474_v30  ;;  %vm7447_vm1 = vcmp.gt.f32.partialorder %v7411_v5, 0.0  ;;  %v7479_v55 = vmul.f32 0.2, %v7411_v5  ;;  %v7403_v8 = vadd.f32 %v7402_v44, %v12108_v15 }
 0x73a   : > { %v7876_v26 = vadd.f32 %v7856_v23, %v7854_v54  ;;  %v7859_v35 = vadd.f32 %v7795_v51, %v7701_v3  ;;  %v7793_v56 = vrot.slane %v7687_v11, 4  ;;  %v7694_v7 = vrot.slane %v7506_v59, %v12120_v12 }
 0x73b   : > { %v7796_v36 = vrot.slane %v7708_v37, 4  ;;  %v7511_v52 = vsel %vm7447_vm1, %v7411_v5, %v7479_v55  ;;  %v7414_v43 = vadd.f32 %v8999_v33, %v12117_v62  ;;  %vm7445_vm2 = vcmp.gt.f32.partialorder %v7403_v8, 0.0 }
 0x73c   : > { %v7892_v57 = vmul.f32 0.25, %v7876_v26  ;;  %v7857_v25 = vadd.f32 %v7793_v56, %v7687_v11  ;;  %v7794_v49 = vrot.slane %v7694_v7, 4  ;;  %v7729_v10 = vrot.slane %v7511_v52, %v12120_v12 }
 0x73d   : > { %v7860_v47 = vadd.f32 %v7796_v36, %v7708_v37  ;;  %v7477_v27 = vmul.f32 0.2, %v7403_v8  ;;  %vm7448_vm4 = vcmp.gt.f32.partialorder %v7414_v43, 0.0  ;;  %v7480_v18 = vmul.f32 0.2, %v7414_v43 }
 0x73e   : > { %v7918_v24 = vcombine.low %v7891_v2, %v7892_v57  ;;  %v7877_v34 = vadd.f32 %v7859_v35, %v7857_v25  ;;  %v7858_v60 = vadd.f32 %v7794_v49, %v7694_v7  ;;  %v7799_v40 = vrot.slane %v7729_v10, 4 }
 0x73f   : > { %v7509_v1 = vsel %vm7445_vm2, %v7403_v8, %v7477_v27  ;;  %v7406_v15 = vadd.f32 %v7405_v0, %v12111_v53  ;;  %v7512_v38 = vsel %vm7448_vm4, %v7414_v43, %v7480_v18 }
 0x740   : > { %v8374_v21 = vpack.c.bf16 %v7918_v24, %v7917_v28  ;;  %v7878_v62 = vadd.f32 %v7860_v47, %v7858_v60  ;;  %v7715_v19 = vrot.slane %v7509_v1, %v12120_v12  ;;  %v7893_v48 = vmul.f32 0.25, %v7877_v34 }
 0x741   : > { %vm7446_vm5 = vcmp.gt.f32.partialorder %v7406_v15, 0.0  ;;  %v7478_v39 = vmul.f32 0.2, %v7406_v15  ;;  %v7736_v46 = vrot.slane %v7512_v38, %v12120_v12  ;;  %v7863_v6 = vadd.f32 %v7799_v40, %v7729_v10 }
 0x742   : > { %8400 = vst [vmem:[%s12155_s2 + $0x10] sm:$0xff] %v8374_v21   ;;  %v7894_v22 = vmul.f32 0.25, %v7878_v62  ;;  %v7797_v50 = vrot.slane %v7715_v19, 4 }
 0x743   : > { %v7510_v17 = vsel %vm7446_vm5, %v7406_v15, %v7478_v39  ;;  %v7800_v20 = vrot.slane %v7736_v46, 4 }
 0x744   : > { %v7919_v13 = vcombine.low %v7893_v48, %v7894_v22  ;;  %v7722_v53 = vrot.slane %v7510_v17, %v12120_v12  ;;  %v7861_v58 = vadd.f32 %v7797_v50, %v7715_v19 }
 0x745   : > { %v7864_v16 = vadd.f32 %v7800_v20, %v7736_v46 }
 0x746   : > { %v7798_v31 = vrot.slane %v7722_v53, 4  ;;  %v7879_v41 = vadd.f32 %v7863_v6, %v7861_v58 }
 0x748   : > { %v7862_v28 = vadd.f32 %v7798_v31, %v7722_v53  ;;  %v7895_v23 = vmul.f32 0.25, %v7879_v41 }
 0x74a   : > { %v7880_v63 = vadd.f32 %v7864_v16, %v7862_v28 }
 0x74c   : > { %v7896_v9 = vmul.f32 0.25, %v7880_v63 }
 0x74e   : > { %v7920_v14 = vcombine.low %v7895_v23, %v7896_v9 }
 0x750   : > { %v8379_v61 = vpack.c.bf16 %v7920_v14, %v7919_v13 }
 0x752   : > { %8401 = vst [vmem:[%s12155_s2 + $0x18] sm:$0xff] %v8379_v61  }
 0x753 PF: > { %s21_s30 = sadd.s32 1, %s9866_s30   ;;  %s12268_s28 = smov %s9862_s29 }
 0x754   : > { %p18_p6 = scmp.ge.s32.totalorder %s21_s30, 4   ;;  %s12269_s29 = smov %s12271_s11 }
 0x756   :  { %20 = sbr.rel (!%p18_p6) target bundleno = 3 (0x3), region = 109 }
 0x75d   :  { %7975 = vsyncpa [#allocation4], 1 }
 0x75e   :  { %7977 = vsyncpa [#allocation4 + $0x1], 1 }
 0x75f   :  { %7978 = vsyncpa [#allocation6], 1 }

</bundles_post_ra>
